<compile_context>
chip_gen: v6e
topology: v6e:2x2x1
jax: 0.10.0
libtpu: 0.0.40
codegen_flags: <defaults>
</compile_context>

<pallas_src>
import functools
import math

import jax
import jax.numpy as jnp
from jax.experimental import pallas as pl
from jax.experimental.pallas import tpu as pltpu


# ----------------------------------------------------------------------------
# Fused Pallas kernel: Conv(k1, pad1) + ReLU + Conv(3, pad 1) + ReLU
# ----------------------------------------------------------------------------
def _fused_decoder_block_kernel(x_ref, wm1_ref, b1_ref, wm2t_ref, b2_ref,
                                o_ref, xpad_s, ypad_s, *, k1, pad1):
    """One batch element.

    x_ref   : (1, H1, W1, Cin)      bf16  un-padded layer-1 input (NHWC)
    wm1_ref : (k1*k1*Cin, Cmid)     bf16  layer-1 weights in im2col row order
    b1_ref  : (1, Cmid)             f32
    wm2t_ref: (Cout, 9*Cmid)        bf16  layer-2 weights, transposed
    b2_ref  : (Cout, 1)             f32
    o_ref   : (1, Cout, Ho*Wo)      f32   lane-dense output (spatial on lanes)
    xpad_s  : (H1+2p, W1+p+8, Cin)  bf16  halo scratch, interior at column 8
    ypad_s  : (Ho+2, Wo+9, Cmid)    bf16  halo scratch, interior at column 8
    """
    _, h1, w1, cin = x_ref.shape
    cmid = wm1_ref.shape[1]
    ho = h1 + 2 * pad1 - k1 + 1
    wo = w1 + 2 * pad1 - k1 + 1
    hp1, wp1, _ = xpad_s.shape
    hp2, wp2, _ = ypad_s.shape
    bf16 = jnp.bfloat16

    # ---- layer 1: zero only the halo strips (interior is overwritten below).
    xpad_s[0:pad1, :, :] = jnp.zeros((pad1, wp1, cin), bf16)
    xpad_s[pad1 + h1:, :, :] = jnp.zeros((hp1 - pad1 - h1, wp1, cin), bf16)
    xpad_s[:, 0:8, :] = jnp.zeros((hp1, 8, cin), bf16)
    xpad_s[:, 8 + w1:, :] = jnp.zeros((hp1, wp1 - 8 - w1, cin), bf16)
    # Interior starts at column 8 so the store stays sublane-aligned.
    xpad_s[pad1:pad1 + h1, 8:8 + w1, :] = x_ref[0]

    # ---- layer 1: im2col -> a single wide MXU matmul + bias + ReLU (f32 acc).
    c0 = 8 - pad1  # physical column of logical padded column 0
    taps1 = [
        xpad_s[ky:ky + ho, c0 + kx:c0 + kx + wo, :]
        for ky in range(k1) for kx in range(k1)
    ]
    p1 = jnp.concatenate(taps1, axis=-1).reshape(ho * wo, k1 * k1 * cin)
    y = jnp.dot(p1, wm1_ref[...], preferred_element_type=jnp.float32)
    y = jnp.maximum(y + b1_ref[...], 0.0)                      # (Ho*Wo, Cmid)

    # ---- intermediate stays in VMEM (1-pixel zero halo for the 3x3 conv).
    ypad_s[0:1, :, :] = jnp.zeros((1, wp2, cmid), bf16)
    ypad_s[ho + 1:, :, :] = jnp.zeros((hp2 - ho - 1, wp2, cmid), bf16)
    ypad_s[:, 0:8, :] = jnp.zeros((hp2, 8, cmid), bf16)
    ypad_s[:, 8 + wo:, :] = jnp.zeros((hp2, wp2 - 8 - wo, cmid), bf16)
    ypad_s[1:ho + 1, 8:8 + wo, :] = y.reshape(ho, wo, cmid).astype(bf16)

    # ---- layer 2: im2col -> transposed-RHS matmul so the result is produced
    # directly as (Cout, Ho*Wo): channels on sublanes, spatial on lanes.
    taps2 = [
        ypad_s[ky:ky + ho, 7 + kx:7 + kx + wo, :]
        for ky in range(3) for kx in range(3)
    ]
    p2 = jnp.concatenate(taps2, axis=-1).reshape(ho * wo, 9 * cmid)
    z = jax.lax.dot_general(
        wm2t_ref[...], p2,
        dimension_numbers=(((1,), (1,)), ((), ())),            # contract 9*Cmid
        preferred_element_type=jnp.float32)                    # (Cout, Ho*Wo)
    o_ref[0] = jnp.maximum(z + b2_ref[...], 0.0)


def _fused_decoder_block(x_nhwc, wm1, b1, wm2t, b2, *, k1, pad1):
    """Calls the fused kernel.  Returns NCHW f32 output (N, Cout, Ho, Wo)."""
    n, h1, w1, cin = x_nhwc.shape
    cmid = wm1.shape[1]
    cout = wm2t.shape[0]
    ho = h1 + 2 * pad1 - k1 + 1
    wo = w1 + 2 * pad1 - k1 + 1

    kernel = functools.partial(_fused_decoder_block_kernel, k1=k1, pad1=pad1)

    flops = 2 * n * ho * wo * (k1 * k1 * cin * cmid + 9 * cmid * cout)
    bytes_accessed = (x_nhwc.size * 2 + wm1.size * 2 + wm2t.size * 2
                      + b1.size * 4 + b2.size * 4 + n * cout * ho * wo * 4)

    out = pl.pallas_call(
        kernel,
        out_shape=jax.ShapeDtypeStruct((n, cout, ho * wo), jnp.float32),
        grid=(n,),
        in_specs=[
            pl.BlockSpec((1, h1, w1, cin), lambda i: (i, 0, 0, 0)),
            pl.BlockSpec((k1 * k1 * cin, cmid), lambda i: (0, 0)),
            pl.BlockSpec((1, cmid), lambda i: (0, 0)),
            pl.BlockSpec((cout, 9 * cmid), lambda i: (0, 0)),
            pl.BlockSpec((cout, 1), lambda i: (0, 0)),
        ],
        out_specs=pl.BlockSpec((1, cout, ho * wo), lambda i: (i, 0, 0)),
        scratch_shapes=[
            pltpu.VMEM((h1 + 2 * pad1, w1 + pad1 + 8, cin), jnp.bfloat16),
            pltpu.VMEM((ho + 2, wo + 9, cmid), jnp.bfloat16),
        ],
        compiler_params=pltpu.CompilerParams(
            dimension_semantics=("parallel",),
            vmem_limit_bytes=32 * 1024 * 1024),
        cost_estimate=pl.CostEstimate(
            flops=flops, transcendentals=0, bytes_accessed=bytes_accessed),
    )(x_nhwc.astype(jnp.bfloat16), wm1, b1, wm2t, b2)

    return out.reshape(n, cout, ho, wo)  # free reshape -> NCHW


# ----------------------------------------------------------------------------
# DecoderBlock parameters (deterministic init, PyTorch-shaped) and forward
# ----------------------------------------------------------------------------
def _uniform(key, shape, bound):
    return jax.random.uniform(key, shape, jnp.float32, -bound, bound)


def init_decoder_block_params(key, in_channels, mid_channels, out_channels,
                              is_deconv=False):
    """Mimics nn.Conv2d / nn.ConvTranspose2d default (uniform) init shapes."""
    k0, k1, k2, k3 = jax.random.split(key, 4)
    if is_deconv:
        # nn.ConvTranspose2d(in, mid, kernel_size=4): weight (in, mid, 4, 4)
        bound1 = 1.0 / math.sqrt(in_channels * 4 * 4)
        w1 = _uniform(k0, (in_channels, mid_channels, 4, 4), bound1)
    else:
        # nn.Conv2d(in, mid, kernel_size=3): weight (mid, in, 3, 3)
        bound1 = 1.0 / math.sqrt(in_channels * 3 * 3)
        w1 = _uniform(k0, (mid_channels, in_channels, 3, 3), bound1)
    b1 = _uniform(k1, (mid_channels,), bound1)

    bound2 = 1.0 / math.sqrt(mid_channels * 3 * 3)
    w2 = _uniform(k2, (out_channels, mid_channels, 3, 3), bound2)
    b2 = _uniform(k3, (out_channels,), bound2)
    return {"w1": w1, "b1": b1, "w2": w2, "b2": b2, "is_deconv": is_deconv}


def decoder_block_forward(params, x_nchw):
    """Forward of DecoderBlock.  x_nchw: (N, C, H, W) f32 -> NCHW f32 output."""
    is_deconv = params["is_deconv"]
    cmid = params["b1"].shape[0]
    cout = params["b2"].shape[0]

    # NCHW -> NHWC; matmul inputs go through bf16 (accumulation stays f32).
    x = jnp.transpose(x_nchw.astype(jnp.float32), (0, 2, 3, 1)).astype(jnp.bfloat16)

    if is_deconv:
        # ConvTranspose2d(k=4, s=2, p=1) == zero-insert (stride 2), pad 2, then
        # valid conv with the spatially flipped kernel.  The padding happens
        # inside the kernel; only the zero-insert is done here.
        n, h, w, c = x.shape
        x_in = jnp.zeros((n, 2 * h - 1, 2 * w - 1, c), x.dtype)
        x_in = x_in.at[:, ::2, ::2, :].set(x)
        # torch weight (I, O, kh, kw) -> flipped HWIO
        w1_hwio = jnp.transpose(params["w1"][:, :, ::-1, ::-1], (2, 3, 0, 1))
        k1, pad1 = 4, 2
    else:
        x_in = x
        # torch weight (O, I, kh, kw) -> HWIO
        w1_hwio = jnp.transpose(params["w1"], (2, 3, 1, 0))
        k1, pad1 = 3, 1

    cin = x_in.shape[-1]
    # Hoisted weight / bias packing (done once in XLA, outside the kernel):
    wm1 = w1_hwio.reshape(k1 * k1 * cin, cmid).astype(jnp.bfloat16)
    b1 = params["b1"].reshape(1, cmid).astype(jnp.float32)
    wm2t = jnp.transpose(params["w2"], (2, 3, 1, 0)).reshape(9 * cmid, cout).T
    wm2t = wm2t.astype(jnp.bfloat16)
    b2 = params["b2"].reshape(cout, 1).astype(jnp.float32)

    return _fused_decoder_block(x_in, wm1, b1, wm2t, b2, k1=k1, pad1=pad1)


# ----------------------------------------------------------------------------
# Pure-JAX reference (lax conv) for a numerical sanity check
# ----------------------------------------------------------------------------
def _ref_conv_relu(x, w_oihw, b, pad):
    y = jax.lax.conv_general_dilated(
        x, w_oihw, (1, 1), [(pad, pad), (pad, pad)],
        dimension_numbers=("NCHW", "OIHW", "NCHW"))
    return jax.nn.relu(y + b[None, :, None, None])


def reference_forward(params, x_nchw):
    x = x_nchw.astype(jnp.float32)
    if params["is_deconv"]:
        w1 = params["w1"]  # (I, O, 4, 4)
        w1c = jnp.transpose(w1[:, :, ::-1, ::-1], (1, 0, 2, 3))  # OIHW, flipped
        y = jax.lax.conv_general_dilated(
            x, w1c, (1, 1), [(2, 2), (2, 2)], lhs_dilation=(2, 2),
            dimension_numbers=("NCHW", "OIHW", "NCHW"))
        y = jax.nn.relu(y + params["b1"][None, :, None, None])
    else:
        y = _ref_conv_relu(x, params["w1"], params["b1"], pad=1)
    return _ref_conv_relu(y, params["w2"], params["b2"], pad=1)


if __name__ == "__main__":
    key = jax.random.PRNGKey(0)
    k_x, k_p1, k_p2 = jax.random.split(key, 3)

    N, in_c, mid_c, out_c, H, W = 2, 4, 8, 4, 16, 16
    x = jax.random.normal(k_x, (N, in_c, H, W), jnp.float32)

    # Default branch: Conv3x3 -> ReLU -> Conv3x3 -> ReLU
    params = init_decoder_block_params(k_p1, in_c, mid_c, out_c, is_deconv=False)
    y = jax.block_until_ready(decoder_block_forward(params, x))
    assert y.shape == (N, out_c, H, W), y.shape
    y_ref = jax.block_until_ready(reference_forward(params, x))
    assert jnp.allclose(y, y_ref, atol=2e-2, rtol=2e-2), "mismatch vs reference"

    # Deconv branch: ConvT4x4/s2 -> ReLU -> Conv3x3 -> ReLU  (2x upsample)
    params_d = init_decoder_block_params(k_p2, in_c, mid_c, out_c, is_deconv=True)
    yd = jax.block_until_ready(decoder_block_forward(params_d, x))
    assert yd.shape == (N, out_c, 2 * H, 2 * W), yd.shape
    yd_ref = jax.block_until_ready(reference_forward(params_d, x))
    assert jnp.allclose(yd, yd_ref, atol=2e-2, rtol=2e-2), "deconv mismatch"

    print("KERNEL_OK")
</pallas_src>

<mosaic_0001>
module attributes {stable_mosaic.version = 11 : i64} {
  func.func @_fused_decoder_block_kernel(%arg0: i32, %arg1: memref<1x16x16x4xbf16, #tpu.memory_space<vmem>>, %arg2: memref<36x8xbf16, #tpu.memory_space<vmem>>, %arg3: memref<1x8xf32, #tpu.memory_space<vmem>>, %arg4: memref<4x72xbf16, #tpu.memory_space<vmem>>, %arg5: memref<4x1xf32, #tpu.memory_space<vmem>>, %arg6: memref<1x4x256xf32, #tpu.memory_space<vmem>>, %arg7: memref<18x25x4xbf16, #tpu.memory_space<vmem>>, %arg8: memref<18x25x8xbf16, #tpu.memory_space<vmem>>) attributes {dimension_semantics = [#tpu.dimension_semantics<parallel>], iteration_bounds = array<i64: 2>, scalar_prefetch = 0 : i64, scratch_operands = 2 : i64, tpu.core_type = #tpu.core_type<tc>, window_params = [{transform_indices = @transform_0, window_bounds = array<i64: 1, 16, 16, 4>}, {pipeline_mode = #tpu.pipeline_mode<synchronous>, transform_indices = @transform_1, window_bounds = array<i64: 36, 8>}, {pipeline_mode = #tpu.pipeline_mode<synchronous>, transform_indices = @transform_2, window_bounds = array<i64: 1, 8>}, {pipeline_mode = #tpu.pipeline_mode<synchronous>, transform_indices = @transform_3, window_bounds = array<i64: 4, 72>}, {pipeline_mode = #tpu.pipeline_mode<synchronous>, transform_indices = @transform_4, window_bounds = array<i64: 4, 1>}, {transform_indices = @transform_5, window_bounds = array<i64: 1, 4, 256>}]} {
    %cst = arith.constant 0.000000e+00 : bf16
    %0 = vector.broadcast %cst : bf16 to vector<1x25x4xbf16>
    %c0 = arith.constant 0 : index
    %c0_0 = arith.constant 0 : index
    %c0_1 = arith.constant 0 : index
    %1 = vector.load %arg7[%c0, %c0_0, %c0_1] : memref<18x25x4xbf16, #tpu.memory_space<vmem>>, vector<1x25x4xbf16>
    tpu.vector_store %arg7[%c0, %c0_0, %c0_1], %0 {strides = array<i32>} : memref<18x25x4xbf16, #tpu.memory_space<vmem>>, vector<1x25x4xbf16>,
    %cst_2 = arith.constant 0.000000e+00 : bf16
    %2 = vector.broadcast %cst_2 : bf16 to vector<1x25x4xbf16>
    %c17 = arith.constant 17 : index
    %c0_3 = arith.constant 0 : index
    %c0_4 = arith.constant 0 : index
    %3 = vector.load %arg7[%c17, %c0_3, %c0_4] : memref<18x25x4xbf16, #tpu.memory_space<vmem>>, vector<1x25x4xbf16>
    tpu.vector_store %arg7[%c17, %c0_3, %c0_4], %2 {strides = array<i32>} : memref<18x25x4xbf16, #tpu.memory_space<vmem>>, vector<1x25x4xbf16>,
    %cst_5 = arith.constant 0.000000e+00 : bf16
    %4 = vector.broadcast %cst_5 : bf16 to vector<18x8x4xbf16>
    %c0_6 = arith.constant 0 : index
    %c0_7 = arith.constant 0 : index
    %c0_8 = arith.constant 0 : index
    %5 = vector.load %arg7[%c0_6, %c0_7, %c0_8] : memref<18x25x4xbf16, #tpu.memory_space<vmem>>, vector<18x8x4xbf16>
    tpu.vector_store %arg7[%c0_6, %c0_7, %c0_8], %4 {strides = array<i32>} : memref<18x25x4xbf16, #tpu.memory_space<vmem>>, vector<18x8x4xbf16>,
    %cst_9 = arith.constant 0.000000e+00 : bf16
    %6 = vector.broadcast %cst_9 : bf16 to vector<18x1x4xbf16>
    %c0_10 = arith.constant 0 : index
    %c24 = arith.constant 24 : index
    %c0_11 = arith.constant 0 : index
    %7 = vector.load %arg7[%c0_10, %c24, %c0_11] : memref<18x25x4xbf16, #tpu.memory_space<vmem>>, vector<18x1x4xbf16>
    tpu.vector_store %arg7[%c0_10, %c24, %c0_11], %6 {strides = array<i32>} : memref<18x25x4xbf16, #tpu.memory_space<vmem>>, vector<18x1x4xbf16>,
    %c0_12 = arith.constant 0 : index
    %c0_13 = arith.constant 0 : index
    %c0_14 = arith.constant 0 : index
    %c0_15 = arith.constant 0 : index
    %8 = vector.load %arg1[%c0_12, %c0_13, %c0_14, %c0_15] : memref<1x16x16x4xbf16, #tpu.memory_space<vmem>>, vector<1x16x16x4xbf16>
    %9 = vector.shape_cast %8 : vector<1x16x16x4xbf16> to vector<16x16x4xbf16>
    %c1 = arith.constant 1 : index
    %c8 = arith.constant 8 : index
    %c0_16 = arith.constant 0 : index
    %10 = vector.load %arg7[%c1, %c8, %c0_16] : memref<18x25x4xbf16, #tpu.memory_space<vmem>>, vector<16x16x4xbf16>
    tpu.vector_store %arg7[%c1, %c8, %c0_16], %9 {strides = array<i32>} : memref<18x25x4xbf16, #tpu.memory_space<vmem>>, vector<16x16x4xbf16>,
    %c0_17 = arith.constant 0 : index
    %c7 = arith.constant 7 : index
    %c0_18 = arith.constant 0 : index
    %11 = vector.load %arg7[%c0_17, %c7, %c0_18] : memref<18x25x4xbf16, #tpu.memory_space<vmem>>, vector<16x16x4xbf16>
    %c0_19 = arith.constant 0 : index
    %c8_20 = arith.constant 8 : index
    %c0_21 = arith.constant 0 : index
    %12 = vector.load %arg7[%c0_19, %c8_20, %c0_21] : memref<18x25x4xbf16, #tpu.memory_space<vmem>>, vector<16x16x4xbf16>
    %c0_22 = arith.constant 0 : index
    %c9 = arith.constant 9 : index
    %c0_23 = arith.constant 0 : index
    %13 = vector.load %arg7[%c0_22, %c9, %c0_23] : memref<18x25x4xbf16, #tpu.memory_space<vmem>>, vector<16x16x4xbf16>
    %c1_24 = arith.constant 1 : index
    %c7_25 = arith.constant 7 : index
    %c0_26 = arith.constant 0 : index
    %14 = vector.load %arg7[%c1_24, %c7_25, %c0_26] : memref<18x25x4xbf16, #tpu.memory_space<vmem>>, vector<16x16x4xbf16>
    %c1_27 = arith.constant 1 : index
    %c8_28 = arith.constant 8 : index
    %c0_29 = arith.constant 0 : index
    %15 = vector.load %arg7[%c1_27, %c8_28, %c0_29] : memref<18x25x4xbf16, #tpu.memory_space<vmem>>, vector<16x16x4xbf16>
    %c1_30 = arith.constant 1 : index
    %c9_31 = arith.constant 9 : index
    %c0_32 = arith.constant 0 : index
    %16 = vector.load %arg7[%c1_30, %c9_31, %c0_32] : memref<18x25x4xbf16, #tpu.memory_space<vmem>>, vector<16x16x4xbf16>
    %c2 = arith.constant 2 : index
    %c7_33 = arith.constant 7 : index
    %c0_34 = arith.constant 0 : index
    %17 = vector.load %arg7[%c2, %c7_33, %c0_34] : memref<18x25x4xbf16, #tpu.memory_space<vmem>>, vector<16x16x4xbf16>
    %c2_35 = arith.constant 2 : index
    %c8_36 = arith.constant 8 : index
    %c0_37 = arith.constant 0 : index
    %18 = vector.load %arg7[%c2_35, %c8_36, %c0_37] : memref<18x25x4xbf16, #tpu.memory_space<vmem>>, vector<16x16x4xbf16>
    %c2_38 = arith.constant 2 : index
    %c9_39 = arith.constant 9 : index
    %c0_40 = arith.constant 0 : index
    %19 = vector.load %arg7[%c2_38, %c9_39, %c0_40] : memref<18x25x4xbf16, #tpu.memory_space<vmem>>, vector<16x16x4xbf16>
    %20 = tpu.concatenate %11, %12, %13, %14, %15, %16, %17, %18, %19 in 2 : vector<16x16x4xbf16>, vector<16x16x4xbf16>, vector<16x16x4xbf16>, vector<16x16x4xbf16>, vector<16x16x4xbf16>, vector<16x16x4xbf16>, vector<16x16x4xbf16>, vector<16x16x4xbf16>, vector<16x16x4xbf16> -> vector<16x16x36xbf16>
    %21 = vector.shape_cast %20 : vector<16x16x36xbf16> to vector<256x36xbf16>
    %c0_41 = arith.constant 0 : index
    %c0_42 = arith.constant 0 : index
    %22 = vector.load %arg2[%c0_41, %c0_42] : memref<36x8xbf16, #tpu.memory_space<vmem>>, vector<36x8xbf16>
    %cst_43 = arith.constant dense<0.000000e+00> : vector<256x8xf32>
    %23 = tpu.matmul %21, %22, %cst_43 {dimension_numbers = #tpu.dot_dimension_numbers<[1], [0], [0], [1], [0, 0, 1, 1], [], []>} : vector<256x36xbf16>, vector<36x8xbf16>, vector<256x8xf32> -> vector<256x8xf32>
    %c0_44 = arith.constant 0 : index
    %c0_45 = arith.constant 0 : index
    %24 = vector.load %arg3[%c0_44, %c0_45] : memref<1x8xf32, #tpu.memory_space<vmem>>, vector<1x8xf32>
    %25 = vector.broadcast %24 : vector<1x8xf32> to vector<256x8xf32>
    %26 = arith.addf %23, %25 : vector<256x8xf32>
    %cst_46 = arith.constant 0.000000e+00 : f32
    %27 = vector.broadcast %cst_46 : f32 to vector<256x8xf32>
    %28 = arith.maximumf %26, %27 : vector<256x8xf32>
    %cst_47 = arith.constant 0.000000e+00 : bf16
    %29 = vector.broadcast %cst_47 : bf16 to vector<1x25x8xbf16>
    %c0_48 = arith.constant 0 : index
    %c0_49 = arith.constant 0 : index
    %c0_50 = arith.constant 0 : index
    %30 = vector.load %arg8[%c0_48, %c0_49, %c0_50] : memref<18x25x8xbf16, #tpu.memory_space<vmem>>, vector<1x25x8xbf16>
    tpu.vector_store %arg8[%c0_48, %c0_49, %c0_50], %29 {strides = array<i32>} : memref<18x25x8xbf16, #tpu.memory_space<vmem>>, vector<1x25x8xbf16>,
    %cst_51 = arith.constant 0.000000e+00 : bf16
    %31 = vector.broadcast %cst_51 : bf16 to vector<1x25x8xbf16>
    %c17_52 = arith.constant 17 : index
    %c0_53 = arith.constant 0 : index
    %c0_54 = arith.constant 0 : index
    %32 = vector.load %arg8[%c17_52, %c0_53, %c0_54] : memref<18x25x8xbf16, #tpu.memory_space<vmem>>, vector<1x25x8xbf16>
    tpu.vector_store %arg8[%c17_52, %c0_53, %c0_54], %31 {strides = array<i32>} : memref<18x25x8xbf16, #tpu.memory_space<vmem>>, vector<1x25x8xbf16>,
    %cst_55 = arith.constant 0.000000e+00 : bf16
    %33 = vector.broadcast %cst_55 : bf16 to vector<18x8x8xbf16>
    %c0_56 = arith.constant 0 : index
    %c0_57 = arith.constant 0 : index
    %c0_58 = arith.constant 0 : index
    %34 = vector.load %arg8[%c0_56, %c0_57, %c0_58] : memref<18x25x8xbf16, #tpu.memory_space<vmem>>, vector<18x8x8xbf16>
    tpu.vector_store %arg8[%c0_56, %c0_57, %c0_58], %33 {strides = array<i32>} : memref<18x25x8xbf16, #tpu.memory_space<vmem>>, vector<18x8x8xbf16>,
    %cst_59 = arith.constant 0.000000e+00 : bf16
    %35 = vector.broadcast %cst_59 : bf16 to vector<18x1x8xbf16>
    %c0_60 = arith.constant 0 : index
    %c24_61 = arith.constant 24 : index
    %c0_62 = arith.constant 0 : index
    %36 = vector.load %arg8[%c0_60, %c24_61, %c0_62] : memref<18x25x8xbf16, #tpu.memory_space<vmem>>, vector<18x1x8xbf16>
    tpu.vector_store %arg8[%c0_60, %c24_61, %c0_62], %35 {strides = array<i32>} : memref<18x25x8xbf16, #tpu.memory_space<vmem>>, vector<18x1x8xbf16>,
    %37 = vector.shape_cast %28 : vector<256x8xf32> to vector<16x16x8xf32>
    %38 = arith.truncf %37 : vector<16x16x8xf32> to vector<16x16x8xbf16>
    %c1_63 = arith.constant 1 : index
    %c8_64 = arith.constant 8 : index
    %c0_65 = arith.constant 0 : index
    %39 = vector.load %arg8[%c1_63, %c8_64, %c0_65] : memref<18x25x8xbf16, #tpu.memory_space<vmem>>, vector<16x16x8xbf16>
    tpu.vector_store %arg8[%c1_63, %c8_64, %c0_65], %38 {strides = array<i32>} : memref<18x25x8xbf16, #tpu.memory_space<vmem>>, vector<16x16x8xbf16>,
    %c0_66 = arith.constant 0 : index
    %c7_67 = arith.constant 7 : index
    %c0_68 = arith.constant 0 : index
    %40 = vector.load %arg8[%c0_66, %c7_67, %c0_68] : memref<18x25x8xbf16, #tpu.memory_space<vmem>>, vector<16x16x8xbf16>
    %c0_69 = arith.constant 0 : index
    %c8_70 = arith.constant 8 : index
    %c0_71 = arith.constant 0 : index
    %41 = vector.load %arg8[%c0_69, %c8_70, %c0_71] : memref<18x25x8xbf16, #tpu.memory_space<vmem>>, vector<16x16x8xbf16>
    %c0_72 = arith.constant 0 : index
    %c9_73 = arith.constant 9 : index
    %c0_74 = arith.constant 0 : index
    %42 = vector.load %arg8[%c0_72, %c9_73, %c0_74] : memref<18x25x8xbf16, #tpu.memory_space<vmem>>, vector<16x16x8xbf16>
    %c1_75 = arith.constant 1 : index
    %c7_76 = arith.constant 7 : index
    %c0_77 = arith.constant 0 : index
    %43 = vector.load %arg8[%c1_75, %c7_76, %c0_77] : memref<18x25x8xbf16, #tpu.memory_space<vmem>>, vector<16x16x8xbf16>
    %c1_78 = arith.constant 1 : index
    %c8_79 = arith.constant 8 : index
    %c0_80 = arith.constant 0 : index
    %44 = vector.load %arg8[%c1_78, %c8_79, %c0_80] : memref<18x25x8xbf16, #tpu.memory_space<vmem>>, vector<16x16x8xbf16>
    %c1_81 = arith.constant 1 : index
    %c9_82 = arith.constant 9 : index
    %c0_83 = arith.constant 0 : index
    %45 = vector.load %arg8[%c1_81, %c9_82, %c0_83] : memref<18x25x8xbf16, #tpu.memory_space<vmem>>, vector<16x16x8xbf16>
    %c2_84 = arith.constant 2 : index
    %c7_85 = arith.constant 7 : index
    %c0_86 = arith.constant 0 : index
    %46 = vector.load %arg8[%c2_84, %c7_85, %c0_86] : memref<18x25x8xbf16, #tpu.memory_space<vmem>>, vector<16x16x8xbf16>
    %c2_87 = arith.constant 2 : index
    %c8_88 = arith.constant 8 : index
    %c0_89 = arith.constant 0 : index
    %47 = vector.load %arg8[%c2_87, %c8_88, %c0_89] : memref<18x25x8xbf16, #tpu.memory_space<vmem>>, vector<16x16x8xbf16>
    %c2_90 = arith.constant 2 : index
    %c9_91 = arith.constant 9 : index
    %c0_92 = arith.constant 0 : index
    %48 = vector.load %arg8[%c2_90, %c9_91, %c0_92] : memref<18x25x8xbf16, #tpu.memory_space<vmem>>, vector<16x16x8xbf16>
    %49 = tpu.concatenate %40, %41, %42, %43, %44, %45, %46, %47, %48 in 2 : vector<16x16x8xbf16>, vector<16x16x8xbf16>, vector<16x16x8xbf16>, vector<16x16x8xbf16>, vector<16x16x8xbf16>, vector<16x16x8xbf16>, vector<16x16x8xbf16>, vector<16x16x8xbf16>, vector<16x16x8xbf16> -> vector<16x16x72xbf16>
    %50 = vector.shape_cast %49 : vector<16x16x72xbf16> to vector<256x72xbf16>
    %c0_93 = arith.constant 0 : index
    %c0_94 = arith.constant 0 : index
    %51 = vector.load %arg4[%c0_93, %c0_94] : memref<4x72xbf16, #tpu.memory_space<vmem>>, vector<4x72xbf16>
    %cst_95 = arith.constant dense<0.000000e+00> : vector<4x256xf32>
    %52 = tpu.matmul %51, %50, %cst_95 {dimension_numbers = #tpu.dot_dimension_numbers<[1], [1], [0], [0], [0, 0, 1, 0], [], []>} : vector<4x72xbf16>, vector<256x72xbf16>, vector<4x256xf32> -> vector<4x256xf32>
    %c0_96 = arith.constant 0 : index
    %c0_97 = arith.constant 0 : index
    %53 = vector.load %arg5[%c0_96, %c0_97] : memref<4x1xf32, #tpu.memory_space<vmem>>, vector<4x1xf32>
    %54 = vector.broadcast %53 : vector<4x1xf32> to vector<4x256xf32>
    %55 = arith.addf %52, %54 : vector<4x256xf32>
    %cst_98 = arith.constant 0.000000e+00 : f32
    %56 = vector.broadcast %cst_98 : f32 to vector<4x256xf32>
    %57 = arith.maximumf %55, %56 : vector<4x256xf32>
    %c0_99 = arith.constant 0 : index
    %c0_100 = arith.constant 0 : index
    %c0_101 = arith.constant 0 : index
    %58 = vector.load %arg6[%c0_99, %c0_100, %c0_101] : memref<1x4x256xf32, #tpu.memory_space<vmem>>, vector<1x4x256xf32>
    %59 = vector.shape_cast %58 : vector<1x4x256xf32> to vector<4x256xf32>
    %60 = vector.shape_cast %57 : vector<4x256xf32> to vector<1x4x256xf32>
    tpu.vector_store %arg6[%c0_99, %c0_100, %c0_101], %60 {strides = array<i32>} : memref<1x4x256xf32, #tpu.memory_space<vmem>>, vector<1x4x256xf32>,
    return
  }
  func.func @transform_0(%arg0: i32) -> (i32, i32, i32, i32) {
    %c0_i32 = arith.constant 0 : i32
    %c0_i32_0 = arith.constant 0 : i32
    %c0_i32_1 = arith.constant 0 : i32
    %c0_i32_2 = arith.constant 0 : i32
    return %arg0, %c0_i32, %c0_i32_0, %c0_i32_1 : i32, i32, i32, i32
  }
  func.func @transform_1(%arg0: i32) -> (i32, i32) {
    %c0_i32 = arith.constant 0 : i32
    %c0_i32_0 = arith.constant 0 : i32
    %c0_i32_1 = arith.constant 0 : i32
    return %c0_i32, %c0_i32_0 : i32, i32
  }
  func.func @transform_2(%arg0: i32) -> (i32, i32) {
    %c0_i32 = arith.constant 0 : i32
    %c0_i32_0 = arith.constant 0 : i32
    %c0_i32_1 = arith.constant 0 : i32
    return %c0_i32, %c0_i32_0 : i32, i32
  }
  func.func @transform_3(%arg0: i32) -> (i32, i32) {
    %c0_i32 = arith.constant 0 : i32
    %c0_i32_0 = arith.constant 0 : i32
    %c0_i32_1 = arith.constant 0 : i32
    return %c0_i32, %c0_i32_0 : i32, i32
  }
  func.func @transform_4(%arg0: i32) -> (i32, i32) {
    %c0_i32 = arith.constant 0 : i32
    %c0_i32_0 = arith.constant 0 : i32
    %c0_i32_1 = arith.constant 0 : i32
    return %c0_i32, %c0_i32_0 : i32, i32
  }
  func.func @transform_5(%arg0: i32) -> (i32, i32, i32) {
    %c0_i32 = arith.constant 0 : i32
    %c0_i32_0 = arith.constant 0 : i32
    %c0_i32_1 = arith.constant 0 : i32
    return %arg0, %c0_i32, %c0_i32_0 : i32, i32, i32
  }
}

</mosaic_0001>

<bundles_post_ra>
// kernel: tpu_custom_call.1
= control target key start
LH: loop header
LB: loop body
LE: loop exit
PB: predicated region body
PF: predicated region fallthrough
CT: control target
= control target key end

     0   :  { %10 = vsyncpa [#allocation5], 0  ;;  %s10587_s0 = inlined_call_operand.vmem [shape: bf16[2,16,16,4], index: 0, kind: input, shape index: {}]   ;;  %s10588_s1 = inlined_call_operand.vmem [shape: bf16[36,8], index: 1, kind: input, shape index: {}]   ;;  %s10589_s2 = inlined_call_operand.vmem [shape: f32[1,8], index: 2, kind: input, shape index: {}]   ;;  %s10590_s3 = inlined_call_operand.vmem [shape: bf16[4,72], index: 3, kind: input, shape index: {}]   ;;  %s10591_s4 = inlined_call_operand.vmem [shape: f32[4,1], index: 4, kind: input, shape index: {}]   ;;  %s10592_s5 = inlined_call_operand.hbm [shape: f32[2,4,256], index: 5, kind: output, shape index: {}]  }
   0x1   :  { %12 = vsyncpa [#allocation5 + $0x1], 0  ;;  %s7084_s18 = smov 0   ;;  %s7086_s19 = smov 0  }
   0x2   :  { %s7088_s20 = smov 0   ;;  %s7090_s21 = smov 0  }
   0x3 LB: > { %s7105_s22 = sadd.s32 4294967295, %s7038_s21   ;;  %s5993_s23 = sadd.s32 4294967294, %s7038_s21   ;;  %s7038_s21 = sphi %s7090_s21, %s10845_s21   ;;  %s7034_s20 = sphi %s7088_s20, %s10844_s20   ;;  %s7030_s19 = sphi %s7086_s19, %s10843_s19   ;;  %s7026_s18 = sphi %s7084_s18, %s10842_s18  }
   0x4   : > { %s7109_s24 = sadd.s32 1, %s7038_s21   ;;  %s135_s25 = sadd.s32 1, %s7034_s20 }
   0x5   : > { %s132_s26 = ssub.s32 %s7038_s21, %s7109_s24  ;;  %p145_p0 = scmp.ne.s32.totalorder %s7034_s20, %s7030_s19 }
   0x6   : > { %p133_p1 = scmp.eq.s32.totalorder %s132_s26, 0  ;;  %p146_p2 = scmp.eq.s32.totalorder %s7105_s22, 1 }
   0x7   : > { %p151_p3 = scmp.ne.s32.totalorder %s7030_s19, %s7026_s18  ;;  %p152_p4 = scmp.eq.s32.totalorder %s5993_s23, 1 }
   0x8   : > { %s7120_s27 = scalar_select %p133_p1, %s7034_s20, %s135_s25  }
   0x9   : > { %p7122_p5 = por %p146_p2, %p145_p0  ;;  %p7126_p6 = por %p152_p4, %p151_p3 }
   0xa   : > { %p5996_p7 = scmp.ge.s32.totalorder %s7038_s21, 1  ;;  %p190_p8 = scmp.lt.s32.totalorder %s7038_s21, 3 }
   0xc   : > { %p191_p9 = pnand %p5996_p7, %p190_p8 }
   0xe   : > { %194 = sbr.rel (%p191_p9) target bundleno = 1543 (0x607), region = 40 }
  0x13   : > { %vm224_vm0 = vcmask 27648   ;;  %p218_p10 = scmp.lt.s32.totalorder %s7105_s22, 1  ;;  %vm228_vm1 = vcmask 24576   ;;  %v10593_v0 = vmov 0   ;;  %vm229_vm2 = vsmask.f32 256 }
  0x14   : > { %226 = vst.msk [vmem:[#allocation2 + $0x4] sm:$0xf] %vm224_vm0, %v10593_v0  ;;  %227 = vst.msk [vmem:[#allocation2 + $0x8] sm:$0xf] %vm224_vm0, %v10593_v0  ;;  %v231_v1 = vld [vmem:[#allocation2 + $0xc] sm:$0x1]  ;;  %6612 = vset.pattern.permute.xlu0 %v10593_v0 }
  0x15   : > { %225 = vst.msk [vmem:[#allocation2] sm:$0xf] %vm224_vm0, %v10593_v0  ;;  %235 = vst.msk [vmem:[#allocation2 + $0x110] sm:$0xf] %vm224_vm0, %v10593_v0  ;;  %s219_s30 = scalar_select %p218_p10, %s7105_s22, 1  ;;  %v10630_v2 = vmov 0 }
  0x16   : > { %236 = vst.msk [vmem:[#allocation2 + $0x114] sm:$0xf] %vm224_vm0, %v10593_v0  ;;  %237 = vst.msk [vmem:[#allocation2 + $0x118] sm:$0xf] %vm224_vm0, %v10593_v0  ;;  %v262_v3 = vld [vmem:[#allocation2 + $0x1c] sm:$0x1] }
  0x17   : > { %242 = vst.msk [vmem:[#allocation2 + $0x10] sm:$0xf] %vm224_vm0, %v10593_v0  ;;  %243 = vst.msk [vmem:[#allocation2 + $0x20] sm:$0xf] %vm224_vm0, %v10593_v0  ;;  %v265_v4 = vld [vmem:[#allocation2 + $0x2c] sm:$0x1] }
  0x18   : > { %244 = vst.msk [vmem:[#allocation2 + $0x30] sm:$0xf] %vm224_vm0, %v10593_v0  ;;  %245 = vst.msk [vmem:[#allocation2 + $0x40] sm:$0xf] %vm224_vm0, %v10593_v0  ;;  %v268_v8 = vld [vmem:[#allocation2 + $0x3c] sm:$0x1] }
  0x19   : > { %246 = vst.msk [vmem:[#allocation2 + $0x50] sm:$0xf] %vm224_vm0, %v10593_v0  ;;  %247 = vst.msk [vmem:[#allocation2 + $0x60] sm:$0xf] %vm224_vm0, %v10593_v0  ;;  %s6442_s6 = sshll.u32 %s219_s30, 7  ;;  %s7041_s10 = smov 4  }
  0x1a   : > { %248 = vst.msk [vmem:[#allocation2 + $0x70] sm:$0xf] %vm224_vm0, %v10593_v0  ;;  %249 = vst.msk [vmem:[#allocation2 + $0x80] sm:$0xf] %vm224_vm0, %v10593_v0  ;;  %v271_v10 = vld [vmem:[#allocation2 + $0x4c] sm:$0x1]  ;;  %s7202_s9 = scalar_lea.vmem %s10587_s0, %s6442_s6 }
  0x1b   : > { %250 = vst.msk [vmem:[#allocation2 + $0x90] sm:$0xf] %vm224_vm0, %v10593_v0  ;;  %251 = vst.msk [vmem:[#allocation2 + $0xa0] sm:$0xf] %vm224_vm0, %v10593_v0  ;;  %v274_v11 = vld [vmem:[#allocation2 + $0x5c] sm:$0x1] }
  0x1c   : > { %252 = vst.msk [vmem:[#allocation2 + $0xb0] sm:$0xf] %vm224_vm0, %v10593_v0  ;;  %253 = vst.msk [vmem:[#allocation2 + $0xc0] sm:$0xf] %vm224_vm0, %v10593_v0  ;;  %v315_v14 = vld [vmem:[%s7202_s9 + $0x8] sm:$0xf] }
  0x1d   : > { %254 = vst.msk [vmem:[#allocation2 + $0xd0] sm:$0xf] %vm224_vm0, %v10593_v0  ;;  %255 = vst.msk [vmem:[#allocation2 + $0xe0] sm:$0xf] %vm224_vm0, %v10593_v0  ;;  %v316_v15 = vld [vmem:[%s7202_s9 + $0xc] sm:$0xf] }
  0x1e   : > { %256 = vst.msk [vmem:[#allocation2 + $0xf0] sm:$0xf] %vm224_vm0, %v10593_v0  ;;  %257 = vst.msk [vmem:[#allocation2 + $0x100] sm:$0xf] %vm224_vm0, %v10593_v0  ;;  %v313_v16 = vld [vmem:[%s7202_s9] sm:$0xf] }
  0x1f   : > { %241 = vst.msk [vmem:[#allocation2] sm:$0xf] %vm224_vm0, %v10593_v0  ;;  %258 = vst.msk [vmem:[#allocation2 + $0x110] sm:$0xf] %vm224_vm0, %v10593_v0  ;;  %v314_v17 = vld [vmem:[%s7202_s9 + $0x4] sm:$0xf] }
  0x20   : > { %vm7187_vm3 = vmand %vm228_vm1, %vm229_vm2  ;;  %348 = vst.msk [vmem:[#allocation2 + $0x24] sm:$0xf] %vm224_vm0, %v315_v14  ;;  %v317_v18 = vld [vmem:[%s7202_s9 + $0x10] sm:$0xf]  ;;  %v318_v19 = vld [vmem:[%s7202_s9 + $0x14] sm:$0xf] }
  0x21   : > { %v10631_v2 = vsel %vm7187_vm3, 4294967295, %v10630_v2  ;;  %v232_v5 = vsel %vm7187_vm3, 0, %v231_v1  ;;  %v263_v6 = vsel %vm7187_vm3, 0, %v262_v3  ;;  %v266_v7 = vsel %vm7187_vm3, 0, %v265_v4  ;;  %349 = vst.msk [vmem:[#allocation2 + $0x28] sm:$0xf] %vm224_vm0, %v316_v15 }
  0x22   : > { %10632 = vst [vmem:[#allocation7_spill] sm:$0xff] %v10631_v2  ;;  %233 = vst [vmem:[#allocation2 + $0xc] sm:$0x1] %v232_v5  ;;  %v269_v9 = vsel %vm7187_vm3, 0, %v268_v8  ;;  %v272_v12 = vsel %vm7187_vm3, 0, %v271_v10  ;;  %v275_v13 = vsel %vm7187_vm3, 0, %v274_v11 }
  0x23   : > { %264 = vst [vmem:[#allocation2 + $0x1c] sm:$0x1] %v263_v6  ;;  %267 = vst [vmem:[#allocation2 + $0x2c] sm:$0x1] %v266_v7  ;;  %v379_v20 = vld [vmem:[#allocation2 + $0x4] sm:$0xf] }
  0x24   : > { %270 = vst [vmem:[#allocation2 + $0x3c] sm:$0x1] %v269_v9  ;;  %273 = vst [vmem:[#allocation2 + $0x4c] sm:$0x1] %v272_v12  ;;  %v380_v21 = vld [vmem:[#allocation2 + $0x8] sm:$0xf] }
  0x25   : > { %276 = vst [vmem:[#allocation2 + $0x5c] sm:$0x1] %v275_v13  ;;  %346 = vst.msk [vmem:[#allocation2 + $0x14] sm:$0xf] %vm224_vm0, %v313_v16  ;;  %v319_v22 = vld [vmem:[%s7202_s9 + $0x18] sm:$0xf]  ;;  %v7221_v23 = vcombine.low %v379_v20, %v380_v21 }
  0x26   : > { %347 = vst.msk [vmem:[#allocation2 + $0x18] sm:$0xf] %vm224_vm0, %v314_v17  ;;  %350 = vst.msk [vmem:[#allocation2 + $0x34] sm:$0xf] %vm224_vm0, %v317_v18  ;;  %v320_v24 = vld [vmem:[%s7202_s9 + $0x1c] sm:$0xf] }
  0x27   : > { %351 = vst.msk [vmem:[#allocation2 + $0x38] sm:$0xf] %vm224_vm0, %v318_v19  ;;  %352 = vst.msk [vmem:[#allocation2 + $0x44] sm:$0xf] %vm224_vm0, %v319_v22  ;;  %v321_v25 = vld [vmem:[%s7202_s9 + $0x20] sm:$0xf] }
  0x28   : > { %v322_v26 = vld [vmem:[%s7202_s9 + $0x24] sm:$0xf]  ;;  %353 = vst.msk [vmem:[#allocation2 + $0x48] sm:$0xf] %vm224_vm0, %v320_v24  ;;  %354 = vst.msk [vmem:[#allocation2 + $0x54] sm:$0xf] %vm224_vm0, %v321_v25 }
  0x29   : > { %355 = vst.msk [vmem:[#allocation2 + $0x58] sm:$0xf] %vm224_vm0, %v322_v26  ;;  %v323_v27 = vld [vmem:[%s7202_s9 + $0x28] sm:$0xf]  ;;  %v324_v28 = vld [vmem:[%s7202_s9 + $0x2c] sm:$0xf] }
  0x2a   : > { %v325_v29 = vld [vmem:[%s7202_s9 + $0x30] sm:$0xf]  ;;  %v716_v30 = vshrl.u32 %v7221_v23, 16  ;;  %v719_v31 = vshll.u32 %v7221_v23, 16  ;;  %356 = vst.msk [vmem:[#allocation2 + $0x64] sm:$0xf] %vm224_vm0, %v323_v27 }
  0x2b   : > { %357 = vst.msk [vmem:[#allocation2 + $0x68] sm:$0xf] %vm224_vm0, %v324_v28  ;;  %v326_v32 = vld [vmem:[%s7202_s9 + $0x34] sm:$0xf]  ;;  %358 = vst.msk [vmem:[#allocation2 + $0x74] sm:$0xf] %vm224_vm0, %v325_v29 }
  0x2c   : > { %v327_v33 = vld [vmem:[%s7202_s9 + $0x38] sm:$0xf]  ;;  %359 = vst.msk [vmem:[#allocation2 + $0x78] sm:$0xf] %vm224_vm0, %v326_v32  ;;  %v328_v34 = vld [vmem:[%s7202_s9 + $0x3c] sm:$0xf] }
  0x2d   : > { %360 = vst.msk [vmem:[#allocation2 + $0x84] sm:$0xf] %vm224_vm0, %v327_v33  ;;  %v329_v35 = vld [vmem:[%s7202_s9 + $0x40] sm:$0xf]  ;;  %v330_v36 = vld [vmem:[%s7202_s9 + $0x44] sm:$0xf] }
  0x2e   : > { %v718_v37 = vrot.slane %v716_v30, 4  ;;  %v721_v38 = vrot.slane %v719_v31, 5  ;;  %361 = vst.msk [vmem:[#allocation2 + $0x88] sm:$0xf] %vm224_vm0, %v328_v34  ;;  %362 = vst.msk [vmem:[#allocation2 + $0x94] sm:$0xf] %vm224_vm0, %v329_v35 }
  0x2f   : > { %363 = vst.msk [vmem:[#allocation2 + $0x98] sm:$0xf] %vm224_vm0, %v330_v36  ;;  %v331_v39 = vld [vmem:[%s7202_s9 + $0x48] sm:$0xf]  ;;  %v332_v40 = vld [vmem:[%s7202_s9 + $0x4c] sm:$0xf] }
  0x30   : > { %v385_v41 = vld [vmem:[#allocation2 + $0x24] sm:$0xf]  ;;  %v386_v42 = vld [vmem:[#allocation2 + $0x28] sm:$0xf]  ;;  %v382_v43 = vld [vmem:[#allocation2 + $0x14] sm:$0xf]  ;;  %v722_v44 = vor.u32 %v721_v38, %v718_v37 }
  0x31   : > { %364 = vst.msk [vmem:[#allocation2 + $0xa4] sm:$0xf] %vm224_vm0, %v331_v39  ;;  %365 = vst.msk [vmem:[#allocation2 + $0xa8] sm:$0xf] %vm224_vm0, %v332_v40  ;;  %v7252_v45 = vcombine.low %v385_v41, %v386_v42  ;;  %v383_v46 = vld [vmem:[#allocation2 + $0x18] sm:$0xf] }
  0x32   : > { %v388_v47 = vld [vmem:[#allocation2 + $0x34] sm:$0xf]  ;;  %v389_v48 = vld [vmem:[#allocation2 + $0x38] sm:$0xf]  ;;  %v7254_v49 = vcombine.low %v382_v43, %v383_v46  ;;  %v391_v51 = vld [vmem:[#allocation2 + $0x44] sm:$0xf]  ;;  %843 = vrot.lane.b32.xlu0 %v722_v44, %s7041_s10 }
  0x33   : > { %v7256_v50 = vcombine.low %v388_v47, %v389_v48  ;;  %v333_v52 = vld [vmem:[%s7202_s9 + $0x50] sm:$0xf]  ;;  %v334_v53 = vld [vmem:[%s7202_s9 + $0x54] sm:$0xf]  ;;  %v732_v54 = vshrl.u32 %v7252_v45, 16  ;;  %v735_v55 = vshll.u32 %v7252_v45, 16 }
  0x34   : > { %v392_v56 = vld [vmem:[#allocation2 + $0x48] sm:$0xf]  ;;  %v7263_v57 = vld [vmem:[#allocation2 + $0x54] sm:$0xf]  ;;  %366 = vst.msk [vmem:[#allocation2 + $0xb4] sm:$0xf] %vm224_vm0, %v333_v52 }
  0x35   : > { %367 = vst.msk [vmem:[#allocation2 + $0xb8] sm:$0xf] %vm224_vm0, %v334_v53  ;;  %v724_v58 = vshrl.u32 %v7254_v49, 16  ;;  %v727_v59 = vshll.u32 %v7254_v49, 16  ;;  %v740_v60 = vshrl.u32 %v7256_v50, 16  ;;  %v743_v61 = vshll.u32 %v7256_v50, 16 }
  0x36   : > { %v7271_v62 = vld [vmem:[#allocation2 + $0x58] sm:$0xf]  ;;  %v734_v63 = vrot.slane %v732_v54, 4  ;;  %v737_v1 = vrot.slane %v735_v55, 5  ;;  %v7273_v3 = vcombine.low %v391_v51, %v392_v56  ;;  %v7279_v5 = vld [vmem:[#allocation2 + $0x64] sm:$0xf] }
  0x37   : > { %v7277_v4 = vcombine.low %v7263_v57, %v7271_v62  ;;  %v7281_v6 = vld [vmem:[#allocation2 + $0x68] sm:$0xf]  ;;  %v726_v7 = vrot.slane %v724_v58, 4  ;;  %v729_v8 = vrot.slane %v727_v59, 5  ;;  %v742_v9 = vrot.slane %v740_v60, 4  ;;  %s7042_s11 = smov 8  }
  0x38   : > { %v745_v10 = vrot.slane %v743_v61, 5  ;;  %v7283_v11 = vld [vmem:[#allocation2 + $0x74] sm:$0xf]  ;;  %v738_v12 = vor.u32 %v737_v1, %v734_v63  ;;  %v748_v13 = vshrl.u32 %v7273_v3, 16  ;;  %v751_v14 = vshll.u32 %v7273_v3, 16  ;;  %s7043_s12 = smov 12  }
  0x39   : > { %v756_v15 = vshrl.u32 %v7277_v4, 16  ;;  %v7288_v16 = vld [vmem:[#allocation2 + $0x78] sm:$0xf]  ;;  %v730_v17 = vor.u32 %v729_v8, %v726_v7  ;;  %v759_v19 = vshll.u32 %v7277_v4, 16  ;;  %v7293_v20 = vcombine.low %v7279_v5, %v7281_v6  ;;  %v7295_v21 = vld [vmem:[#allocation2 + $0x84] sm:$0xf] }
  0x3a   : > { %v746_v18 = vor.u32 %v745_v10, %v742_v9  ;;  %v7297_v22 = vld [vmem:[#allocation2 + $0x88] sm:$0xf]  ;;  %847 = vrot.lane.b32.xlu1 %v738_v12, %s7041_s10  ;;  %v750_v24 = vrot.slane %v748_v13, 4  ;;  %v753_v25 = vrot.slane %v751_v14, 5  ;;  %v7302_v27 = vcombine.low %v7283_v11, %v7288_v16  ;;  %v7304_v28 = vld [vmem:[#allocation2 + $0x94] sm:$0xf] }
  0x3b   : > { %v758_v26 = vrot.slane %v756_v15, 4  ;;  %845 = vrot.lane.b32.xlu0 %v730_v17, %s7041_s10  ;;  %v761_v29 = vrot.slane %v759_v19, 5  ;;  %v764_v30 = vshrl.u32 %v7293_v20, 16  ;;  %v767_v31 = vshll.u32 %v7293_v20, 16  ;;  %v7313_v33 = vld [vmem:[#allocation2 + $0x98] sm:$0xf] }
  0x3c   : > { %v7311_v32 = vcombine.low %v7295_v21, %v7297_v22  ;;  %v754_v34 = vor.u32 %v753_v25, %v750_v24  ;;  %v772_v35 = vshrl.u32 %v7302_v27, 16  ;;  %v775_v36 = vshll.u32 %v7302_v27, 16  ;;  %v7321_v38 = vld [vmem:[#allocation2 + $0xa4] sm:$0xf]  ;;  %v7323_v39 = vld [vmem:[#allocation2 + $0xa8] sm:$0xf] }
  0x3d   : > { %v7319_v37 = vcombine.low %v7304_v28, %v7313_v33  ;;  %v762_v40 = vor.u32 %v761_v29, %v758_v26  ;;  %v766_v41 = vrot.slane %v764_v30, 4  ;;  %v769_v42 = vrot.slane %v767_v31, 5  ;;  %v7326_v44 = vld [vmem:[#allocation2 + $0xb4] sm:$0xf]  ;;  %v7331_v52 = vld [vmem:[#allocation2 + $0xb8] sm:$0xf] }
  0x3e   : > { %v780_v43 = vshrl.u32 %v7311_v32, 16  ;;  %849 = vrot.lane.b32.xlu1 %v746_v18, %s7041_s10  ;;  %v774_v46 = vrot.slane %v772_v35, 4  ;;  %v777_v47 = vrot.slane %v775_v36, 5  ;;  %v783_v48 = vshll.u32 %v7311_v32, 16  ;;  %v335_v58 = vld [vmem:[%s7202_s9 + $0x58] sm:$0xf] }
  0x3f   : > { %v788_v51 = vshrl.u32 %v7319_v37, 16  ;;  %851 = vrot.lane.b32.xlu0 %v754_v34, %s7041_s10  ;;  %v770_v53 = vor.u32 %v769_v42, %v766_v41  ;;  %v791_v55 = vshll.u32 %v7319_v37, 16  ;;  %v7337_v56 = vcombine.low %v7321_v38, %v7323_v39  ;;  %v336_v59 = vld [vmem:[%s7202_s9 + $0x5c] sm:$0xf]  ;;  %368 = vst.msk [vmem:[#allocation2 + $0xc4] sm:$0xf] %vm224_vm0, %v335_v58 }
  0x40   : > { %v782_v54 = vrot.slane %v780_v43, 4  ;;  %v785_v60 = vrot.slane %v783_v48, 5  ;;  %v7343_v61 = vcombine.low %v7326_v44, %v7331_v52  ;;  %369 = vst.msk [vmem:[#allocation2 + $0xc8] sm:$0xf] %vm224_vm0, %v336_v59  ;;  %v337_v63 = vld [vmem:[%s7202_s9 + $0x60] sm:$0xf]  ;;  %v778_v13 = vor.u32 %v777_v47, %v774_v46 }
  0x41   : > { %v338_v1 = vld [vmem:[%s7202_s9 + $0x64] sm:$0xf]  ;;  %v790_v7 = vrot.slane %v788_v51, 4  ;;  %v793_v8 = vrot.slane %v791_v55, 5  ;;  %v796_v9 = vshrl.u32 %v7337_v56, 16  ;;  %v799_v10 = vshll.u32 %v7337_v56, 16 }
  0x42   : > { %370 = vst.msk [vmem:[#allocation2 + $0xd4] sm:$0xf] %vm224_vm0, %v337_v63  ;;  %371 = vst.msk [vmem:[#allocation2 + $0xd8] sm:$0xf] %vm224_vm0, %v338_v1  ;;  %v339_v12 = vld [vmem:[%s7202_s9 + $0x68] sm:$0xf]  ;;  %853 = vrot.lane.b32.xlu1 %v762_v40, %s7041_s10  ;;  %v786_v19 = vor.u32 %v785_v60, %v782_v54 }
  0x43   : > { %v804_v14 = vshrl.u32 %v7343_v61, 16  ;;  %v807_v15 = vshll.u32 %v7343_v61, 16  ;;  %v340_v17 = vld [vmem:[%s7202_s9 + $0x6c] sm:$0xf]  ;;  %372 = vst.msk [vmem:[#allocation2 + $0xe4] sm:$0xf] %vm224_vm0, %v339_v12  ;;  %855 = vrot.lane.b32.xlu0 %v770_v53, %s7041_s10  ;;  %v794_v31 = vor.u32 %v793_v8, %v790_v7 }
  0x44   : > { %v341_v18 = vld [vmem:[%s7202_s9 + $0x70] sm:$0xf]  ;;  %v798_v24 = vrot.slane %v796_v9, 4  ;;  %v801_v25 = vrot.slane %v799_v10, 5  ;;  %373 = vst.msk [vmem:[#allocation2 + $0xe8] sm:$0xf] %vm224_vm0, %v340_v17 }
  0x45   : > { %v342_v26 = vld [vmem:[%s7202_s9 + $0x74] sm:$0xf]  ;;  %374 = vst.msk [vmem:[#allocation2 + $0xf4] sm:$0xf] %vm224_vm0, %v341_v18  ;;  %v259_v29 = vld [vmem:[#allocation2 + $0xc] sm:$0x1] }
  0x46   : > { %375 = vst.msk [vmem:[#allocation2 + $0xf8] sm:$0xf] %vm224_vm0, %v342_v26  ;;  %v260_v30 = vsel %vm7187_vm3, 0, %v259_v29  ;;  %857 = vrot.lane.b32.xlu1 %v778_v13, %s7041_s10  ;;  %v806_v34 = vrot.slane %v804_v14, 4  ;;  %v809_v35 = vrot.slane %v807_v15, 5  ;;  %v802_v36 = vor.u32 %v801_v25, %v798_v24  ;;  %s7044_s13 = smov 16  }
  0x47   : > { %261 = vst [vmem:[#allocation2 + $0xc] sm:$0x1] %v260_v30  ;;  %859 = vrot.lane.b32.xlu0 %v786_v19, %s7041_s10  ;;  %v7369_v40 = vld [vmem:[#allocation2 + $0xc4] sm:$0xf]  ;;  %v7371_v41 = vld [vmem:[#allocation2 + $0xc8] sm:$0xf] }
  0x48   : > { %v7375_v42 = vcombine.low %v7369_v40, %v7371_v41  ;;  %v810_v51 = vor.u32 %v809_v35, %v806_v34  ;;  %v277_v7 = vld [vmem:[#allocation2 + $0x6c] sm:$0x1]  ;;  %v280_v24 = vld [vmem:[#allocation2 + $0x7c] sm:$0x1]  ;;  %vm923_vm4 = vcmask 1042432   ;;  %vm2092_vm5 = vcmask 31744  }
  0x49   : > { %v7377_v43 = vld [vmem:[#allocation2 + $0xd4] sm:$0xf]  ;;  %v7379_v46 = vld [vmem:[#allocation2 + $0xd8] sm:$0xf]  ;;  %s7045_s14 = smov 20   ;;  %s7046_s17 = smov 24  }
  0x4a   : > { %v7383_v47 = vcombine.low %v7377_v43, %v7379_v46  ;;  %v7385_v48 = vld [vmem:[#allocation2 + $0xe4] sm:$0xf]  ;;  %861 = vrot.lane.b32.xlu1 %v794_v31, %s7041_s10  ;;  %v812_v53 = vshrl.u32 %v7375_v42, 16  ;;  %v815_v54 = vshll.u32 %v7375_v42, 16  ;;  %v278_v31 = vsel %vm7187_vm3, 0, %v277_v7  ;;  %s7047_s6 = smov 28  }
  0x4b   : > { %v7390_v55 = vld [vmem:[#allocation2 + $0xe8] sm:$0xf]  ;;  %863 = vrot.lane.b32.xlu0 %v802_v36, %s7041_s10  ;;  %279 = vst [vmem:[#allocation2 + $0x6c] sm:$0x1] %v278_v31  ;;  %v7528_v0 = vld [vmem:[#allocation2 + $0xb4] sm:$0xf] }
  0x4c   : > { %v7392_v58 = vld [vmem:[#allocation2 + $0xf4] sm:$0xf]  ;;  %v820_v59 = vshrl.u32 %v7383_v47, 16  ;;  %v823_v60 = vshll.u32 %v7383_v47, 16  ;;  %v7399_v63 = vcombine.low %v7385_v48, %v7390_v55  ;;  %v814_v8 = vrot.slane %v812_v53, 4  ;;  %s7048_s7 = smov 32  }
  0x4d   : > { %v7401_v1 = vld [vmem:[#allocation2 + $0xf8] sm:$0xf]  ;;  %v817_v9 = vrot.slane %v815_v54, 5  ;;  %v281_v53 = vsel %vm7187_vm3, 0, %v280_v24  ;;  %v283_v54 = vld [vmem:[#allocation2 + $0x8c] sm:$0x1] }
  0x4e   : > { %v7405_v10 = vcombine.low %v7392_v58, %v7401_v1  ;;  %v822_v12 = vrot.slane %v820_v59, 4  ;;  %v825_v13 = vrot.slane %v823_v60, 5  ;;  %v828_v14 = vshrl.u32 %v7399_v63, 16  ;;  %865 = vrot.lane.b32.xlu1 %v810_v51, %s7041_s10  ;;  %v6629_v30 = vld [vmem:[#allocation2 + $0xc] ss:$0 sps:$4 sm:$0x11]  }
  0x4f   : > { %v831_v15 = vshll.u32 %v7399_v63, 16  ;;  %v818_v17 = vor.u32 %v817_v9, %v814_v8  ;;  %v6630_v51 = vld [vmem:[#allocation2 + $0x1c] ss:$0 sps:$4 sm:$0x11]   ;;  %282 = vst [vmem:[#allocation2 + $0x7c] sm:$0x1] %v281_v53 }
  0x50   : > { %v836_v18 = vshrl.u32 %v7405_v10, 16  ;;  %v839_v19 = vshll.u32 %v7405_v10, 16  ;;  %v826_v25 = vor.u32 %v825_v13, %v822_v12  ;;  %v830_v26 = vrot.slane %v828_v14, 4  ;;  %v286_v60 = vld [vmem:[#allocation2 + $0x9c] sm:$0x1]  ;;  %s215_s23 = sand.u32 1, %s7030_s19  }
  0x51   : > { %v833_v29 = vrot.slane %v831_v15, 5  ;;  %867 = vrot.lane.b32.xlu0 %v818_v17, %s7041_s10  ;;  %v289_v8 = vld [vmem:[#allocation2 + $0xac] sm:$0x1]  ;;  %v925_v9 = vrot.slane %v6629_v30, 5  ;;  %v284_v7 = vsel %vm7187_vm3, 0, %v283_v54  ;;  %v287_v12 = vsel %vm7187_vm3, 0, %v286_v60 }
  0x52   : > { %v838_v34 = vrot.slane %v836_v18, 4  ;;  %v841_v35 = vrot.slane %v839_v19, 5  ;;  %869 = vrot.lane.b32.xlu1 %v826_v25, %s7041_s10  ;;  %v292_v13 = vld [vmem:[#allocation2 + $0xbc] sm:$0x1]  ;;  %v924_v14 = vrot.slane %v7221_v23, 5  ;;  %v290_v15 = vsel %vm7187_vm3, 0, %v289_v8 }
  0x53   : > { %v834_v36 = vor.u32 %v833_v29, %v830_v26  ;;  %285 = vst [vmem:[#allocation2 + $0x8c] sm:$0x1] %v284_v7  ;;  %288 = vst [vmem:[#allocation2 + $0x9c] sm:$0x1] %v287_v12  ;;  %v295_v17 = vld [vmem:[#allocation2 + $0xcc] sm:$0x1] }
  0x54   : > { %v842_v59 = vor.u32 %v841_v35, %v838_v34  ;;  %291 = vst [vmem:[#allocation2 + $0xac] sm:$0x1] %v290_v15  ;;  %v293_v18 = vsel %vm7187_vm3, 0, %v292_v13  ;;  %v296_v19 = vsel %vm7187_vm3, 0, %v295_v17  ;;  %v298_v24 = vld [vmem:[#allocation2 + $0xdc] sm:$0x1]  ;;  %v926_v29 = vsel %vm923_vm4, %v924_v14, %v925_v9 }
  0x55   : > { %871 = vrot.lane.b32.xlu0 %v834_v36, %s7041_s10  ;;  %v6631_v25 = vld [vmem:[#allocation2 + $0x2c] ss:$0 sps:$4 sm:$0x11]   ;;  %294 = vst [vmem:[#allocation2 + $0xbc] sm:$0x1] %v293_v18  ;;  %v299_v23 = vsel %vm7187_vm3, 0, %v298_v24 }
  0x56   : > { %873 = vrot.lane.b32.xlu1 %v842_v59, %s7041_s10  ;;  %297 = vst [vmem:[#allocation2 + $0xcc] sm:$0x1] %v296_v19  ;;  %v301_v26 = vld [vmem:[#allocation2 + $0xec] sm:$0x1]  ;;  %v928_v30 = vrot.slane %v6630_v51, 5  ;;  %v927_v34 = vrot.slane %v7254_v49, 5 }
  0x57   : > { %300 = vst [vmem:[#allocation2 + $0xdc] sm:$0x1] %v299_v23  ;;  %v302_v31 = vsel %vm7187_vm3, 0, %v301_v26  ;;  %v304_v35 = vld [vmem:[#allocation2 + $0xfc] sm:$0x1]  ;;  %v931_v54 = vrot.slane %v6631_v25, 5 }
  0x58   : > { %303 = vst [vmem:[#allocation2 + $0xec] sm:$0x1] %v302_v31  ;;  %v305_v36 = vsel %vm7187_vm3, 0, %v304_v35  ;;  %v929_v53 = vsel %vm923_vm4, %v927_v34, %v928_v30  ;;  %v6632_v51 = vld [vmem:[#allocation2 + $0x3c] ss:$0 sps:$4 sm:$0x11]  }
  0x59   : > { %972 = vrot.lane.b32.xlu0 %v924_v14, %s7042_s11  ;;  %306 = vst [vmem:[#allocation2 + $0xfc] sm:$0x1] %v305_v36  ;;  %v930_v59 = vrot.slane %v7252_v45, 5  ;;  %v934_v60 = vrot.slane %v6632_v51, 5  ;;  %v933_v9 = vrot.slane %v7256_v50, 5  ;;  %v936_v45 = vrot.slane %v7273_v3, 5 }
  0x5a   : > { %974 = vrot.lane.b32.xlu1 %v926_v29, %s7042_s11  ;;  %v6633_v8 = vld [vmem:[#allocation2 + $0x4c] ss:$0 sps:$4 sm:$0x11]   ;;  %v6634_v13 = vld [vmem:[#allocation2 + $0x5c] ss:$0 sps:$4 sm:$0x11]  }
  0x5b   : > { %v932_v49 = vsel %vm923_vm4, %v930_v59, %v931_v54  ;;  %v935_v7 = vsel %vm923_vm4, %v933_v9, %v934_v60  ;;  %v937_v12 = vrot.slane %v6633_v8, 5  ;;  %v6635_v14 = vld [vmem:[#allocation2 + $0x6c] ss:$0 sps:$4 sm:$0x11]   ;;  %v7452_v15 = vld [vmem:[#allocation2 + $0x34] sm:$0xf] }
  0x5c   : > { %v7454_v17 = vld [vmem:[#allocation2 + $0x38] sm:$0xf]  ;;  %v7461_v18 = vld [vmem:[#allocation2 + $0x44] sm:$0xf]  ;;  %v7463_v19 = vld [vmem:[#allocation2 + $0x48] sm:$0xf] }
  0x5d   : > { %976 = vrot.lane.b32.xlu0 %v927_v34, %s7042_s11  ;;  %v7459_v50 = vcombine.low %v7452_v15, %v7454_v17  ;;  %v938_v24 = vsel %vm923_vm4, %v936_v45, %v937_v12  ;;  %v940_v25 = vrot.slane %v6634_v13, 5  ;;  %v7468_v3 = vcombine.low %v7461_v18, %v7463_v19  ;;  %v7470_v23 = vld [vmem:[#allocation2 + $0x54] sm:$0xf]  ;;  %v7472_v26 = vld [vmem:[#allocation2 + $0x58] sm:$0xf]  ;;  %s7049_s10 = smov 40  }
  0x5e   : > { %978 = vrot.lane.b32.xlu1 %v929_v53, %s7042_s11  ;;  %v939_v29 = vrot.slane %v7277_v4, 5  ;;  %v7478_v30 = vcombine.low %v7470_v23, %v7472_v26  ;;  %v7480_v31 = vld [vmem:[#allocation2 + $0x64] sm:$0xf]  ;;  %v7482_v34 = vld [vmem:[#allocation2 + $0x68] sm:$0xf]  ;;  %v943_v54 = vrot.slane %v6635_v14, 5 }
  0x5f   : > { %10633 = vst [vmem:[#allocation8_spill] sm:$0xff] %v7468_v3  ;;  %v7487_v35 = vcombine.low %v7480_v31, %v7482_v34  ;;  %v7489_v36 = vld [vmem:[#allocation2 + $0x74] sm:$0xf]  ;;  %v7491_v53 = vld [vmem:[#allocation2 + $0x78] sm:$0xf]  ;;  %vm2913_vm6 = vcmask 1041408  }
  0x60   : > { %10634 = vst [vmem:[#allocation9_spill] sm:$0xff] %v7478_v30  ;;  %v941_v4 = vsel %vm923_vm4, %v939_v29, %v940_v25  ;;  %v6636_v51 = vld [vmem:[#allocation2 + $0x7c] ss:$0 sps:$4 sm:$0x11]   ;;  %v7500_v60 = vld [vmem:[#allocation2 + $0x84] sm:$0xf] }
  0x61   : > { %980 = vrot.lane.b32.xlu0 %v930_v59, %s7042_s11  ;;  %10635 = vst [vmem:[#allocation10_spill] sm:$0xff] %v7487_v35  ;;  %v7496_v59 = vcombine.low %v7489_v36, %v7491_v53  ;;  %v7502_v8 = vld [vmem:[#allocation2 + $0x88] sm:$0xf]  ;;  %v7509_v12 = vld [vmem:[#allocation2 + $0x94] sm:$0xf]  ;;  %v946_v14 = vrot.slane %v6636_v51, 5 }
  0x62   : > { %982 = vrot.lane.b32.xlu1 %v932_v49, %s7042_s11  ;;  %v942_v49 = vrot.slane %v7293_v20, 5  ;;  %v7511_v13 = vld [vmem:[#allocation2 + $0x98] sm:$0xf]  ;;  %v7520_v25 = vld [vmem:[#allocation2 + $0xa8] sm:$0xf]  ;;  %vm2173_vm7 = vcmask 64512  }
  0x63   : > { %10636 = vst [vmem:[#allocation11_spill] sm:$0xff] %v7496_v59  ;;  %v7516_v20 = vcombine.low %v7509_v12, %v7511_v13  ;;  %v6638_v51 = vld [vmem:[#allocation2 + $0x9c] ss:$0 sps:$4 sm:$0x11]   ;;  %v7550_v35 = vld [vmem:[#allocation2 + $0xd8] sm:$0xf] }
  0x64   : > { %v6640_v3 = vld [vmem:[#allocation2 + $0xbc] ss:$0 sps:$4 sm:$0x11]   ;;  %vm2238_vm8 = vcmask 97280   ;;  %vm2303_vm9 = vcmask 130048   ;;  %vm2352_vm10 = vcmask 162816  }
  0x65   : > { %984 = vrot.lane.b32.xlu0 %v933_v9, %s7042_s11  ;;  %v6637_v9 = vld [vmem:[#allocation2 + $0x8c] ss:$0 sps:$4 sm:$0x11]   ;;  %10638 = vst [vmem:[#allocation13_spill] sm:$0xff] %v7516_v20  ;;  %vm2417_vm11 = vcmask 195584   ;;  %vm2482_vm12 = vcmask 228352  }
  0x66   : > { %986 = vrot.lane.b32.xlu1 %v935_v7, %s7042_s11  ;;  %v7506_v7 = vcombine.low %v7500_v60, %v7502_v8  ;;  %vm2531_vm13 = vcmask 261120   ;;  %vm2596_vm14 = vsmask.f32 4352  ;;  %vm2864_vm15 = vcmask 293888   ;;  %s5997_s25 = sshll.u32 %s215_s23, 3  ;;  %s6475_s26 = sshll.u32 %s7105_s22, 7 }
  0x67   : > { %vm3114_vm1 = vcmask 57344   ;;  %s217_s30 = scalar_lea.vmem [#allocation4], %s5997_s25 }
  0x68   : > { %10637 = vst [vmem:[#allocation12_spill] sm:$0xff] %v7506_v7  ;;  %v7538_v7 = vld [vmem:[#allocation2 + $0xc4] sm:$0xf] }
  0x69   : > { %988 = vrot.lane.b32.xlu0 %v936_v45, %s7042_s11  ;;  %v944_v45 = vsel %vm923_vm4, %v942_v49, %v943_v54  ;;  %v7530_v54 = vld [vmem:[#allocation2 + $0xb8] sm:$0xf] }
  0x6a   : > { %990 = vrot.lane.b32.xlu1 %v938_v24, %s7042_s11  ;;  %v7518_v24 = vld [vmem:[#allocation2 + $0xa4] sm:$0xf]  ;;  %v7535_v20 = vcombine.low %v7528_v0, %v7530_v54 }
  0x6c   : > { %10640 = vst [vmem:[#allocation15_spill] sm:$0xff] %v7535_v20  ;;  %v952_v20 = vrot.slane %v6638_v51, 5  ;;  %v958_v51 = vrot.slane %v6640_v3, 5 }
  0x6d   : > { %992 = vrot.lane.b32.xlu0 %v939_v29, %s7042_s11  ;;  %v945_v29 = vrot.slane %v7302_v27, 5  ;;  %v7540_v27 = vld [vmem:[#allocation2 + $0xc8] sm:$0xf] }
  0x6e   : > { %994 = vrot.lane.b32.xlu1 %v941_v4, %s7042_s11  ;;  %v7526_v4 = vcombine.low %v7518_v24, %v7520_v25  ;;  %v7546_v59 = vcombine.low %v7538_v7, %v7540_v27 }
  0x6f   : > { %v947_v2 = vsel %vm923_vm4, %v945_v29, %v946_v14 }
  0x70   : > { %10639 = vst [vmem:[#allocation14_spill] sm:$0xff] %v7526_v4  ;;  %v948_v4 = vrot.slane %v7311_v32, 5  ;;  %10641 = vst [vmem:[#allocation16_spill] sm:$0xff] %v7546_v59  ;;  %v951_v32 = vrot.slane %v7319_v37, 5  ;;  %v957_v37 = vrot.slane %v7343_v61, 5  ;;  %v963_v61 = vrot.slane %v7383_v47, 5 }
  0x71   : > { %996 = vrot.lane.b32.xlu0 %v942_v49, %s7042_s11  ;;  %v949_v49 = vrot.slane %v6637_v9, 5  ;;  %v7584_v47 = vld [vmem:[#allocation2 + $0x14] sm:$0xf] }
  0x72   : > { %998 = vrot.lane.b32.xlu1 %v944_v45, %s7042_s11  ;;  %v7548_v45 = vld [vmem:[#allocation2 + $0xd4] sm:$0xf]  ;;  %v953_v59 = vsel %vm923_vm4, %v951_v32, %v952_v20  ;;  %v959_v20 = vsel %vm923_vm4, %v957_v37, %v958_v51  ;;  %v969_v51 = vrot.slane %v7405_v10, 5 }
  0x73   : > { %v7554_v14 = vcombine.low %v7548_v45, %v7550_v35  ;;  %v950_v9 = vsel %vm923_vm4, %v948_v4, %v949_v49  ;;  %v6641_v49 = vld [vmem:[#allocation2 + $0xcc] ss:$0 sps:$4 sm:$0x11]  }
  0x75   : > { %1000 = vrot.lane.b32.xlu0 %v945_v29, %s7042_s11  ;;  %10642 = vst [vmem:[#allocation17_spill] sm:$0xff] %v7554_v14  ;;  %v6639_v29 = vld [vmem:[#allocation2 + $0xac] ss:$0 sps:$4 sm:$0x11]   ;;  %v954_v14 = vrot.slane %v7337_v56, 5  ;;  %v960_v56 = vrot.slane %v7375_v42, 5 }
  0x76   : > { %1002 = vrot.lane.b32.xlu1 %v947_v2, %s7042_s11  ;;  %v955_v30 = vrot.slane %v6639_v29, 5  ;;  %v966_v42 = vrot.slane %v7399_v63, 5 }
  0x78   : > { %v956_v2 = vsel %vm923_vm4, %v954_v14, %v955_v30 }
  0x79   : > { %1004 = vrot.lane.b32.xlu0 %v948_v4, %s7042_s11  ;;  %v961_v4 = vrot.slane %v6641_v49, 5 }
  0x7a   : > { %1006 = vrot.lane.b32.xlu1 %v950_v9, %s7042_s11  ;;  %v6642_v9 = vld [vmem:[#allocation2 + $0xdc] ss:$0 sps:$4 sm:$0x11]  }
  0x7b   : > { %v962_v30 = vsel %vm923_vm4, %v960_v56, %v961_v4  ;;  %v964_v3 = vrot.slane %v6642_v9, 5  ;;  %v7588_v4 = vld [vmem:[#allocation2 + $0x18] sm:$0xf]  ;;  %v445_v9 = vld [vmem:[#allocation2 + $0x20] sm:$0x8] }
  0x7c   : > { %v6065_v10 = vcombine.low %v7588_v4, %v7588_v4 }
  0x7d   : > { %1008 = vrot.lane.b32.xlu0 %v951_v32, %s7042_s11  ;;  %v6644_v32 = vld [vmem:[#allocation2 + $0xfc] ss:$0 sps:$4 sm:$0x11]  }
  0x7e   : > { %1010 = vrot.lane.b32.xlu1 %v953_v59, %s7042_s11  ;;  %v6643_v59 = vld [vmem:[#allocation2 + $0xec] ss:$0 sps:$4 sm:$0x11]   ;;  %v970_v49 = vrot.slane %v6644_v32, 5  ;;  %v6069_v32 = vcombine.low %v7454_v17, %v7454_v17  ;;  %v6073_v17 = vcombine.low %v7472_v26, %v7472_v26  ;;  %v463_v26 = vld [vmem:[#allocation2 + $0x80] sm:$0x8] }
  0x7f   : > { %v967_v29 = vrot.slane %v6643_v59, 5  ;;  %v448_v59 = vld [vmem:[#allocation2 + $0x30] sm:$0x8] }
  0x81   : > { %1012 = vrot.lane.b32.xlu0 %v954_v14, %s7042_s11  ;;  %v965_v14 = vsel %vm923_vm4, %v963_v61, %v964_v3 }
  0x82   : > { %1014 = vrot.lane.b32.xlu1 %v956_v2, %s7042_s11  ;;  %v968_v2 = vsel %vm923_vm4, %v966_v42, %v967_v29  ;;  %v451_v29 = vld [vmem:[#allocation2 + $0x40] sm:$0x8] }
  0x85   : > { %1016 = vrot.lane.b32.xlu0 %v957_v37, %s7042_s11  ;;  %v442_v37 = vld [vmem:[#allocation2 + $0x10] sm:$0x8] }
  0x86   : > { %1018 = vrot.lane.b32.xlu1 %v959_v20, %s7042_s11  ;;  %v971_v20 = vsel %vm923_vm4, %v969_v51, %v970_v49  ;;  %v6064_v63 = vcombine.low %v442_v37, %v7584_v47  ;;  %v457_v49 = vld [vmem:[#allocation2 + $0x60] sm:$0x8] }
  0x89   : > { %1020 = vrot.lane.b32.xlu0 %v960_v56, %s7042_s11  ;;  %v7592_v56 = vld [vmem:[#allocation2 + $0x24] sm:$0xf] }
  0x8a   : > { %1022 = vrot.lane.b32.xlu1 %v962_v30, %s7042_s11  ;;  %v7597_v30 = vld [vmem:[#allocation2 + $0x28] sm:$0xf]  ;;  %v6066_v3 = vcombine.low %v445_v9, %v7592_v56 }
  0x8d   : > { %1024 = vrot.lane.b32.xlu0 %v963_v61, %s7042_s11  ;;  %v6067_v61 = vcombine.low %v7597_v30, %v7597_v30 }
  0x8e   : > { %1026 = vrot.lane.b32.xlu1 %v965_v14, %s7042_s11  ;;  %v6068_v14 = vcombine.low %v448_v59, %v7452_v15 }
  0x91   : > { %1028 = vrot.lane.b32.xlu0 %v966_v42, %s7042_s11  ;;  %v6070_v42 = vcombine.low %v451_v29, %v7461_v18  ;;  %v6074_v18 = vcombine.low %v457_v49, %v7480_v31  ;;  %v6077_v31 = vcombine.low %v7491_v53, %v7491_v53  ;;  %v466_v29 = vld [vmem:[#allocation2 + $0x90] sm:$0x8]  ;;  %v6017_v49 = vcombine.low %v7297_v22, %v7297_v22 }
  0x92   : > { %1030 = vrot.lane.b32.xlu1 %v968_v2, %s7042_s11  ;;  %v454_v2 = vld [vmem:[#allocation2 + $0x50] sm:$0x8] }
  0x93   : > { %v6072_v15 = vcombine.low %v454_v2, %v7470_v23  ;;  %v399_v2 = vld [vmem:[#allocation2 + $0x70] sm:$0x8] }
  0x95   : > { %1032 = vrot.lane.b32.xlu0 %v969_v51, %s7042_s11  ;;  %v6071_v51 = vcombine.low %v7463_v19, %v7463_v19  ;;  %v6075_v19 = vcombine.low %v7482_v34, %v7482_v34  ;;  %v6078_v34 = vcombine.low %v463_v26, %v7500_v60  ;;  %v402_v60 = vld [vmem:[#allocation2 + $0x80] sm:$0x8]  ;;  %v6019_v26 = vcombine.low %v7313_v33, %v7313_v33 }
  0x96   : > { %1034 = vrot.lane.b32.xlu1 %v971_v20, %s7042_s11  ;;  %v460_v20 = vld [vmem:[#allocation2 + $0x70] sm:$0x8] }
  0x97   : > { %v6076_v9 = vcombine.low %v460_v20, %v7489_v36  ;;  %v6081_v20 = vcombine.low %v7511_v13, %v7511_v13  ;;  %v6021_v13 = vcombine.low %v7323_v39, %v7323_v39 }
  0x99   : > { %1164 = vrot.lane.b32.xlu0 %v6064_v63, %s7043_s12 }
  0x9a   : > { %1166 = vrot.lane.b32.xlu1 %v6065_v10, %s7043_s12  ;;  %v393_v10 = vld [vmem:[#allocation2 + $0x50] sm:$0x8] }
  0x9b   : > { %v6010_v36 = vcombine.low %v393_v10, %v7263_v57 }
  0x9d   : > { %1168 = vrot.lane.b32.xlu0 %v6066_v3, %s7043_s12  ;;  %v396_v3 = vld [vmem:[#allocation2 + $0x60] sm:$0x8] }
  0x9e   : > { %1170 = vrot.lane.b32.xlu1 %v6067_v61, %s7043_s12  ;;  %v6012_v53 = vcombine.low %v396_v3, %v7279_v5 }
  0xa1   : > { %1172 = vrot.lane.b32.xlu0 %v6068_v14, %s7043_s12  ;;  %v6011_v14 = vcombine.low %v7271_v62, %v7271_v62  ;;  %v6015_v62 = vcombine.low %v7288_v16, %v7288_v16  ;;  %v6016_v16 = vcombine.low %v402_v60, %v7295_v21 }
  0xa2   : > { %1174 = vrot.lane.b32.xlu1 %v6069_v32, %s7043_s12  ;;  %v6013_v32 = vcombine.low %v7281_v6, %v7281_v6 }
  0xa4   : > { %v7619_v37 = vpop.permute.xlu0 %843 }
  0xa5   : > { %1176 = vrot.lane.b32.xlu0 %v6070_v42, %s7043_s12  ;;  %v6079_v42 = vcombine.low %v7502_v8, %v7502_v8  ;;  %v6014_v8 = vcombine.low %v399_v2, %v7283_v11 }
  0xa6   : > { %1178 = vrot.lane.b32.xlu1 %v6071_v51, %s7043_s12  ;;  %v6080_v51 = vcombine.low %v466_v29, %v7509_v12  ;;  %v411_v29 = vld [vmem:[#allocation2 + $0xb0] sm:$0x8] }
  0xa7   : > { %v6022_v60 = vcombine.low %v411_v29, %v7326_v44  ;;  %v417_v44 = vld [vmem:[#allocation2 + $0xd0] sm:$0x8] }
  0xa9   : > { %1180 = vrot.lane.b32.xlu0 %v6072_v15, %s7043_s12 }
  0xaa   : > { %1182 = vrot.lane.b32.xlu1 %v6073_v17, %s7043_s12  ;;  %v469_v17 = vld [vmem:[#allocation2 + $0xa0] sm:$0x8] }
  0xab   : > { %v6082_v22 = vcombine.low %v469_v17, %v7518_v24 }
  0xac   : > { %v7627_v23 = vpop.permute.xlu1 %847 }
  0xad   : > { %1184 = vrot.lane.b32.xlu0 %v6074_v18, %s7043_s12  ;;  %v7630_v63 = vpop.permute.xlu0 %845 }
  0xae   : > { %1186 = vrot.lane.b32.xlu1 %v6075_v19, %s7043_s12  ;;  %v405_v19 = vld [vmem:[#allocation2 + $0x90] sm:$0x8] }
  0xaf   : > { %v6018_v3 = vcombine.low %v405_v19, %v7304_v28 }
  0xb0   : > { %v7636_v59 = vpop.permute.xlu1 %849 }
  0xb1   : > { %1188 = vrot.lane.b32.xlu0 %v6076_v9, %s7043_s12  ;;  %v7639_v61 = vpop.permute.xlu0 %851  ;;  %v408_v9 = vld [vmem:[#allocation2 + $0xa0] sm:$0x8] }
  0xb2   : > { %1190 = vrot.lane.b32.xlu1 %v6077_v31, %s7043_s12  ;;  %v6020_v33 = vcombine.low %v408_v9, %v7321_v38  ;;  %v6023_v38 = vcombine.low %v7331_v52, %v7331_v52  ;;  %v6025_v52 = vcombine.low %v7371_v41, %v7371_v41  ;;  %v6027_v41 = vcombine.low %v7379_v46, %v7379_v46 }
  0xb4   : > { %v854_v57 = vpop.permute.xlu1 %853 }
  0xb5   : > { %1192 = vrot.lane.b32.xlu0 %v6078_v34, %s7043_s12  ;;  %v7655_v15 = vsel %vm2092_vm5, %v6010_v36, %v854_v57  ;;  %v7658_v5 = vsel %vm2092_vm5, %v6011_v14, %v854_v57  ;;  %v856_v6 = vpop.permute.xlu0 %855  ;;  %v472_v34 = vld [vmem:[#allocation2 + $0xb0] sm:$0x8]  ;;  %v6083_v14 = vcombine.low %v7520_v25, %v7520_v25  ;;  %v475_v25 = vld [vmem:[#allocation2 + $0xc0] sm:$0x8]  ;;  %v7709_v57 = vcombine.low %v7584_v47, %v7588_v4 }
  0xb6   : > { %v7664_v18 = vsel %vm2092_vm5, %v6012_v53, %v856_v6  ;;  %v7667_v12 = vsel %vm2092_vm5, %v6013_v32, %v856_v6  ;;  %1194 = vrot.lane.b32.xlu1 %v6079_v42, %s7043_s12  ;;  %v6084_v39 = vcombine.low %v472_v34, %v7528_v0  ;;  %v414_v53 = vld [vmem:[#allocation2 + $0xc0] sm:$0x8]  ;;  %v7725_v47 = vcombine.low %v7592_v56, %v7597_v30 }
  0xb7   : > { %10643 = vst [vmem:[#allocation18_spill] sm:$0xff] %v7664_v18  ;;  %10644 = vst [vmem:[#allocation19_spill] sm:$0xff] %v7667_v12  ;;  %v6024_v6 = vcombine.low %v414_v53, %v7369_v40  ;;  %v6026_v40 = vcombine.low %v417_v44, %v7377_v43  ;;  %v6087_v30 = vcombine.low %v7540_v27, %v7540_v27  ;;  %v1248_v19 = vshll.u32 %v7709_v57, 16  ;;  %v481_v34 = vld [vmem:[#allocation2 + $0xe0] sm:$0x8] }
  0xb8   : > { %v858_v11 = vpop.permute.xlu1 %857  ;;  %v6940_v12 = vld [vmem:[#allocation2 + $0x14] sm:$0xf] }
  0xb9   : > { %1196 = vrot.lane.b32.xlu0 %v6080_v51, %s7043_s12  ;;  %v7678_v31 = vsel %vm2092_vm5, %v6014_v8, %v858_v11  ;;  %v7681_v10 = vsel %vm2092_vm5, %v6015_v62, %v858_v11  ;;  %v860_v21 = vpop.permute.xlu0 %859  ;;  %v6085_v62 = vcombine.low %v7530_v54, %v7530_v54  ;;  %v6086_v8 = vcombine.low %v475_v25, %v7538_v7  ;;  %v423_v7 = vld [vmem:[#allocation2 + $0xf0] sm:$0x8] }
  0xba   : > { %10645 = vst [vmem:[#allocation20_spill] sm:$0xff] %v7678_v31  ;;  %10646 = vst [vmem:[#allocation21_spill] sm:$0xff] %v7681_v10  ;;  %v7687_v36 = vsel %vm2092_vm5, %v6016_v16, %v860_v21  ;;  %v7690_v24 = vsel %vm2092_vm5, %v6017_v49, %v860_v21  ;;  %1198 = vrot.lane.b32.xlu1 %v6081_v20, %s7043_s12  ;;  %v420_v49 = vld [vmem:[#allocation2 + $0xe0] sm:$0x8]  ;;  %v478_v16 = vld [vmem:[#allocation2 + $0xd0] sm:$0x8]  ;;  %v6029_v11 = vcombine.low %v7390_v55, %v7390_v55 }
  0xbb   : > { %10647 = vst [vmem:[#allocation22_spill] sm:$0xff] %v7687_v36  ;;  %10648 = vst [vmem:[#allocation23_spill] sm:$0xff] %v7690_v24  ;;  %v1245_v20 = vshrl.u32 %v7709_v57, 16  ;;  %v6028_v46 = vcombine.low %v420_v49, %v7385_v48  ;;  %v6088_v27 = vcombine.low %v478_v16, %v7548_v45  ;;  %v1256_v21 = vshll.u32 %v7725_v47, 16 }
  0xbc   : > { %v862_v28 = vpop.permute.xlu1 %861  ;;  %v6030_v48 = vcombine.low %v423_v7, %v7392_v58  ;;  %v6031_v55 = vcombine.low %v7401_v1, %v7401_v1  ;;  %v6089_v45 = vcombine.low %v7550_v35, %v7550_v35  ;;  %v6687_v35 = vld [vmem:[#allocation2 + $0x1c] ss:$0 sps:$4 sm:$0x11]   ;;  %v1455_v16 = vrot.slane %v7725_v47, 5 }
  0xbd   : > { %1200 = vrot.lane.b32.xlu0 %v6082_v22, %s7043_s12  ;;  %v7699_v32 = vsel %vm2092_vm5, %v6018_v3, %v862_v28  ;;  %v7702_v42 = vsel %vm2092_vm5, %v6019_v26, %v862_v28  ;;  %v864_v2 = vpop.permute.xlu0 %863  ;;  %v1253_v26 = vshrl.u32 %v7725_v47, 16  ;;  %v1247_v29 = vrot.slane %v1245_v20, 4  ;;  %v509_v20 = vld [vmem:[#allocation2 + $0x28] sm:$0xf] }
  0xbe   : > { %10649 = vst [vmem:[#allocation24_spill] sm:$0xff] %v7699_v32  ;;  %10650 = vst [vmem:[#allocation25_spill] sm:$0xff] %v7702_v42  ;;  %v7712_v0 = vsel %vm2092_vm5, %v6020_v33, %v864_v2  ;;  %v7715_v51 = vsel %vm2092_vm5, %v6021_v13, %v864_v2  ;;  %1202 = vrot.lane.b32.xlu1 %v6083_v14, %s7043_s12  ;;  %v482_v33 = vld [vmem:[#allocation2 + $0xe4] sm:$0xf]  ;;  %v1250_v28 = vrot.slane %v1248_v19, 5  ;;  %v1453_v49 = vrot.slane %v6687_v35, 5 }
  0xbf   : > { %10651 = vst [vmem:[#allocation26_spill] sm:$0xff] %v7712_v0  ;;  %10652 = vst [vmem:[#allocation27_spill] sm:$0xff] %v7715_v51  ;;  %v6090_v1 = vcombine.low %v481_v34, %v482_v33  ;;  %v1255_v2 = vrot.slane %v1253_v26, 4  ;;  %v511_v19 = vld [vmem:[#allocation2 + $0x34] sm:$0xf] }
  0xc0   : > { %v866_v4 = vpop.permute.xlu1 %865  ;;  %v1251_v44 = vor.u32 %v1250_v28, %v1247_v29  ;;  %v510_v33 = vld [vmem:[#allocation2 + $0x30] sm:$0x8] }
  0xc1   : > { %1204 = vrot.lane.b32.xlu0 %v6084_v39, %s7043_s12  ;;  %v7730_v17 = vsel %vm2092_vm5, %v6022_v60, %v866_v4  ;;  %v7733_v54 = vsel %vm2092_vm5, %v6023_v38, %v866_v4  ;;  %v1258_v60 = vrot.slane %v1256_v21, 5  ;;  %v6688_v4 = vld [vmem:[#allocation2 + $0x2c] ss:$0 sps:$4 sm:$0x11]  }
  0xc2   : > { %10653 = vst [vmem:[#allocation28_spill] sm:$0xff] %v7730_v17  ;;  %10654 = vst [vmem:[#allocation29_spill] sm:$0xff] %v7733_v54  ;;  %1206 = vrot.lane.b32.xlu1 %v6085_v62, %s7043_s12 }
  0xc3   : > { %v868_v56 = vpop.permute.xlu0 %867 }
  0xc4   : > { %v7744_v9 = vsel %vm2092_vm5, %v6024_v6, %v868_v56  ;;  %v7747_v43 = vsel %vm2092_vm5, %v6025_v52, %v868_v56  ;;  %v870_v22 = vpop.permute.xlu1 %869  ;;  %v1259_v52 = vor.u32 %v1258_v60, %v1255_v2  ;;  %v1456_v56 = vrot.slane %v6688_v4, 5 }
  0xc5   : > { %10655 = vst [vmem:[#allocation30_spill] sm:$0xff] %v7744_v9  ;;  %10656 = vst [vmem:[#allocation31_spill] sm:$0xff] %v7747_v43  ;;  %1208 = vrot.lane.b32.xlu0 %v6086_v8, %s7043_s12  ;;  %v7757_v3 = vsel %vm2092_vm5, %v6026_v40, %v870_v22  ;;  %v7760_v13 = vsel %vm2092_vm5, %v6027_v41, %v870_v22  ;;  %v1452_v8 = vrot.slane %v7709_v57, 5  ;;  %v507_v22 = vld [vmem:[#allocation2 + $0x20] sm:$0x8] }
  0xc6   : > { %10657 = vst [vmem:[#allocation32_spill] sm:$0xff] %v7757_v3  ;;  %10658 = vst [vmem:[#allocation33_spill] sm:$0xff] %v7760_v13  ;;  %1210 = vrot.lane.b32.xlu1 %v6087_v30, %s7043_s12  ;;  %v508_v30 = vld [vmem:[#allocation2 + $0x24] sm:$0xf]  ;;  %v1457_v26 = vsel %vm923_vm4, %v1455_v16, %v1456_v56  ;;  %v6130_v2 = vcombine.low %v510_v33, %v511_v19  ;;  %v6733_v56 = vld [vmem:[%s10588_s1 + $0x8] sm:$0xff]   ;;  %v1264_v33 = vshll.u32 %v7459_v50, 16 }
  0xc7   : > { %v872_v14 = vpop.permute.xlu0 %871  ;;  %v1454_v7 = vsel %vm923_vm4, %v1452_v8, %v1453_v49 }
  0xc8   : > { %v7769_v39 = vsel %vm2092_vm5, %v6028_v46, %v872_v14  ;;  %v7772_v53 = vsel %vm2092_vm5, %v6029_v11, %v872_v14  ;;  %v874_v58 = vpop.permute.xlu1 %873  ;;  %v512_v46 = vld [vmem:[#allocation2 + $0x38] sm:$0xf]  ;;  %v7799_v11 = vcombine.low %v508_v30, %v509_v20 }
  0xc9   : > { %10659 = vst [vmem:[#allocation34_spill] sm:$0xff] %v7769_v39  ;;  %10660 = vst [vmem:[#allocation35_spill] sm:$0xff] %v7772_v53  ;;  %1212 = vrot.lane.b32.xlu0 %v6088_v27, %s7043_s12  ;;  %v7776_v38 = vsel %vm2092_vm5, %v6030_v48, %v874_v58  ;;  %v7779_v25 = vsel %vm2092_vm5, %v6031_v55, %v874_v58  ;;  %v7804_v47 = vcombine.low %v511_v19, %v512_v46  ;;  %v6729_v58 = vld [vmem:[%s10588_s1 + $0x10] ss:$0 sps:$4 sm:$0x33]  }
  0xca   : > { %10661 = vst [vmem:[#allocation36_spill] sm:$0xff] %v7776_v38  ;;  %10662 = vst [vmem:[#allocation37_spill] sm:$0xff] %v7779_v25  ;;  %1214 = vrot.lane.b32.xlu1 %v6089_v45, %s7043_s12  ;;  %v6128_v48 = vcombine.low %v507_v22, %v508_v30  ;;  %v1773_v55 = vshrl.u32 %v7799_v11, 16  ;;  %v1776_v34 = vshll.u32 %v7799_v11, 16  ;;  %v6129_v45 = vcombine.low %v509_v20, %v509_v20  ;;  %v516_v38 = vld [vmem:[#allocation2 + $0x50] sm:$0x8] }
  0xcb   : > { %v7781_v62 = vpop.permute.xlu0 %972  ;;  %v1781_v29 = vshrl.u32 %v7804_v47, 16  ;;  %v1784_v28 = vshll.u32 %v7804_v47, 16  ;;  %6551 = vmatprep.subr.msk.bf16.mxu0 %vm2913_vm6, %v6729_v58  ;;  %v6131_v4 = vcombine.low %v512_v46, %v512_v46  ;;  %v1980_v46 = vrot.slane %v7799_v11, 5  ;;  %v10665_v11 = vld [vmem:[#allocation8_spill] sm:$0xff] }
  0xcc   : > { %v7785_v6 = vpop.permute.xlu1 %974  ;;  %v1775_v60 = vrot.slane %v1773_v55, 4  ;;  %v1778_v35 = vrot.slane %v1776_v34, 5  ;;  %v1261_v34 = vshrl.u32 %v7459_v50, 16 }
  0xcd   : > { %1216 = vrot.lane.b32.xlu0 %v6090_v1, %s7043_s12  ;;  %v1786_v49 = vrot.slane %v1784_v28, 5  ;;  %v1272_v28 = vshll.u32 %v10665_v11, 16 }
  0xce   : > { %1372 = vrot.lane.b32.xlu1 %v1251_v44, %s7044_s13  ;;  %v2915_v44 = vsel %vm2913_vm6, %v6729_v58, 0  ;;  %vm5458_vm6 = vcmask 457728  }
  0xcf   : > { %v7788_v40 = vpop.permute.xlu0 %976  ;;  %6514 = vmatpush3.bf16.msra.mxu0 %v2915_v44  ;;  %v1263_v44 = vrot.slane %v1261_v34, 4 }
  0xd0   : > { %v7792_v41 = vpop.permute.xlu1 %978  ;;  %6515 = vmatprep.subr.bf16.mxu0 %v6733_v56 }
  0xd1   : > { %1374 = vrot.lane.b32.xlu0 %v1259_v52, %s7044_s13 }
  0xd2   : > { %1500 = vrot.lane.b32.xlu1 %v1452_v8, %s7045_s14  ;;  %v1783_v8 = vrot.slane %v1781_v29, 4  ;;  %v1269_v29 = vshrl.u32 %v10665_v11, 16 }
  0xd3   : > { %v7796_v57 = vpop.permute.xlu0 %980  ;;  %6516 = vmatpush3.bf16.msra.mxu0 %v6733_v56 }
  0xd4   : > { %v7802_v27 = vpop.permute.xlu1 %982  ;;  %v1787_v19 = vor.u32 %v1786_v49, %v1783_v8  ;;  %v1271_v49 = vrot.slane %v1269_v29, 4 }
  0xd5   : > { %1502 = vrot.lane.b32.xlu0 %v1454_v7, %s7045_s14  ;;  %v1779_v7 = vor.u32 %v1778_v35, %v1775_v60 }
  0xd6   : > { %1504 = vrot.lane.b32.xlu1 %v1455_v16, %s7045_s14  ;;  %v6695_v16 = vld [vmem:[#allocation2 + $0x2c] ss:$0 sps:$4 sm:$0x11]  }
  0xd7   : > { %v7807_v21 = vpop.permute.xlu0 %984  ;;  %v1981_v22 = vrot.slane %v6695_v16, 5  ;;  %v1274_v16 = vrot.slane %v1272_v28, 5  ;;  %v1461_v28 = vrot.slane %v10665_v11, 5 }
  0xd8   : > { %v7813_v14 = vpop.permute.xlu1 %986 }
  0xd9   : > { %1506 = vrot.lane.b32.xlu0 %v1457_v26, %s7045_s14  ;;  %v6696_v26 = vld [vmem:[#allocation2 + $0x3c] ss:$0 sps:$4 sm:$0x11]   ;;  %v1982_v58 = vsel %vm923_vm4, %v1980_v46, %v1981_v22 }
  0xda   : > { %1692 = vrot.lane.b32.xlu1 %v6128_v48, %s7046_s17  ;;  %v6737_v48 = vld [vmem:[%s10588_s1] sm:$0xff]   ;;  %v1984_v60 = vrot.slane %v6696_v26, 5  ;;  %v6698_v26 = vld [vmem:[#allocation2 + $0x4c] ss:$0 sps:$4 sm:$0x11]  }
  0xdb   : > { %v7820_v1 = vpop.permute.xlu0 %988  ;;  %6517 = vmatprep.subr.bf16.mxu0 %v6737_v48 }
  0xdc   : > { %v7824_v52 = vpop.permute.xlu1 %990  ;;  %6518 = vmatpush3.bf16.msra.mxu0 %v6737_v48  ;;  %v1458_v48 = vrot.slane %v7459_v50, 5 }
  0xdd   : > { %1694 = vrot.lane.b32.xlu0 %v6129_v45, %s7046_s17 }
  0xde   : > { %1696 = vrot.lane.b32.xlu1 %v6130_v2, %s7046_s17  ;;  %v1983_v2 = vrot.slane %v7804_v47, 5 }
  0xdf   : > { %v7829_v30 = vpop.permute.xlu0 %992 }
  0xe0   : > { %v7833_v20 = vpop.permute.xlu1 %994  ;;  %v1985_v56 = vsel %vm923_vm4, %v1983_v2, %v1984_v60 }
  0xe1   : > { %1698 = vrot.lane.b32.xlu0 %v6131_v4, %s7046_s17  ;;  %v1266_v4 = vrot.slane %v1264_v33, 5 }
  0xe2   : > { %1900 = vrot.lane.b32.xlu1 %v1779_v7, %s7047_s6  ;;  %v6697_v7 = vld [vmem:[#allocation2 + $0x3c] ss:$0 sps:$4 sm:$0x11]  }
  0xe3   : > { %v7839_v55 = vpop.permute.xlu0 %996  ;;  %v1267_v47 = vor.u32 %v1266_v4, %v1263_v44  ;;  %v1459_v34 = vrot.slane %v6697_v7, 5  ;;  %v515_v44 = vld [vmem:[#allocation2 + $0x48] sm:$0xf]  ;;  %v517_v4 = vld [vmem:[#allocation2 + $0x54] sm:$0xf] }
  0xe4   : > { %10663 = vst [vmem:[#allocation38_spill] sm:$0xff] %v7839_v55  ;;  %v7845_v45 = vpop.permute.xlu1 %998  ;;  %v6133_v53 = vcombine.low %v515_v44, %v515_v44  ;;  %v8053_v55 = vld [vmem:[#allocation2 + $0xa4] sm:$0xf] }
  0xe5   : > { %1902 = vrot.lane.b32.xlu0 %v1787_v19, %s7047_s6  ;;  %10664 = vst [vmem:[#allocation39_spill] sm:$0xff] %v7845_v45  ;;  %v1460_v60 = vsel %vm923_vm4, %v1458_v48, %v1459_v34 }
  0xe6   : > { %2028 = vrot.lane.b32.xlu1 %v1980_v46, %s7048_s7  ;;  %v1275_v46 = vor.u32 %v1274_v16, %v1271_v49  ;;  %v518_v49 = vld [vmem:[#allocation2 + $0x58] sm:$0xf] }
  0xe7   : > { %v7851_v35 = vpop.permute.xlu0 %1000 }
  0xe8   : > { %10666 = vst [vmem:[#allocation8_spill] sm:$0xff] %v7851_v35  ;;  %v7855_v8 = vpop.permute.xlu1 %1002  ;;  %v8048_v35 = vld [vmem:[#allocation2 + $0xb4] sm:$0xf] }
  0xe9   : > { %2030 = vrot.lane.b32.xlu0 %v1982_v58, %s7048_s7  ;;  %10667 = vst [vmem:[#allocation40_spill] sm:$0xff] %v7855_v8  ;;  %v1462_v58 = vrot.slane %v6698_v26, 5  ;;  %v6727_v8 = vld [vmem:[#allocation2 + $0x9c] ss:$0 sps:$4 sm:$0x11]  }
  0xea   : > { %2032 = vrot.lane.b32.xlu1 %v1983_v2, %s7048_s7  ;;  %v514_v2 = vld [vmem:[#allocation2 + $0x44] sm:$0xf] }
  0xeb   : > { %v7858_v19 = vpop.permute.xlu0 %1004  ;;  %v6162_v50 = vcombine.low %v514_v2, %v515_v44  ;;  %v1463_v11 = vsel %vm923_vm4, %v1461_v28, %v1462_v58  ;;  %v6134_v58 = vcombine.low %v516_v38, %v517_v4 }
  0xec   : > { %10668 = vst [vmem:[#allocation41_spill] sm:$0xff] %v7858_v19  ;;  %v7862_v22 = vpop.permute.xlu1 %1006 }
  0xed   : > { %2034 = vrot.lane.b32.xlu0 %v1985_v56, %s7048_s7  ;;  %10669 = vst [vmem:[#allocation42_spill] sm:$0xff] %v7862_v22  ;;  %v513_v56 = vld [vmem:[#allocation2 + $0x40] sm:$0x8]  ;;  %v1789_v34 = vshrl.u32 %v6162_v50, 16  ;;  %v1792_v25 = vshll.u32 %v6162_v50, 16 }
  0xee   : > { %1376 = vrot.lane.b32.xlu1 %v1267_v47, %s7044_s13  ;;  %v6163_v47 = vcombine.low %v517_v4, %v518_v49  ;;  %v6132_v26 = vcombine.low %v513_v56, %v514_v2  ;;  %v6135_v2 = vcombine.low %v518_v49, %v518_v49  ;;  %v1986_v4 = vrot.slane %v6162_v50, 5  ;;  %v6717_v22 = vld [vmem:[#allocation2 + $0x7c] ss:$0 sps:$4 sm:$0x11]  }
  0xef   : > { %v7865_v33 = vpop.permute.xlu0 %1008  ;;  %v1791_v3 = vrot.slane %v1789_v34, 4  ;;  %v1794_v43 = vrot.slane %v1792_v25, 5 }
  0xf0   : > { %10670 = vst [vmem:[#allocation43_spill] sm:$0xff] %v7865_v33  ;;  %v7869_v29 = vpop.permute.xlu1 %1010  ;;  %v1797_v39 = vshrl.u32 %v6163_v47, 16  ;;  %v1989_v50 = vrot.slane %v6163_v47, 5 }
  0xf1   : > { %1378 = vrot.lane.b32.xlu0 %v1275_v46, %s7044_s13  ;;  %10671 = vst [vmem:[#allocation44_spill] sm:$0xff] %v7869_v29  ;;  %v1795_v44 = vor.u32 %v1794_v43, %v1791_v3  ;;  %v10683_v43 = vld [vmem:[#allocation10_spill] sm:$0xff] }
  0xf2   : > { %1508 = vrot.lane.b32.xlu1 %v1458_v48, %s7045_s14  ;;  %v1799_v56 = vrot.slane %v1797_v39, 4  ;;  %v10681_v39 = vld [vmem:[#allocation9_spill] sm:$0xff]  ;;  %v1285_v3 = vshrl.u32 %v10683_v43, 16 }
  0xf3   : > { %v7873_v16 = vpop.permute.xlu0 %1012  ;;  %v1277_v49 = vshrl.u32 %v10681_v39, 16  ;;  %v1280_v34 = vshll.u32 %v10681_v39, 16 }
  0xf4   : > { %10672 = vst [vmem:[#allocation45_spill] sm:$0xff] %v7873_v16  ;;  %v7877_v7 = vpop.permute.xlu1 %1014 }
  0xf5   : > { %1510 = vrot.lane.b32.xlu0 %v1460_v60, %s7045_s14  ;;  %10673 = vst [vmem:[#allocation46_spill] sm:$0xff] %v7877_v7  ;;  %v1800_v60 = vshll.u32 %v6163_v47, 16 }
  0xf6   : > { %1512 = vrot.lane.b32.xlu1 %v1461_v28, %s7045_s14 }
  0xf7   : > { %v7880_v46 = vpop.permute.xlu0 %1016  ;;  %v1802_v9 = vrot.slane %v1800_v60, 5 }
  0xf8   : > { %10674 = vst [vmem:[#allocation47_spill] sm:$0xff] %v7880_v46  ;;  %v7884_v48 = vpop.permute.xlu1 %1018 }
  0xf9   : > { %1514 = vrot.lane.b32.xlu0 %v1463_v11, %s7045_s14  ;;  %10675 = vst [vmem:[#allocation48_spill] sm:$0xff] %v7884_v48  ;;  %v6705_v11 = vld [vmem:[#allocation2 + $0x4c] ss:$0 sps:$4 sm:$0x11]   ;;  %v1803_v38 = vor.u32 %v1802_v9, %v1799_v56  ;;  %v522_v48 = vld [vmem:[#allocation2 + $0x70] sm:$0x8] }
  0xfa   : > { %1700 = vrot.lane.b32.xlu1 %v6132_v26, %s7046_s17  ;;  %v1987_v25 = vrot.slane %v6705_v11, 5  ;;  %v6706_v26 = vld [vmem:[#allocation2 + $0x5c] ss:$0 sps:$4 sm:$0x11]   ;;  %v1279_v11 = vrot.slane %v1277_v49, 4  ;;  %v1464_v49 = vrot.slane %v10681_v39, 5 }
  0xfb   : > { %v7886_v13 = vpop.permute.xlu0 %1020  ;;  %v519_v39 = vld [vmem:[#allocation2 + $0x60] sm:$0x8] }
  0xfc   : > { %10676 = vst [vmem:[#allocation49_spill] sm:$0xff] %v7886_v13  ;;  %v7890_v28 = vpop.permute.xlu1 %1022  ;;  %v1988_v9 = vsel %vm923_vm4, %v1986_v4, %v1987_v25 }
  0xfd   : > { %1702 = vrot.lane.b32.xlu0 %v6133_v53, %s7046_s17  ;;  %10677 = vst [vmem:[#allocation50_spill] sm:$0xff] %v7890_v28 }
  0xfe   : > { %1704 = vrot.lane.b32.xlu1 %v6134_v58, %s7046_s17  ;;  %v1288_v58 = vshll.u32 %v10683_v43, 16 }
  0xff   : > { %v7892_v54 = vpop.permute.xlu0 %1024 }
 0x100   : > { %10678 = vst [vmem:[#allocation51_spill] sm:$0xff] %v7892_v54  ;;  %v7896_v13 = vpop.permute.xlu1 %1026  ;;  %v6707_v54 = vld [vmem:[#allocation2 + $0x5c] ss:$0 sps:$4 sm:$0x11]  }
 0x101   : > { %1706 = vrot.lane.b32.xlu0 %v6135_v2, %s7046_s17  ;;  %10679 = vst [vmem:[#allocation52_spill] sm:$0xff] %v7896_v13  ;;  %v1990_v2 = vrot.slane %v6706_v26, 5  ;;  %v6708_v26 = vld [vmem:[#allocation2 + $0x6c] ss:$0 sps:$4 sm:$0x11]  }
 0x102   : > { %1904 = vrot.lane.b32.xlu1 %v1795_v44, %s7047_s6  ;;  %v1282_v44 = vrot.slane %v1280_v34, 5  ;;  %v1465_v34 = vrot.slane %v6707_v54, 5 }
 0x103   : > { %v7898_v53 = vpop.permute.xlu0 %1028  ;;  %v1991_v13 = vsel %vm923_vm4, %v1989_v50, %v1990_v2  ;;  %v520_v2 = vld [vmem:[#allocation2 + $0x64] sm:$0xf] }
 0x104   : > { %10680 = vst [vmem:[#allocation53_spill] sm:$0xff] %v7898_v53  ;;  %v7904_v60 = vpop.permute.xlu1 %1030  ;;  %v1283_v47 = vor.u32 %v1282_v44, %v1279_v11  ;;  %v521_v11 = vld [vmem:[#allocation2 + $0x68] sm:$0xf]  ;;  %v524_v44 = vld [vmem:[#allocation2 + $0x78] sm:$0xf] }
 0x105   : > { %1906 = vrot.lane.b32.xlu0 %v1803_v38, %s7047_s6  ;;  %10682 = vst [vmem:[#allocation9_spill] sm:$0xff] %v7904_v60  ;;  %v1287_v38 = vrot.slane %v1285_v3, 4  ;;  %v1290_v60 = vrot.slane %v1288_v58, 5  ;;  %v1467_v58 = vrot.slane %v10683_v43, 5  ;;  %v6164_v54 = vcombine.low %v520_v2, %v521_v11 }
 0x106   : > { %2036 = vrot.lane.b32.xlu1 %v1986_v4, %s7048_s7  ;;  %v6137_v17 = vcombine.low %v521_v11, %v521_v11 }
 0x107   : > { %v7909_v56 = vpop.permute.xlu0 %1032  ;;  %v1291_v4 = vor.u32 %v1290_v60, %v1287_v38  ;;  %v523_v60 = vld [vmem:[#allocation2 + $0x74] sm:$0xf] }
 0x108   : > { %10684 = vst [vmem:[#allocation10_spill] sm:$0xff] %v7909_v56  ;;  %v7913_v53 = vpop.permute.xlu1 %1034  ;;  %v1808_v56 = vshll.u32 %v6164_v54, 16 }
 0x109   : > { %2038 = vrot.lane.b32.xlu0 %v1988_v9, %s7048_s7  ;;  %10685 = vst [vmem:[#allocation54_spill] sm:$0xff] %v7913_v53  ;;  %v1805_v53 = vshrl.u32 %v6164_v54, 16 }
 0x10a   : > { %2040 = vrot.lane.b32.xlu1 %v1989_v50, %s7048_s7  ;;  %v1468_v50 = vrot.slane %v6708_v26, 5  ;;  %v1810_v0 = vrot.slane %v1808_v56, 5 }
 0x10b   : > { %v7916_v28 = vpop.permute.xlu0 %1164  ;;  %v1807_v7 = vrot.slane %v1805_v53, 4  ;;  %v1992_v53 = vrot.slane %v6164_v54, 5 }
 0x10c   : > { %v7920_v25 = vpop.permute.xlu1 %1166  ;;  %v1469_v43 = vsel %vm923_vm4, %v1467_v58, %v1468_v50  ;;  %v6138_v50 = vcombine.low %v522_v48, %v523_v60 }
 0x10d   : > { %2042 = vrot.lane.b32.xlu0 %v1991_v13, %s7048_s7  ;;  %v1466_v13 = vsel %vm923_vm4, %v1464_v49, %v1465_v34  ;;  %v6136_v34 = vcombine.low %v519_v39, %v520_v2  ;;  %v6139_v2 = vcombine.low %v524_v44, %v524_v44  ;;  %v1811_v11 = vor.u32 %v1810_v0, %v1807_v7  ;;  %v10689_v0 = vld [vmem:[#allocation12_spill] sm:$0xff] }
 0x10e   : > { %1380 = vrot.lane.b32.xlu1 %v1283_v47, %s7044_s13  ;;  %v1301_v7 = vshrl.u32 %v10689_v0, 16 }
 0x10f   : > { %v7923_v9 = vpop.permute.xlu0 %1168 }
 0x110   : > { %v7927_v3 = vpop.permute.xlu1 %1170  ;;  %v1303_v32 = vrot.slane %v1301_v7, 4 }
 0x111   : > { %1382 = vrot.lane.b32.xlu0 %v1291_v4, %s7044_s13  ;;  %v6165_v4 = vcombine.low %v523_v60, %v524_v44  ;;  %v6716_v60 = vld [vmem:[#allocation2 + $0x7c] ss:$0 sps:$4 sm:$0x11]  }
 0x112   : > { %1516 = vrot.lane.b32.xlu1 %v1464_v49, %s7045_s14 }
 0x113   : > { %v7931_v38 = vpop.permute.xlu0 %1172  ;;  %v1813_v46 = vshrl.u32 %v6165_v4, 16  ;;  %v1995_v54 = vrot.slane %v6165_v4, 5 }
 0x114   : > { %v7935_v47 = vpop.permute.xlu1 %1174 }
 0x115   : > { %1518 = vrot.lane.b32.xlu0 %v1466_v13, %s7045_s14  ;;  %v1816_v13 = vshll.u32 %v6165_v4, 16  ;;  %v1815_v39 = vrot.slane %v1813_v46, 4  ;;  %v10687_v46 = vld [vmem:[#allocation11_spill] sm:$0xff] }
 0x116   : > { %1520 = vrot.lane.b32.xlu1 %v1467_v58, %s7045_s14  ;;  %v1293_v44 = vshrl.u32 %v10687_v46, 16  ;;  %v1470_v7 = vrot.slane %v10687_v46, 5 }
 0x117   : > { %v7938_v26 = vpop.permute.xlu0 %1176  ;;  %v1818_v16 = vrot.slane %v1816_v13, 5 }
 0x118   : > { %v7942_v49 = vpop.permute.xlu1 %1178 }
 0x119   : > { %1522 = vrot.lane.b32.xlu0 %v1469_v43, %s7045_s14  ;;  %v6715_v43 = vld [vmem:[#allocation2 + $0x6c] ss:$0 sps:$4 sm:$0x11]   ;;  %v1819_v48 = vor.u32 %v1818_v16, %v1815_v39 }
 0x11a   : > { %1708 = vrot.lane.b32.xlu1 %v6136_v34, %s7046_s17  ;;  %v1993_v56 = vrot.slane %v6715_v43, 5  ;;  %v1296_v34 = vshll.u32 %v10687_v46, 16  ;;  %v1295_v43 = vrot.slane %v1293_v44, 4  ;;  %v530_v46 = vld [vmem:[#allocation2 + $0x98] sm:$0xf] }
 0x11b   : > { %v7944_v51 = vpop.permute.xlu0 %1180 }
 0x11c   : > { %v7948_v58 = vpop.permute.xlu1 %1182  ;;  %v1994_v16 = vsel %vm923_vm4, %v1992_v53, %v1993_v56 }
 0x11d   : > { %1710 = vrot.lane.b32.xlu0 %v6137_v17, %s7046_s17 }
 0x11e   : > { %1712 = vrot.lane.b32.xlu1 %v6138_v50, %s7046_s17  ;;  %v1304_v50 = vshll.u32 %v10689_v0, 16 }
 0x11f   : > { %v7950_v42 = vpop.permute.xlu0 %1184 }
 0x120   : > { %v7954_v29 = vpop.permute.xlu1 %1186  ;;  %v1306_v33 = vrot.slane %v1304_v50, 5  ;;  %v1471_v50 = vrot.slane %v6717_v22, 5 }
 0x121   : > { %1714 = vrot.lane.b32.xlu0 %v6139_v2, %s7046_s17  ;;  %v1996_v2 = vrot.slane %v6716_v60, 5  ;;  %v343_v60 = vld [vmem:[%s7202_s9 + $0x78] sm:$0xf] }
 0x122   : > { %1908 = vrot.lane.b32.xlu1 %v1811_v11, %s7047_s6  ;;  %v1298_v11 = vrot.slane %v1296_v34, 5  ;;  %376 = vst.msk [vmem:[#allocation2 + $0x104] sm:$0xf] %vm224_vm0, %v343_v60  ;;  %v1307_v44 = vor.u32 %v1306_v33, %v1303_v32  ;;  %v6718_v34 = vld [vmem:[#allocation2 + $0x8c] ss:$0 sps:$4 sm:$0x11]   ;;  %v1472_v32 = vsel %vm923_vm4, %v1470_v7, %v1471_v50 }
 0x123   : > { %v7956_v17 = vpop.permute.xlu0 %1188  ;;  %v1997_v24 = vsel %vm923_vm4, %v1995_v54, %v1996_v2  ;;  %v527_v33 = vld [vmem:[#allocation2 + $0x88] sm:$0xf]  ;;  %v529_v60 = vld [vmem:[#allocation2 + $0x94] sm:$0xf] }
 0x124   : > { %10686 = vst [vmem:[#allocation55_spill] sm:$0xff] %v7956_v17  ;;  %v7962_v13 = vpop.permute.xlu1 %1190  ;;  %v1299_v4 = vor.u32 %v1298_v11, %v1295_v43  ;;  %v1474_v43 = vrot.slane %v6718_v34, 5  ;;  %v526_v11 = vld [vmem:[#allocation2 + $0x84] sm:$0xf] }
 0x125   : > { %1910 = vrot.lane.b32.xlu0 %v1819_v48, %s7047_s6  ;;  %10688 = vst [vmem:[#allocation11_spill] sm:$0xff] %v7962_v13 }
 0x126   : > { %2044 = vrot.lane.b32.xlu1 %v1992_v53, %s7048_s7 }
 0x127   : > { %v7967_v39 = vpop.permute.xlu0 %1192 }
 0x128   : > { %10690 = vst [vmem:[#allocation12_spill] sm:$0xff] %v7967_v39  ;;  %v7971_v48 = vpop.permute.xlu1 %1194  ;;  %v6725_v39 = vld [vmem:[#allocation2 + $0x8c] ss:$0 sps:$4 sm:$0x11]  }
 0x129   : > { %2046 = vrot.lane.b32.xlu0 %v1994_v16, %s7048_s7  ;;  %10691 = vst [vmem:[#allocation56_spill] sm:$0xff] %v7971_v48  ;;  %v344_v16 = vld [vmem:[%s7202_s9 + $0x7c] sm:$0xf]  ;;  %s5932_s9 = scalar_lea.hbm %s10592_s5, %s6475_s26 }
 0x12a   : > { %2048 = vrot.lane.b32.xlu1 %v1995_v54, %s7048_s7  ;;  %377 = vst.msk [vmem:[#allocation2 + $0x108] sm:$0xf] %vm224_vm0, %v344_v16  ;;  %v6166_v16 = vcombine.low %v526_v11, %v527_v33  ;;  %vm3110_vm0 = vcmask 60416  }
 0x12b   : > { %v7974_v56 = vpop.permute.xlu0 %1196 }
 0x12c   : > { %10692 = vst [vmem:[#allocation57_spill] sm:$0xff] %v7974_v56  ;;  %v7980_v53 = vpop.permute.xlu1 %1198  ;;  %v307_v56 = vld [vmem:[#allocation2 + $0x10c] sm:$0x1] }
 0x12d   : > { %2050 = vrot.lane.b32.xlu0 %v1997_v24, %s7048_s7  ;;  %10693 = vst [vmem:[#allocation58_spill] sm:$0xff] %v7980_v53  ;;  %v1473_v24 = vrot.slane %v10689_v0, 5  ;;  %v1824_v53 = vshll.u32 %v6166_v16, 16 }
 0x12e   : > { %1384 = vrot.lane.b32.xlu1 %v1299_v4, %s7044_s13 }
 0x12f   : > { %v7985_v2 = vpop.permute.xlu0 %1200  ;;  %v1475_v0 = vsel %vm923_vm4, %v1473_v24, %v1474_v43  ;;  %v308_v43 = vsel %vm7187_vm3, 0, %v307_v56 }
 0x130   : > { %10694 = vst [vmem:[#allocation59_spill] sm:$0xff] %v7985_v2  ;;  %v7989_v54 = vpop.permute.xlu1 %1202  ;;  %v525_v2 = vld [vmem:[#allocation2 + $0x80] sm:$0x8]  ;;  %309 = vst [vmem:[#allocation2 + $0x10c] sm:$0x1] %v308_v43 }
 0x131   : > { %1386 = vrot.lane.b32.xlu0 %v1307_v44, %s7044_s13  ;;  %10695 = vst [vmem:[#allocation60_spill] sm:$0xff] %v7989_v54  ;;  %v7999_v44 = vcombine.low %v529_v60, %v530_v46  ;;  %v6140_v50 = vcombine.low %v525_v2, %v526_v11  ;;  %v1821_v54 = vshrl.u32 %v6166_v16, 16  ;;  %v1826_v11 = vrot.slane %v1824_v53, 5 }
 0x132   : > { %1524 = vrot.lane.b32.xlu1 %v1470_v7, %s7045_s14  ;;  %v1999_v53 = vrot.slane %v6725_v39, 5 }
 0x133   : > { %v7993_v22 = vpop.permute.xlu0 %1204  ;;  %v1832_v36 = vshll.u32 %v7999_v44, 16 }
 0x134   : > { %10696 = vst [vmem:[#allocation61_spill] sm:$0xff] %v7993_v22  ;;  %v7997_v4 = vpop.permute.xlu1 %1206  ;;  %v528_v22 = vld [vmem:[#allocation2 + $0x90] sm:$0x8] }
 0x135   : > { %1526 = vrot.lane.b32.xlu0 %v1472_v32, %s7045_s14  ;;  %10697 = vst [vmem:[#allocation62_spill] sm:$0xff] %v7997_v4  ;;  %v6141_v32 = vcombine.low %v527_v33, %v527_v33  ;;  %v1829_v4 = vshrl.u32 %v7999_v44, 16  ;;  %v6142_v2 = vcombine.low %v528_v22, %v529_v60  ;;  %v6143_v33 = vcombine.low %v530_v46, %v530_v46  ;;  %v6726_v22 = vld [vmem:[#allocation2 + $0x9c] ss:$0 sps:$4 sm:$0x11]   ;;  %v10704_v46 = vld [vmem:[#allocation13_spill] sm:$0xff] }
 0x136   : > { %1528 = vrot.lane.b32.xlu1 %v1473_v24, %s7045_s14  ;;  %v1823_v24 = vrot.slane %v1821_v54, 4  ;;  %v1834_v48 = vrot.slane %v1832_v36, 5  ;;  %v1998_v54 = vrot.slane %v6166_v16, 5  ;;  %v1309_v36 = vshrl.u32 %v10704_v46, 16 }
 0x137   : > { %v8002_v34 = vpop.permute.xlu0 %1208 }
 0x138   : > { %10698 = vst [vmem:[#allocation63_spill] sm:$0xff] %v8002_v34  ;;  %v8006_v7 = vpop.permute.xlu1 %1210  ;;  %v1827_v56 = vor.u32 %v1826_v11, %v1823_v24  ;;  %v10705_v24 = vld [vmem:[#allocation14_spill] sm:$0xff]  ;;  %v2000_v16 = vsel %vm923_vm4, %v1998_v54, %v1999_v53 }
 0x139   : > { %1530 = vrot.lane.b32.xlu0 %v1475_v0, %s7045_s14  ;;  %10699 = vst [vmem:[#allocation64_spill] sm:$0xff] %v8006_v7  ;;  %v1831_v7 = vrot.slane %v1829_v4, 4  ;;  %v1312_v4 = vshll.u32 %v10704_v46, 16  ;;  %v1317_v11 = vshrl.u32 %v10705_v24, 16 }
 0x13a   : > { %1716 = vrot.lane.b32.xlu1 %v6140_v50, %s7046_s17 }
 0x13b   : > { %v8012_v34 = vpop.permute.xlu0 %1212  ;;  %v1835_v60 = vor.u32 %v1834_v48, %v1831_v7  ;;  %v1320_v48 = vshll.u32 %v10705_v24, 16  ;;  %v2001_v7 = vrot.slane %v7999_v44, 5  ;;  %v1319_v17 = vrot.slane %v1317_v11, 4  ;;  %v6939_v11 = vld [vmem:[#allocation2 + $0x18] sm:$0xf] }
 0x13c   : > { %10701 = vst [vmem:[#allocation7_spill] sm:$0xff] %v8012_v34  ;;  %v8016_v0 = vpop.permute.xlu1 %1214 }
 0x13d   : > { %1718 = vrot.lane.b32.xlu0 %v6141_v32, %s7046_s17  ;;  %10702 = vst [vmem:[#allocation65_spill] sm:$0xff] %v8016_v0  ;;  %v238_v32 = vld [vmem:[#allocation2 + $0x11c] sm:$0x1]  ;;  %v378_v0 = vld [vmem:[#allocation2] sm:$0x8]  ;;  %v1322_v10 = vrot.slane %v1320_v48, 5  ;;  %v6003_v48 = vcombine.low %v6939_v11, %v6939_v11 }
 0x13e   : > { %1720 = vrot.lane.b32.xlu1 %v6142_v2, %s7046_s17  ;;  %v239_v39 = vsel %vm7187_vm3, 0, %v238_v32  ;;  %v381_v32 = vld [vmem:[#allocation2 + $0x10] sm:$0x8] }
 0x13f   : > { %v8018_v13 = vpop.permute.xlu0 %1216  ;;  %240 = vst [vmem:[#allocation2 + $0x11c] sm:$0x1] %v239_v39  ;;  %v6728_v39 = vld [vmem:[#allocation2 + $0xac] ss:$0 sps:$4 sm:$0x11]   ;;  %v6002_v45 = vcombine.low %v381_v32, %v6940_v12  ;;  %v1323_v18 = vor.u32 %v1322_v10, %v1319_v17 }
 0x140   : > { %10703 = vst [vmem:[#allocation66_spill] sm:$0xff] %v8018_v13  ;;  %v8022_v43 = vpop.permute.xlu1 %1372  ;;  %v1314_v13 = vrot.slane %v1312_v4, 5  ;;  %v6938_v4 = vld [vmem:[#allocation2 + $0x4] sm:$0xf]  ;;  %v1480_v19 = vrot.slane %v6728_v39, 5 }
 0x141   : > { %1722 = vrot.lane.b32.xlu0 %v6143_v33, %s7046_s17  ;;  %v2002_v33 = vrot.slane %v6726_v22, 5  ;;  %v6000_v31 = vcombine.low %v378_v0, %v6938_v4  ;;  %v1477_v0 = vrot.slane %v6727_v8, 5  ;;  %v2100_v32 = vsel %vm2092_vm5, %v6002_v45, %v7630_v63 }
 0x142   : > { %1912 = vrot.lane.b32.xlu1 %v1827_v56, %s7047_s6 }
 0x143   : > { %v8024_v50 = vpop.permute.xlu0 %1374  ;;  %v2003_v53 = vsel %vm923_vm4, %v2001_v7, %v2002_v33  ;;  %v2095_v8 = vsel %vm2092_vm5, %v6000_v31, %v7619_v37 }
 0x144   : > { %v8030_v2 = vpop.permute.xlu1 %1500  ;;  %v2175_v31 = vsel %vm2173_vm7, %v2095_v8, %v7781_v62 }
 0x145   : > { %1914 = vrot.lane.b32.xlu0 %v1835_v60, %s7047_s6  ;;  %v1311_v60 = vrot.slane %v1309_v36, 4 }
 0x146   : > { %2052 = vrot.lane.b32.xlu1 %v1998_v54, %s7048_s7  ;;  %v6937_v54 = vld [vmem:[#allocation2 + $0x8] sm:$0xf] }
 0x147   : > { %v8038_v56 = vpop.permute.xlu0 %1502  ;;  %v1315_v22 = vor.u32 %v1314_v13, %v1311_v60  ;;  %v6001_v36 = vcombine.low %v6937_v54, %v6937_v54  ;;  %v8055_v13 = vld [vmem:[#allocation2 + $0xa8] sm:$0xf]  ;;  %v1476_v60 = vrot.slane %v10704_v46, 5  ;;  %v1479_v46 = vrot.slane %v10705_v24, 5  ;;  %v8082_v24 = vld [vmem:[#allocation2 + $0xb0] sm:$0x8] }
 0x148   : > { %v8042_v34 = vpop.permute.xlu1 %1504  ;;  %v8060_v54 = vcombine.low %v8053_v55, %v8055_v13 }
 0x149   : > { %2054 = vrot.lane.b32.xlu0 %v2000_v16, %s7048_s7  ;;  %v8050_v16 = vld [vmem:[#allocation2 + $0xb8] sm:$0xf]  ;;  %v2097_v17 = vsel %vm2092_vm5, %v6001_v36, %v7619_v37  ;;  %v1478_v37 = vsel %vm923_vm4, %v1476_v60, %v1477_v0  ;;  %v531_v36 = vld [vmem:[#allocation2 + $0xa0] sm:$0x8] }
 0x14a   : > { %2056 = vrot.lane.b32.xlu1 %v2001_v7, %s7048_s7  ;;  %v310_v7 = vld [vmem:[#allocation2 + $0x11c] sm:$0x1]  ;;  %v8067_v10 = vcombine.low %v8048_v35, %v8050_v16  ;;  %v1837_v39 = vshrl.u32 %v8060_v54, 16  ;;  %v2177_v45 = vsel %vm2173_vm7, %v2097_v17, %v7785_v6  ;;  %v2240_v6 = vsel %vm2238_vm8, %v2175_v31, %v7916_v28 }
 0x14b   : > { %v8045_v44 = vpop.permute.xlu0 %1506  ;;  %v311_v4 = vsel %vm7187_vm3, 0, %v310_v7  ;;  %v1481_v7 = vsel %vm923_vm4, %v1479_v46, %v1480_v19  ;;  %v6144_v0 = vcombine.low %v531_v36, %v8053_v55  ;;  %v6147_v8 = vcombine.low %v8050_v16, %v8050_v16  ;;  %vm8520_vm3 = vmand %vm3114_vm1, %vm229_vm2 }
 0x14c   : > { %v1693_v33 = vpop.permute.xlu1 %1692  ;;  %312 = vst [vmem:[#allocation2 + $0x11c] sm:$0x1] %v311_v4  ;;  %v1845_v62 = vshrl.u32 %v8067_v10, 16  ;;  %v6146_v4 = vcombine.low %v8082_v24, %v8048_v35  ;;  %v8107_v17 = vrot.slane %v1837_v39, 4  ;;  %v1848_v28 = vshll.u32 %v8067_v10, 16 }
 0x14d   : > { %2058 = vrot.lane.b32.xlu0 %v2003_v53, %s7048_s7  ;;  %v2102_v53 = vsel %vm2092_vm5, %v6003_v48, %v7630_v63  ;;  %v2179_v63 = vsel %vm2173_vm7, %v2100_v32, %v7788_v40  ;;  %v2242_v19 = vsel %vm2238_vm8, %v2177_v45, %v7920_v25  ;;  %vm5328_vm2 = vcmask 326656  }
 0x14e   : > { %1388 = vrot.lane.b32.xlu1 %v1315_v22, %s7044_s13  ;;  %v2181_v48 = vsel %vm2173_vm7, %v2102_v53, %v7792_v41  ;;  %v2305_v41 = vsel %vm2303_vm9, %v2240_v6, %v8022_v43  ;;  %v8115_v32 = vrot.slane %v1845_v62, 4  ;;  %v2244_v53 = vsel %vm2238_vm8, %v2179_v63, %v7923_v9 }
 0x14f   : > { %v1695_v12 = vpop.permute.xlu0 %1694  ;;  %v2354_v55 = vsel %vm2352_vm10, %v2305_v41, %v8030_v2  ;;  %v2246_v16 = vsel %vm2238_vm8, %v2181_v48, %v7927_v3  ;;  %v2306_v31 = vsel %vm2303_vm9, %v2242_v19, %v8022_v43  ;;  %v2308_v2 = vsel %vm2303_vm9, %v2244_v53, %v8024_v50 }
 0x150   : > { %v1697_v22 = vpop.permute.xlu1 %1696  ;;  %v2419_v25 = vsel %vm2417_vm11, %v2354_v55, %v1693_v33  ;;  %v2358_v3 = vsel %vm2352_vm10, %v2308_v2, %v8042_v34 }
 0x151   : > { %1390 = vrot.lane.b32.xlu0 %v1323_v18, %s7044_s13  ;;  %v1840_v18 = vshll.u32 %v8060_v54, 16 }
 0x152   : > { %1532 = vrot.lane.b32.xlu1 %v1476_v60, %s7045_s14  ;;  %v6145_v60 = vcombine.low %v8055_v13, %v8055_v13 }
 0x153   : > { %v1699_v11 = vpop.permute.xlu0 %1698  ;;  %v1842_v35 = vrot.slane %v1840_v18, 5 }
 0x154   : > { %v1901_v40 = vpop.permute.xlu1 %1900 }
 0x155   : > { %1534 = vrot.lane.b32.xlu0 %v1478_v37, %s7045_s14  ;;  %v2356_v37 = vsel %vm2352_vm10, %v2306_v31, %v8038_v56  ;;  %v2484_v36 = vsel %vm2482_vm12, %v2419_v25, %v1901_v40 }
 0x156   : > { %1536 = vrot.lane.b32.xlu1 %v1479_v46, %s7045_s14  ;;  %v2309_v46 = vsel %vm2303_vm9, %v2246_v16, %v8024_v50  ;;  %v2421_v33 = vsel %vm2417_vm11, %v2356_v37, %v1695_v12  ;;  %v2423_v50 = vsel %vm2417_vm11, %v2358_v3, %v1697_v22  ;;  %v6739_v3 = vld [vmem:[#allocation2 + $0xbc] ss:$0 sps:$4 sm:$0x11]  }
 0x157   : > { %v1903_v13 = vpop.permute.xlu0 %1902  ;;  %v2360_v43 = vsel %vm2352_vm10, %v2309_v46, %v8045_v44  ;;  %v2485_v39 = vsel %vm2482_vm12, %v2421_v33, %v1901_v40  ;;  %v1850_v44 = vrot.slane %v1848_v28, 5 }
 0x158   : > { %v2029_v9 = vpop.permute.xlu1 %2028  ;;  %v2425_v18 = vsel %vm2417_vm11, %v2360_v43, %v1699_v11  ;;  %v2487_v34 = vsel %vm2482_vm12, %v2423_v50, %v1903_v13  ;;  %v6738_v11 = vld [vmem:[#allocation2 + $0xac] ss:$0 sps:$4 sm:$0x11]  }
 0x159   : > { %1538 = vrot.lane.b32.xlu0 %v1481_v7, %s7045_s14  ;;  %v2533_v24 = vsel %vm2531_vm13, %v2484_v36, %v2029_v9  ;;  %v2488_v40 = vsel %vm2482_vm12, %v2425_v18, %v1903_v13  ;;  %v2004_v36 = vrot.slane %v8060_v54, 5  ;;  %v2005_v9 = vrot.slane %v6738_v11, 5  ;;  %v6740_v11 = vld [vmem:[#allocation2 + $0xbc] ss:$0 sps:$4 sm:$0x11]  }
 0x15a   : > { %v2597_v56 = vshrl.u32 %v2533_v24, 16  ;;  %v2600_v45 = vshll.u32 %v2533_v24, 16  ;;  %1724 = vrot.lane.b32.xlu1 %v6144_v0, %s7046_s17  ;;  %v1843_v0 = vor.u32 %v1842_v35, %v8107_v17 }
 0x15b   : > { %v2031_v63 = vpop.permute.xlu0 %2030 }
 0x15c   : > { %v2535_v62 = vsel %vm2531_vm13, %v2485_v39, %v2031_v63  ;;  %v2599_v48 = vrot.slane %v2597_v56, 3  ;;  %v2602_v12 = vrot.slane %v2600_v45, 4  ;;  %v2033_v22 = vpop.permute.xlu1 %2032  ;;  %v10707_v45 = vld [vmem:[#allocation16_spill] sm:$0xff] }
 0x15d   : > { %v2604_v7 = vshrl.u32 %v2535_v62, 16  ;;  %v2607_v6 = vshll.u32 %v2535_v62, 16  ;;  %1726 = vrot.lane.b32.xlu0 %v6145_v60, %s7046_s17  ;;  %v2537_v41 = vsel %vm2531_vm13, %v2487_v34, %v2033_v22  ;;  %v1851_v60 = vor.u32 %v1850_v44, %v8115_v32 }
 0x15e   : > { %v2612_v53 = vshrl.u32 %v2537_v41, 16  ;;  %v2615_v16 = vshll.u32 %v2537_v41, 16  ;;  %1728 = vrot.lane.b32.xlu1 %v6146_v4, %s7046_s17  ;;  %v2603_v25 = vor.u32 %v2602_v12, %v2599_v48  ;;  %v10706_v4 = vld [vmem:[#allocation15_spill] sm:$0xff]  ;;  %v1333_v63 = vshrl.u32 %v10707_v45, 16 }
 0x15f   : > { %v2606_v19 = vrot.slane %v2604_v7, 3  ;;  %v2609_v55 = vrot.slane %v2607_v6, 4  ;;  %v2035_v28 = vpop.permute.xlu0 %2034  ;;  %v1325_v43 = vshrl.u32 %v10706_v4, 16  ;;  %v1328_v32 = vshll.u32 %v10706_v4, 16 }
 0x160   : > { %v2539_v31 = vsel %vm2531_vm13, %v2488_v40, %v2035_v28  ;;  %v2614_v13 = vrot.slane %v2612_v53, 3  ;;  %v2617_v2 = vrot.slane %v2615_v16, 4  ;;  %v8152_v17 = vpop.permute.xlu1 %1376  ;;  %v1336_v18 = vshll.u32 %v10707_v45, 16  ;;  %v6741_v16 = vld [vmem:[#allocation2 + $0xcc] ss:$0 sps:$4 sm:$0x11]  }
 0x161   : > { %v2619_v46 = vshrl.u32 %v2539_v31, 16  ;;  %v2622_v37 = vshll.u32 %v2539_v31, 16  ;;  %1730 = vrot.lane.b32.xlu0 %v6147_v8, %s7046_s17  ;;  %v2610_v35 = vor.u32 %v2609_v55, %v2606_v19  ;;  %v2006_v34 = vsel %vm923_vm4, %v2004_v36, %v2005_v9  ;;  %v387_v19 = vld [vmem:[#allocation2 + $0x30] sm:$0x8]  ;;  %v8181_v28 = vld [vmem:[#allocation2 + $0xd4] sm:$0xf] }
 0x162   : > { %v2618_v33 = vor.u32 %v2617_v2, %v2614_v13  ;;  %1916 = vrot.lane.b32.xlu1 %v1843_v0, %s7047_s6  ;;  %v2007_v62 = vrot.slane %v8067_v10, 5  ;;  %v2008_v44 = vrot.slane %v6739_v3, 5  ;;  %v1327_v7 = vrot.slane %v1325_v43, 4  ;;  %v384_v0 = vld [vmem:[#allocation2 + $0x20] sm:$0x8] }
 0x163   : > { %v2621_v24 = vrot.slane %v2619_v46, 3  ;;  %v2624_v50 = vrot.slane %v2622_v37, 4  ;;  %v8156_v39 = vpop.permute.xlu0 %1378  ;;  %v2611_v8 = vsel %vm2596_vm14, %v2603_v25, %v2610_v35  ;;  %v1330_v6 = vrot.slane %v1328_v32, 5  ;;  %v8183_v31 = vld [vmem:[#allocation2 + $0xd8] sm:$0xf] }
 0x164   : > { %6519 = vmatprep.mubr.msk.bf16.mxu0 %vm2864_vm15, %v2611_v8  ;;  %v8163_v54 = vpop.permute.xlu1 %1508  ;;  %v1335_v40 = vrot.slane %v1333_v63, 4  ;;  %v1338_v41 = vrot.slane %v1336_v18, 5  ;;  %v2009_v10 = vsel %vm923_vm4, %v2007_v62, %v2008_v44  ;;  %v6941_v25 = vld [vmem:[#allocation2 + $0x28] sm:$0xf]  ;;  %v6942_v13 = vld [vmem:[#allocation2 + $0x24] sm:$0xf] }
 0x165   : > { %v2625_v56 = vor.u32 %v2624_v50, %v2621_v24  ;;  %1918 = vrot.lane.b32.xlu0 %v1851_v60, %s7047_s6  ;;  %v1331_v53 = vor.u32 %v1330_v6, %v1327_v7  ;;  %v6005_v60 = vcombine.low %v6941_v25, %v6941_v25  ;;  %v6004_v2 = vcombine.low %v384_v0, %v6942_v13  ;;  %v8186_v35 = vld [vmem:[#allocation2 + $0xc4] sm:$0xf]  ;;  %v6943_v9 = vld [vmem:[#allocation2 + $0x34] sm:$0xf]  ;;  %v6944_v50 = vld [vmem:[#allocation2 + $0x38] sm:$0xf] }
 0x166   : > { %2060 = vrot.lane.b32.xlu1 %v2004_v36, %s7048_s7  ;;  %v1339_v37 = vor.u32 %v1338_v41, %v1335_v40  ;;  %v8188_v36 = vld [vmem:[#allocation2 + $0xc8] sm:$0xf]  ;;  %v6006_v3 = vcombine.low %v387_v19, %v6943_v9  ;;  %v1482_v43 = vrot.slane %v10706_v4, 5  ;;  %v6007_v32 = vcombine.low %v6944_v50, %v6944_v50  ;;  %v537_v7 = vld [vmem:[#allocation2 + $0xc0] sm:$0x8] }
 0x167   : > { %v8169_v48 = vpop.permute.xlu0 %1510  ;;  %v2626_v12 = vsel %vm2596_vm14, %v2618_v33, %v2625_v56  ;;  %v1483_v33 = vrot.slane %v6740_v11, 5  ;;  %v8193_v24 = vcombine.low %v8186_v35, %v8188_v36  ;;  %v8198_v56 = vcombine.low %v8181_v28, %v8183_v31  ;;  %v8209_v6 = vld [vmem:[#allocation2 + $0xd0] sm:$0x8] }
 0x168   : > { %6520 = vmatmul.mubr.msk.bf16.vlgmr.msra.gmra.mxu0 %vm2864_vm15, %v2626_v12  ;;  %v8175_v22 = vpop.permute.xlu1 %1512  ;;  %v1485_v63 = vrot.slane %v10707_v45, 5  ;;  %v1486_v18 = vrot.slane %v6741_v16, 5  ;;  %v2105_v4 = vsel %vm2092_vm5, %v6004_v2, %v7627_v23  ;;  %v2110_v44 = vsel %vm2092_vm5, %v6006_v3, %v7636_v59 }
 0x169   : > { %2062 = vrot.lane.b32.xlu0 %v2006_v34, %s7048_s7  ;;  %v1484_v12 = vsel %vm923_vm4, %v1482_v43, %v1483_v33  ;;  %v1853_v45 = vshrl.u32 %v8193_v24, 16  ;;  %v2112_v40 = vsel %vm2092_vm5, %v6007_v32, %v7636_v59  ;;  %v2183_v41 = vsel %vm2173_vm7, %v2105_v4, %v7796_v57 }
 0x16a   : > { %2064 = vrot.lane.b32.xlu1 %v2007_v62, %s7048_s7  ;;  %v2107_v62 = vsel %vm2092_vm5, %v6005_v60, %v7627_v23  ;;  %v1856_v23 = vshll.u32 %v8193_v24, 16  ;;  %v2187_v19 = vsel %vm2173_vm7, %v2110_v44, %v7807_v21  ;;  %v1487_v59 = vsel %vm923_vm4, %v1485_v63, %v1486_v18 }
 0x16b   : > { %v8178_v55 = vpop.permute.xlu0 %1514  ;;  %v2185_v11 = vsel %vm2173_vm7, %v2107_v62, %v7802_v27  ;;  %v2248_v57 = vsel %vm2238_vm8, %v2183_v41, %v7931_v38  ;;  %v6148_v25 = vcombine.low %v537_v7, %v8186_v35  ;;  %v6149_v60 = vcombine.low %v8188_v36, %v8188_v36 }
 0x16c   : > { %v1701_v46 = vpop.permute.xlu1 %1700  ;;  %v6150_v27 = vcombine.low %v8209_v6, %v8181_v28  ;;  %v2311_v21 = vsel %vm2303_vm9, %v2248_v57, %v8152_v17  ;;  %v8238_v13 = vrot.slane %v1853_v45, 4  ;;  %v1864_v38 = vshll.u32 %v8198_v56, 16 }
 0x16d   : > { %2066 = vrot.lane.b32.xlu0 %v2009_v10, %s7048_s7  ;;  %v1861_v10 = vshrl.u32 %v8198_v56, 16  ;;  %v2250_v2 = vsel %vm2238_vm8, %v2185_v11, %v7935_v47  ;;  %v8246_v28 = vrot.slane %v1856_v23, 5 }
 0x16e   : > { %1392 = vrot.lane.b32.xlu1 %v1331_v53, %s7044_s13  ;;  %v2189_v53 = vsel %vm2173_vm7, %v2112_v40, %v7813_v14  ;;  %v6151_v14 = vcombine.low %v8183_v31, %v8183_v31  ;;  %v2252_v31 = vsel %vm2238_vm8, %v2187_v19, %v7938_v26  ;;  %v2312_v3 = vsel %vm2303_vm9, %v2250_v2, %v8152_v17 }
 0x16f   : > { %v1703_v8 = vpop.permute.xlu0 %1702  ;;  %v8248_v36 = vrot.slane %v1861_v10, 4  ;;  %v2254_v9 = vsel %vm2238_vm8, %v2189_v53, %v7942_v49  ;;  %v2364_v33 = vsel %vm2352_vm10, %v2312_v3, %v8169_v48  ;;  %v1859_v41 = vor.u32 %v8246_v28, %v8238_v13 }
 0x170   : > { %v1705_v34 = vpop.permute.xlu1 %1704 }
 0x171   : > { %1394 = vrot.lane.b32.xlu0 %v1339_v37, %s7044_s13  ;;  %v2362_v37 = vsel %vm2352_vm10, %v2311_v21, %v8163_v54  ;;  %v2314_v54 = vsel %vm2303_vm9, %v2252_v31, %v8156_v39  ;;  %v6749_v31 = vld [vmem:[#allocation2 + $0xdc] ss:$0 sps:$4 sm:$0x11]  }
 0x172   : > { %1540 = vrot.lane.b32.xlu1 %v1482_v43, %s7045_s14  ;;  %v2427_v47 = vsel %vm2417_vm11, %v2362_v37, %v1701_v46  ;;  %v2315_v43 = vsel %vm2303_vm9, %v2254_v9, %v8156_v39  ;;  %v2366_v49 = vsel %vm2352_vm10, %v2314_v54, %v8175_v22  ;;  %v2429_v46 = vsel %vm2417_vm11, %v2364_v33, %v1703_v8  ;;  %v10708_v33 = vld [vmem:[#allocation17_spill] sm:$0xff] }
 0x173   : > { %v1707_v0 = vpop.permute.xlu0 %1706  ;;  %v2368_v17 = vsel %vm2352_vm10, %v2315_v43, %v8178_v55  ;;  %v2431_v39 = vsel %vm2417_vm11, %v2366_v49, %v1705_v34  ;;  %v1866_v55 = vrot.slane %v1864_v38, 5 }
 0x174   : > { %v1905_v16 = vpop.permute.xlu1 %1904  ;;  %v2433_v62 = vsel %vm2417_vm11, %v2368_v17, %v1707_v0  ;;  %v6748_v0 = vld [vmem:[#allocation2 + $0xcc] ss:$0 sps:$4 sm:$0x11]   ;;  %v2013_v17 = vrot.slane %v8198_v56, 5 }
 0x175   : > { %1542 = vrot.lane.b32.xlu0 %v1484_v12, %s7045_s14  ;;  %v2490_v50 = vsel %vm2482_vm12, %v2427_v47, %v1905_v16  ;;  %v2011_v28 = vrot.slane %v6748_v0, 5 }
 0x176   : > { %1544 = vrot.lane.b32.xlu1 %v1485_v63, %s7045_s14  ;;  %v2491_v63 = vsel %vm2482_vm12, %v2429_v46, %v1905_v16  ;;  %v2014_v46 = vrot.slane %v6749_v31, 5 }
 0x177   : > { %v1907_v35 = vpop.permute.xlu0 %1906 }
 0x178   : > { %v2037_v26 = vpop.permute.xlu1 %2036  ;;  %v2493_v22 = vsel %vm2482_vm12, %v2431_v39, %v1907_v35  ;;  %v2494_v45 = vsel %vm2482_vm12, %v2433_v62, %v1907_v35  ;;  %v2010_v35 = vrot.slane %v8193_v24, 5  ;;  %v2015_v56 = vsel %vm923_vm4, %v2013_v17, %v2014_v46 }
 0x179   : > { %1546 = vrot.lane.b32.xlu0 %v1487_v59, %s7045_s14  ;;  %v2541_v32 = vsel %vm2531_vm13, %v2490_v50, %v2037_v26  ;;  %v483_v59 = vld [vmem:[#allocation2 + $0xe8] sm:$0xf]  ;;  %v1341_v50 = vshrl.u32 %v10708_v33, 16  ;;  %v1344_v26 = vshll.u32 %v10708_v33, 16 }
 0x17a   : > { %v2627_v48 = vshrl.u32 %v2541_v32, 16  ;;  %v2630_v18 = vshll.u32 %v2541_v32, 16  ;;  %1732 = vrot.lane.b32.xlu1 %v6148_v25, %s7046_s17  ;;  %v1867_v25 = vor.u32 %v1866_v55, %v8248_v36  ;;  %v2012_v49 = vsel %vm923_vm4, %v2010_v35, %v2011_v28 }
 0x17b   : > { %v2039_v4 = vpop.permute.xlu0 %2038  ;;  %v1346_v62 = vrot.slane %v1344_v26, 5  ;;  %v6091_v55 = vcombine.low %v483_v59, %v483_v59 }
 0x17c   : > { %v2543_v44 = vsel %vm2531_vm13, %v2491_v63, %v2039_v4  ;;  %v2629_v12 = vrot.slane %v2627_v48, 3  ;;  %v2632_v8 = vrot.slane %v2630_v18, 4  ;;  %v2041_v34 = vpop.permute.xlu1 %2040  ;;  %v1343_v4 = vrot.slane %v1341_v50, 4 }
 0x17d   : > { %v2634_v7 = vshrl.u32 %v2543_v44, 16  ;;  %v2637_v6 = vshll.u32 %v2543_v44, 16  ;;  %1734 = vrot.lane.b32.xlu0 %v6149_v60, %s7046_s17  ;;  %v2545_v40 = vsel %vm2531_vm13, %v2493_v22, %v2041_v34  ;;  %v390_v22 = vld [vmem:[#allocation2 + $0x40] sm:$0x8] }
 0x17e   : > { %v2633_v23 = vor.u32 %v2632_v8, %v2629_v12  ;;  %v2642_v19 = vshrl.u32 %v2545_v40, 16  ;;  %1736 = vrot.lane.b32.xlu1 %v6150_v27, %s7046_s17  ;;  %v2645_v57 = vshll.u32 %v2545_v40, 16  ;;  %v6945_v27 = vld [vmem:[#allocation2 + $0xe4] sm:$0xf] }
 0x17f   : > { %v2636_v10 = vrot.slane %v2634_v7, 3  ;;  %v2639_v11 = vrot.slane %v2637_v6, 4  ;;  %v2043_v53 = vpop.permute.xlu0 %2042  ;;  %v8289_v9 = vcombine.low %v6945_v27, %v483_v59  ;;  %v6751_v7 = vld [vmem:[#allocation2 + $0xdc] ss:$0 sps:$4 sm:$0x11]  }
 0x180   : > { %v2547_v16 = vsel %vm2531_vm13, %v2494_v45, %v2043_v53  ;;  %v2644_v21 = vrot.slane %v2642_v19, 3  ;;  %v8286_v13 = vpop.permute.xlu1 %1380  ;;  %v2647_v37 = vrot.slane %v2645_v57, 4  ;;  %v8317_v6 = vld [vmem:[#allocation2 + $0xe8] sm:$0xf]  ;;  %v1347_v45 = vor.u32 %v1346_v62, %v1343_v4 }
 0x181   : > { %v2640_v60 = vor.u32 %v2639_v11, %v2636_v10  ;;  %v2649_v38 = vshrl.u32 %v2547_v16, 16  ;;  %v2652_v2 = vshll.u32 %v2547_v16, 16  ;;  %1738 = vrot.lane.b32.xlu0 %v6151_v14, %s7046_s17  ;;  %v1349_v63 = vshrl.u32 %v8289_v9, 16  ;;  %v6752_v40 = vld [vmem:[#allocation2 + $0xec] ss:$0 sps:$4 sm:$0x11]  }
 0x182   : > { %1920 = vrot.lane.b32.xlu1 %v1859_v41, %s7047_s6  ;;  %v2648_v43 = vor.u32 %v2647_v37, %v2644_v21  ;;  %v1352_v48 = vshll.u32 %v8289_v9, 16  ;;  %v6946_v41 = vld [vmem:[#allocation2 + $0x44] sm:$0xf]  ;;  %v1489_v57 = vrot.slane %v6751_v7, 5  ;;  %v8329_v21 = vld [vmem:[#allocation2 + $0xf8] sm:$0xf]  ;;  %v6153_v26 = vcombine.low %v8317_v6, %v8317_v6 }
 0x183   : > { %v2651_v3 = vrot.slane %v2649_v38, 3  ;;  %v2654_v47 = vrot.slane %v2652_v2, 4  ;;  %v8291_v54 = vpop.permute.xlu0 %1382  ;;  %v2641_v36 = vsel %vm2596_vm14, %v2633_v23, %v2640_v60  ;;  %v1351_v12 = vrot.slane %v1349_v63, 4  ;;  %v6947_v23 = vld [vmem:[#allocation2 + $0x48] sm:$0xf] }
 0x184   : > { %6523 = vmatprep.mubr.msk.bf16.mxu0 %vm2864_vm15, %v2641_v36  ;;  %v8297_v24 = vpop.permute.xlu1 %1516  ;;  %v1354_v8 = vrot.slane %v1352_v48, 5  ;;  %v6008_v0 = vcombine.low %v390_v22, %v6946_v41  ;;  %v6009_v10 = vcombine.low %v6947_v23, %v6947_v23  ;;  %v8320_v11 = vld [vmem:[#allocation2 + $0xe4] sm:$0xf]  ;;  %v1492_v60 = vrot.slane %v6752_v40, 5 }
 0x185   : > { %v2655_v14 = vor.u32 %v2654_v47, %v2651_v3  ;;  %1922 = vrot.lane.b32.xlu0 %v1867_v25, %s7047_s6  ;;  %v8325_v59 = vcombine.low %v8320_v11, %v8317_v6  ;;  %v1488_v25 = vrot.slane %v10708_v33, 5  ;;  %v1491_v37 = vrot.slane %v8289_v9, 5  ;;  %v8341_v3 = vld [vmem:[#allocation2 + $0xf0] sm:$0x8]  ;;  %v8343_v47 = vld [vmem:[#allocation2 + $0xf4] sm:$0xf] }
 0x186   : > { %2068 = vrot.lane.b32.xlu1 %v2010_v35, %s7048_s7  ;;  %v1355_v53 = vor.u32 %v1354_v8, %v1351_v12  ;;  %v2115_v38 = vsel %vm2092_vm5, %v6008_v0, %v7639_v61  ;;  %v2117_v2 = vsel %vm2092_vm5, %v6009_v10, %v7639_v61  ;;  %v543_v35 = vld [vmem:[#allocation2 + $0xe0] sm:$0x8]  ;;  %v2195_v9 = vsel %vm2173_vm7, %v7655_v15, %v7829_v30 }
 0x187   : > { %v8303_v32 = vpop.permute.xlu0 %1518  ;;  %v2656_v39 = vsel %vm2596_vm14, %v2648_v43, %v2655_v14  ;;  %v2191_v28 = vsel %vm2173_vm7, %v2115_v38, %v7820_v1  ;;  %v2193_v31 = vsel %vm2173_vm7, %v2117_v2, %v7824_v52  ;;  %v1869_v36 = vshrl.u32 %v8325_v59, 16 }
 0x188   : > { %6524 = vmatmul.mubr.msk.bf16.gmra.mxu0 %vm2864_vm15, %v2656_v39  ;;  %v8311_v18 = vpop.permute.xlu1 %1520  ;;  %v1872_v61 = vshll.u32 %v8325_v59, 16  ;;  %v2197_v1 = vsel %vm2173_vm7, %v7658_v5, %v7833_v20  ;;  %v1490_v52 = vsel %vm923_vm4, %v1488_v25, %v1489_v57  ;;  %v8356_v43 = vcombine.low %v8343_v47, %v8329_v21 }
 0x189   : > { %2070 = vrot.lane.b32.xlu0 %v2012_v49, %s7048_s7  ;;  %v2256_v14 = vsel %vm2238_vm8, %v2191_v28, %v7944_v51  ;;  %v2258_v33 = vsel %vm2238_vm8, %v2193_v31, %v7948_v58  ;;  %v1493_v15 = vsel %vm923_vm4, %v1491_v37, %v1492_v60  ;;  %v6152_v30 = vcombine.low %v543_v35, %v8320_v11  ;;  %v6759_v31 = vld [vmem:[#allocation2 + $0xec] ss:$0 sps:$4 sm:$0x11]  }
 0x18a   : > { %2072 = vrot.lane.b32.xlu1 %v2013_v17, %s7048_s7  ;;  %v2260_v5 = vsel %vm2238_vm8, %v2195_v9, %v7950_v42  ;;  %v2317_v20 = vsel %vm2303_vm9, %v2256_v14, %v8286_v13  ;;  %v6154_v51 = vcombine.low %v8341_v3, %v8343_v47  ;;  %v2262_v58 = vsel %vm2238_vm8, %v2197_v1, %v7954_v29 }
 0x18b   : > { %v8314_v44 = vpop.permute.xlu0 %1522  ;;  %v2370_v49 = vsel %vm2352_vm10, %v2317_v20, %v8297_v24  ;;  %v8378_v46 = vrot.slane %v1869_v36, 4  ;;  %v8380_v42 = vrot.slane %v1872_v61, 5  ;;  %v2318_v39 = vsel %vm2303_vm9, %v2258_v33, %v8286_v13 }
 0x18c   : > { %v1709_v34 = vpop.permute.xlu1 %1708  ;;  %v1877_v48 = vshrl.u32 %v8356_v43, 16  ;;  %v1880_v4 = vshll.u32 %v8356_v43, 16  ;;  %v2320_v29 = vsel %vm2303_vm9, %v2260_v5, %v8291_v54  ;;  %v2321_v24 = vsel %vm2303_vm9, %v2262_v58, %v8291_v54  ;;  %v6760_v5 = vld [vmem:[#allocation2 + $0xfc] ss:$0 sps:$4 sm:$0x11]  }
 0x18d   : > { %2074 = vrot.lane.b32.xlu0 %v2015_v56, %s7048_s7  ;;  %v2435_v63 = vsel %vm2417_vm11, %v2370_v49, %v1709_v34  ;;  %v2372_v62 = vsel %vm2352_vm10, %v2318_v39, %v8303_v32  ;;  %v2374_v22 = vsel %vm2352_vm10, %v2320_v29, %v8311_v18  ;;  %v1875_v28 = vor.u32 %v8380_v42, %v8378_v46  ;;  %v8428_v58 = vld [vmem:[#allocation2 + $0xf8] sm:$0xf]  ;;  %v485_v39 = vld [vmem:[#allocation2 + $0xf4] sm:$0xf]  ;;  %v484_v29 = vld [vmem:[#allocation2 + $0xf0] sm:$0x8] }
 0x18e   : > { %1218 = vrot.lane.b32.xlu1 %v6091_v55, %s7043_s12  ;;  %v2376_v55 = vsel %vm2352_vm10, %v2321_v24, %v8314_v44  ;;  %v6155_v44 = vcombine.low %v8329_v21, %v8329_v21  ;;  %v1879_v57 = vrot.slane %v1877_v48, 4  ;;  %v2020_v42 = vrot.slane %v6760_v5, 5  ;;  %v8445_v24 = vld [vmem:[#allocation2 + $0x104] sm:$0xf]  ;;  %v8541_v5 = vld [vmem:[#allocation2 + $0x100] sm:$0x8] }
 0x18f   : > { %v1711_v19 = vpop.permute.xlu0 %1710  ;;  %vm5393_vm5 = vcmask 392192  }
 0x190   : > { %v1713_v16 = vpop.permute.xlu1 %1712  ;;  %v2437_v12 = vsel %vm2417_vm11, %v2372_v62, %v1711_v19 }
 0x191   : > { %1396 = vrot.lane.b32.xlu0 %v1347_v45, %s7044_s13  ;;  %v2439_v54 = vsel %vm2417_vm11, %v2374_v22, %v1713_v16  ;;  %v1882_v16 = vrot.slane %v1880_v4, 5  ;;  %v8443_v4 = vcombine.low %v485_v39, %v8428_v58  ;;  %v10709_v22 = vmov 0  }
 0x192   : > { %1398 = vrot.lane.b32.xlu1 %v1355_v53, %s7044_s13  ;;  %3111 = vst.msk [vmem:[#allocation3] sm:$0xf] %vm3110_vm0, %v10709_v22  ;;  %3112 = vst.msk [vmem:[#allocation3 + $0x4] sm:$0xf] %vm3110_vm0, %v10709_v22 }
 0x193   : > { %v1715_v27 = vpop.permute.xlu0 %1714  ;;  %3113 = vst.msk [vmem:[#allocation3 + $0x8] sm:$0xf] %vm3110_vm0, %v10709_v22  ;;  %3120 = vst.msk [vmem:[#allocation3 + $0x110] sm:$0xf] %vm3110_vm0, %v10709_v22 }
 0x194   : > { %v1909_v50 = vpop.permute.xlu1 %1908  ;;  %v2441_v45 = vsel %vm2417_vm11, %v2376_v55, %v1715_v27  ;;  %3121 = vst.msk [vmem:[#allocation3 + $0x114] sm:$0xf] %vm3110_vm0, %v10709_v22  ;;  %3122 = vst.msk [vmem:[#allocation3 + $0x118] sm:$0xf] %vm3110_vm0, %v10709_v22  ;;  %v6092_v55 = vcombine.low %v484_v29, %v485_v39 }
 0x195   : > { %1548 = vrot.lane.b32.xlu0 %v1488_v25, %s7045_s14  ;;  %v2496_v56 = vsel %vm2482_vm12, %v2435_v63, %v1909_v50  ;;  %v2497_v7 = vsel %vm2482_vm12, %v2437_v12, %v1909_v50  ;;  %v1883_v50 = vor.u32 %v1882_v16, %v1879_v57  ;;  %v8436_v63 = vld [vmem:[#allocation2 + $0x108] sm:$0xf]  ;;  %3127 = vst.msk [vmem:[#allocation3 + $0x10] sm:$0xf] %vm3110_vm0, %v10709_v22  ;;  %3128 = vst.msk [vmem:[#allocation3 + $0x20] sm:$0xf] %vm3110_vm0, %v10709_v22 }
 0x196   : > { %1550 = vrot.lane.b32.xlu1 %v1490_v52, %s7045_s14  ;;  %3129 = vst.msk [vmem:[#allocation3 + $0x30] sm:$0xf] %vm3110_vm0, %v10709_v22  ;;  %3130 = vst.msk [vmem:[#allocation3 + $0x40] sm:$0xf] %vm3110_vm0, %v10709_v22  ;;  %v1357_v12 = vshrl.u32 %v8443_v4, 16 }
 0x197   : > { %v1911_v17 = vpop.permute.xlu0 %1910  ;;  %3131 = vst.msk [vmem:[#allocation3 + $0x50] sm:$0xf] %vm3110_vm0, %v10709_v22  ;;  %3132 = vst.msk [vmem:[#allocation3 + $0x60] sm:$0xf] %vm3110_vm0, %v10709_v22 }
 0x198   : > { %v2045_v13 = vpop.permute.xlu1 %2044  ;;  %v2499_v18 = vsel %vm2482_vm12, %v2439_v54, %v1911_v17  ;;  %v2500_v19 = vsel %vm2482_vm12, %v2441_v45, %v1911_v17  ;;  %3133 = vst.msk [vmem:[#allocation3 + $0x70] sm:$0xf] %vm3110_vm0, %v10709_v22  ;;  %3134 = vst.msk [vmem:[#allocation3 + $0x80] sm:$0xf] %vm3110_vm0, %v10709_v22  ;;  %v487_v54 = vld [vmem:[#allocation2 + $0x100] sm:$0x8] }
 0x199   : > { %1552 = vrot.lane.b32.xlu0 %v1491_v37, %s7045_s14  ;;  %v2549_v8 = vsel %vm2531_vm13, %v2496_v56, %v2045_v13  ;;  %v8452_v56 = vcombine.low %v8445_v24, %v8436_v63  ;;  %3135 = vst.msk [vmem:[#allocation3 + $0x90] sm:$0xf] %vm3110_vm0, %v10709_v22  ;;  %3136 = vst.msk [vmem:[#allocation3 + $0xa0] sm:$0xf] %vm3110_vm0, %v10709_v22 }
 0x19a   : > { %v2657_v32 = vshrl.u32 %v2549_v8, 16  ;;  %v2660_v6 = vshll.u32 %v2549_v8, 16  ;;  %1554 = vrot.lane.b32.xlu1 %v1493_v15, %s7045_s14  ;;  %3137 = vst.msk [vmem:[#allocation3 + $0xb0] sm:$0xf] %vm3110_vm0, %v10709_v22  ;;  %3138 = vst.msk [vmem:[#allocation3 + $0xc0] sm:$0xf] %vm3110_vm0, %v10709_v22 }
 0x19b   : > { %v2047_v34 = vpop.permute.xlu0 %2046  ;;  %3139 = vst.msk [vmem:[#allocation3 + $0xd0] sm:$0xf] %vm3110_vm0, %v10709_v22  ;;  %3140 = vst.msk [vmem:[#allocation3 + $0xe0] sm:$0xf] %vm3110_vm0, %v10709_v22  ;;  %v1360_v8 = vshll.u32 %v8443_v4, 16 }
 0x19c   : > { %v2551_v40 = vsel %vm2531_vm13, %v2497_v7, %v2047_v34  ;;  %v2659_v41 = vrot.slane %v2657_v32, 3  ;;  %v2662_v0 = vrot.slane %v2660_v6, 4  ;;  %v2049_v11 = vpop.permute.xlu1 %2048  ;;  %3141 = vst.msk [vmem:[#allocation3 + $0xf0] sm:$0xf] %vm3110_vm0, %v10709_v22  ;;  %3142 = vst.msk [vmem:[#allocation3 + $0x100] sm:$0xf] %vm3110_vm0, %v10709_v22  ;;  %v6093_v32 = vcombine.low %v8428_v58, %v8428_v58 }
 0x19d   : > { %v2664_v23 = vshrl.u32 %v2551_v40, 16  ;;  %v2667_v10 = vshll.u32 %v2551_v40, 16  ;;  %1740 = vrot.lane.b32.xlu0 %v6152_v30, %s7046_s17  ;;  %v2553_v53 = vsel %vm2531_vm13, %v2499_v18, %v2049_v11  ;;  %v2017_v30 = vrot.slane %v6759_v31, 5  ;;  %3126 = vst.msk [vmem:[#allocation3] sm:$0xf] %vm3110_vm0, %v10709_v22  ;;  %v10722_v58 = vld [vmem:[#allocation12_spill] sm:$0xff] }
 0x19e   : > { %v2663_v25 = vor.u32 %v2662_v0, %v2659_v41  ;;  %v2672_v2 = vshrl.u32 %v2553_v53, 16  ;;  %1742 = vrot.lane.b32.xlu1 %v6153_v26, %s7046_s17  ;;  %v2675_v21 = vshll.u32 %v2553_v53, 16  ;;  %3143 = vst.msk [vmem:[#allocation3 + $0x110] sm:$0xf] %vm3110_vm0, %v10709_v22  ;;  %v1365_v6 = vshrl.u32 %v8452_v56, 16  ;;  %v10710_v0 = vld [vmem:[#allocation38_spill] sm:$0xff] }
 0x19f   : > { %v2666_v60 = vrot.slane %v2664_v23, 3  ;;  %v2669_v38 = vrot.slane %v2667_v10, 4  ;;  %v2051_v37 = vpop.permute.xlu0 %2050  ;;  %v1368_v34 = vshll.u32 %v8452_v56, 16  ;;  %v6766_v45 = vld [vmem:[#allocation2 + $0xfc] ss:$0 sps:$4 sm:$0x11]   ;;  %v6094_v40 = vcombine.low %v487_v54, %v8445_v24 }
 0x1a0   : > { %v2555_v35 = vsel %vm2531_vm13, %v2500_v19, %v2051_v37  ;;  %v2674_v3 = vrot.slane %v2672_v2, 3  ;;  %v8417_v61 = vpop.permute.xlu1 %1384  ;;  %v2677_v9 = vrot.slane %v2675_v21, 4  ;;  %v1362_v41 = vrot.slane %v1360_v8, 5  ;;  %v10711_v23 = vld [vmem:[#allocation18_spill] sm:$0xff]  ;;  %v10715_v2 = vld [vmem:[#allocation19_spill] sm:$0xff]  ;;  %v10716_v21 = vld [vmem:[#allocation8_spill] sm:$0xff] }
 0x1a1   : > { %v2670_v27 = vor.u32 %v2669_v38, %v2666_v60  ;;  %v2679_v47 = vshrl.u32 %v2555_v35, 16  ;;  %v2682_v36 = vshll.u32 %v2555_v35, 16  ;;  %1744 = vrot.lane.b32.xlu0 %v6154_v51, %s7046_s17  ;;  %v2016_v51 = vrot.slane %v8325_v59, 5  ;;  %v3150_v60 = vld [vmem:[#allocation3 + $0x2c] sm:$0x1]  ;;  %v10714_v38 = vld [vmem:[#allocation39_spill] sm:$0xff] }
 0x1a2   : > { %1746 = vrot.lane.b32.xlu1 %v6155_v44, %s7046_s17  ;;  %v2678_v15 = vor.u32 %v2677_v9, %v2674_v3  ;;  %v2019_v59 = vrot.slane %v8356_v43, 5  ;;  %v1359_v44 = vrot.slane %v1357_v12, 4  ;;  %v2199_v10 = vsel %vm2173_vm7, %v10711_v23, %v10710_v0  ;;  %v10717_v35 = vld [vmem:[#allocation20_spill] sm:$0xff] }
 0x1a3   : > { %v2681_v1 = vrot.slane %v2679_v47, 3  ;;  %v2684_v52 = vrot.slane %v2682_v36, 4  ;;  %v8419_v14 = vpop.permute.xlu0 %1386  ;;  %v2671_v33 = vsel %vm2596_vm14, %v2663_v25, %v2670_v27  ;;  %v2018_v46 = vsel %vm923_vm4, %v2016_v51, %v2017_v30  ;;  %v6767_v27 = vld [vmem:[#allocation2 + $0x10c] ss:$0 sps:$4 sm:$0x11]   ;;  %v10718_v47 = vld [vmem:[#allocation40_spill] sm:$0xff] }
 0x1a4   : > { %6527 = vmatprep.mubr.msk.bf16.mxu0 %vm2864_vm15, %v2671_v33  ;;  %v8425_v26 = vpop.permute.xlu1 %1524  ;;  %v2021_v13 = vsel %vm923_vm4, %v2019_v59, %v2020_v42  ;;  %v6095_v19 = vcombine.low %v8436_v63, %v8436_v63  ;;  %v1367_v53 = vrot.slane %v1365_v6, 4  ;;  %v1370_v57 = vrot.slane %v1368_v34, 5  ;;  %v10719_v36 = vld [vmem:[#allocation21_spill] sm:$0xff]  ;;  %v10721_v33 = vld [vmem:[#allocation11_spill] sm:$0xff]  ;;  %v8571_v6 = vld [vmem:[#allocation2 + $0x108] sm:$0xf] }
 0x1a5   : > { %v2685_v20 = vor.u32 %v2684_v52, %v2681_v1  ;;  %1924 = vrot.lane.b32.xlu0 %v1875_v28, %s7047_s6  ;;  %v1495_v16 = vrot.slane %v6766_v45, 5  ;;  %v2201_v37 = vsel %vm2173_vm7, %v10715_v2, %v10714_v38  ;;  %v2203_v28 = vsel %vm2173_vm7, %v10717_v35, %v10716_v21  ;;  %v10720_v1 = vld [vmem:[#allocation55_spill] sm:$0xff]  ;;  %v8582_v23 = vld [vmem:[#allocation2 + $0x118] sm:$0xf] }
 0x1a6   : > { %1926 = vrot.lane.b32.xlu1 %v1883_v50, %s7047_s6  ;;  %v1494_v31 = vrot.slane %v8443_v4, 5  ;;  %v3151_v3 = vsel %vm8520_vm3, 0, %v3150_v60  ;;  %v2205_v9 = vsel %vm2173_vm7, %v10719_v36, %v10718_v47  ;;  %v2264_v52 = vsel %vm2238_vm8, %v2199_v10, %v10720_v1 }
 0x1a7   : > { %v8430_v49 = vpop.permute.xlu0 %1526  ;;  %v2686_v17 = vsel %vm2596_vm14, %v2678_v15, %v2685_v20  ;;  %v2266_v50 = vsel %vm2238_vm8, %v2201_v37, %v10721_v33  ;;  %v1363_v30 = vor.u32 %v1362_v41, %v1359_v44  ;;  %v8543_v20 = vld [vmem:[#allocation2 + $0x104] sm:$0xf]  ;;  %3152 = vst [vmem:[#allocation3 + $0x2c] sm:$0x1] %v3151_v3  ;;  %v2323_v39 = vsel %vm2303_vm9, %v2264_v52, %v8417_v61 }
 0x1a8   : > { %6528 = vmatmul.mubr.msk.bf16.gmra.mxu0 %vm2864_vm15, %v2686_v17  ;;  %v8439_v48 = vpop.permute.xlu1 %1528  ;;  %v2268_v17 = vsel %vm2238_vm8, %v2203_v28, %v10722_v58  ;;  %v1371_v29 = vor.u32 %v1370_v57, %v1367_v53  ;;  %v1496_v24 = vsel %vm923_vm4, %v1494_v31, %v1495_v16  ;;  %v2324_v22 = vsel %vm2303_vm9, %v2266_v50, %v8417_v61  ;;  %v552_v58 = vld [vmem:[#allocation2 + $0x110] sm:$0x8] }
 0x1a9   : > { %2076 = vrot.lane.b32.xlu0 %v2016_v51, %s7048_s7  ;;  %v3147_v51 = vld [vmem:[#allocation3 + $0x1c] sm:$0x1]  ;;  %v1498_v12 = vrot.slane %v6767_v27, 5  ;;  %v6156_v8 = vcombine.low %v8541_v5, %v8543_v20  ;;  %v6774_v5 = vld [vmem:[#allocation2 + $0x10c] ss:$0 sps:$4 sm:$0x11]  }
 0x1aa   : > { %2078 = vrot.lane.b32.xlu1 %v2018_v46, %s7048_s7  ;;  %v10723_v46 = vld [vmem:[#allocation56_spill] sm:$0xff]  ;;  %v3148_v63 = vsel %vm8520_vm3, 0, %v3147_v51  ;;  %v6157_v51 = vcombine.low %v8571_v6, %v8571_v6 }
 0x1ab   : > { %v8447_v62 = vpop.permute.xlu0 %1530  ;;  %v2270_v42 = vsel %vm2238_vm8, %v2205_v9, %v10723_v46  ;;  %3149 = vst [vmem:[#allocation3 + $0x1c] sm:$0x1] %v3148_v63 }
 0x1ac   : > { %v1717_v43 = vpop.permute.xlu1 %1716  ;;  %v2327_v54 = vsel %vm2303_vm9, %v2270_v42, %v8419_v14 }
 0x1ad   : > { %2080 = vrot.lane.b32.xlu0 %v2019_v59, %s7048_s7  ;;  %v2378_v59 = vsel %vm2352_vm10, %v2323_v39, %v8425_v26  ;;  %v2326_v26 = vsel %vm2303_vm9, %v2268_v17, %v8419_v14  ;;  %v2384_v34 = vsel %vm2352_vm10, %v2327_v54, %v8447_v62 }
 0x1ae   : > { %2082 = vrot.lane.b32.xlu1 %v2021_v13, %s7048_s7  ;;  %v1497_v13 = vrot.slane %v8452_v56, 5 }
 0x1af   : > { %v1719_v7 = vpop.permute.xlu0 %1718 }
 0x1b0   : > { %v1721_v18 = vpop.permute.xlu1 %1720  ;;  %v1499_v2 = vsel %vm923_vm4, %v1497_v13, %v1498_v12  ;;  %v3360_v12 = vld [vmem:[#allocation3 + $0x4] sm:$0xf] }
 0x1b1   : > { %1220 = vrot.lane.b32.xlu0 %v6092_v55, %s7043_s12  ;;  %v2443_v55 = vsel %vm2417_vm11, %v2378_v59, %v1717_v43  ;;  %v2382_v43 = vsel %vm2352_vm10, %v2326_v26, %v8439_v48  ;;  %v3361_v26 = vld [vmem:[#allocation3 + $0x8] sm:$0xf] }
 0x1b2   : > { %1222 = vrot.lane.b32.xlu1 %v6093_v32, %s7043_s12  ;;  %v2380_v32 = vsel %vm2352_vm10, %v2324_v22, %v8430_v49 }
 0x1b3   : > { %v1723_v11 = vpop.permute.xlu0 %1722  ;;  %v2445_v45 = vsel %vm2417_vm11, %v2380_v32, %v1719_v7  ;;  %v8589_v7 = vcombine.low %v8543_v20, %v8571_v6 }
 0x1b4   : > { %v1913_v15 = vpop.permute.xlu1 %1912  ;;  %v2449_v48 = vsel %vm2417_vm11, %v2384_v34, %v1723_v11 }
 0x1b5   : > { %1224 = vrot.lane.b32.xlu0 %v6094_v40, %s7043_s12  ;;  %v2502_v56 = vsel %vm2482_vm12, %v2443_v55, %v1913_v15  ;;  %v2447_v40 = vsel %vm2417_vm11, %v2382_v43, %v1721_v18  ;;  %v2503_v49 = vsel %vm2482_vm12, %v2445_v45, %v1913_v15  ;;  %v553_v18 = vld [vmem:[#allocation2 + $0x114] sm:$0xf]  ;;  %v1885_v36 = vshrl.u32 %v8589_v7, 16 }
 0x1b6   : > { %1226 = vrot.lane.b32.xlu1 %v6095_v19, %s7043_s12  ;;  %v8596_v37 = vcombine.low %v553_v18, %v8582_v23  ;;  %v1888_v9 = vshll.u32 %v8589_v7, 16  ;;  %v8624_v43 = vcombine.low %v3360_v12, %v3361_v26  ;;  %s7051_s12 = smov 56  }
 0x1b7   : > { %v1915_v4 = vpop.permute.xlu0 %1914  ;;  %v1887_v22 = vrot.slane %v1885_v36, 4 }
 0x1b8   : > { %v2053_v61 = vpop.permute.xlu1 %2052  ;;  %v2505_v10 = vsel %vm2482_vm12, %v2447_v40, %v1915_v4  ;;  %v2506_v38 = vsel %vm2482_vm12, %v2449_v48, %v1915_v4  ;;  %v1893_v17 = vshrl.u32 %v8596_v37, 16  ;;  %v1896_v59 = vshll.u32 %v8596_v37, 16  ;;  %v6775_v40 = vld [vmem:[#allocation2 + $0x11c] ss:$0 sps:$4 sm:$0x11]  }
 0x1b9   : > { %1400 = vrot.lane.b32.xlu0 %v1363_v30, %s7044_s13  ;;  %v2557_v14 = vsel %vm2531_vm13, %v2502_v56, %v2053_v61  ;;  %v1890_v55 = vrot.slane %v1888_v9, 5  ;;  %v6159_v56 = vcombine.low %v8582_v23, %v8582_v23 }
 0x1ba   : > { %v2687_v44 = vshrl.u32 %v2557_v14, 16  ;;  %v2690_v41 = vshll.u32 %v2557_v14, 16  ;;  %1402 = vrot.lane.b32.xlu1 %v1371_v29, %s7044_s13  ;;  %v1895_v61 = vrot.slane %v1893_v17, 4  ;;  %v1898_v6 = vrot.slane %v1896_v59, 5 }
 0x1bb   : > { %v2055_v0 = vpop.permute.xlu0 %2054  ;;  %v2023_v14 = vrot.slane %v6774_v5, 5 }
 0x1bc   : > { %v2559_v62 = vsel %vm2531_vm13, %v2503_v49, %v2055_v0  ;;  %v2689_v19 = vrot.slane %v2687_v44, 3  ;;  %v2692_v53 = vrot.slane %v2690_v41, 4  ;;  %v2057_v60 = vpop.permute.xlu1 %2056  ;;  %v1899_v45 = vor.u32 %v1898_v6, %v1895_v61 }
 0x1bd   : > { %v2694_v57 = vshrl.u32 %v2559_v62, 16  ;;  %v2697_v16 = vshll.u32 %v2559_v62, 16  ;;  %1556 = vrot.lane.b32.xlu0 %v1494_v31, %s7045_s14  ;;  %v2561_v11 = vsel %vm2531_vm13, %v2505_v10, %v2057_v60  ;;  %v2022_v44 = vrot.slane %v8589_v7, 5  ;;  %v3156_v7 = vld [vmem:[#allocation3 + $0x4c] sm:$0x1] }
 0x1be   : > { %v2693_v21 = vor.u32 %v2692_v53, %v2689_v19  ;;  %v2702_v27 = vshrl.u32 %v2561_v11, 16  ;;  %1558 = vrot.lane.b32.xlu1 %v1496_v24, %s7045_s14  ;;  %v2705_v47 = vshll.u32 %v2561_v11, 16  ;;  %v3697_v41 = vshrl.u32 %v8624_v43, 16  ;;  %v10725_v60 = vld [vmem:[#allocation22_spill] sm:$0xff] }
 0x1bf   : > { %v2696_v35 = vrot.slane %v2694_v57, 3  ;;  %v2699_v28 = vrot.slane %v2697_v16, 4  ;;  %v2059_v3 = vpop.permute.xlu0 %2058  ;;  %v3700_v0 = vshll.u32 %v8624_v43, 16  ;;  %v2024_v48 = vsel %vm923_vm4, %v2022_v44, %v2023_v14  ;;  %v10724_v16 = vld [vmem:[#allocation41_spill] sm:$0xff] }
 0x1c0   : > { %v2563_v31 = vsel %vm2531_vm13, %v2506_v38, %v2059_v3  ;;  %v2704_v52 = vrot.slane %v2702_v27, 3  ;;  %v8603_v15 = vpop.permute.xlu1 %1388  ;;  %v2707_v30 = vrot.slane %v2705_v47, 4  ;;  %v2026_v10 = vrot.slane %v6775_v40, 5  ;;  %v3153_v27 = vld [vmem:[#allocation3 + $0x3c] sm:$0x1]  ;;  %v10727_v3 = vld [vmem:[#allocation42_spill] sm:$0xff] }
 0x1c1   : > { %v2700_v1 = vor.u32 %v2699_v28, %v2696_v35  ;;  %v2709_v33 = vshrl.u32 %v2563_v31, 16  ;;  %v2712_v50 = vshll.u32 %v2563_v31, 16  ;;  %1560 = vrot.lane.b32.xlu0 %v1497_v13, %s7045_s14  ;;  %v6158_v13 = vcombine.low %v552_v58, %v553_v18  ;;  %v10728_v47 = vld [vmem:[#allocation23_spill] sm:$0xff]  ;;  %v10733_v58 = vld [vmem:[#allocation58_spill] sm:$0xff] }
 0x1c2   : > { %1562 = vrot.lane.b32.xlu1 %v1499_v2, %s7045_s14  ;;  %v2708_v4 = vor.u32 %v2707_v30, %v2704_v52  ;;  %v2025_v18 = vrot.slane %v8596_v37, 5  ;;  %v3699_v19 = vrot.slane %v3697_v41, 4  ;;  %v3702_v53 = vrot.slane %v3700_v0, 5  ;;  %v10730_v52 = vld [vmem:[#allocation24_spill] sm:$0xff]  ;;  %v10732_v30 = vld [vmem:[#allocation25_spill] sm:$0xff]  ;;  %s7052_s14 = smov 64  }
 0x1c3   : > { %v2711_v46 = vrot.slane %v2709_v33, 3  ;;  %v2714_v42 = vrot.slane %v2712_v50, 4  ;;  %v8608_v39 = vpop.permute.xlu0 %1390  ;;  %v2701_v63 = vsel %vm2596_vm14, %v2693_v21, %v2700_v1  ;;  %v2207_v38 = vsel %vm2173_vm7, %v10725_v60, %v10724_v16  ;;  %v10726_v21 = vld [vmem:[#allocation57_spill] sm:$0xff]  ;;  %v10729_v1 = vld [vmem:[#allocation43_spill] sm:$0xff]  ;;  %v10731_v50 = vld [vmem:[#allocation44_spill] sm:$0xff] }
 0x1c4   : > { %6531 = vmatprep.mubr.msk.bf16.mxu0 %vm2864_vm15, %v2701_v63  ;;  %v1533_v24 = vpop.permute.xlu1 %1532  ;;  %v2027_v11 = vsel %vm923_vm4, %v2025_v18, %v2026_v10  ;;  %v3157_v2 = vsel %vm8520_vm3, 0, %v3156_v7  ;;  %v2272_v35 = vsel %vm2238_vm8, %v2207_v38, %v10726_v21  ;;  %v3703_v28 = vor.u32 %v3702_v53, %v3699_v19  ;;  %v10734_v63 = vld [vmem:[#allocation59_spill] sm:$0xff] }
 0x1c5   : > { %v2715_v29 = vor.u32 %v2714_v42, %v2711_v46  ;;  %1748 = vrot.lane.b32.xlu0 %v6156_v8, %s7046_s17  ;;  %v1891_v8 = vor.u32 %v1890_v55, %v1887_v22  ;;  %3158 = vst [vmem:[#allocation3 + $0x4c] sm:$0x1] %v3157_v2  ;;  %v2209_v31 = vsel %vm2173_vm7, %v10728_v47, %v10727_v3  ;;  %v3154_v9 = vsel %vm8520_vm3, 0, %v3153_v27 }
 0x1c6   : > { %1750 = vrot.lane.b32.xlu1 %v6157_v51, %s7046_s17  ;;  %v2329_v36 = vsel %vm2303_vm9, %v2272_v35, %v8603_v15  ;;  %v2211_v33 = vsel %vm2173_vm7, %v10730_v52, %v10729_v1  ;;  %v2213_v51 = vsel %vm2173_vm7, %v10732_v30, %v10731_v50  ;;  %v2274_v17 = vsel %vm2238_vm8, %v2209_v31, %v10733_v58  ;;  %v3162_v58 = vld [vmem:[#allocation3 + $0x6c] sm:$0x1] }
 0x1c7   : > { %v1535_v54 = vpop.permute.xlu0 %1534  ;;  %v2716_v32 = vsel %vm2596_vm14, %v2708_v4, %v2715_v29  ;;  %v2386_v46 = vsel %vm2352_vm10, %v2329_v36, %v1533_v24  ;;  %3155 = vst [vmem:[#allocation3 + $0x3c] sm:$0x1] %v3154_v9  ;;  %v2276_v59 = vsel %vm2238_vm8, %v2211_v33, %v10734_v63  ;;  %v10735_v4 = vld [vmem:[#allocation60_spill] sm:$0xff]  ;;  %v3163_v63 = vsel %vm8520_vm3, 0, %v3162_v58 }
 0x1c8   : > { %6532 = vmatmul.mubr.msk.bf16.gmra.mxu0 %vm2864_vm15, %v2716_v32  ;;  %v1537_v20 = vpop.permute.xlu1 %1536  ;;  %v2278_v29 = vsel %vm2238_vm8, %v2213_v51, %v10735_v4  ;;  %v2332_v55 = vsel %vm2303_vm9, %v2276_v59, %v8608_v39  ;;  %v10738_v59 = vld [vmem:[#allocation61_spill] sm:$0xff]  ;;  %3164 = vst [vmem:[#allocation3 + $0x6c] sm:$0x1] %v3163_v63 }
 0x1c9   : > { %1752 = vrot.lane.b32.xlu0 %v6158_v13, %s7046_s17  ;;  %v2330_v13 = vsel %vm2303_vm9, %v2274_v17, %v8603_v15  ;;  %v2333_v24 = vsel %vm2303_vm9, %v2278_v29, %v8608_v39  ;;  %v10736_v17 = vld [vmem:[#allocation45_spill] sm:$0xff] }
 0x1ca   : > { %1754 = vrot.lane.b32.xlu1 %v6159_v56, %s7046_s17  ;;  %v2388_v12 = vsel %vm2352_vm10, %v2330_v13, %v1535_v54  ;;  %v2390_v56 = vsel %vm2352_vm10, %v2332_v55, %v1537_v20  ;;  %v3159_v13 = vld [vmem:[#allocation3 + $0x5c] sm:$0x1]  ;;  %v10740_v55 = vld [vmem:[#allocation27_spill] sm:$0xff] }
 0x1cb   : > { %v1539_v34 = vpop.permute.xlu0 %1538 }
 0x1cc   : > { %v1725_v49 = vpop.permute.xlu1 %1724  ;;  %v2392_v61 = vsel %vm2352_vm10, %v2333_v24, %v1539_v34 }
 0x1cd   : > { %1928 = vrot.lane.b32.xlu0 %v1891_v8, %s7047_s6  ;;  %v2451_v22 = vsel %vm2417_vm11, %v2386_v46, %v1725_v49  ;;  %v10737_v46 = vld [vmem:[#allocation26_spill] sm:$0xff] }
 0x1ce   : > { %1930 = vrot.lane.b32.xlu1 %v1899_v45, %s7047_s6  ;;  %s5934_s6 = sshll.u32 %s217_s30, 4  ;;  %s5935_s6 = int_to_ptr.vmem [resolvable:$true] %s5934_s6 }
 0x1cf   : > { %v1727_v23 = vpop.permute.xlu0 %1726 }
 0x1d0   : > { %v1729_v62 = vpop.permute.xlu1 %1728  ;;  %v2453_v15 = vsel %vm2417_vm11, %v2388_v12, %v1727_v23 }
 0x1d1   : > { %2084 = vrot.lane.b32.xlu0 %v2022_v44, %s7048_s7  ;;  %v2455_v5 = vsel %vm2417_vm11, %v2390_v56, %v1729_v62  ;;  %v10742_v56 = vld [vmem:[#allocation28_spill] sm:$0xff] }
 0x1d2   : > { %2086 = vrot.lane.b32.xlu1 %v2024_v48, %s7048_s7 }
 0x1d3   : > { %v1731_v57 = vpop.permute.xlu0 %1730 }
 0x1d4   : > { %v1917_v37 = vpop.permute.xlu1 %1916  ;;  %v2457_v14 = vsel %vm2417_vm11, %v2392_v61, %v1731_v57 }
 0x1d5   : > { %2088 = vrot.lane.b32.xlu0 %v2025_v18, %s7048_s7  ;;  %v2508_v26 = vsel %vm2482_vm12, %v2451_v22, %v1917_v37  ;;  %v2509_v8 = vsel %vm2482_vm12, %v2453_v15, %v1917_v37  ;;  %v10739_v22 = vld [vmem:[#allocation46_spill] sm:$0xff]  ;;  %v10743_v15 = vld [vmem:[#allocation48_spill] sm:$0xff] }
 0x1d6   : > { %2090 = vrot.lane.b32.xlu1 %v2027_v11, %s7048_s7  ;;  %v2217_v24 = vsel %vm2173_vm7, %v10740_v55, %v10739_v22 }
 0x1d7   : > { %v1919_v42 = vpop.permute.xlu0 %1918 }
 0x1d8   : > { %v2061_v32 = vpop.permute.xlu1 %2060  ;;  %v2511_v40 = vsel %vm2482_vm12, %v2455_v5, %v1919_v42  ;;  %v2512_v23 = vsel %vm2482_vm12, %v2457_v14, %v1919_v42  ;;  %v2215_v42 = vsel %vm2173_vm7, %v10737_v46, %v10736_v17  ;;  %v10746_v14 = vld [vmem:[#allocation63_spill] sm:$0xff] }
 0x1d9   : > { %3824 = vrot.lane.b32.xlu0 %v3703_v28, %s7042_s11  ;;  %v2565_v6 = vsel %vm2531_vm13, %v2508_v26, %v2061_v32  ;;  %v2280_v4 = vsel %vm2238_vm8, %v2215_v42, %v10738_v59  ;;  %v3160_v26 = vsel %vm8520_vm3, 0, %v3159_v13  ;;  %v10741_v32 = vld [vmem:[#allocation47_spill] sm:$0xff] }
 0x1da   : > { %v2717_v39 = vshrl.u32 %v2565_v6, 16  ;;  %v2720_v45 = vshll.u32 %v2565_v6, 16  ;;  %v2219_v61 = vsel %vm2173_vm7, %v10742_v56, %v10741_v32  ;;  %v10744_v6 = vld [vmem:[#allocation29_spill] sm:$0xff]  ;;  %3161 = vst [vmem:[#allocation3 + $0x5c] sm:$0x1] %v3160_v26 }
 0x1db   : > { %v2063_v54 = vpop.permute.xlu0 %2062  ;;  %v2221_v5 = vsel %vm2173_vm7, %v10744_v6, %v10743_v15 }
 0x1dc   : > { %v2567_v49 = vsel %vm2531_vm13, %v2509_v8, %v2063_v54  ;;  %v2719_v20 = vrot.slane %v2717_v39, 3  ;;  %v2722_v44 = vrot.slane %v2720_v45, 4  ;;  %v2065_v0 = vpop.permute.xlu1 %2064  ;;  %v10745_v8 = vld [vmem:[#allocation62_spill] sm:$0xff] }
 0x1dd   : > { %v2724_v34 = vshrl.u32 %v2567_v49, 16  ;;  %v2727_v41 = vshll.u32 %v2567_v49, 16  ;;  %v2569_v48 = vsel %vm2531_vm13, %v2511_v40, %v2065_v0  ;;  %v2282_v39 = vsel %vm2238_vm8, %v2217_v24, %v10745_v8  ;;  %v10747_v49 = vld [vmem:[#allocation64_spill] sm:$0xff]  ;;  %v3168_v8 = vld [vmem:[#allocation3 + $0x8c] sm:$0x1] }
 0x1de   : > { %v2723_v10 = vor.u32 %v2722_v44, %v2719_v20  ;;  %v2732_v19 = vshrl.u32 %v2569_v48, 16  ;;  %v2735_v7 = vshll.u32 %v2569_v48, 16  ;;  %v2284_v40 = vsel %vm2238_vm8, %v2219_v61, %v10746_v14  ;;  %v10748_v14 = vld [vmem:[#allocation49_spill] sm:$0xff] }
 0x1df   : > { %v2726_v62 = vrot.slane %v2724_v34, 3  ;;  %v2729_v18 = vrot.slane %v2727_v41, 4  ;;  %v2067_v53 = vpop.permute.xlu0 %2066  ;;  %v2286_v20 = vsel %vm2238_vm8, %v2221_v5, %v10747_v49 }
 0x1e0   : > { %v2571_v57 = vsel %vm2531_vm13, %v2512_v23, %v2067_v53  ;;  %v2734_v60 = vrot.slane %v2732_v19, 3  ;;  %v1393_v2 = vpop.permute.xlu1 %1392  ;;  %v2737_v21 = vrot.slane %v2735_v7, 4 }
 0x1e1   : > { %v2730_v16 = vor.u32 %v2729_v18, %v2726_v62  ;;  %v2739_v38 = vshrl.u32 %v2571_v57, 16  ;;  %v2742_v11 = vshll.u32 %v2571_v57, 16  ;;  %v2335_v12 = vsel %vm2303_vm9, %v2280_v4, %v1393_v2 }
 0x1e2   : > { %v2738_v3 = vor.u32 %v2737_v21, %v2734_v60  ;;  %v2336_v44 = vsel %vm2303_vm9, %v2282_v39, %v1393_v2  ;;  %v3169_v39 = vsel %vm8520_vm3, 0, %v3168_v8 }
 0x1e3   : > { %v2741_v35 = vrot.slane %v2739_v38, 3  ;;  %v2744_v37 = vrot.slane %v2742_v11, 4  ;;  %v1395_v28 = vpop.permute.xlu0 %1394  ;;  %v2731_v27 = vsel %vm2596_vm14, %v2723_v10, %v2730_v16  ;;  %3170 = vst [vmem:[#allocation3 + $0x8c] sm:$0x1] %v3169_v39 }
 0x1e4   : > { %6535 = vmatprep.mubr.msk.bf16.mxu0 %vm2864_vm15, %v2731_v27  ;;  %v1541_v31 = vpop.permute.xlu1 %1540  ;;  %v2338_v41 = vsel %vm2303_vm9, %v2284_v40, %v1395_v28  ;;  %v2339_v0 = vsel %vm2303_vm9, %v2286_v20, %v1395_v28  ;;  %v10749_v40 = vld [vmem:[#allocation30_spill] sm:$0xff] }
 0x1e5   : > { %v2745_v47 = vor.u32 %v2744_v37, %v2741_v35  ;;  %v2394_v45 = vsel %vm2352_vm10, %v2335_v12, %v1541_v31  ;;  %v2223_v49 = vsel %vm2173_vm7, %v10749_v40, %v10748_v14 }
 0x1e7   : > { %v1543_v36 = vpop.permute.xlu0 %1542  ;;  %v2746_v9 = vsel %vm2596_vm14, %v2738_v3, %v2745_v47 }
 0x1e8   : > { %6536 = vmatmul.mubr.msk.bf16.gmra.mxu0 %vm2864_vm15, %v2746_v9  ;;  %v1545_v1 = vpop.permute.xlu1 %1544  ;;  %v2396_v23 = vsel %vm2352_vm10, %v2336_v44, %v1543_v36  ;;  %v10750_v44 = vld [vmem:[#allocation7_spill] sm:$0xff] }
 0x1e9   : > { %v2398_v62 = vsel %vm2352_vm10, %v2338_v41, %v1545_v1 }
 0x1eb   : > { %v1547_v52 = vpop.permute.xlu0 %1546 }
 0x1ec   : > { %v1733_v33 = vpop.permute.xlu1 %1732  ;;  %v2400_v18 = vsel %vm2352_vm10, %v2339_v0, %v1547_v52  ;;  %v10751_v0 = vld [vmem:[#allocation50_spill] sm:$0xff] }
 0x1ed   : > { %v2459_v34 = vsel %vm2417_vm11, %v2394_v45, %v1733_v33 }
 0x1ef   : > { %v1735_v50 = vpop.permute.xlu0 %1734 }
 0x1f0   : > { %v1737_v30 = vpop.permute.xlu1 %1736  ;;  %v2461_v19 = vsel %vm2417_vm11, %v2396_v23, %v1735_v50  ;;  %v10752_v23 = vld [vmem:[#allocation31_spill] sm:$0xff] }
 0x1f1   : > { %v2463_v7 = vsel %vm2417_vm11, %v2398_v62, %v1737_v30  ;;  %v10753_v62 = vld [vmem:[#allocation51_spill] sm:$0xff] }
 0x1f3   : > { %v1739_v51 = vpop.permute.xlu0 %1738 }
 0x1f4   : > { %v1921_v29 = vpop.permute.xlu1 %1920  ;;  %v2465_v11 = vsel %vm2417_vm11, %v2400_v18, %v1739_v51  ;;  %v10754_v18 = vld [vmem:[#allocation32_spill] sm:$0xff] }
 0x1f5   : > { %v2514_v48 = vsel %vm2482_vm12, %v2459_v34, %v1921_v29  ;;  %v2515_v57 = vsel %vm2482_vm12, %v2461_v19, %v1921_v29  ;;  %v2288_v34 = vsel %vm2238_vm8, %v2223_v49, %v10750_v44  ;;  %v2227_v19 = vsel %vm2173_vm7, %v10754_v18, %v10753_v62 }
 0x1f7   : > { %v1923_v54 = vpop.permute.xlu0 %1922 }
 0x1f8   : > { %v2069_v10 = vpop.permute.xlu1 %2068  ;;  %v2517_v2 = vsel %vm2482_vm12, %v2463_v7, %v1923_v54  ;;  %v2518_v47 = vsel %vm2482_vm12, %v2465_v11, %v1923_v54  ;;  %v3165_v54 = vld [vmem:[#allocation3 + $0x7c] sm:$0x1] }
 0x1f9   : > { %v2573_v53 = vsel %vm2531_vm13, %v2514_v48, %v2069_v10  ;;  %v3166_v20 = vsel %vm8520_vm3, 0, %v3165_v54  ;;  %v2225_v48 = vsel %vm2173_vm7, %v10752_v23, %v10751_v0 }
 0x1fa   : > { %v2747_v16 = vshrl.u32 %v2573_v53, 16  ;;  %v2750_v60 = vshll.u32 %v2573_v53, 16  ;;  %3167 = vst [vmem:[#allocation3 + $0x7c] sm:$0x1] %v3166_v20  ;;  %v10755_v53 = vld [vmem:[#allocation65_spill] sm:$0xff] }
 0x1fb   : > { %v2071_v38 = vpop.permute.xlu0 %2070  ;;  %v2290_v7 = vsel %vm2238_vm8, %v2225_v48, %v10755_v53 }
 0x1fc   : > { %v2575_v21 = vsel %vm2531_vm13, %v2515_v57, %v2071_v38  ;;  %v2749_v35 = vrot.slane %v2747_v16, 3  ;;  %v2752_v37 = vrot.slane %v2750_v60, 4  ;;  %v2073_v3 = vpop.permute.xlu1 %2072  ;;  %v10756_v60 = vld [vmem:[#allocation52_spill] sm:$0xff]  ;;  %v10757_v38 = vld [vmem:[#allocation33_spill] sm:$0xff] }
 0x1fd   : > { %v2754_v28 = vshrl.u32 %v2575_v21, 16  ;;  %v2757_v27 = vshll.u32 %v2575_v21, 16  ;;  %v2577_v31 = vsel %vm2531_vm13, %v2517_v2, %v2073_v3  ;;  %v2229_v11 = vsel %vm2173_vm7, %v10757_v38, %v10756_v60  ;;  %v10758_v2 = vld [vmem:[#allocation66_spill] sm:$0xff] }
 0x1fe   : > { %v2753_v36 = vor.u32 %v2752_v37, %v2749_v35  ;;  %v2762_v52 = vshrl.u32 %v2577_v31, 16  ;;  %v2765_v50 = vshll.u32 %v2577_v31, 16  ;;  %v2292_v21 = vsel %vm2238_vm8, %v2227_v19, %v10758_v2 }
 0x1ff   : > { %v2756_v9 = vrot.slane %v2754_v28, 3  ;;  %v2759_v1 = vrot.slane %v2757_v27, 4  ;;  %v2075_v33 = vpop.permute.xlu0 %2074 }
 0x200   : > { %v2579_v30 = vsel %vm2531_vm13, %v2518_v47, %v2075_v33  ;;  %v2764_v58 = vrot.slane %v2762_v52, 3  ;;  %v1219_v42 = vpop.permute.xlu1 %1218  ;;  %v2767_v63 = vrot.slane %v2765_v50, 4 }
 0x201   : > { %v2760_v51 = vor.u32 %v2759_v1, %v2756_v9  ;;  %v2769_v17 = vshrl.u32 %v2579_v30, 16  ;;  %v2772_v46 = vshll.u32 %v2579_v30, 16  ;;  %v2294_v28 = vsel %vm2238_vm8, %v2229_v11, %v1219_v42 }
 0x202   : > { %v2768_v22 = vor.u32 %v2767_v63, %v2764_v58 }
 0x203   : > { %v2771_v59 = vrot.slane %v2769_v17, 3  ;;  %v2774_v4 = vrot.slane %v2772_v46, 4  ;;  %v1397_v29 = vpop.permute.xlu0 %1396  ;;  %v2761_v13 = vsel %vm2596_vm14, %v2753_v36, %v2760_v51 }
 0x204   : > { %6539 = vmatprep.mubr.msk.bf16.mxu0 %vm2864_vm15, %v2761_v13  ;;  %v1399_v24 = vpop.permute.xlu1 %1398  ;;  %v2341_v10 = vsel %vm2303_vm9, %v2288_v34, %v1397_v29  ;;  %v2342_v35 = vsel %vm2303_vm9, %v2290_v7, %v1397_v29  ;;  %v8789_v34 = vld [vmem:[%s10589_s2] ss:$0 sm:$0xff] }
 0x205   : > { %v2775_v55 = vor.u32 %v2774_v4, %v2771_v59  ;;  %v2344_v27 = vsel %vm2303_vm9, %v2292_v21, %v1399_v24  ;;  %v2345_v36 = vsel %vm2303_vm9, %v2294_v28, %v1399_v24 }
 0x207   : > { %v1549_v12 = vpop.permute.xlu0 %1548  ;;  %v2776_v26 = vsel %vm2596_vm14, %v2768_v22, %v2775_v55 }
 0x208   : > { %6540 = vmatmul.mubr.msk.bf16.gmra.mxu0 %vm2864_vm15, %v2776_v26  ;;  %v1551_v32 = vpop.permute.xlu1 %1550  ;;  %v2402_v57 = vsel %vm2352_vm10, %v2341_v10, %v1549_v12 }
 0x209   : > { %v2404_v3 = vsel %vm2352_vm10, %v2342_v35, %v1551_v32 }
 0x20b   : > { %v1553_v56 = vpop.permute.xlu0 %1552 }
 0x20c   : > { %v1555_v61 = vpop.permute.xlu1 %1554  ;;  %v2406_v9 = vsel %vm2352_vm10, %v2344_v27, %v1553_v56 }
 0x20d   : > { %v2408_v17 = vsel %vm2352_vm10, %v2345_v36, %v1555_v61 }
 0x20f   : > { %v1741_v15 = vpop.permute.xlu0 %1740 }
 0x210   : > { %v1743_v6 = vpop.permute.xlu1 %1742  ;;  %v2467_v37 = vsel %vm2417_vm11, %v2402_v57, %v1741_v15 }
 0x211   : > { %v2469_v1 = vsel %vm2417_vm11, %v2404_v3, %v1743_v6 }
 0x213   : > { %v1745_v5 = vpop.permute.xlu0 %1744 }
 0x214   : > { %v1747_v45 = vpop.permute.xlu1 %1746  ;;  %v2471_v33 = vsel %vm2417_vm11, %v2406_v9, %v1745_v5 }
 0x215   : > { %v2473_v22 = vsel %vm2417_vm11, %v2408_v17, %v1747_v45 }
 0x217   : > { %v1925_v41 = vpop.permute.xlu0 %1924 }
 0x218   : > { %v1927_v16 = vpop.permute.xlu1 %1926  ;;  %v2520_v47 = vsel %vm2482_vm12, %v2467_v37, %v1925_v41  ;;  %v2521_v50 = vsel %vm2482_vm12, %v2469_v1, %v1925_v41  ;;  %v3174_v1 = vld [vmem:[#allocation3 + $0xac] sm:$0x1] }
 0x219   : > { %v2523_v46 = vsel %vm2482_vm12, %v2471_v33, %v1927_v16  ;;  %v2524_v24 = vsel %vm2482_vm12, %v2473_v22, %v1927_v16 }
 0x21b   : > { %v2077_v31 = vpop.permute.xlu0 %2076 }
 0x21c   : > { %v2581_v52 = vsel %vm2531_vm13, %v2520_v47, %v2077_v31  ;;  %v2079_v58 = vpop.permute.xlu1 %2078 }
 0x21d   : > { %v2777_v30 = vshrl.u32 %v2581_v52, 16  ;;  %v2780_v51 = vshll.u32 %v2581_v52, 16  ;;  %v2583_v42 = vsel %vm2531_vm13, %v2521_v50, %v2079_v58  ;;  %v3175_v52 = vsel %vm8520_vm3, 0, %v3174_v1  ;;  %v3171_v50 = vld [vmem:[#allocation3 + $0x9c] sm:$0x1] }
 0x21e   : > { %v2784_v4 = vshrl.u32 %v2583_v42, 16  ;;  %v2787_v29 = vshll.u32 %v2583_v42, 16  ;;  %3176 = vst [vmem:[#allocation3 + $0xac] sm:$0x1] %v3175_v52 }
 0x21f   : > { %v2779_v63 = vrot.slane %v2777_v30, 3  ;;  %v2782_v59 = vrot.slane %v2780_v51, 4  ;;  %v2081_v13 = vpop.permute.xlu0 %2080  ;;  %v3172_v30 = vsel %vm8520_vm3, 0, %v3171_v50 }
 0x220   : > { %v2585_v55 = vsel %vm2531_vm13, %v2523_v46, %v2081_v13  ;;  %v2786_v12 = vrot.slane %v2784_v4, 3  ;;  %v2789_v26 = vrot.slane %v2787_v29, 4  ;;  %v2083_v56 = vpop.permute.xlu1 %2082  ;;  %3173 = vst [vmem:[#allocation3 + $0x9c] sm:$0x1] %v3172_v30  ;;  %v10759_v29 = vld [vmem:[#allocation53_spill] sm:$0xff]  ;;  %v10760_v13 = vld [vmem:[#allocation34_spill] sm:$0xff] }
 0x221   : > { %v2792_v32 = vshrl.u32 %v2585_v55, 16  ;;  %v2783_v61 = vor.u32 %v2782_v59, %v2779_v63  ;;  %v2795_v15 = vshll.u32 %v2585_v55, 16  ;;  %v2587_v6 = vsel %vm2531_vm13, %v2524_v24, %v2083_v56  ;;  %v10762_v56 = vld [vmem:[#allocation35_spill] sm:$0xff] }
 0x222   : > { %v2790_v5 = vor.u32 %v2789_v26, %v2786_v12  ;;  %v2799_v39 = vshrl.u32 %v2587_v6, 16  ;;  %v2802_v54 = vshll.u32 %v2587_v6, 16  ;;  %v2231_v22 = vsel %vm2173_vm7, %v10760_v13, %v10759_v29 }
 0x223   : > { %v2794_v8 = vrot.slane %v2792_v32, 3  ;;  %v1221_v14 = vpop.permute.xlu0 %1220  ;;  %v2797_v40 = vrot.slane %v2795_v15, 4  ;;  %v10761_v32 = vld [vmem:[#allocation9_spill] sm:$0xff] }
 0x224   : > { %v2801_v49 = vrot.slane %v2799_v39, 3  ;;  %v2804_v45 = vrot.slane %v2802_v54, 4  ;;  %v8783_v20 = vpop.permute.xlu1 %1222  ;;  %v2791_v44 = vsel %vm2596_vm14, %v2783_v61, %v2790_v5  ;;  %v2233_v61 = vsel %vm2173_vm7, %v10762_v56, %v10761_v32 }
 0x225   : > { %6543 = vmatprep.mubr.msk.bf16.mxu0 %vm2864_vm15, %v2791_v44  ;;  %v2798_v41 = vor.u32 %v2797_v40, %v2794_v8  ;;  %v2296_v15 = vsel %vm2238_vm8, %v2231_v22, %v1221_v14  ;;  %v10763_v40 = vld [vmem:[#allocation10_spill] sm:$0xff] }
 0x226   : > { %v2805_v0 = vor.u32 %v2804_v45, %v2801_v49  ;;  %v10764_v49 = vld [vmem:[#allocation36_spill] sm:$0xff]  ;;  %v10765_v44 = vld [vmem:[#allocation54_spill] sm:$0xff] }
 0x227   : > { %v8792_v23 = vpop.permute.xlu0 %1224  ;;  %v2235_v45 = vsel %vm2173_vm7, %v10764_v49, %v10763_v40 }
 0x228   : > { %v6521_v48 = vpop.f32.mrf.mxu0  ;;  %v8795_v62 = vpop.permute.xlu1 %1226  ;;  %v2806_v18 = vsel %vm2596_vm14, %v2798_v41, %v2805_v0  ;;  %v10766_v41 = vld [vmem:[#allocation37_spill] sm:$0xff] }
 0x229   : > { %v2960_v10 = vadd.f32 %v6521_v48, %v8789_v34  ;;  %6544 = vmatmul.mubr.msk.bf16.gmra.mxu0 %vm2864_vm15, %v2806_v18  ;;  %v2237_v0 = vsel %vm2173_vm7, %v10766_v41, %v10765_v44  ;;  %v2298_v48 = vsel %vm2238_vm8, %v2233_v61, %v8783_v20 }
 0x22a   : > { %v2951_v19 = vpop.f32.mrf.mxu0 }
 0x22b   : > { %v3080_v53 = vmax.f32 %v2960_v10, 0.0  ;;  %v2952_v7 = vadd.f32 %v8789_v34, %v2951_v19  ;;  %v1401_v57 = vpop.permute.xlu0 %1400 }
 0x22c   : > { %v6522_v16 = vpop.f32.mrf.mxu0  ;;  %v1403_v2 = vpop.permute.xlu1 %1402  ;;  %v2347_v14 = vsel %vm2303_vm9, %v2296_v15, %v1401_v57 }
 0x22d   : > { %v6445_v60 = vpack.c.bf16 %v3080_v53, %v3080_v53  ;;  %v3078_v38 = vmax.f32 %v2952_v7, 0.0  ;;  %v2963_v11 = vadd.f32 %v6522_v16, %v8789_v34  ;;  %v2300_v16 = vsel %vm2238_vm8, %v2235_v45, %v8792_v23 }
 0x22e   : > { %v2954_v21 = vpop.f32.mrf.mxu0  ;;  %v2350_v20 = vsel %vm2303_vm9, %v2300_v16, %v1403_v2 }
 0x22f   : > { %3329 = vst.msk [vmem:[#allocation3 + $0x24] sm:$0xf] %vm3110_vm0, %v6445_v60  ;;  %v6443_v35 = vpack.c.bf16 %v3078_v38, %v3078_v38  ;;  %v3081_v37 = vmax.f32 %v2963_v11, 0.0  ;;  %v2955_v28 = vadd.f32 %v8789_v34, %v2954_v21  ;;  %v1557_v27 = vpop.permute.xlu0 %1556  ;;  %v2302_v60 = vsel %vm2238_vm8, %v2237_v0, %v8795_v62 }
 0x230   : > { %v1559_v31 = vpop.permute.xlu1 %1558  ;;  %v2410_v10 = vsel %vm2352_vm10, %v2347_v14, %v1557_v27  ;;  %v2348_v38 = vsel %vm2303_vm9, %v2298_v48, %v1401_v57  ;;  %v2351_v27 = vsel %vm2303_vm9, %v2302_v60, %v1403_v2  ;;  %vm5507_vm8 = vcmask 523264  }
 0x231   : > { %3327 = vst.msk [vmem:[#allocation3 + $0x14] sm:$0xf] %vm3110_vm0, %v6443_v35  ;;  %v6446_v3 = vpack.c.bf16 %v3081_v37, %v3081_v37  ;;  %v3079_v47 = vmax.f32 %v2955_v28, 0.0  ;;  %v2412_v21 = vsel %vm2352_vm10, %v2348_v38, %v1559_v31 }
 0x233   : > { %3330 = vst.msk [vmem:[#allocation3 + $0x28] sm:$0xf] %vm3110_vm0, %v6446_v3  ;;  %v6444_v36 = vpack.c.bf16 %v3079_v47, %v3079_v47  ;;  %v1561_v9 = vpop.permute.xlu0 %1560 }
 0x234   : > { %v1563_v33 = vpop.permute.xlu1 %1562  ;;  %v2414_v23 = vsel %vm2352_vm10, %v2350_v20, %v1561_v9  ;;  %v3177_v20 = vld [vmem:[#allocation3 + $0xbc] sm:$0x1] }
 0x235   : > { %3328 = vst.msk [vmem:[#allocation3 + $0x18] sm:$0xf] %vm3110_vm0, %v6444_v36  ;;  %v2416_v52 = vsel %vm2352_vm10, %v2351_v27, %v1563_v33  ;;  %vm5819_vm10 = vcmask 588800  }
 0x236   : > { %v3366_v17 = vld [vmem:[#allocation3 + $0x24] sm:$0xf] }
 0x237   : > { %v1749_v51 = vpop.permute.xlu0 %1748 }
 0x238   : > { %v1751_v58 = vpop.permute.xlu1 %1750  ;;  %v3363_v59 = vld [vmem:[#allocation3 + $0x14] sm:$0xf]  ;;  %v2475_v11 = vsel %vm2417_vm11, %v2410_v10, %v1749_v51 }
 0x239   : > { %v2477_v62 = vsel %vm2417_vm11, %v2412_v21, %v1751_v58  ;;  %v3178_v21 = vsel %vm8520_vm3, 0, %v3177_v20 }
 0x23a   : > { %v3367_v46 = vld [vmem:[#allocation3 + $0x28] sm:$0xf]  ;;  %3179 = vst [vmem:[#allocation3 + $0xbc] sm:$0x1] %v3178_v21 }
 0x23b   : > { %v1753_v42 = vpop.permute.xlu0 %1752  ;;  %v8810_v63 = vcombine.low %v3366_v17, %v3367_v46 }
 0x23c   : > { %v3364_v4 = vld [vmem:[#allocation3 + $0x18] sm:$0xf]  ;;  %v1755_v55 = vpop.permute.xlu1 %1754  ;;  %v2479_v3 = vsel %vm2417_vm11, %v2414_v23, %v1753_v42 }
 0x23d   : > { %v3713_v24 = vshrl.u32 %v8810_v63, 16  ;;  %v3716_v12 = vshll.u32 %v8810_v63, 16  ;;  %v8817_v26 = vcombine.low %v3363_v59, %v3364_v4  ;;  %v2481_v46 = vsel %vm2417_vm11, %v2416_v52, %v1755_v55 }
 0x23f   : > { %v1929_v6 = vpop.permute.xlu0 %1928  ;;  %v3715_v5 = vrot.slane %v3713_v24, 4  ;;  %v3718_v8 = vrot.slane %v3716_v12, 5  ;;  %v3705_v39 = vshrl.u32 %v8817_v26, 16  ;;  %v3708_v54 = vshll.u32 %v8817_v26, 16 }
 0x240   : > { %v1931_v18 = vpop.permute.xlu1 %1930  ;;  %v2526_v35 = vsel %vm2482_vm12, %v2475_v11, %v1929_v6  ;;  %v2527_v47 = vsel %vm2482_vm12, %v2477_v62, %v1929_v6 }
 0x241   : > { %v3719_v19 = vor.u32 %v3718_v8, %v3715_v5  ;;  %v3707_v53 = vrot.slane %v3705_v39, 4  ;;  %v3710_v7 = vrot.slane %v3708_v54, 5  ;;  %v2529_v50 = vsel %vm2482_vm12, %v2479_v3, %v1931_v18 }
 0x242   : > { %v2530_v4 = vsel %vm2482_vm12, %v2481_v46, %v1931_v18 }
 0x243   : > { %v2085_v37 = vpop.permute.xlu0 %2084  ;;  %3828 = vrot.lane.b32.xlu0 %v3719_v19, %s7042_s11  ;;  %v3711_v28 = vor.u32 %v3710_v7, %v3707_v53 }
 0x244   : > { %v2589_v57 = vsel %vm2531_vm13, %v2526_v35, %v2085_v37  ;;  %v2087_v1 = vpop.permute.xlu1 %2086 }
 0x245   : > { %v2807_v36 = vshrl.u32 %v2589_v57, 16  ;;  %v2810_v31 = vshll.u32 %v2589_v57, 16  ;;  %3826 = vrot.lane.b32.xlu1 %v3711_v28, %s7042_s11  ;;  %v2591_v2 = vsel %vm2531_vm13, %v2527_v47, %v2087_v1  ;;  %v3180_v47 = vld [vmem:[#allocation3 + $0xcc] sm:$0x1] }
 0x246   : > { %v2814_v51 = vshrl.u32 %v2591_v2, 16  ;;  %v2817_v58 = vshll.u32 %v2591_v2, 16 }
 0x247   : > { %v2809_v9 = vrot.slane %v2807_v36, 3  ;;  %v2812_v30 = vrot.slane %v2810_v31, 4  ;;  %v2089_v17 = vpop.permute.xlu0 %2088 }
 0x248   : > { %v2593_v42 = vsel %vm2531_vm13, %v2529_v50, %v2089_v17  ;;  %v6525_v59 = vpop.f32.mrf.mxu0  ;;  %v2816_v29 = vrot.slane %v2814_v51, 3  ;;  %v2819_v13 = vrot.slane %v2817_v58, 4  ;;  %v2091_v33 = vpop.permute.xlu1 %2090  ;;  %v3181_v50 = vsel %vm8520_vm3, 0, %v3180_v47 }
 0x249   : > { %v2822_v22 = vshrl.u32 %v2593_v42, 16  ;;  %v2825_v24 = vshll.u32 %v2593_v42, 16  ;;  %v2976_v12 = vadd.f32 %v6525_v59, %v8789_v34  ;;  %v2595_v56 = vsel %vm2531_vm13, %v2530_v4, %v2091_v33  ;;  %3182 = vst [vmem:[#allocation3 + $0xcc] sm:$0x1] %v3181_v50 }
 0x24a   : > { %v2967_v32 = vpop.f32.mrf.mxu0  ;;  %v2813_v61 = vor.u32 %v2812_v30, %v2809_v9  ;;  %v2820_v15 = vor.u32 %v2819_v13, %v2816_v29  ;;  %v2829_v55 = vshrl.u32 %v2595_v56, 16  ;;  %v2832_v54 = vshll.u32 %v2595_v56, 16 }
 0x24b   : > { %v2968_v6 = vadd.f32 %v8789_v34, %v2967_v32  ;;  %v2824_v5 = vrot.slane %v2822_v22, 3  ;;  %v2827_v8 = vrot.slane %v2825_v24, 4  ;;  %v3084_v39 = vmax.f32 %v2976_v12, 0.0 }
 0x24c   : > { %v6526_v40 = vpop.f32.mrf.mxu0  ;;  %v2831_v45 = vrot.slane %v2829_v55, 3  ;;  %v2821_v41 = vsel %vm2596_vm14, %v2813_v61, %v2820_v15  ;;  %v2834_v48 = vrot.slane %v2832_v54, 4 }
 0x24d   : > { %v3082_v49 = vmax.f32 %v2968_v6, 0.0  ;;  %v2979_v44 = vadd.f32 %v6526_v40, %v8789_v34  ;;  %v6449_v0 = vpack.c.bf16 %v3084_v39, %v3084_v39  ;;  %6547 = vmatprep.mubr.msk.bf16.mxu0 %vm2864_vm15, %v2821_v41  ;;  %v2828_v53 = vor.u32 %v2827_v8, %v2824_v5  ;;  %v3186_v6 = vld [vmem:[#allocation3 + $0xec] sm:$0x1]  ;;  %v3183_v41 = vld [vmem:[#allocation3 + $0xdc] sm:$0x1] }
 0x24e   : > { %v2970_v14 = vpop.f32.mrf.mxu0  ;;  %v2835_v7 = vor.u32 %v2834_v48, %v2831_v45  ;;  %v3187_v55 = vsel %vm8520_vm3, 0, %v3186_v6 }
 0x24f   : > { %v6447_v10 = vpack.c.bf16 %v3082_v49, %v3082_v49  ;;  %v3085_v18 = vmax.f32 %v2979_v44, 0.0  ;;  %v2971_v19 = vadd.f32 %v8789_v34, %v2970_v14  ;;  %3333 = vst.msk [vmem:[#allocation3 + $0x44] sm:$0xf] %vm3110_vm0, %v6449_v0  ;;  %3188 = vst [vmem:[#allocation3 + $0xec] sm:$0x1] %v3187_v55 }
 0x250   : > { %v2836_v38 = vsel %vm2596_vm14, %v2828_v53, %v2835_v7  ;;  %v3184_v7 = vsel %vm8520_vm3, 0, %v3183_v41 }
 0x251   : > { %3331 = vst.msk [vmem:[#allocation3 + $0x34] sm:$0xf] %vm3110_vm0, %v6447_v10  ;;  %v6450_v16 = vpack.c.bf16 %v3085_v18, %v3085_v18  ;;  %v3083_v60 = vmax.f32 %v2971_v19, 0.0  ;;  %6548 = vmatmul.mubr.msk.bf16.gmra.mxu0 %vm2864_vm15, %v2836_v38  ;;  %3185 = vst [vmem:[#allocation3 + $0xdc] sm:$0x1] %v3184_v7 }
 0x253   : > { %3334 = vst.msk [vmem:[#allocation3 + $0x48] sm:$0xf] %vm3110_vm0, %v6450_v16  ;;  %v6448_v11 = vpack.c.bf16 %v3083_v60, %v3083_v60 }
 0x255   : > { %3332 = vst.msk [vmem:[#allocation3 + $0x38] sm:$0xf] %vm3110_vm0, %v6448_v11 }
 0x256   : > { %v3372_v35 = vld [vmem:[#allocation3 + $0x44] sm:$0xf] }
 0x258   : > { %v3369_v27 = vld [vmem:[#allocation3 + $0x34] sm:$0xf] }
 0x25a   : > { %v3373_v37 = vld [vmem:[#allocation3 + $0x48] sm:$0xf] }
 0x25b   : > { %v8873_v28 = vcombine.low %v3372_v35, %v3373_v37 }
 0x25c   : > { %v3370_v23 = vld [vmem:[#allocation3 + $0x38] sm:$0xf] }
 0x25d   : > { %v3729_v62 = vshrl.u32 %v8873_v28, 16  ;;  %v3732_v57 = vshll.u32 %v8873_v28, 16  ;;  %v8877_v3 = vcombine.low %v3369_v27, %v3370_v23 }
 0x25f   : > { %v3731_v36 = vrot.slane %v3729_v62, 4  ;;  %v3734_v31 = vrot.slane %v3732_v57, 5  ;;  %v3721_v1 = vshrl.u32 %v8877_v3, 16  ;;  %v3724_v52 = vshll.u32 %v8877_v3, 16 }
 0x261   : > { %v3735_v2 = vor.u32 %v3734_v31, %v3731_v36  ;;  %v3723_v9 = vrot.slane %v3721_v1, 4  ;;  %v3726_v30 = vrot.slane %v3724_v52, 5 }
 0x263   : > { %3832 = vrot.lane.b32.xlu0 %v3735_v2, %s7042_s11  ;;  %v3727_v51 = vor.u32 %v3726_v30, %v3723_v9 }
 0x265   : > { %3830 = vrot.lane.b32.xlu1 %v3727_v51, %s7042_s11 }
 0x268   : > { %v6529_v58 = vpop.f32.mrf.mxu0 }
 0x269   : > { %v2992_v17 = vadd.f32 %v6529_v58, %v8789_v34 }
 0x26a   : > { %v2983_v46 = vpop.f32.mrf.mxu0 }
 0x26b   : > { %v3088_v42 = vmax.f32 %v2992_v17, 0.0  ;;  %v2984_v59 = vadd.f32 %v8789_v34, %v2983_v46 }
 0x26c   : > { %v6530_v4 = vpop.f32.mrf.mxu0 }
 0x26d   : > { %v6453_v29 = vpack.c.bf16 %v3088_v42, %v3088_v42  ;;  %v3086_v13 = vmax.f32 %v2984_v59, 0.0  ;;  %v2995_v22 = vadd.f32 %v6530_v4, %v8789_v34 }
 0x26e   : > { %v2986_v33 = vpop.f32.mrf.mxu0 }
 0x26f   : > { %3337 = vst.msk [vmem:[#allocation3 + $0x64] sm:$0xf] %vm3110_vm0, %v6453_v29  ;;  %v6451_v24 = vpack.c.bf16 %v3086_v13, %v3086_v13  ;;  %v3089_v12 = vmax.f32 %v2995_v22, 0.0  ;;  %v2987_v32 = vadd.f32 %v8789_v34, %v2986_v33  ;;  %v3116_v13 = vld [vmem:[#allocation3 + $0xc] sm:$0x1] }
 0x270   : > { %v3117_v22 = vsel %vm8520_vm3, 0, %v3116_v13  ;;  %v3192_v33 = vld [vmem:[#allocation3 + $0x10c] sm:$0x1] }
 0x271   : > { %3335 = vst.msk [vmem:[#allocation3 + $0x54] sm:$0xf] %vm3110_vm0, %v6451_v24  ;;  %v6454_v56 = vpack.c.bf16 %v3089_v12, %v3089_v12  ;;  %v3087_v61 = vmax.f32 %v2987_v32, 0.0  ;;  %3118 = vst [vmem:[#allocation3 + $0xc] sm:$0x1] %v3117_v22 }
 0x273   : > { %3338 = vst.msk [vmem:[#allocation3 + $0x68] sm:$0xf] %vm3110_vm0, %v6454_v56  ;;  %v6452_v15 = vpack.c.bf16 %v3087_v61, %v3087_v61  ;;  %v3189_v56 = vld [vmem:[#allocation3 + $0xfc] sm:$0x1]  ;;  %v3193_v61 = vsel %vm8520_vm3, 0, %v3192_v33 }
 0x274   : > { %3194 = vst [vmem:[#allocation3 + $0x10c] sm:$0x1] %v3193_v61 }
 0x275   : > { %3336 = vst.msk [vmem:[#allocation3 + $0x58] sm:$0xf] %vm3110_vm0, %v6452_v15  ;;  %v3190_v15 = vsel %vm8520_vm3, 0, %v3189_v56  ;;  %v3123_v56 = vld [vmem:[#allocation3 + $0x11c] sm:$0x1] }
 0x276   : > { %v3378_v5 = vld [vmem:[#allocation3 + $0x64] sm:$0xf]  ;;  %3191 = vst [vmem:[#allocation3 + $0xfc] sm:$0x1] %v3190_v15  ;;  %v3124_v61 = vsel %vm8520_vm3, 0, %v3123_v56 }
 0x277   : > { %3125 = vst [vmem:[#allocation3 + $0x11c] sm:$0x1] %v3124_v61  ;;  %v3904_v61 = vrot.slane %v8624_v43, 5 }
 0x278   : > { %v3375_v54 = vld [vmem:[#allocation3 + $0x54] sm:$0xf] }
 0x27a   : > { %v3379_v8 = vld [vmem:[#allocation3 + $0x68] sm:$0xf] }
 0x27b   : > { %v8895_v39 = vcombine.low %v3378_v5, %v3379_v8  ;;  %v3144_v5 = vld [vmem:[#allocation3 + $0xc] sm:$0x1] }
 0x27c   : > { %v3376_v40 = vld [vmem:[#allocation3 + $0x58] sm:$0xf] }
 0x27d   : > { %v3745_v49 = vshrl.u32 %v8895_v39, 16  ;;  %v3748_v45 = vshll.u32 %v8895_v39, 16  ;;  %v8899_v44 = vcombine.low %v3375_v54, %v3376_v40  ;;  %v3145_v54 = vsel %vm8520_vm3, 0, %v3144_v5 }
 0x27e   : > { %3146 = vst [vmem:[#allocation3 + $0xc] sm:$0x1] %v3145_v54  ;;  %v3195_v5 = vld [vmem:[#allocation3 + $0x11c] sm:$0x1] }
 0x27f   : > { %v3747_v0 = vrot.slane %v3745_v49, 4  ;;  %v3750_v48 = vrot.slane %v3748_v45, 5  ;;  %v3737_v14 = vshrl.u32 %v8899_v44, 16  ;;  %v3740_v10 = vshll.u32 %v8899_v44, 16 }
 0x280   : > { %v3196_v54 = vsel %vm8520_vm3, 0, %v3195_v5  ;;  %v3913_v5 = vrot.slane %v8877_v3, 5 }
 0x281   : > { %v3751_v18 = vor.u32 %v3750_v48, %v3747_v0  ;;  %v3739_v19 = vrot.slane %v3737_v14, 4  ;;  %v3742_v53 = vrot.slane %v3740_v10, 5  ;;  %3197 = vst [vmem:[#allocation3 + $0x11c] sm:$0x1] %v3196_v54 }
 0x283   : > { %3836 = vrot.lane.b32.xlu0 %v3751_v18, %s7042_s11  ;;  %v3743_v16 = vor.u32 %v3742_v53, %v3739_v19 }
 0x285   : > { %3834 = vrot.lane.b32.xlu1 %v3743_v16, %s7042_s11 }
 0x288   : > { %v6533_v60 = vpop.f32.mrf.mxu0 }
 0x289   : > { %v3008_v38 = vadd.f32 %v6533_v60, %v8789_v34 }
 0x28a   : > { %v2999_v11 = vpop.f32.mrf.mxu0 }
 0x28b   : > { %v3092_v20 = vmax.f32 %v3008_v38, 0.0  ;;  %v3000_v21 = vadd.f32 %v8789_v34, %v2999_v11 }
 0x28c   : > { %v6534_v35 = vpop.f32.mrf.mxu0 }
 0x28d   : > { %v6457_v37 = vpack.c.bf16 %v3092_v20, %v3092_v20  ;;  %v3090_v27 = vmax.f32 %v3000_v21, 0.0  ;;  %v3011_v23 = vadd.f32 %v6534_v35, %v8789_v34 }
 0x28e   : > { %v3002_v62 = vpop.f32.mrf.mxu0 }
 0x28f   : > { %3341 = vst.msk [vmem:[#allocation3 + $0x84] sm:$0xf] %vm3110_vm0, %v6457_v37  ;;  %v6455_v57 = vpack.c.bf16 %v3090_v27, %v3090_v27  ;;  %v3093_v47 = vmax.f32 %v3011_v23, 0.0  ;;  %v3003_v36 = vadd.f32 %v8789_v34, %v3002_v62 }
 0x291   : > { %3339 = vst.msk [vmem:[#allocation3 + $0x74] sm:$0xf] %vm3110_vm0, %v6455_v57  ;;  %v6458_v31 = vpack.c.bf16 %v3093_v47, %v3093_v47  ;;  %v3091_v1 = vmax.f32 %v3003_v36, 0.0 }
 0x293   : > { %3342 = vst.msk [vmem:[#allocation3 + $0x88] sm:$0xf] %vm3110_vm0, %v6458_v31  ;;  %v6456_v52 = vpack.c.bf16 %v3091_v1, %v3091_v1 }
 0x295   : > { %3340 = vst.msk [vmem:[#allocation3 + $0x78] sm:$0xf] %vm3110_vm0, %v6456_v52 }
 0x296   : > { %v3384_v50 = vld [vmem:[#allocation3 + $0x84] sm:$0xf] }
 0x298   : > { %v3381_v30 = vld [vmem:[#allocation3 + $0x74] sm:$0xf] }
 0x29a   : > { %v3385_v2 = vld [vmem:[#allocation3 + $0x88] sm:$0xf] }
 0x29b   : > { %v8915_v9 = vcombine.low %v3384_v50, %v3385_v2 }
 0x29c   : > { %v3382_v51 = vld [vmem:[#allocation3 + $0x78] sm:$0xf] }
 0x29d   : > { %v3761_v58 = vshrl.u32 %v8915_v9, 16  ;;  %v3764_v17 = vshll.u32 %v8915_v9, 16  ;;  %v8919_v46 = vcombine.low %v3381_v30, %v3382_v51 }
 0x29f   : > { %v3763_v42 = vrot.slane %v3761_v58, 4  ;;  %v3766_v59 = vrot.slane %v3764_v17, 5  ;;  %v3753_v4 = vshrl.u32 %v8919_v46, 16  ;;  %v3756_v29 = vshll.u32 %v8919_v46, 16 }
 0x2a1   : > { %v3767_v24 = vor.u32 %v3766_v59, %v3763_v42  ;;  %v3755_v12 = vrot.slane %v3753_v4, 4  ;;  %v3758_v32 = vrot.slane %v3756_v29, 5 }
 0x2a3   : > { %3840 = vrot.lane.b32.xlu0 %v3767_v24, %s7042_s11  ;;  %v3759_v6 = vor.u32 %v3758_v32, %v3755_v12 }
 0x2a5   : > { %3838 = vrot.lane.b32.xlu1 %v3759_v6, %s7042_s11 }
 0x2a8   : > { %v6537_v55 = vpop.f32.mrf.mxu0 }
 0x2a9   : > { %v3024_v8 = vadd.f32 %v6537_v55, %v8789_v34 }
 0x2aa   : > { %v3015_v40 = vpop.f32.mrf.mxu0 }
 0x2ab   : > { %v3096_v49 = vmax.f32 %v3024_v8, 0.0  ;;  %v3016_v45 = vadd.f32 %v8789_v34, %v3015_v40 }
 0x2ac   : > { %v6538_v41 = vpop.f32.mrf.mxu0 }
 0x2ad   : > { %v6461_v0 = vpack.c.bf16 %v3096_v49, %v3096_v49  ;;  %v3094_v48 = vmax.f32 %v3016_v45, 0.0  ;;  %v3027_v14 = vadd.f32 %v6538_v41, %v8789_v34 }
 0x2ae   : > { %v3018_v10 = vpop.f32.mrf.mxu0 }
 0x2af   : > { %3345 = vst.msk [vmem:[#allocation3 + $0xa4] sm:$0xf] %vm3110_vm0, %v6461_v0  ;;  %v6459_v18 = vpack.c.bf16 %v3094_v48, %v3094_v48  ;;  %v3097_v19 = vmax.f32 %v3027_v14, 0.0  ;;  %v3019_v53 = vadd.f32 %v8789_v34, %v3018_v10 }
 0x2b1   : > { %3343 = vst.msk [vmem:[#allocation3 + $0x94] sm:$0xf] %vm3110_vm0, %v6459_v18  ;;  %v6462_v7 = vpack.c.bf16 %v3097_v19, %v3097_v19  ;;  %v3095_v16 = vmax.f32 %v3019_v53, 0.0 }
 0x2b3   : > { %3346 = vst.msk [vmem:[#allocation3 + $0xa8] sm:$0xf] %vm3110_vm0, %v6462_v7  ;;  %v6460_v60 = vpack.c.bf16 %v3095_v16, %v3095_v16 }
 0x2b5   : > { %3344 = vst.msk [vmem:[#allocation3 + $0x98] sm:$0xf] %vm3110_vm0, %v6460_v60 }
 0x2b6   : > { %v3390_v38 = vld [vmem:[#allocation3 + $0xa4] sm:$0xf] }
 0x2b8   : > { %v3387_v21 = vld [vmem:[#allocation3 + $0x94] sm:$0xf] }
 0x2ba   : > { %v3391_v11 = vld [vmem:[#allocation3 + $0xa8] sm:$0xf] }
 0x2bb   : > { %v8941_v20 = vcombine.low %v3390_v38, %v3391_v11 }
 0x2bc   : > { %v3388_v35 = vld [vmem:[#allocation3 + $0x98] sm:$0xf] }
 0x2bd   : > { %v3777_v37 = vshrl.u32 %v8941_v20, 16  ;;  %v3780_v27 = vshll.u32 %v8941_v20, 16  ;;  %v8945_v23 = vcombine.low %v3387_v21, %v3388_v35 }
 0x2bf   : > { %v3779_v62 = vrot.slane %v3777_v37, 4  ;;  %v3782_v57 = vrot.slane %v3780_v27, 5  ;;  %v3769_v47 = vshrl.u32 %v8945_v23, 16  ;;  %v3772_v36 = vshll.u32 %v8945_v23, 16 }
 0x2c1   : > { %v3783_v31 = vor.u32 %v3782_v57, %v3779_v62  ;;  %v3771_v1 = vrot.slane %v3769_v47, 4  ;;  %v3774_v52 = vrot.slane %v3772_v36, 5 }
 0x2c3   : > { %3844 = vrot.lane.b32.xlu0 %v3783_v31, %s7042_s11  ;;  %v3775_v50 = vor.u32 %v3774_v52, %v3771_v1 }
 0x2c5   : > { %3842 = vrot.lane.b32.xlu1 %v3775_v50, %s7042_s11 }
 0x2c8   : > { %v6541_v2 = vpop.f32.mrf.mxu0 }
 0x2c9   : > { %v3040_v30 = vadd.f32 %v6541_v2, %v8789_v34 }
 0x2ca   : > { %v3031_v51 = vpop.f32.mrf.mxu0 }
 0x2cb   : > { %v3100_v58 = vmax.f32 %v3040_v30, 0.0  ;;  %v3032_v17 = vadd.f32 %v8789_v34, %v3031_v51 }
 0x2cc   : > { %v6542_v42 = vpop.f32.mrf.mxu0 }
 0x2cd   : > { %v6465_v59 = vpack.c.bf16 %v3100_v58, %v3100_v58  ;;  %v3098_v4 = vmax.f32 %v3032_v17, 0.0  ;;  %v3043_v29 = vadd.f32 %v6542_v42, %v8789_v34 }
 0x2ce   : > { %v3034_v13 = vpop.f32.mrf.mxu0 }
 0x2cf   : > { %3349 = vst.msk [vmem:[#allocation3 + $0xc4] sm:$0xf] %vm3110_vm0, %v6465_v59  ;;  %v6463_v22 = vpack.c.bf16 %v3098_v4, %v3098_v4  ;;  %v3101_v33 = vmax.f32 %v3043_v29, 0.0  ;;  %v3035_v24 = vadd.f32 %v8789_v34, %v3034_v13 }
 0x2d1   : > { %3347 = vst.msk [vmem:[#allocation3 + $0xb4] sm:$0xf] %vm3110_vm0, %v6463_v22  ;;  %v6466_v12 = vpack.c.bf16 %v3101_v33, %v3101_v33  ;;  %v3099_v32 = vmax.f32 %v3035_v24, 0.0 }
 0x2d3   : > { %3350 = vst.msk [vmem:[#allocation3 + $0xc8] sm:$0xf] %vm3110_vm0, %v6466_v12  ;;  %v6464_v15 = vpack.c.bf16 %v3099_v32, %v3099_v32 }
 0x2d5   : > { %3348 = vst.msk [vmem:[#allocation3 + $0xb8] sm:$0xf] %vm3110_vm0, %v6464_v15  ;;  %v3907_v15 = vrot.slane %v8817_v26, 5 }
 0x2d6   : > { %v3396_v6 = vld [vmem:[#allocation3 + $0xc4] sm:$0xf] }
 0x2d8   : > { %v3393_v40 = vld [vmem:[#allocation3 + $0xb4] sm:$0xf] }
 0x2da   : > { %v3397_v55 = vld [vmem:[#allocation3 + $0xc8] sm:$0xf] }
 0x2db   : > { %v8961_v8 = vcombine.low %v3396_v6, %v3397_v55  ;;  %v3910_v6 = vrot.slane %v8810_v63, 5 }
 0x2dc   : > { %v3394_v49 = vld [vmem:[#allocation3 + $0xb8] sm:$0xf] }
 0x2dd   : > { %v3793_v45 = vshrl.u32 %v8961_v8, 16  ;;  %v3796_v41 = vshll.u32 %v8961_v8, 16  ;;  %v8967_v0 = vcombine.low %v3393_v40, %v3394_v49 }
 0x2df   : > { %v3795_v48 = vrot.slane %v3793_v45, 4  ;;  %v3798_v14 = vrot.slane %v3796_v41, 5  ;;  %v3785_v10 = vshrl.u32 %v8967_v0, 16  ;;  %v3788_v18 = vshll.u32 %v8967_v0, 16 }
 0x2e0   : > { %v3916_v45 = vrot.slane %v8873_v28, 5  ;;  %v6805_v28 = vld [vmem:[#allocation3 + $0x7c] ss:$0 sps:$4 sm:$0x11]  }
 0x2e1   : > { %v3799_v19 = vor.u32 %v3798_v14, %v3795_v48  ;;  %v3787_v53 = vrot.slane %v3785_v10, 4  ;;  %v3790_v7 = vrot.slane %v3788_v18, 5 }
 0x2e3   : > { %3848 = vrot.lane.b32.xlu0 %v3799_v19, %s7042_s11  ;;  %v3791_v25 = vor.u32 %v3790_v7, %v3787_v53  ;;  %v3919_v7 = vrot.slane %v8899_v44, 5 }
 0x2e5   : > { %3846 = vrot.lane.b32.xlu1 %v3791_v25, %s7042_s11 }
 0x2e9   : > { %v6545_v16 = vpop.f32.mrf.mxu0 }
 0x2ea   : > { %v3056_v60 = vadd.f32 %v6545_v16, %v8789_v34 }
 0x2eb   : > { %v3047_v38 = vpop.f32.mrf.mxu0 }
 0x2ec   : > { %v3104_v11 = vmax.f32 %v3056_v60, 0.0  ;;  %v3048_v21 = vadd.f32 %v8789_v34, %v3047_v38  ;;  %v3922_v38 = vrot.slane %v8895_v39, 5 }
 0x2ed   : > { %v6546_v35 = vpop.f32.mrf.mxu0 }
 0x2ee   : > { %v6469_v37 = vpack.c.bf16 %v3104_v11, %v3104_v11  ;;  %v3102_v27 = vmax.f32 %v3048_v21, 0.0  ;;  %v3059_v62 = vadd.f32 %v6546_v35, %v8789_v34  ;;  %v3928_v11 = vrot.slane %v8915_v9, 5 }
 0x2ef   : > { %v3050_v57 = vpop.f32.mrf.mxu0 }
 0x2f0   : > { %3353 = vst.msk [vmem:[#allocation3 + $0xe4] sm:$0xf] %vm3110_vm0, %v6469_v37  ;;  %v6467_v47 = vpack.c.bf16 %v3102_v27, %v3102_v27  ;;  %v3105_v36 = vmax.f32 %v3059_v62, 0.0  ;;  %v3051_v31 = vadd.f32 %v8789_v34, %v3050_v57  ;;  %v6792_v27 = vld [vmem:[#allocation3 + $0xc] ss:$0 sps:$4 sm:$0x11]  }
 0x2f2   : > { %3351 = vst.msk [vmem:[#allocation3 + $0xd4] sm:$0xf] %vm3110_vm0, %v6467_v47  ;;  %v6470_v1 = vpack.c.bf16 %v3105_v36, %v3105_v36  ;;  %v3103_v52 = vmax.f32 %v3051_v31, 0.0  ;;  %v3931_v47 = vrot.slane %v8945_v23, 5 }
 0x2f4   : > { %3354 = vst.msk [vmem:[#allocation3 + $0xe8] sm:$0xf] %vm3110_vm0, %v6470_v1  ;;  %v6468_v50 = vpack.c.bf16 %v3103_v52, %v3103_v52  ;;  %v3905_v1 = vrot.slane %v6792_v27, 5 }
 0x2f6   : > { %3352 = vst.msk [vmem:[#allocation3 + $0xd8] sm:$0xf] %vm3110_vm0, %v6468_v50  ;;  %v3934_v50 = vrot.slane %v8941_v20, 5 }
 0x2f7   : > { %v3402_v2 = vld [vmem:[#allocation3 + $0xe4] sm:$0xf] }
 0x2f9   : > { %v3399_v58 = vld [vmem:[#allocation3 + $0xd4] sm:$0xf] }
 0x2fb   : > { %v3403_v30 = vld [vmem:[#allocation3 + $0xe8] sm:$0xf] }
 0x2fc   : > { %v8981_v51 = vcombine.low %v3402_v2, %v3403_v30  ;;  %v6793_v2 = vld [vmem:[#allocation3 + $0x1c] ss:$0 sps:$4 sm:$0x11]   ;;  %v3906_v30 = vsel %vm923_vm4, %v3904_v61, %v3905_v1  ;;  %v3535_v1 = vld [vmem:[#allocation3 + $0x118] sm:$0xf] }
 0x2fd   : > { %v3400_v17 = vld [vmem:[#allocation3 + $0xd8] sm:$0xf] }
 0x2fe   : > { %v3809_v42 = vshrl.u32 %v8981_v51, 16  ;;  %v3812_v59 = vshll.u32 %v8981_v51, 16  ;;  %v8985_v4 = vcombine.low %v3399_v58, %v3400_v17  ;;  %v3937_v58 = vrot.slane %v8967_v0, 5 }
 0x2ff   : > { %v3908_v17 = vrot.slane %v6793_v2, 5  ;;  %v3946_v0 = vrot.slane %v8981_v51, 5  ;;  %v9284_v51 = vld [vmem:[#allocation3 + $0xe4] sm:$0xf] }
 0x300   : > { %v3811_v29 = vrot.slane %v3809_v42, 4  ;;  %v3814_v13 = vrot.slane %v3812_v59, 5  ;;  %v3801_v22 = vshrl.u32 %v8985_v4, 16  ;;  %v3804_v33 = vshll.u32 %v8985_v4, 16 }
 0x301   : > { %v6794_v42 = vld [vmem:[#allocation3 + $0x2c] ss:$0 sps:$4 sm:$0x11]   ;;  %v6795_v59 = vld [vmem:[#allocation3 + $0xfc] ss:$0 sps:$4 sm:$0x11]  }
 0x302   : > { %v3815_v24 = vor.u32 %v3814_v13, %v3811_v29  ;;  %v3803_v12 = vrot.slane %v3801_v22, 4  ;;  %v3806_v32 = vrot.slane %v3804_v33, 5  ;;  %v3909_v29 = vsel %vm923_vm4, %v3907_v15, %v3908_v17  ;;  %v6796_v33 = vld [vmem:[#allocation3 + $0x3c] ss:$0 sps:$4 sm:$0x11]  }
 0x303   : > { %v10607_v13 = vrot.slane %v8961_v8, 5  ;;  %v3911_v22 = vrot.slane %v6794_v42, 5 }
 0x304   : > { %3852 = vrot.lane.b32.xlu0 %v3815_v24, %s7042_s11  ;;  %v3807_v56 = vor.u32 %v3806_v32, %v3803_v12  ;;  %v3950_v12 = vrot.slane %v6795_v59, 5  ;;  %v6810_v59 = vld [vmem:[#allocation3 + $0x9c] ss:$0 sps:$4 sm:$0x11]  }
 0x306   : > { %3850 = vrot.lane.b32.xlu1 %v3807_v56, %s7042_s11  ;;  %v6799_v56 = vld [vmem:[#allocation3 + $0x4c] ss:$0 sps:$4 sm:$0x11]  }
 0x308   : > { %3952 = vrot.lane.b32.xlu0 %v3904_v61, %s7044_s13 }
 0x30c   : > { %3956 = vrot.lane.b32.xlu0 %v3907_v15, %s7044_s13  ;;  %v3912_v15 = vsel %vm923_vm4, %v3910_v6, %v3911_v22  ;;  %v3511_v22 = vld [vmem:[#allocation3 + $0x98] sm:$0xf] }
 0x310   : > { %3960 = vrot.lane.b32.xlu0 %v3910_v6, %s7044_s13 }
 0x311   : > { %v6549_v55 = vpop.f32.mrf.mxu0 }
 0x312   : > { %v3072_v54 = vadd.f32 %v6549_v55, %v8789_v34  ;;  %v3914_v55 = vrot.slane %v6796_v33, 5 }
 0x313   : > { %v3063_v43 = vpop.f32.mrf.mxu0 }
 0x314   : > { %3964 = vrot.lane.b32.xlu0 %v3913_v5, %s7044_s13  ;;  %v3108_v40 = vmax.f32 %v3072_v54, 0.0  ;;  %v3064_v26 = vadd.f32 %v8789_v34, %v3063_v43  ;;  %v3915_v63 = vsel %vm923_vm4, %v3913_v5, %v3914_v55 }
 0x315   : > { %v6550_v49 = vpop.f32.mrf.mxu0 }
 0x316   : > { %v6473_v41 = vpack.c.bf16 %v3108_v40, %v3108_v40  ;;  %v3106_v48 = vmax.f32 %v3064_v26, 0.0  ;;  %v3075_v14 = vadd.f32 %v6550_v49, %v8789_v34  ;;  %v3446_v40 = vld [vmem:[#allocation3 + $0x88] sm:$0xf]  ;;  %v3917_v26 = vrot.slane %v6799_v56, 5 }
 0x317   : > { %v3066_v10 = vpop.f32.mrf.mxu0  ;;  %v6802_v49 = vld [vmem:[#allocation3 + $0x5c] ss:$0 sps:$4 sm:$0x11]   ;;  %v6323_v6 = vcombine.low %v3446_v40, %v3446_v40  ;;  %v6813_v56 = vld [vmem:[#allocation3 + $0xac] ss:$0 sps:$4 sm:$0x11]  }
 0x318   : > { %3968 = vrot.lane.b32.xlu0 %v3916_v45, %s7044_s13  ;;  %3357 = vst.msk [vmem:[#allocation3 + $0x104] sm:$0xf] %vm3110_vm0, %v6473_v41  ;;  %v6471_v18 = vpack.c.bf16 %v3106_v48, %v3106_v48  ;;  %v3067_v19 = vadd.f32 %v8789_v34, %v3066_v10  ;;  %v3109_v53 = vmax.f32 %v3075_v14, 0.0  ;;  %v3925_v34 = vrot.slane %v8919_v46, 5 }
 0x319   : > { %v3920_v14 = vrot.slane %v6802_v49, 5  ;;  %v6803_v10 = vld [vmem:[#allocation3 + $0x6c] ss:$0 sps:$4 sm:$0x11]   ;;  %v3935_v9 = vrot.slane %v6813_v56, 5 }
 0x31a   : > { %3355 = vst.msk [vmem:[#allocation3 + $0xf4] sm:$0xf] %vm3110_vm0, %v6471_v18  ;;  %v3107_v25 = vmax.f32 %v3067_v19, 0.0  ;;  %v6474_v16 = vpack.c.bf16 %v3109_v53, %v3109_v53  ;;  %v9083_v18 = vld [vmem:[#allocation3 + $0x84] sm:$0xf]  ;;  %v3918_v19 = vsel %vm923_vm4, %v3916_v45, %v3917_v26 }
 0x31b   : > { %v6814_v49 = vld [vmem:[#allocation3 + $0xbc] ss:$0 sps:$4 sm:$0x11]   ;;  %v3936_v23 = vsel %vm923_vm4, %v3934_v50, %v3935_v9 }
 0x31c   : > { %3972 = vrot.lane.b32.xlu0 %v3919_v7, %s7044_s13  ;;  %v6472_v60 = vpack.c.bf16 %v3107_v25, %v3107_v25  ;;  %3358 = vst.msk [vmem:[#allocation3 + $0x108] sm:$0xf] %vm3110_vm0, %v6474_v16  ;;  %v9089_v25 = vcombine.low %v9083_v18, %v3446_v40  ;;  %v6804_v16 = vld [vmem:[#allocation3 + $0x8c] ss:$0 sps:$4 sm:$0x11]  }
 0x31d   : > { %v9128_v40 = vld [vmem:[#allocation3 + $0x94] sm:$0xf]  ;;  %v6824_v56 = vld [vmem:[#allocation3 + $0x7c] ss:$0 sps:$4 sm:$0x11]  }
 0x31e   : > { %3356 = vst.msk [vmem:[#allocation3 + $0xf8] sm:$0xf] %vm3110_vm0, %v6472_v60  ;;  %v3921_v60 = vsel %vm923_vm4, %v3919_v7, %v3920_v14  ;;  %v4453_v45 = vrot.slane %v9089_v25, 5  ;;  %v6807_v7 = vld [vmem:[#allocation3 + $0x8c] ss:$0 sps:$4 sm:$0x11]  }
 0x31f   : > { %v9063_v61 = vld [vmem:[#allocation3 + $0x104] sm:$0xf]  ;;  %v3938_v14 = vrot.slane %v6814_v49, 5  ;;  %v6826_v9 = vld [vmem:[#allocation3 + $0xfc] ss:$0 sps:$4 sm:$0x11]  }
 0x320   : > { %3976 = vrot.lane.b32.xlu0 %v3922_v38, %s7044_s13 }
 0x321   : > { %v9028_v21 = vld [vmem:[#allocation3 + $0xf4] sm:$0xf]  ;;  %v3939_v20 = vsel %vm923_vm4, %v3937_v58, %v3938_v14 }
 0x323   : > { %v3470_v32 = vld [vmem:[#allocation3 + $0x108] sm:$0xf] }
 0x324   : > { %3980 = vrot.lane.b32.xlu0 %v3925_v34, %s7044_s13  ;;  %v9069_v54 = vcombine.low %v9063_v61, %v3470_v32  ;;  %v6339_v3 = vcombine.low %v3470_v32, %v3470_v32  ;;  %v3932_v32 = vrot.slane %v6810_v59, 5 }
 0x325   : > { %v9030_v35 = vld [vmem:[#allocation3 + $0xf8] sm:$0xf] }
 0x326   : > { %v9034_v37 = vcombine.low %v9028_v21, %v9030_v35  ;;  %v4345_v41 = vshrl.u32 %v9069_v54, 16  ;;  %v4348_v48 = vshll.u32 %v9069_v54, 16  ;;  %v3933_v26 = vsel %vm923_vm4, %v3931_v47, %v3932_v32 }
 0x328   : > { %3984 = vrot.lane.b32.xlu0 %v3928_v11, %s7044_s13  ;;  %v3817_v62 = vshrl.u32 %v9034_v37, 16  ;;  %v3820_v57 = vshll.u32 %v9034_v37, 16  ;;  %v3949_v24 = vrot.slane %v9034_v37, 5  ;;  %v4347_v53 = vrot.slane %v4345_v41, 4 }
 0x329   : > { %v4350_v5 = vrot.slane %v4348_v48, 5  ;;  %v6816_v48 = vld [vmem:[#allocation3 + $0x11c] ss:$0 sps:$4 sm:$0x11]  }
 0x32a   : > { %v3819_v36 = vrot.slane %v3817_v62, 4  ;;  %v3822_v31 = vrot.slane %v3820_v57, 5  ;;  %v3951_v43 = vsel %vm923_vm4, %v3949_v24, %v3950_v12  ;;  %v3923_v62 = vrot.slane %v6803_v10, 5 }
 0x32b   : > { %v4351_v27 = vor.u32 %v4350_v5, %v4347_v53  ;;  %v4454_v57 = vrot.slane %v6804_v16, 5  ;;  %v6818_v5 = vld [vmem:[#allocation3 + $0xec] ss:$0 sps:$4 sm:$0x11]  }
 0x32c   : > { %3988 = vrot.lane.b32.xlu0 %v3931_v47, %s7044_s13  ;;  %v3823_v52 = vor.u32 %v3822_v31, %v3819_v36  ;;  %v6806_v36 = vld [vmem:[#allocation3 + $0x10c] ss:$0 sps:$4 sm:$0x11]   ;;  %v9099_v31 = vld [vmem:[#allocation3 + $0x114] sm:$0xf]  ;;  %v3924_v44 = vsel %vm923_vm4, %v3922_v38, %v3923_v62  ;;  %v3929_v38 = vrot.slane %v6807_v7, 5 }
 0x32d   : > { %v4455_v2 = vsel %vm923_vm4, %v4453_v45, %v4454_v57  ;;  %v4478_v17 = vrot.slane %v6806_v36, 5  ;;  %v9111_v42 = vcombine.low %v9099_v31, %v3535_v1  ;;  %v3467_v62 = vld [vmem:[#allocation3 + $0xf8] sm:$0xf]  ;;  %v4281_v57 = vshrl.u32 %v9089_v25, 16 }
 0x32e   : > { %3854 = vrot.lane.b32.xlu1 %v3823_v52, %s7042_s11  ;;  %v3926_v52 = vrot.slane %v6805_v28, 5  ;;  %v3930_v46 = vsel %vm923_vm4, %v3928_v11, %v3929_v38  ;;  %s7050_s11 = smov 48   ;;  %v9134_v11 = vcombine.low %v9128_v40, %v3511_v22  ;;  %v4284_v36 = vshll.u32 %v9089_v25, 16  ;;  %v3443_v7 = vld [vmem:[#allocation3 + $0x78] sm:$0xf] }
 0x32f   : > { %v4873_v33 = vshrl.u32 %v9111_v42, 16  ;;  %v4876_v12 = vshll.u32 %v9111_v42, 16  ;;  %v6321_v38 = vcombine.low %v3443_v7, %v3443_v7 }
 0x330   : > { %3992 = vrot.lane.b32.xlu0 %v3934_v50, %s7044_s13  ;;  %v3927_v39 = vsel %vm923_vm4, %v3925_v34, %v3926_v52  ;;  %v6387_v34 = vcombine.low %v3511_v22, %v3511_v22  ;;  %v4981_v47 = vrot.slane %v9134_v11, 5  ;;  %v3468_v52 = vld [vmem:[#allocation3 + $0x100] sm:$0x8] }
 0x331   : > { %v4875_v55 = vrot.slane %v4873_v33, 4 }
 0x332   : > { %3954 = vrot.lane.b32.xlu1 %v3906_v30, %s7044_s13  ;;  %v4477_v30 = vrot.slane %v9069_v54, 5 }
 0x334   : > { %3996 = vrot.lane.b32.xlu0 %v3937_v58, %s7044_s13  ;;  %v3947_v58 = vrot.slane %v6818_v5, 5 }
 0x336   : > { %3958 = vrot.lane.b32.xlu1 %v3909_v29, %s7044_s13  ;;  %v4479_v29 = vsel %vm923_vm4, %v4477_v30, %v4478_v17  ;;  %v4286_v17 = vrot.slane %v4284_v36, 5 }
 0x338   : > { %4000 = vrot.lane.b32.xlu0 %v10607_v13, %s7044_s13 }
 0x33a   : > { %3962 = vrot.lane.b32.xlu1 %v3912_v15, %s7044_s13  ;;  %v6403_v15 = vcombine.low %v3535_v1, %v3535_v1  ;;  %v9170_v1 = vld [vmem:[#allocation3 + $0xf4] sm:$0xf] }
 0x33b   : > { %v9175_v37 = vcombine.low %v9170_v1, %v3467_v62 }
 0x33c   : > { %4014 = vrot.lane.b32.xlu0 %v3951_v43, %s7044_s13  ;;  %v4878_v43 = vrot.slane %v4876_v12, 5  ;;  %v9191_v12 = vld [vmem:[#allocation3 + $0x74] sm:$0xf] }
 0x33d   : > { %v4337_v59 = vshrl.u32 %v9175_v37, 16  ;;  %v9194_v32 = vcombine.low %v9191_v12, %v3443_v7  ;;  %v4474_v25 = vrot.slane %v9175_v37, 5 }
 0x33e   : > { %3966 = vrot.lane.b32.xlu1 %v3915_v63, %s7044_s13  ;;  %v6815_v63 = vld [vmem:[#allocation3 + $0x9c] ss:$0 sps:$4 sm:$0x11]   ;;  %v4879_v41 = vor.u32 %v4878_v43, %v4875_v55 }
 0x33f   : > { %v4982_v10 = vrot.slane %v6815_v63, 5  ;;  %v4450_v43 = vrot.slane %v9194_v32, 5  ;;  %v3509_v63 = vld [vmem:[#allocation3 + $0x90] sm:$0x8] }
 0x340   : > { %4174 = vrot.lane.b32.xlu0 %v6323_v6, %s7046_s17  ;;  %v9137_v6 = vpop.permute.xlu0 %3824  ;;  %v6386_v14 = vcombine.low %v3509_v63, %v9128_v40  ;;  %v3508_v40 = vld [vmem:[#allocation3 + $0x88] sm:$0xf] }
 0x341   : > { %10767 = vst [vmem:[#allocation13_spill] sm:$0xff] %v9137_v6  ;;  %v4983_v50 = vsel %vm923_vm4, %v4981_v47, %v4982_v10  ;;  %v4809_v10 = vshrl.u32 %v9134_v11, 16 }
 0x342   : > { %3970 = vrot.lane.b32.xlu1 %v3918_v19, %s7044_s13  ;;  %v5005_v19 = vrot.slane %v9111_v42, 5 }
 0x344   : > { %4206 = vrot.lane.b32.xlu0 %v6339_v3, %s7046_s17  ;;  %v5006_v3 = vrot.slane %v6816_v48, 5  ;;  %v9147_v53 = vpop.permute.xlu0 %3828  ;;  %v3532_v48 = vld [vmem:[#allocation3 + $0x108] sm:$0xf] }
 0x345   : > { %10768 = vst [vmem:[#allocation14_spill] sm:$0xff] %v9147_v53 }
 0x346   : > { %3974 = vrot.lane.b32.xlu1 %v3921_v60, %s7044_s13  ;;  %v5007_v16 = vsel %vm923_vm4, %v5005_v19, %v5006_v3  ;;  %v4812_v3 = vshll.u32 %v9134_v11, 16 }
 0x348   : > { %4382 = vrot.lane.b32.xlu0 %v4351_v27, %s7048_s7  ;;  %v9160_v60 = vpop.permute.xlu0 %3832  ;;  %v3444_v27 = vld [vmem:[#allocation3 + $0x80] sm:$0x8] }
 0x349   : > { %10769 = vst [vmem:[#allocation15_spill] sm:$0xff] %v9160_v60  ;;  %v6322_v28 = vcombine.low %v3444_v27, %v9083_v18  ;;  %v6338_v18 = vcombine.low %v3468_v52, %v9063_v61  ;;  %v4339_v61 = vrot.slane %v4337_v59, 4  ;;  %v4814_v27 = vrot.slane %v4812_v3, 5  ;;  %v9237_v52 = vld [vmem:[#allocation3 + $0x84] sm:$0xf] }
 0x34a   : > { %3978 = vrot.lane.b32.xlu1 %v3924_v44, %s7044_s13  ;;  %v4276_v3 = vshll.u32 %v9194_v32, 16  ;;  %v3380_v60 = vld [vmem:[#allocation3 + $0x70] sm:$0x8] }
 0x34c   : > { %4510 = vrot.lane.b32.xlu0 %v4455_v2, %s7049_s10  ;;  %v9172_v44 = vpop.permute.xlu0 %3836  ;;  %v4283_v2 = vrot.slane %v4281_v57, 4 }
 0x34e   : > { %3982 = vrot.lane.b32.xlu1 %v3927_v39, %s7044_s13  ;;  %v4287_v22 = vor.u32 %v4286_v17, %v4283_v2  ;;  %v9242_v2 = vcombine.low %v9237_v52, %v3508_v40  ;;  %v6832_v17 = vld [vmem:[#allocation3 + $0x8c] ss:$0 sps:$4 sm:$0x11]  }
 0x350   : > { %4542 = vrot.lane.b32.xlu0 %v4479_v29, %s7049_s10  ;;  %v9183_v39 = vpop.permute.xlu0 %3840  ;;  %v4340_v29 = vshll.u32 %v9175_v37, 16  ;;  %v9342_v37 = vld [vmem:[#allocation3 + $0xf4] sm:$0xf] }
 0x351   : > { %10770 = vst [vmem:[#allocation16_spill] sm:$0xff] %v9183_v39 }
 0x352   : > { %3986 = vrot.lane.b32.xlu1 %v3930_v46, %s7044_s13  ;;  %v6337_v46 = vcombine.low %v3467_v62, %v3467_v62  ;;  %v6385_v62 = vcombine.low %v3508_v40, %v3508_v40 }
 0x354   : > { %4702 = vrot.lane.b32.xlu0 %v6387_v34, %s7050_s11  ;;  %v9189_v33 = vpop.permute.xlu0 %3844  ;;  %v4342_v34 = vrot.slane %v4340_v29, 5 }
 0x355   : > { %10771 = vst [vmem:[#allocation17_spill] sm:$0xff] %v9189_v33 }
 0x356   : > { %3990 = vrot.lane.b32.xlu1 %v3933_v26, %s7044_s13  ;;  %v4343_v55 = vor.u32 %v4342_v34, %v4339_v61  ;;  %v4451_v26 = vrot.slane %v6824_v56, 5  ;;  %v6833_v61 = vld [vmem:[#allocation3 + $0x10c] ss:$0 sps:$4 sm:$0x11]  }
 0x358   : > { %4734 = vrot.lane.b32.xlu0 %v6403_v15, %s7050_s11  ;;  %v9198_v15 = vpop.permute.xlu0 %3848 }
 0x359   : > { %10772 = vst [vmem:[#allocation38_spill] sm:$0xff] %v9198_v15  ;;  %v9552_v15 = vld [vmem:[#allocation3 + $0xdc] ss:$0 sps:$4 sm:$0x11]  }
 0x35a   : > { %3994 = vrot.lane.b32.xlu1 %v3936_v23, %s7044_s13  ;;  %v3533_v23 = vld [vmem:[#allocation3 + $0x110] sm:$0x8] }
 0x35b   : > { %v6402_v5 = vcombine.low %v3533_v23, %v9099_v31 }
 0x35c   : > { %4910 = vrot.lane.b32.xlu0 %v4879_v41, %s7051_s12  ;;  %v4452_v41 = vsel %vm923_vm4, %v4450_v43, %v4451_v26  ;;  %v6835_v26 = vld [vmem:[#allocation3 + $0xdc] ss:$0 sps:$4 sm:$0x11]  }
 0x35e   : > { %3998 = vrot.lane.b32.xlu1 %v3939_v20, %s7044_s13  ;;  %v9218_v20 = vld [vmem:[#allocation3 + $0x104] sm:$0xf] }
 0x360   : > { %5038 = vrot.lane.b32.xlu0 %v4983_v50, %s7052_s14 }
 0x362   : > { %4012 = vrot.lane.b32.xlu1 %v3949_v24, %s7044_s13  ;;  %v3948_v24 = vsel %vm923_vm4, %v3946_v0, %v3947_v58 }
 0x364   : > { %5070 = vrot.lane.b32.xlu0 %v5007_v16, %s7052_s14  ;;  %v4811_v16 = vrot.slane %v4809_v10, 4  ;;  %v4273_v10 = vshrl.u32 %v9194_v32, 16 }
 0x366   : > { %4172 = vrot.lane.b32.xlu1 %v6322_v28, %s7046_s17  ;;  %v4815_v36 = vor.u32 %v4814_v27, %v4811_v16  ;;  %v3440_v16 = vld [vmem:[#allocation3 + $0x68] sm:$0xf] }
 0x368   : > { %4010 = vrot.lane.b32.xlu0 %v3948_v24, %s7044_s13  ;;  %v6401_v24 = vcombine.low %v3532_v48, %v3532_v48 }
 0x36a   : > { %4204 = vrot.lane.b32.xlu1 %v6338_v18, %s7046_s17 }
 0x36c   : > { %4170 = vrot.lane.b32.xlu0 %v6321_v38, %s7046_s17  ;;  %v9246_v38 = vpop.permute.xlu1 %3826 }
 0x36d   : > { %10776 = vst [vmem:[#allocation8_spill] sm:$0xff] %v9246_v38  ;;  %v3524_v38 = vld [vmem:[#allocation3 + $0xe0] sm:$0x8] }
 0x36e   : > { %4366 = vrot.lane.b32.xlu1 %v4287_v22, %s7048_s7  ;;  %v4978_v22 = vrot.slane %v9242_v2, 5 }
 0x370   : > { %4202 = vrot.lane.b32.xlu0 %v6337_v46, %s7046_s17  ;;  %v4979_v46 = vrot.slane %v6832_v17, 5  ;;  %v9255_v34 = vpop.permute.xlu1 %3830 }
 0x371   : > { %10778 = vst [vmem:[#allocation40_spill] sm:$0xff] %v9255_v34 }
 0x372   : > { %4508 = vrot.lane.b32.xlu1 %v4453_v45, %s7049_s10  ;;  %v4475_v45 = vrot.slane %v6826_v9, 5 }
 0x374   : > { %4380 = vrot.lane.b32.xlu0 %v4343_v55, %s7048_s7  ;;  %v4476_v50 = vsel %vm923_vm4, %v4474_v25, %v4475_v45  ;;  %v4980_v55 = vsel %vm923_vm4, %v4978_v22, %v4979_v46  ;;  %v9267_v9 = vpop.permute.xlu1 %3834  ;;  %v3944_v45 = vrot.slane %v6835_v26, 5  ;;  %v6842_v26 = vld [vmem:[#allocation3 + $0x6c] ss:$0 sps:$4 sm:$0x11]  }
 0x375   : > { %10780 = vst [vmem:[#allocation55_spill] sm:$0xff] %v9267_v9 }
 0x376   : > { %v9205_v49 = vpop.permute.xlu0 %3852  ;;  %4540 = vrot.lane.b32.xlu1 %v4477_v30, %s7049_s10  ;;  %v9223_v30 = vcombine.low %v9218_v20, %v3532_v48  ;;  %v3464_v48 = vld [vmem:[#allocation3 + $0xe8] sm:$0xf] }
 0x378   : > { %4506 = vrot.lane.b32.xlu0 %v4452_v41, %s7049_s10  ;;  %v4865_v28 = vshrl.u32 %v9223_v30, 16  ;;  %v4868_v57 = vshll.u32 %v9223_v30, 16  ;;  %v5002_v11 = vrot.slane %v9223_v30, 5  ;;  %v3441_v41 = vld [vmem:[#allocation3 + $0x70] sm:$0x8]  ;;  %v9279_v23 = vpop.permute.xlu1 %3838 }
 0x37a   : > { %v9220_v54 = vpop.permute.xlu0 %3952  ;;  %4700 = vrot.lane.b32.xlu1 %v6386_v14, %s7050_s11  ;;  %v4867_v7 = vrot.slane %v4865_v28, 4  ;;  %v4870_v18 = vrot.slane %v4868_v57, 5  ;;  %v6320_v14 = vcombine.low %v3441_v41, %v9191_v12  ;;  %v4278_v28 = vrot.slane %v4276_v3, 5 }
 0x37b   : > { %10773 = vst [vmem:[#allocation18_spill] sm:$0xff] %v9220_v54 }
 0x37c   : > { %4538 = vrot.lane.b32.xlu0 %v4476_v50, %s7049_s10  ;;  %v4871_v29 = vor.u32 %v4870_v18, %v4867_v7  ;;  %v3465_v50 = vld [vmem:[#allocation3 + $0xf0] sm:$0x8]  ;;  %v9296_v12 = vpop.permute.xlu1 %3842 }
 0x37d   : > { %10782 = vst [vmem:[#allocation12_spill] sm:$0xff] %v9296_v12  ;;  %v6336_v27 = vcombine.low %v3465_v50, %v9170_v1  ;;  %v6335_v1 = vcombine.low %v3464_v48, %v3464_v48  ;;  %v9433_v12 = vld [vmem:[#allocation3 + $0xd8] sm:$0xf] }
 0x37e   : > { %v9231_v58 = vpop.permute.xlu0 %3956  ;;  %4732 = vrot.lane.b32.xlu1 %v6402_v5, %s7050_s11  ;;  %v9289_v5 = vcombine.low %v9284_v51, %v3464_v48 }
 0x37f   : > { %10774 = vst [vmem:[#allocation39_spill] sm:$0xff] %v9231_v58 }
 0x380   : > { %4698 = vrot.lane.b32.xlu0 %v6385_v62, %s7050_s11  ;;  %v4275_v62 = vrot.slane %v4273_v10, 4  ;;  %v4332_v7 = vshll.u32 %v9289_v5, 16  ;;  %v9305_v18 = vpop.permute.xlu1 %3846  ;;  %v6844_v10 = vld [vmem:[#allocation3 + $0xec] ss:$0 sps:$4 sm:$0x11]  }
 0x381   : > { %10783 = vst [vmem:[#allocation56_spill] sm:$0xff] %v9305_v18  ;;  %v6948_v18 = vld [vmem:[#allocation3 + $0x78] sm:$0xf] }
 0x382   : > { %v9239_v31 = vpop.permute.xlu0 %3960  ;;  %4894 = vrot.lane.b32.xlu1 %v4815_v36, %s7051_s12  ;;  %v6319_v36 = vcombine.low %v3440_v16, %v3440_v16  ;;  %v4279_v17 = vor.u32 %v4278_v28, %v4275_v62 }
 0x383   : > { %10775 = vst [vmem:[#allocation19_spill] sm:$0xff] %v9239_v31 }
 0x384   : > { %4730 = vrot.lane.b32.xlu0 %v6401_v24, %s7050_s11  ;;  %v4329_v24 = vshrl.u32 %v9289_v5, 16  ;;  %v9316_v41 = vpop.permute.xlu1 %3850 }
 0x385   : > { %10785 = vst [vmem:[#allocation22_spill] sm:$0xff] %v9316_v41 }
 0x386   : > { %v9248_v59 = vpop.permute.xlu0 %3964  ;;  %5036 = vrot.lane.b32.xlu1 %v4981_v47, %s7052_s14  ;;  %v5003_v47 = vrot.slane %v6833_v61, 5  ;;  %v4331_v61 = vrot.slane %v4329_v24, 4  ;;  %v4804_v24 = vshll.u32 %v9242_v2, 16 }
 0x387   : > { %10777 = vst [vmem:[#allocation20_spill] sm:$0xff] %v9248_v59  ;;  %v3457_v59 = vld [vmem:[#allocation3 + $0xc4] sm:$0xf] }
 0x388   : > { %4908 = vrot.lane.b32.xlu0 %v4871_v29, %s7051_s12  ;;  %v5004_v42 = vsel %vm923_vm4, %v5002_v11, %v5003_v47  ;;  %v9307_v29 = vld [vmem:[#allocation3 + $0x64] sm:$0xf] }
 0x389   : > { %v9312_v47 = vcombine.low %v9307_v29, %v3440_v16  ;;  %v4472_v16 = vrot.slane %v6844_v10, 5 }
 0x38a   : > { %v9257_v56 = vpop.permute.xlu0 %3968  ;;  %5068 = vrot.lane.b32.xlu1 %v5005_v19, %s7052_s14  ;;  %v3943_v19 = vrot.slane %v8985_v4, 5  ;;  %v3462_v4 = vld [vmem:[#allocation3 + $0xe0] sm:$0x8] }
 0x38b   : > { %10779 = vst [vmem:[#allocation21_spill] sm:$0xff] %v9257_v56  ;;  %v10610_v48 = vrot.slane %v9312_v47, 5  ;;  %v9549_v56 = vld [vmem:[#allocation3 + $0x54] sm:$0xf] }
 0x38c   : > { %5034 = vrot.lane.b32.xlu0 %v4980_v55, %s7052_s14  ;;  %v3945_v40 = vsel %vm923_vm4, %v3943_v19, %v3944_v45  ;;  %v4334_v55 = vrot.slane %v4332_v7, 5  ;;  %v3530_v7 = vld [vmem:[#allocation3 + $0x100] sm:$0x8] }
 0x38e   : > { %v9269_v63 = vpop.permute.xlu0 %3972  ;;  %4008 = vrot.lane.b32.xlu1 %v3946_v0, %s7044_s13  ;;  %v4335_v45 = vor.u32 %v4334_v55, %v4331_v61  ;;  %v3505_v61 = vld [vmem:[#allocation3 + $0x78] sm:$0xf]  ;;  %v6400_v55 = vcombine.low %v3530_v7, %v9218_v20 }
 0x38f   : > { %10781 = vst [vmem:[#allocation11_spill] sm:$0xff] %v9269_v63  ;;  %v6383_v10 = vcombine.low %v3505_v61, %v3505_v61 }
 0x390   : > { %5066 = vrot.lane.b32.xlu0 %v5004_v42, %s7052_s14 }
 0x392   : > { %v9286_v0 = vpop.permute.xlu0 %3976  ;;  %4168 = vrot.lane.b32.xlu1 %v6320_v14, %s7046_s17  ;;  %v4448_v14 = vrot.slane %v6842_v26, 5 }
 0x394   : > { %4006 = vrot.lane.b32.xlu0 %v3945_v40, %s7044_s13  ;;  %v3506_v40 = vld [vmem:[#allocation3 + $0x80] sm:$0x8]  ;;  %v4449_v32 = vsel %vm923_vm4, %v10610_v48, %v4448_v14  ;;  %v4268_v48 = vshll.u32 %v9312_v47, 16 }
 0x395   : > { %v6384_v28 = vcombine.low %v3506_v40, %v9237_v52 }
 0x396   : > { %v9299_v57 = vpop.permute.xlu0 %3980  ;;  %4200 = vrot.lane.b32.xlu1 %v6336_v27, %s7046_s17  ;;  %v3529_v27 = vld [vmem:[#allocation3 + $0xf8] sm:$0xf]  ;;  %v4270_v39 = vrot.slane %v4268_v48, 5 }
 0x397   : > { %v6399_v20 = vcombine.low %v3529_v27, %v3529_v27 }
 0x398   : > { %4166 = vrot.lane.b32.xlu0 %v6319_v36, %s7046_s17  ;;  %v4801_v36 = vshrl.u32 %v9242_v2, 16 }
 0x39a   : > { %v9309_v46 = vpop.permute.xlu0 %3984  ;;  %4364 = vrot.lane.b32.xlu1 %v4279_v17, %s7048_s7  ;;  %v9347_v17 = vcombine.low %v9342_v37, %v3529_v27  ;;  %v4803_v26 = vrot.slane %v4801_v36, 4 }
 0x39b   : > { %10784 = vst [vmem:[#allocation41_spill] sm:$0xff] %v9309_v46 }
 0x39c   : > { %4198 = vrot.lane.b32.xlu0 %v6335_v1, %s7046_s17  ;;  %v4857_v40 = vshrl.u32 %v9347_v17, 16  ;;  %v10611_v2 = vrot.slane %v9347_v17, 5 }
 0x39e   : > { %v9318_v42 = vpop.permute.xlu0 %3988  ;;  %4504 = vrot.lane.b32.xlu1 %v4450_v43, %s7049_s10  ;;  %v10608_v43 = vrot.slane %v9289_v5, 5  ;;  %v4859_v36 = vrot.slane %v4857_v40, 4  ;;  %v6851_v40 = vld [vmem:[#allocation3 + $0xfc] ss:$0 sps:$4 sm:$0x11]  }
 0x39f   : > { %10786 = vst [vmem:[#allocation57_spill] sm:$0xff] %v9318_v42 }
 0x3a0   : > { %4378 = vrot.lane.b32.xlu0 %v4335_v45, %s7048_s7  ;;  %v9325_v3 = vpop.permute.xlu1 %3854  ;;  %v4473_v1 = vsel %vm923_vm4, %v10608_v43, %v4472_v16  ;;  %v4806_v45 = vrot.slane %v4804_v24, 5  ;;  %v6850_v43 = vld [vmem:[#allocation3 + $0x7c] ss:$0 sps:$4 sm:$0x11]  }
 0x3a2   : > { %v9327_v50 = vpop.permute.xlu0 %3992  ;;  %4536 = vrot.lane.b32.xlu1 %v4474_v25, %s7049_s10 }
 0x3a3   : > { %10787 = vst [vmem:[#allocation42_spill] sm:$0xff] %v9327_v50 }
 0x3a4   : > { %4502 = vrot.lane.b32.xlu0 %v4449_v32, %s7049_s10  ;;  %v9337_v62 = vpop.permute.xlu1 %3954  ;;  %v4860_v32 = vshll.u32 %v9347_v17, 16 }
 0x3a5   : > { %10788 = vst [vmem:[#allocation23_spill] sm:$0xff] %v9337_v62 }
 0x3a6   : > { %v9344_v25 = vpop.permute.xlu0 %3996  ;;  %4696 = vrot.lane.b32.xlu1 %v6384_v28, %s7050_s11  ;;  %v4807_v28 = vor.u32 %v4806_v45, %v4803_v26  ;;  %v4862_v24 = vrot.slane %v4860_v32, 5  ;;  %v4976_v45 = vrot.slane %v6850_v43, 5 }
 0x3a7   : > { %10789 = vst [vmem:[#allocation43_spill] sm:$0xff] %v9344_v25 }
 0x3a8   : > { %4534 = vrot.lane.b32.xlu0 %v4473_v1, %s7049_s10  ;;  %v9354_v52 = vpop.permute.xlu1 %3958  ;;  %v9365_v1 = vld [vmem:[#allocation3 + $0x74] sm:$0xf]  ;;  %v4863_v26 = vor.u32 %v4862_v24, %v4859_v36 }
 0x3a9   : > { %10790 = vst [vmem:[#allocation24_spill] sm:$0xff] %v9354_v52  ;;  %v9370_v7 = vcombine.low %v9365_v1, %v3505_v61  ;;  %v3436_v36 = vld [vmem:[#allocation3 + $0x54] sm:$0xf] }
 0x3aa   : > { %v9357_v14 = vpop.permute.xlu0 %4000  ;;  %4728 = vrot.lane.b32.xlu1 %v6400_v55, %s7050_s11 }
 0x3ab   : > { %10791 = vst [vmem:[#allocation44_spill] sm:$0xff] %v9357_v14  ;;  %v10609_v27 = vrot.slane %v9370_v7, 5 }
 0x3ac   : > { %4694 = vrot.lane.b32.xlu0 %v6383_v10, %s7050_s11  ;;  %v9363_v16 = vpop.permute.xlu1 %3962 }
 0x3ad   : > { %10792 = vst [vmem:[#allocation25_spill] sm:$0xff] %v9363_v16 }
 0x3ae   : > { %v9367_v13 = vpop.permute.xlu0 %4014  ;;  %4892 = vrot.lane.b32.xlu1 %v4807_v28, %s7051_s12  ;;  %v4977_v28 = vsel %vm923_vm4, %v10609_v27, %v4976_v45  ;;  %v3435_v45 = vld [vmem:[#allocation3 + $0x50] sm:$0x8]  ;;  %v4265_v27 = vshrl.u32 %v9312_v47, 16 }
 0x3af   : > { %v6316_v54 = vcombine.low %v3435_v45, %v3436_v36 }
 0x3b0   : > { %4726 = vrot.lane.b32.xlu0 %v6399_v20, %s7050_s11  ;;  %v9374_v55 = vpop.permute.xlu1 %3966  ;;  %v9394_v20 = vld [vmem:[#allocation3 + $0x58] sm:$0xf] }
 0x3b1   : > { %10793 = vst [vmem:[#allocation58_spill] sm:$0xff] %v9374_v55  ;;  %v9402_v30 = vcombine.low %v3436_v36, %v9394_v20 }
 0x3b2   : > { %v9376_v10 = vpop.permute.xlu0 %4174  ;;  %5032 = vrot.lane.b32.xlu1 %v4978_v22, %s7052_s14  ;;  %v5000_v22 = vrot.slane %v6851_v40, 5 }
 0x3b3   : > { %v4260_v46 = vshll.u32 %v9402_v30, 16 }
 0x3b4   : > { %4906 = vrot.lane.b32.xlu0 %v4863_v26, %s7051_s12  ;;  %v9383_v61 = vpop.permute.xlu1 %3970  ;;  %v3438_v26 = vld [vmem:[#allocation3 + $0x60] sm:$0x8] }
 0x3b5   : > { %10794 = vst [vmem:[#allocation59_spill] sm:$0xff] %v9383_v61  ;;  %v4262_v52 = vrot.slane %v4260_v46, 5 }
 0x3b6   : > { %v9385_v32 = vpop.permute.xlu0 %4206  ;;  %5064 = vrot.lane.b32.xlu1 %v5002_v11, %s7052_s14  ;;  %v5001_v11 = vsel %vm923_vm4, %v10611_v2, %v5000_v22  ;;  %v3459_v22 = vld [vmem:[#allocation3 + $0xd0] sm:$0x8] }
 0x3b8   : > { %5030 = vrot.lane.b32.xlu0 %v4977_v28, %s7052_s14  ;;  %v9397_v43 = vpop.permute.xlu1 %3974  ;;  %v6318_v28 = vcombine.low %v3438_v26, %v9307_v29  ;;  %v6334_v29 = vcombine.low %v3462_v4, %v9284_v51  ;;  %v4267_v26 = vrot.slane %v4265_v27, 4  ;;  %v10615_v27 = vrot.slane %v9402_v30, 5  ;;  %v3501_v4 = vld [vmem:[#allocation3 + $0x64] sm:$0xf] }
 0x3b9   : > { %10795 = vst [vmem:[#allocation60_spill] sm:$0xff] %v9397_v43  ;;  %v9568_v43 = vld [vmem:[#allocation3 + $0xc8] sm:$0xf] }
 0x3ba   : > { %v9399_v24 = vpop.permute.xlu0 %4382  ;;  %4004 = vrot.lane.b32.xlu1 %v3943_v19, %s7044_s13  ;;  %v4257_v19 = vshrl.u32 %v9402_v30, 16  ;;  %v4271_v42 = vor.u32 %v4270_v39, %v4267_v26  ;;  %v10798_v39 = vrot.slane %v9312_v47, 5  ;;  %v10800_v47 = vrot.slane %v9289_v5, 5  ;;  %v3500_v26 = vld [vmem:[#allocation3 + $0x60] sm:$0x8] }
 0x3bc   : > { %5062 = vrot.lane.b32.xlu0 %v5001_v11, %s7052_s14  ;;  %v9411_v40 = vpop.permute.xlu1 %3978  ;;  %v3460_v11 = vld [vmem:[#allocation3 + $0xd4] sm:$0xf]  ;;  %v4259_v45 = vrot.slane %v4257_v19, 4 }
 0x3bd   : > { %v6332_v36 = vcombine.low %v3459_v22, %v3460_v11  ;;  %v9440_v46 = vcombine.low %v3460_v11, %v9433_v12  ;;  %v3503_v11 = vld [vmem:[#allocation3 + $0x70] sm:$0x8] }
 0x3be   : > { %v9416_v62 = vpop.permute.xlu0 %4510  ;;  %4164 = vrot.lane.b32.xlu1 %v6318_v28, %s7046_s17 }
 0x3bf   : > { %v10617_v22 = vrot.slane %v9440_v46, 5 }
 0x3c0   : > { %4160 = vrot.lane.b32.xlu0 %v6316_v54, %s7046_s17  ;;  %v9422_v2 = vpop.permute.xlu1 %3982  ;;  %v4263_v54 = vor.u32 %v4262_v52, %v4259_v45  ;;  %v9448_v52 = vld [vmem:[#allocation3 + $0x68] sm:$0xf]  ;;  %v6382_v45 = vcombine.low %v3503_v11, %v9365_v1 }
 0x3c2   : > { %v9425_v6 = vpop.permute.xlu0 %4542  ;;  %4196 = vrot.lane.b32.xlu1 %v6334_v29, %s7046_s17  ;;  %v9459_v29 = vcombine.low %v3501_v4, %v9448_v52 }
 0x3c4   : > { %4192 = vrot.lane.b32.xlu0 %v6332_v36, %s7046_s17  ;;  %v9429_v28 = vpop.permute.xlu1 %3986  ;;  %v4785_v5 = vshrl.u32 %v9459_v29, 16 }
 0x3c5   : > { %10796 = vst [vmem:[#allocation45_spill] sm:$0xff] %v9429_v28  ;;  %v6380_v28 = vcombine.low %v3500_v26, %v3501_v4 }
 0x3c6   : > { %v9431_v58 = vpop.permute.xlu0 %4702  ;;  %4362 = vrot.lane.b32.xlu1 %v4271_v42, %s7048_s7  ;;  %v4787_v26 = vrot.slane %v4785_v5, 4  ;;  %v3433_v5 = vld [vmem:[#allocation3 + $0x44] sm:$0xf] }
 0x3c8   : > { %4360 = vrot.lane.b32.xlu0 %v4263_v54, %s7048_s7  ;;  %v9437_v51 = vpop.permute.xlu1 %3990  ;;  %v4793_v54 = vshrl.u32 %v9370_v7, 16 }
 0x3c9   : > { %10797 = vst [vmem:[#allocation26_spill] sm:$0xff] %v9437_v51  ;;  %v3527_v51 = vld [vmem:[#allocation3 + $0xf0] sm:$0x8] }
 0x3ca   : > { %v9442_v48 = vpop.permute.xlu0 %4734  ;;  %4500 = vrot.lane.b32.xlu1 %v10798_v39, %s7049_s10  ;;  %v4796_v39 = vshll.u32 %v9370_v7, 16  ;;  %v6398_v1 = vcombine.low %v3527_v51, %v9342_v37  ;;  %v4795_v11 = vrot.slane %v4793_v54, 4  ;;  %v10620_v54 = vrot.slane %v9459_v29, 5 }
 0x3cc   : > { %4496 = vrot.lane.b32.xlu0 %v10615_v27, %s7049_s10  ;;  %v9453_v42 = vpop.permute.xlu1 %3994  ;;  %v4798_v16 = vrot.slane %v4796_v39, 5  ;;  %v6864_v39 = vld [vmem:[#allocation3 + $0xcc] ss:$0 sps:$4 sm:$0x11]  }
 0x3cd   : > { %10799 = vst [vmem:[#allocation61_spill] sm:$0xff] %v9453_v42 }
 0x3ce   : > { %v9455_v19 = vpop.permute.xlu0 %4910  ;;  %4532 = vrot.lane.b32.xlu1 %v10800_v47, %s7049_s10  ;;  %v4788_v47 = vshll.u32 %v9459_v29, 16  ;;  %v4799_v33 = vor.u32 %v4798_v16, %v4795_v11  ;;  %v10802_v16 = vrot.slane %v9370_v7, 5  ;;  %v10803_v7 = vrot.slane %v9347_v17, 5  ;;  %v6871_v17 = vld [vmem:[#allocation3 + $0x5c] ss:$0 sps:$4 sm:$0x11]  }
 0x3d0   : > { %4528 = vrot.lane.b32.xlu0 %v10617_v22, %s7049_s10  ;;  %v9467_v36 = vpop.permute.xlu1 %3998  ;;  %v3525_v22 = vld [vmem:[#allocation3 + $0xe4] sm:$0xf]  ;;  %v4790_v31 = vrot.slane %v4788_v47, 5 }
 0x3d1   : > { %10801 = vst [vmem:[#allocation46_spill] sm:$0xff] %v9467_v36  ;;  %v6396_v4 = vcombine.low %v3524_v38, %v3525_v22  ;;  %v9489_v36 = vld [vmem:[#allocation3 + $0xe8] sm:$0xf] }
 0x3d2   : > { %v9472_v27 = vpop.permute.xlu0 %5038  ;;  %4692 = vrot.lane.b32.xlu1 %v6382_v45, %s7050_s11  ;;  %v9496_v38 = vcombine.low %v3525_v22, %v9489_v36 }
 0x3d4   : > { %4688 = vrot.lane.b32.xlu0 %v6380_v28, %s7050_s11  ;;  %v9478_v42 = vpop.permute.xlu1 %4012  ;;  %v4791_v28 = vor.u32 %v4790_v31, %v4787_v26  ;;  %v9504_v31 = vld [vmem:[#allocation3 + $0x48] sm:$0xf]  ;;  %v10622_v47 = vrot.slane %v9496_v38, 5 }
 0x3d5   : > { %v9515_v11 = vcombine.low %v3433_v5, %v9504_v31 }
 0x3d6   : > { %v9481_v50 = vpop.permute.xlu0 %5070  ;;  %4724 = vrot.lane.b32.xlu1 %v6398_v1, %s7050_s11  ;;  %v3941_v1 = vrot.slane %v6864_v39, 5 }
 0x3d7   : > { %v4249_v55 = vshrl.u32 %v9515_v11, 16  ;;  %v4252_v25 = vshll.u32 %v9515_v11, 16 }
 0x3d8   : > { %4720 = vrot.lane.b32.xlu0 %v6396_v4, %s7050_s11  ;;  %v9485_v45 = vpop.permute.xlu1 %4172  ;;  %v3432_v4 = vld [vmem:[#allocation3 + $0x40] sm:$0x8] }
 0x3d9   : > { %v4254_v14 = vrot.slane %v4252_v25, 5  ;;  %v6333_v25 = vcombine.low %v9433_v12, %v9433_v12  ;;  %v4441_v12 = vrot.slane %v9515_v11, 5 }
 0x3da   : > { %v9487_v53 = vpop.permute.xlu0 %4010  ;;  %4890 = vrot.lane.b32.xlu1 %v4799_v33, %s7051_s12 }
 0x3dc   : > { %4888 = vrot.lane.b32.xlu0 %v4791_v28, %s7051_s12  ;;  %v9493_v37 = vpop.permute.xlu1 %4204 }
 0x3de   : > { %v9498_v51 = vpop.permute.xlu0 %4170  ;;  %5028 = vrot.lane.b32.xlu1 %v10802_v16, %s7052_s14  ;;  %v10804_v16 = vrot.slane %v8961_v8, 5  ;;  %v6317_v8 = vcombine.low %v9394_v20, %v9394_v20  ;;  %v4445_v20 = vrot.slane %v6871_v17, 5  ;;  %v6275_v17 = vcombine.low %v9030_v35, %v9030_v35  ;;  %v6949_v35 = vld [vmem:[#allocation3 + $0x74] sm:$0xf] }
 0x3df   : > { %v6258_v9 = vcombine.low %v3380_v60, %v6949_v35 }
 0x3e0   : > { %5024 = vrot.lane.b32.xlu0 %v10620_v54, %s7052_s14  ;;  %v9509_v33 = vpop.permute.xlu1 %4366  ;;  %v3942_v39 = vsel %vm923_vm4, %v10804_v16, %v3941_v1  ;;  %v6314_v54 = vcombine.low %v3432_v4, %v3433_v5  ;;  %v4321_v5 = vshrl.u32 %v9440_v46, 16  ;;  %v4324_v1 = vshll.u32 %v9440_v46, 16  ;;  %v9540_v4 = vld [vmem:[#allocation3 + $0x58] sm:$0xf] }
 0x3e2   : > { %v9511_v22 = vpop.permute.xlu0 %4202  ;;  %5060 = vrot.lane.b32.xlu1 %v10803_v7, %s7052_s14  ;;  %v3456_v7 = vld [vmem:[#allocation3 + $0xc0] sm:$0x8] }
 0x3e3   : > { %v6330_v61 = vcombine.low %v3456_v7, %v3457_v59 }
 0x3e4   : > { %5056 = vrot.lane.b32.xlu0 %v10622_v47, %s7052_s14  ;;  %v9523_v26 = vpop.permute.xlu1 %4508  ;;  %v6259_v47 = vcombine.low %v6948_v18, %v6948_v18  ;;  %v4251_v18 = vrot.slane %v4249_v55, 4  ;;  %v4323_v55 = vrot.slane %v4321_v5, 4  ;;  %v10805_v5 = vrot.slane %v9402_v30, 5 }
 0x3e6   : > { %v9525_v28 = vpop.permute.xlu0 %4380  ;;  %4002 = vrot.lane.b32.xlu1 %v3942_v39, %s7044_s13  ;;  %v5111_v16 = vsel %vm2173_vm7, %v6259_v47, %v9279_v23  ;;  %v9556_v47 = vcombine.low %v9549_v56, %v9540_v4  ;;  %v4255_v63 = vor.u32 %v4254_v14, %v4251_v18  ;;  %v4469_v14 = vrot.slane %v9552_v15, 5 }
 0x3e8   : > { %4156 = vrot.lane.b32.xlu0 %v6314_v54, %s7046_s17  ;;  %v9534_v34 = vpop.permute.xlu1 %4540  ;;  %v5183_v54 = vsel %vm2303_vm9, %v5111_v16, %v9422_v2  ;;  %v4326_v2 = vrot.slane %v4324_v1, 5  ;;  %v3404_v16 = vld [vmem:[#allocation3 + $0xf0] sm:$0x8]  ;;  %v4446_v1 = vsel %vm923_vm4, %v10805_v5, %v4445_v20  ;;  %v4777_v18 = vshrl.u32 %v9556_v47, 16 }
 0x3ea   : > { %v9544_v39 = vpop.permute.xlu0 %4506  ;;  %4162 = vrot.lane.b32.xlu1 %v6317_v8, %s7046_s17 }
 0x3ec   : > { %4188 = vrot.lane.b32.xlu0 %v6330_v61, %s7046_s17  ;;  %v4701_v7 = vpop.permute.xlu1 %4700  ;;  %v5247_v61 = vsel %vm2417_vm11, %v5183_v54, %v9376_v10  ;;  %v5151_v10 = vsel %vm2173_vm7, %v6275_v17, %v9325_v3  ;;  %v6274_v54 = vcombine.low %v3404_v16, %v9028_v21  ;;  %v5109_v21 = vsel %vm2173_vm7, %v6258_v9, %v9279_v23 }
 0x3ed   : > { %v5303_v41 = vsel %vm2531_vm13, %v5247_v61, %v9509_v33  ;;  %v4327_v61 = vor.u32 %v4326_v2, %v4323_v55 }
 0x3ee   : > { %v9564_v8 = vpop.permute.xlu0 %4538  ;;  %4194 = vrot.lane.b32.xlu1 %v6333_v25, %s7046_s17  ;;  %v5215_v25 = vsel %vm2303_vm9, %v5151_v10, %v9367_v13  ;;  %v5360_v20 = vsel %vm5328_vm2, %v5303_v41, %v9416_v62  ;;  %v5149_v13 = vsel %vm2173_vm7, %v6274_v54, %v9325_v3  ;;  %v5181_v41 = vsel %vm2303_vm9, %v5109_v21, %v9299_v57 }
 0x3ef   : > { %v5279_v60 = vsel %vm2417_vm11, %v5215_v25, %v9385_v32  ;;  %v5213_v62 = vsel %vm2303_vm9, %v5149_v13, %v9478_v42  ;;  %v5245_v23 = vsel %vm2417_vm11, %v5181_v41, %v9485_v45  ;;  %v3497_v45 = vld [vmem:[#allocation3 + $0x50] sm:$0x8] }
 0x3f0   : > { %4358 = vrot.lane.b32.xlu0 %v4255_v63, %s7048_s7  ;;  %v4733_v30 = vpop.permute.xlu1 %4732  ;;  %v9588_v63 = vcombine.low %v3457_v59, %v9568_v43  ;;  %v5327_v55 = vsel %vm2531_vm13, %v5279_v60, %v9399_v24  ;;  %v5277_v57 = vsel %vm2417_vm11, %v5213_v62, %v9493_v37  ;;  %v5302_v42 = vsel %vm2531_vm13, %v5245_v23, %v9509_v33  ;;  %v3521_v13 = vld [vmem:[#allocation3 + $0xd0] sm:$0x8] }
 0x3f1   : > { %v5392_v59 = vsel %vm5328_vm2, %v5327_v55, %v9425_v6  ;;  %v5425_v6 = vsel %vm5393_vm5, %v5360_v20, %v9431_v58  ;;  %v5358_v58 = vsel %vm5328_vm2, %v5302_v42, %v9523_v26  ;;  %v4780_v33 = vshll.u32 %v9556_v47, 16 }
 0x3f2   : > { %v9590_v15 = vpop.permute.xlu0 %4698  ;;  %4376 = vrot.lane.b32.xlu1 %v4327_v61, %s7048_s7  ;;  %v5457_v9 = vsel %vm5393_vm5, %v5392_v59, %v9442_v48  ;;  %v4465_v48 = vrot.slane %v9588_v63, 5  ;;  %v5326_v5 = vsel %vm2531_vm13, %v5277_v57, %v9399_v24  ;;  %v5423_v35 = vsel %vm5393_vm5, %v5358_v58, %v4701_v7 }
 0x3f3   : > { %v5506_v32 = vsel %vm5458_vm6, %v5457_v9, %v9455_v19  ;;  %v6378_v24 = vcombine.low %v3497_v45, %v9549_v56  ;;  %v6381_v56 = vcombine.low %v9448_v52, %v9448_v52  ;;  %v4782_v62 = vrot.slane %v4780_v33, 5 }
 0x3f4   : > { %4492 = vrot.lane.b32.xlu0 %v4441_v12, %s7049_s10  ;;  %v4895_v3 = vpop.permute.xlu1 %4894  ;;  %v5571_v37 = vsel %vm5507_vm8, %v5506_v32, %v9481_v50  ;;  %v5390_v50 = vsel %vm5328_vm2, %v5326_v5, %v9534_v34 }
 0x3f5   : > { %v5482_v2 = vsel %vm5458_vm6, %v5425_v6, %v4895_v3  ;;  %v5804_v61 = vshrl.u32 %v5571_v37, 16  ;;  %v5807_v7 = vshll.u32 %v5571_v37, 16  ;;  %v5455_v60 = vsel %vm5393_vm5, %v5390_v50, %v4733_v30 }
 0x3f6   : > { %v9621_v16 = vpop.permute.xlu0 %4730  ;;  %v5539_v17 = vsel %vm5507_vm8, %v5482_v2, %v9472_v27  ;;  %4498 = vrot.lane.b32.xlu1 %v4446_v1, %s7049_s10  ;;  %v5481_v27 = vsel %vm5458_vm6, %v5423_v35, %v4895_v3  ;;  %v10806_v1 = vrot.slane %v9440_v46, 5  ;;  %v3522_v46 = vld [vmem:[#allocation3 + $0xd4] sm:$0xf]  ;;  %v4849_v30 = vshrl.u32 %v9496_v38, 16 }
 0x3f7   : > { %v5684_v10 = vshrl.u32 %v5539_v17, 16  ;;  %v5687_v54 = vshll.u32 %v5539_v17, 16  ;;  %v5505_v57 = vsel %vm5458_vm6, %v5455_v60, %v9455_v19  ;;  %v4852_v3 = vshll.u32 %v9496_v38, 16 }
 0x3f8   : > { %4524 = vrot.lane.b32.xlu0 %v4465_v48, %s7049_s10  ;;  %v5037_v26 = vpop.permute.xlu1 %5036  ;;  %v4470_v25 = vsel %vm923_vm4, %v10806_v1, %v4469_v14  ;;  %v4779_v14 = vrot.slane %v4777_v18, 4  ;;  %v5806_v32 = vrot.slane %v5804_v61, 3  ;;  %v5809_v42 = vrot.slane %v5807_v7, 4  ;;  %v6879_v1 = vld [vmem:[#allocation3 + $0x6c] ss:$0 sps:$4 sm:$0x11]  }
 0x3f9   : > { %v5537_v20 = vsel %vm5507_vm8, %v5481_v27, %v5037_v26  ;;  %v5686_v55 = vrot.slane %v5684_v10, 3  ;;  %v5689_v34 = vrot.slane %v5687_v54, 4  ;;  %v6394_v37 = vcombine.low %v3521_v13, %v3522_v46 }
 0x3fa   : > { %v9647_v21 = vpop.permute.xlu0 %4908  ;;  %v5677_v41 = vshrl.u32 %v5537_v20, 16  ;;  %v5680_v59 = vshll.u32 %v5537_v20, 16  ;;  %4530 = vrot.lane.b32.xlu1 %v4470_v25, %s7049_s10  ;;  %v6397_v19 = vcombine.low %v9489_v36, %v9489_v36  ;;  %v4851_v33 = vrot.slane %v4849_v30, 4  ;;  %v9669_v25 = vld [vmem:[#allocation3 + $0xd8] sm:$0xf] }
 0x3fb   : > { %v5690_v17 = vor.u32 %v5689_v34, %v5686_v55  ;;  %v4854_v54 = vrot.slane %v4852_v3, 5  ;;  %v4783_v26 = vor.u32 %v4782_v62, %v4779_v14  ;;  %v5810_v61 = vor.u32 %v5809_v42, %v5806_v32  ;;  %v3430_v14 = vld [vmem:[#allocation3 + $0x34] sm:$0xf]  ;;  %v3429_v3 = vld [vmem:[#allocation3 + $0x30] sm:$0x8] }
 0x3fc   : > { %4684 = vrot.lane.b32.xlu0 %v6378_v24, %s7050_s11  ;;  %v5679_v9 = vrot.slane %v5677_v41, 3  ;;  %v5682_v23 = vrot.slane %v5680_v59, 4  ;;  %v5069_v6 = vpop.permute.xlu1 %5068  ;;  %v9677_v20 = vcombine.low %v3522_v46, %v9669_v25  ;;  %v4969_v34 = vrot.slane %v9556_v47, 5  ;;  %v6880_v59 = vld [vmem:[#allocation3 + $0xec] ss:$0 sps:$4 sm:$0x11]  }
 0x3fd   : > { %v5569_v2 = vsel %vm5507_vm8, %v5505_v57, %v5069_v6  ;;  %v4855_v60 = vor.u32 %v4854_v54, %v4851_v33  ;;  %v4973_v41 = vrot.slane %v6879_v1, 5  ;;  %v10807_v30 = vrot.slane %v9459_v29, 5  ;;  %v9724_v1 = vld [vmem:[#allocation3 + $0x48] sm:$0xf] }
 0x3fe   : > { %v9658_v45 = vpop.permute.xlu0 %5034  ;;  %v5683_v52 = vor.u32 %v5682_v23, %v5679_v9  ;;  %v5797_v18 = vshrl.u32 %v5569_v2, 16  ;;  %v5800_v58 = vshll.u32 %v5569_v2, 16  ;;  %4690 = vrot.lane.b32.xlu1 %v6381_v56, %s7050_s11  ;;  %v9685_v56 = vld [vmem:[#allocation3 + $0x38] sm:$0xf]  ;;  %v4993_v23 = vrot.slane %v9677_v20, 5 }
 0x3ff   : > { %v4974_v9 = vsel %vm923_vm4, %v10807_v30, %v4973_v41  ;;  %v4997_v57 = vrot.slane %v6880_v59, 5  ;;  %v9699_v6 = vcombine.low %v3430_v14, %v9685_v56  ;;  %v10808_v29 = vrot.slane %v9496_v38, 5  ;;  %v6950_v59 = vld [vmem:[#allocation3 + $0x68] sm:$0xf] }
 0x400   : > { %4716 = vrot.lane.b32.xlu0 %v6394_v37, %s7050_s11  ;;  %v5799_v5 = vrot.slane %v5797_v18, 3  ;;  %v5802_v35 = vrot.slane %v5800_v58, 4  ;;  %v9664_v10 = vpop.permute.xlu1 %4008  ;;  %v5691_v50 = vsel %vm2596_vm14, %v5683_v52, %v5690_v17  ;;  %v6312_v37 = vcombine.low %v3429_v3, %v3430_v14  ;;  %v3453_v58 = vld [vmem:[#allocation3 + $0xb0] sm:$0x8]  ;;  %v3454_v17 = vld [vmem:[#allocation3 + $0xb4] sm:$0xf] }
 0x401   : > { %v5845_v55 = vsel %vm5819_vm10, %v5691_v50, 0  ;;  %v4998_v2 = vsel %vm923_vm4, %v10808_v29, %v4997_v57  ;;  %v4241_v52 = vshrl.u32 %v9699_v6, 16  ;;  %v4244_v18 = vshll.u32 %v9699_v6, 16  ;;  %v9740_v57 = vld [vmem:[#allocation3 + $0xb8] sm:$0xf] }
 0x402   : > { %v9667_v27 = vpop.permute.xlu0 %5066  ;;  %4722 = vrot.lane.b32.xlu1 %v6397_v19, %s7050_s11  ;;  %v5803_v24 = vor.u32 %v5802_v35, %v5799_v5  ;;  %v6315_v33 = vcombine.low %v9504_v31, %v9504_v31  ;;  %v4313_v38 = vshrl.u32 %v9588_v63, 16  ;;  %v4316_v5 = vshll.u32 %v9588_v63, 16  ;;  %v3377_v29 = vld [vmem:[#allocation3 + $0x60] sm:$0x8] }
 0x403   : > { %v6328_v54 = vcombine.low %v3453_v58, %v3454_v17  ;;  %v4243_v50 = vrot.slane %v4241_v52, 4  ;;  %v6331_v31 = vcombine.low %v9568_v43, %v9568_v43  ;;  %v6257_v14 = vcombine.low %v6950_v59, %v6950_v59  ;;  %v6952_v59 = vld [vmem:[#allocation3 + $0x64] sm:$0xf] }
 0x404   : > { %4886 = vrot.lane.b32.xlu0 %v4783_v26, %s7051_s12  ;;  %v9673_v36 = vpop.permute.xlu1 %4168  ;;  %v5811_v7 = vsel %vm2596_vm14, %v5803_v24, %v5810_v61  ;;  %v4246_v26 = vrot.slane %v4244_v18, 5  ;;  %v6887_v24 = vld [vmem:[#allocation3 + $0x4c] ss:$0 sps:$4 sm:$0x11]   ;;  %v9728_v61 = vld [vmem:[#allocation3 + $0x44] sm:$0xf] }
 0x405   : > { %6552 = vmatprep.subr.msk.bf16.mxu1 %vm5819_vm10, %v5811_v7  ;;  %v9736_v41 = vcombine.low %v9728_v61, %v9724_v1  ;;  %v5106_v3 = vsel %vm2173_vm7, %v6257_v14, %v9172_v44  ;;  %v4442_v43 = vrot.slane %v6887_v24, 5  ;;  %v3494_v18 = vld [vmem:[#allocation3 + $0x40] sm:$0x8]  ;;  %v4438_v24 = vrot.slane %v9699_v6, 5 }
 0x406   : > { %v9680_v13 = vpop.permute.xlu0 %4006  ;;  %4904 = vrot.lane.b32.xlu1 %v4855_v60, %s7051_s12  ;;  %6496 = vmatpush3.bf16.xpose.msra.mxu1 %v5845_v55  ;;  %v4315_v60 = vrot.slane %v4313_v38, 4  ;;  %v4318_v55 = vrot.slane %v4316_v5, 5  ;;  %v6951_v38 = vld [vmem:[#allocation3 + $0xe8] sm:$0xf]  ;;  %v6256_v14 = vcombine.low %v3377_v29, %v6952_v59 }
 0x407   : > { %v4769_v58 = vshrl.u32 %v9736_v41, 16  ;;  %v6273_v5 = vcombine.low %v6951_v38, %v6951_v38 }
 0x408   : > { %5020 = vrot.lane.b32.xlu0 %v4969_v34, %s7052_s14  ;;  %v9690_v46 = vpop.permute.xlu1 %4200  ;;  %v4319_v52 = vor.u32 %v4318_v55, %v4315_v60  ;;  %v4772_v60 = vshll.u32 %v9736_v41, 16 }
 0x409   : > { %v5146_v55 = vsel %vm2173_vm7, %v6273_v5, %v9205_v49  ;;  %v9772_v38 = vrot.slane %v4769_v58, 4 }
 0x40a   : > { %v9692_v62 = vpop.permute.xlu0 %4166  ;;  %5026 = vrot.lane.b32.xlu1 %v4974_v9, %s7052_s14  ;;  %v4247_v9 = vor.u32 %v4246_v26, %v4243_v50  ;;  %v9752_v50 = vcombine.low %v3454_v17, %v9740_v57  ;;  %v6376_v17 = vcombine.low %v3494_v18, %v9728_v61 }
 0x40c   : > { %5052 = vrot.lane.b32.xlu0 %v4993_v23, %s7052_s14  ;;  %v9705_v32 = vpop.permute.xlu1 %4364 }
 0x40e   : > { %v9707_v42 = vpop.permute.xlu0 %4198  ;;  %5058 = vrot.lane.b32.xlu1 %v4998_v2, %s7052_s14  ;;  %v5179_v2 = vsel %vm2303_vm9, %v5106_v3, %v9411_v40 }
 0x410   : > { %4152 = vrot.lane.b32.xlu0 %v6312_v37, %s7046_s17  ;;  %v9716_v19 = vpop.permute.xlu1 %4504 }
 0x412   : > { %v9722_v35 = vpop.permute.xlu0 %4378  ;;  %4158 = vrot.lane.b32.xlu1 %v6315_v33, %s7046_s17  ;;  %v3401_v33 = vld [vmem:[#allocation3 + $0xe0] sm:$0x8] }
 0x414   : > { %4184 = vrot.lane.b32.xlu0 %v6328_v54, %s7046_s17  ;;  %v9730_v7 = vpop.permute.xlu1 %4536  ;;  %v5243_v54 = vsel %vm2417_vm11, %v5179_v2, %v9498_v51  ;;  %v4443_v51 = vsel %vm923_vm4, %v4441_v12, %v4442_v43  ;;  %v5211_v2 = vsel %vm2303_vm9, %v5146_v55, %v9487_v53  ;;  %v4462_v12 = vrot.slane %v9752_v50, 5 }
 0x415   : > { %v5300_v40 = vsel %vm2531_vm13, %v5243_v54, %v9705_v32  ;;  %v5275_v5 = vsel %vm2417_vm11, %v5211_v2, %v9511_v22  ;;  %v5104_v43 = vsel %vm2173_vm7, %v6256_v14, %v9172_v44  ;;  %v9788_v22 = vrot.slane %v4772_v60, 5 }
 0x416   : > { %v9738_v30 = vpop.permute.xlu0 %4502  ;;  %4190 = vrot.lane.b32.xlu1 %v6331_v31, %s7046_s17  ;;  %v6888_v31 = vld [vmem:[#allocation3 + $0xcc] ss:$0 sps:$4 sm:$0x11]   ;;  %v5356_v11 = vsel %vm5328_vm2, %v5300_v40, %v9544_v39  ;;  %v5324_v29 = vsel %vm2531_vm13, %v5275_v5, %v9525_v28  ;;  %v5177_v39 = vsel %vm2303_vm9, %v5104_v43, %v9286_v0  ;;  %v6379_v44 = vcombine.low %v9540_v4, %v9540_v4 }
 0x417   : > { %v4466_v61 = vrot.slane %v6888_v31, 5  ;;  %v5388_v18 = vsel %vm5328_vm2, %v5324_v29, %v9564_v8  ;;  %v5421_v8 = vsel %vm5393_vm5, %v5356_v11, %v9590_v15 }
 0x418   : > { %4356 = vrot.lane.b32.xlu0 %v4247_v9, %s7048_s7  ;;  %v4697_v37 = vpop.permute.xlu1 %4696  ;;  %v6953_v9 = vld [vmem:[#allocation3 + $0xe4] sm:$0xf] }
 0x419   : > { %v6272_v3 = vcombine.low %v3401_v33, %v6953_v9  ;;  %v5241_v33 = vsel %vm2417_vm11, %v5177_v39, %v9673_v36  ;;  %v3518_v36 = vld [vmem:[#allocation3 + $0xc0] sm:$0x8]  ;;  %v6895_v39 = vld [vmem:[#allocation3 + $0x5c] ss:$0 sps:$4 sm:$0x11]  }
 0x41a   : > { %v9754_v26 = vpop.permute.xlu0 %4534  ;;  %4374 = vrot.lane.b32.xlu1 %v4319_v52, %s7048_s7  ;;  %v5299_v40 = vsel %vm2531_vm13, %v5241_v33, %v9705_v32  ;;  %v4841_v32 = vshrl.u32 %v9677_v20, 16 }
 0x41b   : > { %v5144_v53 = vsel %vm2173_vm7, %v6272_v3, %v9205_v49  ;;  %v5453_v49 = vsel %vm5393_vm5, %v5388_v18, %v9621_v16  ;;  %v4467_v16 = vsel %vm923_vm4, %v4465_v48, %v4466_v61  ;;  %v5354_v55 = vsel %vm5328_vm2, %v5299_v40, %v9716_v19 }
 0x41c   : > { %4488 = vrot.lane.b32.xlu0 %v4438_v24, %s7049_s10  ;;  %v4729_v52 = vpop.permute.xlu1 %4728  ;;  %v5209_v58 = vsel %vm2303_vm9, %v5144_v53, %v9664_v10  ;;  %v5503_v31 = vsel %vm5458_vm6, %v5453_v49, %v9647_v21  ;;  %v5419_v48 = vsel %vm5393_vm5, %v5354_v55, %v4697_v37  ;;  %v4844_v3 = vshll.u32 %v9677_v20, 16 }
 0x41d   : > { %v5273_v0 = vsel %vm2417_vm11, %v5209_v58, %v9690_v46  ;;  %v3519_v46 = vld [vmem:[#allocation3 + $0xc4] sm:$0xf]  ;;  %v5567_v15 = vsel %vm5507_vm8, %v5503_v31, %v9667_v27  ;;  %v4843_v29 = vrot.slane %v4841_v32, 4  ;;  %v4305_v20 = vshrl.u32 %v9752_v50, 16 }
 0x41e   : > { %v9778_v54 = vpop.permute.xlu0 %4694  ;;  %4494 = vrot.lane.b32.xlu1 %v4443_v51, %s7049_s10  ;;  %v5323_v63 = vsel %vm2531_vm13, %v5273_v0, %v9525_v28  ;;  %v5789_v2 = vshrl.u32 %v5567_v15, 16  ;;  %v5792_v5 = vshll.u32 %v5567_v15, 16  ;;  %v4846_v33 = vrot.slane %v4844_v3, 5 }
 0x41f   : > { %v5386_v27 = vsel %vm5328_vm2, %v5323_v63, %v9730_v7  ;;  %v6395_v7 = vcombine.low %v9669_v25, %v9669_v25  ;;  %v9850_v25 = vld [vmem:[#allocation3 + $0xc8] sm:$0xf] }
 0x420   : > { %4520 = vrot.lane.b32.xlu0 %v4462_v12, %s7049_s10  ;;  %v4893_v10 = vpop.permute.xlu1 %4892  ;;  %v5451_v11 = vsel %vm5393_vm5, %v5386_v27, %v4729_v52  ;;  %v5791_v0 = vrot.slane %v5789_v2, 3  ;;  %v4847_v32 = vor.u32 %v4846_v33, %v4843_v29 }
 0x421   : > { %v5479_v4 = vsel %vm5458_vm6, %v5421_v8, %v4893_v10  ;;  %v5478_v19 = vsel %vm5458_vm6, %v5419_v48, %v4893_v10  ;;  %v5502_v52 = vsel %vm5458_vm6, %v5451_v11, %v9647_v21  ;;  %v5794_v8 = vrot.slane %v5792_v5, 4 }
 0x422   : > { %v9814_v60 = vpop.permute.xlu0 %4726  ;;  %v5535_v51 = vsel %vm5507_vm8, %v5479_v4, %v9658_v45  ;;  %4526 = vrot.lane.b32.xlu1 %v4467_v16, %s7049_s10  ;;  %v6392_v45 = vcombine.low %v3518_v36, %v3519_v46  ;;  %v4970_v21 = vrot.slane %v6895_v39, 5  ;;  %v4966_v48 = vrot.slane %v9736_v41, 5  ;;  %v3450_v39 = vld [vmem:[#allocation3 + $0xa0] sm:$0x8] }
 0x423   : > { %v5669_v59 = vshrl.u32 %v5535_v51, 16  ;;  %v5672_v14 = vshll.u32 %v5535_v51, 16  ;;  %v5795_v27 = vor.u32 %v5794_v8, %v5791_v0 }
 0x424   : > { %4680 = vrot.lane.b32.xlu0 %v6376_v17, %s7050_s11  ;;  %v5033_v9 = vpop.permute.xlu1 %5032  ;;  %v4971_v5 = vsel %vm923_vm4, %v4969_v34, %v4970_v21 }
 0x425   : > { %v5533_v28 = vsel %vm5507_vm8, %v5478_v19, %v5033_v9  ;;  %v5671_v61 = vrot.slane %v5669_v59, 3  ;;  %v5674_v43 = vrot.slane %v5672_v14, 4  ;;  %v6896_v59 = vld [vmem:[#allocation3 + $0xdc] ss:$0 sps:$4 sm:$0x11]  }
 0x426   : > { %v9837_v37 = vpop.permute.xlu0 %4906  ;;  %v5662_v17 = vshrl.u32 %v5533_v28, 16  ;;  %v5665_v53 = vshll.u32 %v5533_v28, 16  ;;  %4686 = vrot.lane.b32.xlu1 %v6379_v44, %s7050_s11  ;;  %v4775_v44 = vor.u32 %v9788_v22, %v9772_v38  ;;  %v9858_v38 = vcombine.low %v3519_v46, %v9850_v25  ;;  %v9863_v14 = vld [vmem:[#allocation3 + $0x28] sm:$0xf]  ;;  %v3427_v9 = vld [vmem:[#allocation3 + $0x24] sm:$0xf] }
 0x427   : > { %v5675_v36 = vor.u32 %v5674_v43, %v5671_v61  ;;  %v9873_v3 = vcombine.low %v3427_v9, %v9863_v14  ;;  %v4994_v61 = vrot.slane %v6896_v59, 5  ;;  %v3426_v43 = vld [vmem:[#allocation3 + $0x20] sm:$0x8] }
 0x428   : > { %4712 = vrot.lane.b32.xlu0 %v6392_v45, %s7050_s11  ;;  %v5664_v18 = vrot.slane %v5662_v17, 3  ;;  %v5667_v58 = vrot.slane %v5665_v53, 4  ;;  %v5065_v49 = vpop.permute.xlu1 %5064  ;;  %v4990_v28 = vrot.slane %v9858_v38, 5  ;;  %v6310_v34 = vcombine.low %v3426_v43, %v3427_v9  ;;  %v6954_v9 = vld [vmem:[#allocation3 + $0x58] sm:$0xf] }
 0x429   : > { %v5565_v10 = vsel %vm5507_vm8, %v5502_v52, %v5065_v49  ;;  %v4995_v47 = vsel %vm923_vm4, %v4993_v23, %v4994_v61  ;;  %v4236_v29 = vshll.u32 %v9873_v3, 16  ;;  %v6313_v52 = vcombine.low %v9685_v56, %v9685_v56  ;;  %v6904_v43 = vld [vmem:[#allocation3 + $0xbc] ss:$0 sps:$4 sm:$0x11]  }
 0x42a   : > { %v9846_v31 = vpop.permute.xlu0 %5030  ;;  %v5668_v40 = vor.u32 %v5667_v58, %v5664_v18  ;;  %v5782_v4 = vshrl.u32 %v5565_v10, 16  ;;  %v5785_v16 = vshll.u32 %v5565_v10, 16  ;;  %4718 = vrot.lane.b32.xlu1 %v6395_v7, %s7050_s11  ;;  %v4233_v7 = vshrl.u32 %v9873_v3, 16  ;;  %v3451_v18 = vld [vmem:[#allocation3 + $0xa4] sm:$0xf] }
 0x42b   : > { %v4308_v23 = vshll.u32 %v9752_v50, 16  ;;  %v6326_v33 = vcombine.low %v3450_v39, %v3451_v18  ;;  %v4238_v8 = vrot.slane %v4236_v29, 5  ;;  %v9906_v10 = vld [vmem:[#allocation3 + $0x38] sm:$0xf]  ;;  %v6329_v56 = vcombine.low %v9740_v57, %v9740_v57 }
 0x42c   : > { %4884 = vrot.lane.b32.xlu0 %v4775_v44, %s7051_s12  ;;  %v5784_v15 = vrot.slane %v5782_v4, 3  ;;  %v5787_v55 = vrot.slane %v5785_v16, 4  ;;  %v9854_v51 = vpop.permute.xlu1 %4004  ;;  %v5676_v63 = vsel %vm2596_vm14, %v5668_v40, %v5675_v36  ;;  %v4235_v0 = vrot.slane %v4233_v7, 4  ;;  %v9910_v44 = vld [vmem:[#allocation3 + $0x34] sm:$0xf]  ;;  %v10810_v7 = vld [vmem:[#allocation60_spill] sm:$0xff] }
 0x42d   : > { %v5842_v11 = vsel %vm5819_vm10, %v5676_v63, 0  ;;  %v4307_v4 = vrot.slane %v4305_v20, 4  ;;  %v4310_v16 = vrot.slane %v4308_v23, 5  ;;  %v6903_v36 = vld [vmem:[#allocation3 + $0x3c] ss:$0 sps:$4 sm:$0x11]   ;;  %v9918_v21 = vcombine.low %v9910_v44, %v9906_v10 }
 0x42e   : > { %v9860_v22 = vpop.permute.xlu0 %5062  ;;  %v5788_v19 = vor.u32 %v5787_v55, %v5784_v15  ;;  %4902 = vrot.lane.b32.xlu1 %v4847_v32, %s7051_s12  ;;  %v4239_v55 = vor.u32 %v4238_v8, %v4235_v0  ;;  %v9922_v32 = vld [vmem:[#allocation3 + $0xa8] sm:$0xf]  ;;  %v4439_v57 = vrot.slane %v6903_v36, 5  ;;  %v4435_v61 = vrot.slane %v9873_v3, 5  ;;  %v3398_v0 = vld [vmem:[#allocation3 + $0xd0] sm:$0x8] }
 0x42f   : > { %v4311_v59 = vor.u32 %v4310_v16, %v4307_v4  ;;  %v6955_v8 = vld [vmem:[#allocation3 + $0xd8] sm:$0xf]  ;;  %v4833_v50 = vshrl.u32 %v9858_v38, 16  ;;  %v10814_v3 = vld [vmem:[#allocation38_spill] sm:$0xff] }
 0x430   : > { %5016 = vrot.lane.b32.xlu0 %v4966_v48, %s7052_s14  ;;  %v9869_v45 = vpop.permute.xlu1 %4164  ;;  %v5796_v46 = vsel %vm2596_vm14, %v5788_v19, %v5795_v27  ;;  %v4761_v27 = vshrl.u32 %v9918_v21, 16  ;;  %v4764_v19 = vshll.u32 %v9918_v21, 16 }
 0x431   : > { %6553 = vmatprep.subr.msk.bf16.mxu1 %vm5819_vm10, %v5796_v46  ;;  %v6255_v46 = vcombine.low %v6954_v9, %v6954_v9 }
 0x432   : > { %v9876_v2 = vpop.permute.xlu0 %4160  ;;  %5022 = vrot.lane.b32.xlu1 %v4971_v5, %s7052_s14  ;;  %6498 = vmatpush3.bf16.xpose.msra.mxu1 %v5842_v11  ;;  %v9931_v5 = vcombine.low %v3451_v18, %v9922_v32  ;;  %v4440_v18 = vsel %vm923_vm4, %v4438_v24, %v4439_v57  ;;  %v9947_v20 = vrot.slane %v4761_v27, 4  ;;  %v9949_v23 = vrot.slane %v4764_v19, 5  ;;  %v10811_v24 = vld [vmem:[#allocation22_spill] sm:$0xff]  ;;  %v6957_v19 = vld [vmem:[#allocation3 + $0xd4] sm:$0xf] }
 0x433   : > { %v6270_v9 = vcombine.low %v3398_v0, %v6957_v19  ;;  %v10812_v0 = vld [vmem:[#allocation11_spill] sm:$0xff] }
 0x434   : > { %5048 = vrot.lane.b32.xlu0 %v4990_v28, %s7052_s14  ;;  %v9887_v17 = vpop.permute.xlu1 %4196  ;;  %v4459_v36 = vrot.slane %v9931_v5, 5 }
 0x436   : > { %v9889_v53 = vpop.permute.xlu0 %4192  ;;  %5054 = vrot.lane.b32.xlu1 %v4995_v47, %s7052_s14  ;;  %v10809_v47 = vld [vmem:[#allocation55_spill] sm:$0xff] }
 0x438   : > { %4148 = vrot.lane.b32.xlu0 %v6310_v34, %s7046_s17  ;;  %v9898_v58 = vpop.permute.xlu1 %4362  ;;  %v5101_v34 = vsel %vm2173_vm7, %v6255_v46, %v10809_v47 }
 0x439   : > { %v5175_v29 = vsel %vm2303_vm9, %v5101_v34, %v10810_v7  ;;  %v6377_v34 = vcombine.low %v9724_v1, %v9724_v1  ;;  %v5139_v1 = vsel %vm2173_vm7, %v6270_v9, %v10811_v24 }
 0x43a   : > { %v9904_v49 = vpop.permute.xlu0 %4360  ;;  %4154 = vrot.lane.b32.xlu1 %v6313_v52, %s7046_s17  ;;  %v3491_v52 = vld [vmem:[#allocation3 + $0x30] sm:$0x8]  ;;  %v5239_v4 = vsel %vm2417_vm11, %v5175_v29, %v9692_v62  ;;  %v6956_v62 = vld [vmem:[#allocation3 + $0x54] sm:$0xf] }
 0x43b   : > { %v5297_v6 = vsel %vm2531_vm13, %v5239_v4, %v9898_v58  ;;  %v6374_v57 = vcombine.low %v3491_v52, %v9910_v44  ;;  %v4767_v52 = vor.u32 %v9949_v23, %v9947_v20  ;;  %v4836_v23 = vshll.u32 %v9858_v38, 16 }
 0x43c   : > { %4180 = vrot.lane.b32.xlu0 %v6326_v33, %s7046_s17  ;;  %v9912_v40 = vpop.permute.xlu1 %4500  ;;  %v3374_v33 = vld [vmem:[#allocation3 + $0x50] sm:$0x8]  ;;  %v5352_v29 = vsel %vm5328_vm2, %v5297_v6, %v9738_v30  ;;  %v6311_v38 = vcombine.low %v9863_v14, %v9863_v14 }
 0x43d   : > { %v6254_v27 = vcombine.low %v3374_v33, %v6956_v62  ;;  %v3515_v30 = vld [vmem:[#allocation3 + $0xb0] sm:$0x8]  ;;  %v3516_v33 = vld [vmem:[#allocation3 + $0xb4] sm:$0xf] }
 0x43e   : > { %v9920_v15 = vpop.permute.xlu0 %4496  ;;  %4186 = vrot.lane.b32.xlu1 %v6329_v56, %s7046_s17  ;;  %v6271_v56 = vcombine.low %v6955_v8, %v6955_v8 }
 0x440   : > { %4354 = vrot.lane.b32.xlu0 %v4239_v55, %s7048_s7  ;;  %v9926_v63 = vpop.permute.xlu1 %4532  ;;  %v4463_v55 = vrot.slane %v6904_v43, 5 }
 0x442   : > { %v9933_v11 = vpop.permute.xlu0 %4528  ;;  %4372 = vrot.lane.b32.xlu1 %v4311_v59, %s7048_s7  ;;  %v5141_v59 = vsel %vm2173_vm7, %v6271_v56, %v10811_v24  ;;  %v4464_v44 = vsel %vm923_vm4, %v4462_v12, %v4463_v55  ;;  %v5417_v55 = vsel %vm5393_vm5, %v5352_v29, %v9778_v54 }
 0x443   : > { %v5207_v46 = vsel %vm2303_vm9, %v5141_v59, %v9680_v13  ;;  %v5099_v13 = vsel %vm2173_vm7, %v6254_v27, %v10809_v47  ;;  %v5205_v47 = vsel %vm2303_vm9, %v5139_v1, %v9854_v51  ;;  %v10031_v1 = vld [vmem:[#allocation3 + $0xb8] sm:$0xf] }
 0x444   : > { %4484 = vrot.lane.b32.xlu0 %v4435_v61, %s7049_s10  ;;  %v4693_v39 = vpop.permute.xlu1 %4692  ;;  %v5271_v7 = vsel %vm2417_vm11, %v5207_v46, %v9707_v42  ;;  %v5173_v12 = vsel %vm2303_vm9, %v5099_v13, %v10812_v0  ;;  %v5269_v4 = vsel %vm2417_vm11, %v5205_v47, %v9887_v17  ;;  %v4835_v46 = vrot.slane %v4833_v50, 4 }
 0x445   : > { %v5321_v42 = vsel %vm2531_vm13, %v5271_v7, %v9722_v35  ;;  %v5237_v56 = vsel %vm2417_vm11, %v5173_v12, %v9869_v45 }
 0x446   : > { %v9953_v16 = vpop.permute.xlu0 %4688  ;;  %4490 = vrot.lane.b32.xlu1 %v4440_v18, %s7049_s10  ;;  %v5384_v20 = vsel %vm5328_vm2, %v5321_v42, %v9754_v26  ;;  %v5296_v6 = vsel %vm2531_vm13, %v5237_v56, %v9898_v58  ;;  %v5320_v58 = vsel %vm2531_vm13, %v5269_v4, %v9722_v35  ;;  %v10039_v56 = vcombine.low %v3516_v33, %v10031_v1 }
 0x447   : > { %v5449_v8 = vsel %vm5393_vm5, %v5384_v20, %v9814_v60  ;;  %v6390_v60 = vcombine.low %v3515_v30, %v3516_v33  ;;  %v5350_v17 = vsel %vm5328_vm2, %v5296_v6, %v9912_v40  ;;  %v5382_v40 = vsel %vm5328_vm2, %v5320_v58, %v9926_v63 }
 0x448   : > { %4516 = vrot.lane.b32.xlu0 %v4459_v36, %s7049_s10  ;;  %v4725_v43 = vpop.permute.xlu1 %4724  ;;  %v5500_v51 = vsel %vm5458_vm6, %v5449_v8, %v9837_v37  ;;  %v5415_v62 = vsel %vm5393_vm5, %v5350_v17, %v4693_v39  ;;  %v4963_v63 = vrot.slane %v9918_v21, 5 }
 0x449   : > { %v5563_v45 = vsel %vm5507_vm8, %v5500_v51, %v9860_v22  ;;  %v6911_v22 = vld [vmem:[#allocation3 + $0x4c] ss:$0 sps:$4 sm:$0x11]   ;;  %v5447_v29 = vsel %vm5393_vm5, %v5382_v40, %v4725_v43 }
 0x44a   : > { %v9973_v18 = vpop.permute.xlu0 %4720  ;;  %4522 = vrot.lane.b32.xlu1 %v4464_v44, %s7049_s10  ;;  %v5774_v7 = vshrl.u32 %v5563_v45, 16  ;;  %v4967_v50 = vrot.slane %v6911_v22, 5  ;;  %v5499_v43 = vsel %vm5458_vm6, %v5447_v29, %v9837_v37 }
 0x44c   : > { %4676 = vrot.lane.b32.xlu0 %v6374_v57, %s7050_s11  ;;  %v4891_v26 = vpop.permute.xlu1 %4890  ;;  %v6393_v57 = vcombine.low %v9850_v25, %v9850_v25  ;;  %v5777_v25 = vshll.u32 %v5563_v45, 16  ;;  %v4968_v58 = vsel %vm923_vm4, %v4966_v48, %v4967_v50 }
 0x44d   : > { %v5476_v24 = vsel %vm5458_vm6, %v5417_v55, %v4891_v26 }
 0x44e   : > { %v10009_v59 = vpop.permute.xlu0 %4888  ;;  %v5531_v54 = vsel %vm5507_vm8, %v5476_v24, %v9846_v31  ;;  %4682 = vrot.lane.b32.xlu1 %v6377_v34, %s7050_s11  ;;  %v5475_v31 = vsel %vm5458_vm6, %v5415_v62, %v4891_v26  ;;  %v4838_v34 = vrot.slane %v4836_v23, 5  ;;  %v5776_v23 = vrot.slane %v5774_v7, 3 }
 0x44f   : > { %v5654_v27 = vshrl.u32 %v5531_v54, 16  ;;  %v5657_v19 = vshll.u32 %v5531_v54, 16  ;;  %v5779_v8 = vrot.slane %v5777_v25, 4  ;;  %v3424_v54 = vld [vmem:[#allocation3 + $0x14] sm:$0xf]  ;;  %v4987_v62 = vrot.slane %v10039_v56, 5 }
 0x450   : > { %4708 = vrot.lane.b32.xlu0 %v6390_v60, %s7050_s11  ;;  %v5029_v9 = vpop.permute.xlu1 %5028  ;;  %v4839_v47 = vor.u32 %v4838_v34, %v4835_v46  ;;  %v10045_v60 = vld [vmem:[#allocation3 + $0x18] sm:$0xf] }
 0x451   : > { %v5529_v35 = vsel %vm5507_vm8, %v5475_v31, %v5029_v9  ;;  %v5656_v44 = vrot.slane %v5654_v27, 3  ;;  %v5659_v13 = vrot.slane %v5657_v19, 4  ;;  %v3423_v19 = vld [vmem:[#allocation3 + $0x10] sm:$0x8]  ;;  %v10060_v22 = vcombine.low %v3424_v54, %v10045_v60 }
 0x452   : > { %v10029_v39 = vpop.permute.xlu0 %5024  ;;  %v5647_v42 = vshrl.u32 %v5529_v35, 16  ;;  %v5650_v30 = vshll.u32 %v5529_v35, 16  ;;  %4714 = vrot.lane.b32.xlu1 %v6393_v57, %s7050_s11  ;;  %v5780_v40 = vor.u32 %v5779_v8, %v5776_v23  ;;  %v6308_v48 = vcombine.low %v3423_v19, %v3424_v54  ;;  %v3447_v35 = vld [vmem:[#allocation3 + $0x90] sm:$0x8]  ;;  %v3489_v54 = vld [vmem:[#allocation3 + $0x24] sm:$0xf] }
 0x453   : > { %v5660_v24 = vor.u32 %v5659_v13, %v5656_v44  ;;  %v4225_v25 = vshrl.u32 %v10060_v22, 16  ;;  %v4228_v29 = vshll.u32 %v10060_v22, 16  ;;  %v3448_v44 = vld [vmem:[#allocation3 + $0x94] sm:$0xf] }
 0x454   : > { %4882 = vrot.lane.b32.xlu0 %v4767_v52, %s7051_s12  ;;  %v5649_v0 = vrot.slane %v5647_v42, 3  ;;  %v5652_v12 = vrot.slane %v5650_v30, 4  ;;  %v5061_v20 = vpop.permute.xlu1 %5060  ;;  %v6912_v52 = vld [vmem:[#allocation3 + $0xcc] ss:$0 sps:$4 sm:$0x11]   ;;  %v4300_v42 = vshll.u32 %v9931_v5, 16  ;;  %v6324_v50 = vcombine.low %v3447_v35, %v3448_v44 }
 0x455   : > { %v5561_v4 = vsel %vm5507_vm8, %v5499_v43, %v5061_v20  ;;  %v4991_v27 = vrot.slane %v6912_v52, 5  ;;  %v6327_v20 = vcombine.low %v9922_v32, %v9922_v32  ;;  %v6919_v23 = vld [vmem:[#allocation3 + $0x2c] ss:$0 sps:$4 sm:$0x11]   ;;  %v10096_v52 = vld [vmem:[#allocation3 + $0x98] sm:$0xf] }
 0x456   : > { %v10042_v55 = vpop.permute.xlu0 %5056  ;;  %v5653_v26 = vor.u32 %v5652_v12, %v5649_v0  ;;  %v5767_v51 = vshrl.u32 %v5561_v4, 16  ;;  %v5770_v6 = vshll.u32 %v5561_v4, 16  ;;  %4900 = vrot.lane.b32.xlu1 %v4839_v47, %s7051_s12  ;;  %v4227_v0 = vrot.slane %v4225_v25, 4 }
 0x457   : > { %v4992_v34 = vsel %vm923_vm4, %v4990_v28, %v4991_v27  ;;  %v4297_v28 = vshrl.u32 %v9931_v5, 16  ;;  %v4230_v12 = vrot.slane %v4228_v29, 5  ;;  %v4302_v14 = vrot.slane %v4300_v42, 5  ;;  %v3395_v27 = vld [vmem:[#allocation3 + $0xc0] sm:$0x8] }
 0x458   : > { %5012 = vrot.lane.b32.xlu0 %v4963_v63, %s7052_s14  ;;  %v5769_v37 = vrot.slane %v5767_v51, 3  ;;  %v5772_v33 = vrot.slane %v5770_v6, 4  ;;  %v10050_v45 = vpop.permute.xlu1 %4002  ;;  %v5661_v17 = vsel %vm2596_vm14, %v5653_v26, %v5660_v24  ;;  %v10100_v26 = vld [vmem:[#allocation3 + $0x28] sm:$0xf]  ;;  %v4436_v24 = vrot.slane %v6919_v23, 5 }
 0x459   : > { %v5839_v7 = vsel %vm5819_vm10, %v5661_v17, 0  ;;  %v4299_v47 = vrot.slane %v4297_v28, 4  ;;  %v4231_v4 = vor.u32 %v4230_v12, %v4227_v0  ;;  %v10105_v32 = vcombine.low %v3448_v44, %v10096_v52  ;;  %v6920_v17 = vld [vmem:[#allocation3 + $0xac] ss:$0 sps:$4 sm:$0x11]   ;;  %v10813_v28 = vld [vmem:[#allocation15_spill] sm:$0xff] }
 0x45a   : > { %v10053_v57 = vpop.permute.xlu0 %4156  ;;  %v5773_v31 = vor.u32 %v5772_v33, %v5769_v37  ;;  %5018 = vrot.lane.b32.xlu1 %v4968_v58, %s7052_s14  ;;  %v4432_v33 = vrot.slane %v10060_v22, 5  ;;  %v3371_v58 = vld [vmem:[#allocation3 + $0x40] sm:$0x8]  ;;  %v10112_v19 = vcombine.low %v3489_v54, %v10100_v26  ;;  %v4460_v35 = vrot.slane %v6920_v17, 5 }
 0x45b   : > { %v4303_v6 = vor.u32 %v4302_v14, %v4299_v47  ;;  %v4456_v29 = vrot.slane %v10105_v32, 5  ;;  %v3488_v44 = vld [vmem:[#allocation3 + $0x20] sm:$0x8]  ;;  %v6375_v5 = vcombine.low %v9906_v10, %v9906_v10 }
 0x45c   : > { %5044 = vrot.lane.b32.xlu0 %v4987_v62, %s7052_s14  ;;  %v10066_v9 = vpop.permute.xlu1 %4162  ;;  %v5781_v41 = vsel %vm2596_vm14, %v5773_v31, %v5780_v40  ;;  %v4437_v31 = vsel %vm923_vm4, %v4435_v61, %v4436_v24  ;;  %v10815_v0 = vld [vmem:[#allocation21_spill] sm:$0xff]  ;;  %v6372_v23 = vcombine.low %v3488_v44, %v3489_v54 }
 0x45d   : > { %6554 = vmatprep.subr.msk.bf16.mxu1 %vm5819_vm10, %v5781_v41  ;;  %v6958_v41 = vld [vmem:[#allocation3 + $0x44] sm:$0xf] }
 0x45e   : > { %v10070_v46 = vpop.permute.xlu0 %4188  ;;  %5050 = vrot.lane.b32.xlu1 %v4992_v34, %s7052_s14  ;;  %6500 = vmatpush3.bf16.xpose.msra.mxu1 %v5839_v7  ;;  %v6959_v34 = vld [vmem:[#allocation3 + $0xc4] sm:$0xf] }
 0x45f   : > { %v6268_v7 = vcombine.low %v3395_v27, %v6959_v34  ;;  %v4461_v27 = vsel %vm923_vm4, %v4459_v36, %v4460_v35 }
 0x460   : > { %4144 = vrot.lane.b32.xlu0 %v6308_v48, %s7046_s17  ;;  %v10080_v13 = vpop.permute.xlu1 %4194  ;;  %v6252_v48 = vcombine.low %v3371_v58, %v6958_v41  ;;  %v3512_v41 = vld [vmem:[#allocation3 + $0xa0] sm:$0x8] }
 0x461   : > { %v5134_v61 = vsel %vm2173_vm7, %v6268_v7, %v10814_v3  ;;  %v10817_v7 = vld [vmem:[#allocation59_spill] sm:$0xff] }
 0x462   : > { %v10086_v30 = vpop.permute.xlu0 %4358  ;;  %4150 = vrot.lane.b32.xlu1 %v6311_v38, %s7046_s17  ;;  %v4753_v38 = vshrl.u32 %v10112_v19, 16  ;;  %v5094_v42 = vsel %vm2173_vm7, %v6252_v48, %v10813_v28  ;;  %v3513_v48 = vld [vmem:[#allocation3 + $0xa4] sm:$0xf] }
 0x463   : > { %v5169_v12 = vsel %vm2303_vm9, %v5094_v42, %v10815_v0  ;;  %v6388_v0 = vcombine.low %v3512_v41, %v3513_v48  ;;  %v10192_v41 = vld [vmem:[#allocation3 + $0xa8] sm:$0xf] }
 0x464   : > { %4176 = vrot.lane.b32.xlu0 %v6324_v50, %s7046_s17  ;;  %v10090_v43 = vpop.permute.xlu1 %4376  ;;  %v4756_v50 = vshll.u32 %v10112_v19, 16  ;;  %v5233_v24 = vsel %vm2417_vm11, %v5169_v12, %v9876_v2  ;;  %v4755_v2 = vrot.slane %v4753_v38, 4  ;;  %v4825_v38 = vshrl.u32 %v10039_v56, 16  ;;  %v6961_v12 = vld [vmem:[#allocation3 + $0xc8] sm:$0xf] }
 0x466   : > { %v10094_v8 = vpop.permute.xlu0 %4492  ;;  %4182 = vrot.lane.b32.xlu1 %v6327_v20, %s7046_s17  ;;  %v10816_v20 = vld [vmem:[#allocation44_spill] sm:$0xff]  ;;  %v4758_v36 = vrot.slane %v4756_v50, 5 }
 0x467   : > { %v5201_v47 = vsel %vm2303_vm9, %v5134_v61, %v10816_v20  ;;  %v6269_v20 = vcombine.low %v6961_v12, %v6961_v12 }
 0x468   : > { %4352 = vrot.lane.b32.xlu0 %v4231_v4, %s7048_s7  ;;  %v10102_v51 = vpop.permute.xlu1 %4498  ;;  %v6960_v4 = vld [vmem:[#allocation3 + $0x48] sm:$0xf]  ;;  %v5265_v17 = vsel %vm2417_vm11, %v5201_v47, %v9889_v53  ;;  %v6391_v47 = vcombine.low %v10031_v1, %v10031_v1 }
 0x469   : > { %v5317_v54 = vsel %vm2531_vm13, %v5265_v17, %v10090_v43  ;;  %v5136_v1 = vsel %vm2173_vm7, %v6269_v20, %v10814_v3 }
 0x46a   : > { %v10107_v37 = vpop.permute.xlu0 %4524  ;;  %4370 = vrot.lane.b32.xlu1 %v4303_v6, %s7048_s7  ;;  %v6253_v6 = vcombine.low %v6960_v4, %v6960_v4  ;;  %v5378_v10 = vsel %vm5328_vm2, %v5317_v54, %v9933_v11  ;;  %v4827_v4 = vrot.slane %v4825_v38, 4  ;;  %v4759_v54 = vor.u32 %v4758_v36, %v4755_v2  ;;  %v6928_v36 = vld [vmem:[#allocation3 + $0xbc] ss:$0 sps:$4 sm:$0x11]  }
 0x46b   : > { %v5443_v11 = vsel %vm5393_vm5, %v5378_v10, %v9973_v18 }
 0x46c   : > { %4480 = vrot.lane.b32.xlu0 %v4432_v33, %s7049_s10  ;;  %v10117_v40 = vpop.permute.xlu1 %4530  ;;  %v5096_v53 = vsel %vm2173_vm7, %v6253_v6, %v10813_v28  ;;  %v4828_v28 = vshll.u32 %v10039_v56, 16 }
 0x46d   : > { %v5171_v35 = vsel %vm2303_vm9, %v5096_v53, %v10817_v7  ;;  %v5203_v53 = vsel %vm2303_vm9, %v5136_v1, %v10050_v45  ;;  %v10206_v45 = vcombine.low %v3513_v48, %v10192_v41 }
 0x46e   : > { %v10122_v25 = vpop.permute.xlu0 %4684  ;;  %4486 = vrot.lane.b32.xlu1 %v4437_v31, %s7049_s10  ;;  %v5293_v31 = vsel %vm2531_vm13, %v5233_v24, %v9904_v49  ;;  %v5235_v61 = vsel %vm2417_vm11, %v5171_v35, %v10066_v9  ;;  %v4830_v6 = vrot.slane %v4828_v28, 5  ;;  %v6927_v24 = vld [vmem:[#allocation3 + $0x3c] ss:$0 sps:$4 sm:$0x11]   ;;  %v5267_v2 = vsel %vm2417_vm11, %v5203_v53, %v10080_v13 }
 0x46f   : > { %v5346_v34 = vsel %vm5328_vm2, %v5293_v31, %v9920_v15  ;;  %v5294_v9 = vsel %vm2531_vm13, %v5235_v61, %v9904_v49  ;;  %v5318_v35 = vsel %vm2531_vm13, %v5267_v2, %v10090_v43  ;;  %v6309_v2 = vcombine.low %v10045_v60, %v10045_v60 }
 0x470   : > { %4512 = vrot.lane.b32.xlu0 %v4456_v29, %s7049_s10  ;;  %v4691_v14 = vpop.permute.xlu1 %4690  ;;  %v5411_v44 = vsel %vm5393_vm5, %v5346_v34, %v9953_v16  ;;  %v5348_v17 = vsel %vm5328_vm2, %v5294_v9, %v10102_v51  ;;  %v4831_v3 = vor.u32 %v4830_v6, %v4827_v4  ;;  %v5380_v13 = vsel %vm5328_vm2, %v5318_v35, %v10117_v40 }
 0x471   : > { %v5472_v15 = vsel %vm5458_vm6, %v5411_v44, %v10009_v59  ;;  %v5413_v49 = vsel %vm5393_vm5, %v5348_v17, %v4691_v14  ;;  %v4960_v14 = vrot.slane %v10112_v19, 5 }
 0x472   : > { %v10143_v58 = vpop.permute.xlu0 %4716  ;;  %4518 = vrot.lane.b32.xlu1 %v4461_v27, %s7049_s10  ;;  %v5525_v16 = vsel %vm5507_vm8, %v5472_v15, %v10029_v39 }
 0x473   : > { %v5632_v39 = vshrl.u32 %v5525_v16, 16  ;;  %v5635_v18 = vshll.u32 %v5525_v16, 16  ;;  %v4988_v16 = vrot.slane %v6928_v36, 5  ;;  %v6325_v36 = vcombine.low %v10096_v52, %v10096_v52  ;;  %v6962_v52 = vld [vmem:[#allocation3 + $0x34] sm:$0xf] }
 0x474   : > { %4672 = vrot.lane.b32.xlu0 %v6372_v23, %s7050_s11  ;;  %v4723_v42 = vpop.permute.xlu1 %4722 }
 0x475   : > { %v5634_v7 = vrot.slane %v5632_v39, 3  ;;  %v5637_v61 = vrot.slane %v5635_v18, 4  ;;  %v5445_v43 = vsel %vm5393_vm5, %v5380_v13, %v4723_v42  ;;  %v4984_v42 = vrot.slane %v10206_v45, 5 }
 0x476   : > { %v10172_v50 = vpop.permute.xlu0 %4886  ;;  %4678 = vrot.lane.b32.xlu1 %v6375_v5, %s7050_s11  ;;  %v4964_v5 = vrot.slane %v6927_v24, 5 }
 0x478   : > { %4704 = vrot.lane.b32.xlu0 %v6388_v0, %s7050_s11  ;;  %v4905_v23 = vpop.permute.xlu1 %4904  ;;  %v4965_v40 = vsel %vm923_vm4, %v4963_v63, %v4964_v5 }
 0x479   : > { %v5496_v27 = vsel %vm5458_vm6, %v5443_v11, %v4905_v23 }
 0x47a   : > { %v10187_v31 = vpop.permute.xlu0 %5020  ;;  %4710 = vrot.lane.b32.xlu1 %v6391_v47, %s7050_s11  ;;  %v5557_v51 = vsel %vm5507_vm8, %v5496_v27, %v10042_v55  ;;  %v5473_v55 = vsel %vm5458_vm6, %v5413_v49, %v10009_v59  ;;  %v5497_v59 = vsel %vm5458_vm6, %v5445_v43, %v4905_v23  ;;  %v5638_v23 = vor.u32 %v5637_v61, %v5634_v7  ;;  %v6932_v61 = vld [vmem:[#allocation3 + $0x9c] ss:$0 sps:$4 sm:$0x11]   ;;  %v3368_v43 = vld [vmem:[#allocation3 + $0x30] sm:$0x8] }
 0x47b   : > { %v5752_v38 = vshrl.u32 %v5557_v51, 16  ;;  %v5755_v28 = vshll.u32 %v5557_v51, 16 }
 0x47c   : > { %4880 = vrot.lane.b32.xlu0 %v4759_v54, %s7051_s12  ;;  %v5027_v34 = vpop.permute.xlu1 %5026  ;;  %v4989_v54 = vsel %vm923_vm4, %v4987_v62, %v4988_v16 }
 0x47d   : > { %v5527_v15 = vsel %vm5507_vm8, %v5473_v55, %v5027_v34  ;;  %v5754_v11 = vrot.slane %v5752_v38, 3  ;;  %v5757_v4 = vrot.slane %v5755_v28, 4  ;;  %v4289_v34 = vshrl.u32 %v10105_v32, 16  ;;  %v6931_v55 = vld [vmem:[#allocation3 + $0x1c] ss:$0 sps:$4 sm:$0x11]  }
 0x47e   : > { %v10210_v44 = vpop.permute.xlu0 %5052  ;;  %4898 = vrot.lane.b32.xlu1 %v4831_v3, %s7051_s12  ;;  %v5639_v10 = vshrl.u32 %v5527_v15, 16  ;;  %v5642_v48 = vshll.u32 %v5527_v15, 16  ;;  %v4292_v3 = vshll.u32 %v10105_v32, 16  ;;  %v4433_v15 = vrot.slane %v6931_v55, 5 }
 0x47f   : > { %v5758_v49 = vor.u32 %v5757_v4, %v5754_v11  ;;  %v4291_v7 = vrot.slane %v4289_v34, 4  ;;  %v10819_v4 = vld [vmem:[#allocation56_spill] sm:$0xff]  ;;  %v4817_v34 = vshrl.u32 %v10206_v45, 16 }
 0x480   : > { %5008 = vrot.lane.b32.xlu0 %v4960_v14, %s7052_s14  ;;  %v5059_v0 = vpop.permute.xlu1 %5058  ;;  %v5641_v12 = vrot.slane %v5639_v10, 3  ;;  %v5644_v20 = vrot.slane %v5642_v48, 4  ;;  %v4294_v60 = vrot.slane %v4292_v3, 5  ;;  %v3392_v10 = vld [vmem:[#allocation3 + $0xb0] sm:$0x8]  ;;  %v10822_v3 = vld [vmem:[#allocation58_spill] sm:$0xff] }
 0x481   : > { %v5559_v47 = vsel %vm5507_vm8, %v5497_v59, %v5059_v0  ;;  %v6250_v59 = vcombine.low %v3368_v43, %v6962_v52  ;;  %v6963_v0 = vld [vmem:[#allocation3 + $0xb4] sm:$0xf] }
 0x482   : > { %v10225_v9 = vpop.permute.xlu0 %4152  ;;  %v5759_v6 = vshrl.u32 %v5559_v47, 16  ;;  %v5762_v24 = vshll.u32 %v5559_v47, 16  ;;  %5014 = vrot.lane.b32.xlu1 %v4965_v40, %s7052_s14  ;;  %v5645_v39 = vor.u32 %v5644_v20, %v5641_v12  ;;  %v4295_v38 = vor.u32 %v4294_v60, %v4291_v7  ;;  %v10818_v47 = vld [vmem:[#allocation40_spill] sm:$0xff] }
 0x483   : > { %v6266_v40 = vcombine.low %v3392_v10, %v6963_v0  ;;  %v4434_v12 = vsel %vm923_vm4, %v4432_v33, %v4433_v15  ;;  %v4457_v20 = vrot.slane %v6932_v61, 5  ;;  %v5089_v11 = vsel %vm2173_vm7, %v6250_v59, %v10818_v47  ;;  %v6965_v61 = vld [vmem:[#allocation3 + $0xb8] sm:$0xf] }
 0x484   : > { %5040 = vrot.lane.b32.xlu0 %v4984_v42, %s7052_s14  ;;  %v5761_v21 = vrot.slane %v5759_v6, 3  ;;  %v5764_v63 = vrot.slane %v5762_v24, 4  ;;  %v10232_v17 = vpop.permute.xlu1 %4158  ;;  %v5646_v1 = vsel %vm2596_vm14, %v5638_v23, %v5645_v39  ;;  %v10820_v24 = vld [vmem:[#allocation20_spill] sm:$0xff]  ;;  %v10821_v39 = vld [vmem:[#allocation43_spill] sm:$0xff]  ;;  %v4820_v7 = vshll.u32 %v10206_v45, 16 }
 0x485   : > { %v5836_v62 = vsel %vm5819_vm10, %v5646_v1, 0  ;;  %v5129_v6 = vsel %vm2173_vm7, %v6266_v40, %v10819_v4  ;;  %v5165_v23 = vsel %vm2303_vm9, %v5089_v11, %v10820_v24  ;;  %v4819_v15 = vrot.slane %v4817_v34, 4 }
 0x486   : > { %v10234_v27 = vpop.permute.xlu0 %4184  ;;  %v5765_v18 = vor.u32 %v5764_v63, %v5761_v21  ;;  %5046 = vrot.lane.b32.xlu1 %v4989_v54, %s7052_s14  ;;  %v5197_v21 = vsel %vm2303_vm9, %v5129_v6, %v10821_v39  ;;  %v6964_v54 = vld [vmem:[#allocation3 + $0x38] sm:$0xf]  ;;  %v5229_v33 = vsel %vm2417_vm11, %v5165_v23, %v10053_v57  ;;  %v6267_v43 = vcombine.low %v6965_v61, %v6965_v61  ;;  %v6936_v23 = vld [vmem:[#allocation3 + $0xac] ss:$0 sps:$4 sm:$0x11]  }
 0x487   : > { %v6251_v22 = vcombine.low %v6964_v54, %v6964_v54  ;;  %v5261_v1 = vsel %vm2417_vm11, %v5197_v21, %v10070_v46  ;;  %v4822_v52 = vrot.slane %v4820_v7, 5 }
 0x488   : > { %v10241_v53 = vpop.permute.xlu1 %4190  ;;  %v5766_v51 = vsel %vm2596_vm14, %v5758_v49, %v5765_v18  ;;  %v4458_v18 = vsel %vm923_vm4, %v4456_v29, %v4457_v20 }
 0x489   : > { %6555 = vmatprep.subr.msk.bf16.mxu1 %vm5819_vm10, %v5766_v51  ;;  %v5290_v51 = vsel %vm2531_vm13, %v5229_v33, %v10086_v30  ;;  %v5091_v57 = vsel %vm2173_vm7, %v6251_v22, %v10818_v47  ;;  %v4823_v24 = vor.u32 %v4822_v52, %v4819_v15 }
 0x48a   : > { %v10249_v56 = vpop.permute.xlu0 %4356  ;;  %4146 = vrot.lane.b32.xlu1 %v6309_v2, %s7046_s17  ;;  %6502 = vmatpush3.bf16.xpose.msra.mxu1 %v5836_v62  ;;  %v5342_v46 = vsel %vm5328_vm2, %v5290_v51, %v10094_v8  ;;  %v5167_v32 = vsel %vm2303_vm9, %v5091_v57, %v10822_v3  ;;  %v4985_v57 = vrot.slane %v6936_v23, 5 }
 0x48b   : > { %v5407_v29 = vsel %vm5393_vm5, %v5342_v46, %v10122_v25  ;;  %v5231_v8 = vsel %vm2417_vm11, %v5167_v32, %v10232_v17 }
 0x48c   : > { %v10253_v5 = vpop.permute.xlu1 %4374  ;;  %v5469_v60 = vsel %vm5458_vm6, %v5407_v29, %v10172_v50  ;;  %v5291_v10 = vsel %vm2531_vm13, %v5231_v8, %v10086_v30  ;;  %v10823_v30 = vld [vmem:[#allocation46_spill] sm:$0xff]  ;;  %v4986_v15 = vsel %vm923_vm4, %v4984_v42, %v4985_v57  ;;  %v10828_v57 = vld [vmem:[#allocation25_spill] sm:$0xff] }
 0x48d   : > { %v5314_v2 = vsel %vm2531_vm13, %v5261_v1, %v10253_v5  ;;  %v5521_v25 = vsel %vm5507_vm8, %v5469_v60, %v10187_v31  ;;  %v10358_v60 = vld [vmem:[%s10590_s3] sm:$0x3] }
 0x48e   : > { %v10257_v35 = vpop.permute.xlu0 %4488  ;;  %4178 = vrot.lane.b32.xlu1 %v6325_v36, %s7046_s17  ;;  %v6373_v36 = vcombine.low %v10100_v26, %v10100_v26  ;;  %v5374_v55 = vsel %vm5328_vm2, %v5314_v2, %v10107_v37  ;;  %v6389_v26 = vcombine.low %v10192_v41, %v10192_v41  ;;  %v5617_v59 = vshrl.u32 %v5521_v25, 16  ;;  %6511 = vmatprep.mubr.msk.bf16.mxu1 %vm5819_vm10, %v10358_v60 }
 0x48f   : > { %v5439_v17 = vsel %vm5393_vm5, %v5374_v55, %v10143_v58  ;;  %v5131_v41 = vsel %vm2173_vm7, %v6267_v43, %v10819_v4  ;;  %v5620_v47 = vshll.u32 %v5521_v25, 16 }
 0x490   : > { %v4495_v13 = vpop.permute.xlu1 %4494  ;;  %v5199_v58 = vsel %vm2303_vm9, %v5131_v41, %v10823_v30  ;;  %v5619_v39 = vrot.slane %v5617_v59, 3  ;;  %v5813_v59 = vld [vmem:[%s10591_s4] sm:$0xf]  ;;  %v6966_v30 = vld [vmem:[#allocation3 + $0x24] sm:$0xf] }
 0x491   : > { %v5344_v0 = vsel %vm5328_vm2, %v5291_v10, %v4495_v13  ;;  %v5263_v13 = vsel %vm2417_vm11, %v5199_v58, %v10241_v53  ;;  %v5622_v1 = vrot.slane %v5620_v47, 4  ;;  %5816 = vperm.xlu0 %6612, %v5813_v59   ;;  %v3389_v41 = vld [vmem:[#allocation3 + $0xa0] sm:$0x8]  ;;  %v6967_v47 = vld [vmem:[#allocation3 + $0xa4] sm:$0xf] }
 0x492   : > { %v10260_v28 = vpop.permute.xlu0 %4520  ;;  %4368 = vrot.lane.b32.xlu1 %v4295_v38, %s7048_s7  ;;  %v5315_v4 = vsel %vm2531_vm13, %v5263_v13, %v10253_v5  ;;  %v10824_v13 = vld [vmem:[#allocation14_spill] sm:$0xff] }
 0x493   : > { %v5623_v8 = vor.u32 %v5622_v1, %v5619_v39 }
 0x494   : > { %v10263_v48 = vpop.permute.xlu1 %4526 }
 0x495   : > { %v5376_v22 = vsel %vm5328_vm2, %v5315_v4, %v10263_v48  ;;  %v10826_v4 = vld [vmem:[#allocation19_spill] sm:$0xff] }
 0x496   : > { %v10265_v16 = vpop.permute.xlu0 %4680  ;;  %4482 = vrot.lane.b32.xlu1 %v4434_v12, %s7049_s10  ;;  %v6935_v12 = vld [vmem:[#allocation3 + $0x2c] ss:$0 sps:$4 sm:$0x11]  }
 0x497   : > { %v4961_v54 = vrot.slane %v6935_v12, 5  ;;  %v3365_v12 = vld [vmem:[#allocation3 + $0x20] sm:$0x8] }
 0x498   : > { %v4687_v63 = vpop.permute.xlu1 %4686  ;;  %v6248_v58 = vcombine.low %v3365_v12, %v6966_v30 }
 0x499   : > { %v5409_v20 = vsel %vm5393_vm5, %v5344_v0, %v4687_v63  ;;  %v4962_v32 = vsel %vm923_vm4, %v4960_v14, %v4961_v54  ;;  %v10827_v54 = vld [vmem:[#allocation42_spill] sm:$0xff] }
 0x49a   : > { %v10283_v49 = vpop.permute.xlu0 %4712  ;;  %4514 = vrot.lane.b32.xlu1 %v4458_v18, %s7049_s10  ;;  %v5470_v21 = vsel %vm5458_vm6, %v5409_v20, %v10172_v50  ;;  %s5920_s10 = scalar_lea.sflag [#allocation5], %s215_s23 }
 0x49c   : > { %v4719_v62 = vpop.permute.xlu1 %4718 }
 0x49d   : > { %v5441_v18 = vsel %vm5393_vm5, %v5376_v22, %v4719_v62 }
 0x49e   : > { %v10311_v38 = vpop.permute.xlu0 %4884  ;;  %4674 = vrot.lane.b32.xlu1 %v6373_v36, %s7050_s11 }
 0x4a0   : > { %v4903_v37 = vpop.permute.xlu1 %4902 }
 0x4a1   : > { %v5493_v31 = vsel %vm5458_vm6, %v5439_v17, %v4903_v37  ;;  %v5494_v2 = vsel %vm5458_vm6, %v5441_v18, %v4903_v37 }
 0x4a2   : > { %v10324_v40 = vpop.permute.xlu0 %5016  ;;  %4706 = vrot.lane.b32.xlu1 %v6389_v26, %s7050_s11  ;;  %v5553_v11 = vsel %vm5507_vm8, %v5493_v31, %v10210_v44  ;;  %s6978_s11 = scalar_lea.vmem %s5935_s6, 128 }
 0x4a3   : > { %v5737_v44 = vshrl.u32 %v5553_v11, 16  ;;  %v5740_v33 = vshll.u32 %v5553_v11, 16  ;;  %v6264_v11 = vcombine.low %v3389_v41, %v6967_v47  ;;  %p6979_p11 = scmp.ne.s32.totalorder %s5935_s6, %s6978_s11 }
 0x4a4   : > { %v5023_v6 = vpop.permute.xlu1 %5022 }
 0x4a5   : > { %v5523_v53 = vsel %vm5507_vm8, %v5470_v21, %v5023_v6  ;;  %v5739_v29 = vrot.slane %v5737_v44, 3  ;;  %v5742_v36 = vrot.slane %v5740_v33, 4  ;;  %v5084_v6 = vsel %vm2173_vm7, %v6248_v58, %v10824_v13  ;;  %v6968_v33 = vld [vmem:[#allocation3 + $0x28] sm:$0xf]  ;;  %p6980_p12 = pnand %p6979_p11, %p7122_p5 }
 0x4a6   : > { %v10340_v63 = vpop.permute.xlu0 %5048  ;;  %4896 = vrot.lane.b32.xlu1 %v4823_v24, %s7051_s12  ;;  %v5624_v51 = vshrl.u32 %v5523_v53, 16  ;;  %v5627_v5 = vshll.u32 %v5523_v53, 16  ;;  %v10825_v24 = vld [vmem:[#allocation17_spill] sm:$0xff]  ;;  %v5161_v21 = vsel %vm2303_vm9, %v5084_v6, %v10826_v4  ;;  %v6249_v53 = vcombine.low %v6968_v33, %v6968_v33  ;;  %s7053_s12 = smov [#allocation4]  }
 0x4a7   : > { %v5743_v43 = vor.u32 %v5742_v36, %v5739_v29  ;;  %v5124_v23 = vsel %vm2173_vm7, %v6264_v11, %v10825_v24  ;;  %v5225_v1 = vsel %vm2417_vm11, %v5161_v21, %v10225_v9  ;;  %v6969_v36 = vld [vmem:[#allocation3 + $0xa8] sm:$0xf]  ;;  %p6981_p13 = pneg %p6980_p12  ;;  %s6982_s22 = sshll.u32 %s7053_s12, 4  ;;  %s6983_s22 = int_to_ptr.vmem [resolvable:$false] %s6982_s22 }
 0x4a8   : > { %v5055_v50 = vpop.permute.xlu1 %5054  ;;  %v5626_v46 = vrot.slane %v5624_v51, 3  ;;  %v5629_v34 = vrot.slane %v5627_v5, 4  ;;  %v5193_v22 = vsel %vm2303_vm9, %v5124_v23, %v10827_v54  ;;  %v5287_v51 = vsel %vm2531_vm13, %v5225_v1, %v10249_v56  ;;  %p6985_p0 = scmp.lt.s32.totalorder %s5935_s6, %s6983_s22 }
 0x4a9   : > { %v5555_v3 = vsel %vm5507_vm8, %v5494_v2, %v5055_v50  ;;  %v5257_v18 = vsel %vm2417_vm11, %v5193_v22, %v10234_v27  ;;  %v5086_v2 = vsel %vm2173_vm7, %v6249_v53, %v10824_v13  ;;  %v5338_v50 = vsel %vm5328_vm2, %v5287_v51, %v10257_v35 }
 0x4aa   : > { %v10349_v48 = vpop.permute.xlu0 %4148  ;;  %v5744_v7 = vshrl.u32 %v5555_v3, 16  ;;  %v5747_v62 = vshll.u32 %v5555_v3, 16  ;;  %5010 = vrot.lane.b32.xlu1 %v4962_v32, %s7052_s14  ;;  %v5630_v55 = vor.u32 %v5629_v34, %v5626_v46  ;;  %v5163_v46 = vsel %vm2303_vm9, %v5086_v2, %v10828_v57 }
 0x4ab   : > { %v5403_v9 = vsel %vm5393_vm5, %v5338_v50, %v10265_v16 }
 0x4ac   : > { %v5746_v25 = vrot.slane %v5744_v7, 3  ;;  %v5749_v19 = vrot.slane %v5747_v62, 4  ;;  %v4155_v26 = vpop.permute.xlu1 %4154  ;;  %v5631_v61 = vsel %vm2596_vm14, %v5623_v8, %v5630_v55  ;;  %v5466_v27 = vsel %vm5458_vm6, %v5403_v9, %v10311_v38 }
 0x4ad   : > { %v5833_v52 = vsel %vm5819_vm10, %v5631_v61, 0  ;;  %v5227_v3 = vsel %vm2417_vm11, %v5163_v46, %v4155_v26  ;;  %v5517_v35 = vsel %vm5507_vm8, %v5466_v27, %v10324_v40  ;;  %v6265_v7 = vcombine.low %v6969_v36, %v6969_v36  ;;  %v10829_v40 = vld [vmem:[#allocation61_spill] sm:$0xff]  ;;  %v3362_v27 = vld [vmem:[#allocation3 + $0x10] sm:$0x8]  ;;  %v6970_v36 = vld [vmem:[#allocation3 + $0x14] sm:$0xf] }
 0x4ae   : > { %v10362_v14 = vpop.permute.xlu0 %4180  ;;  %v5750_v10 = vor.u32 %v5749_v19, %v5746_v25  ;;  %5042 = vrot.lane.b32.xlu1 %v4986_v15, %s7052_s14  ;;  %v5288_v62 = vsel %vm2531_vm13, %v5227_v3, %v10249_v56  ;;  %v5602_v55 = vshrl.u32 %v5517_v35, 16  ;;  %v5605_v61 = vshll.u32 %v5517_v35, 16  ;;  %v3386_v3 = vld [vmem:[#allocation3 + $0x90] sm:$0x8]  ;;  %s6984_s14 = scalar_lea.vmem %s6983_s22, 256 }
 0x4af   : > { %p6986_p1 = scmp.lt.s32.totalorder %s6984_s14, %s6978_s11 }
 0x4b0   : > { %v4187_v17 = vpop.permute.xlu1 %4186  ;;  %v5751_v37 = vsel %vm2596_vm14, %v5743_v43, %v5750_v10  ;;  %v5607_v58 = vrot.slane %v5605_v61, 4 }
 0x4b1   : > { %6556 = vmatprep.subr.msk.bf16.mxu1 %vm5819_vm10, %v5751_v37  ;;  %v5604_v37 = vrot.slane %v5602_v55, 3  ;;  %p6987_p2 = por %p6986_p1, %p6985_p0 }
 0x4b2   : > { %6504 = vmatpush3.bf16.xpose.msra.mxu1 %v5833_v52  ;;  %v10375_v45 = vpop.permute.xlu0 %4354 }
 0x4b3   : > { %v5608_v54 = vor.u32 %v5607_v58, %v5604_v37  ;;  %p6988_p3 = pnand %p6987_p2, %p6981_p13 }
 0x4b4   : > { %v4373_v42 = vpop.permute.xlu1 %4372 }
 0x4b5   : > { %v5311_v5 = vsel %vm2531_vm13, %v5257_v18, %v4373_v42 }
 0x4b6   : > { %v10377_v31 = vpop.permute.xlu0 %4484  ;;  %v5370_v32 = vsel %vm5328_vm2, %v5311_v5, %v10260_v28  ;;  %v5126_v28 = vsel %vm2173_vm7, %v6265_v7, %v10825_v24  ;;  %v6246_v7 = vcombine.low %v3362_v27, %v6970_v36 }
 0x4b7   : > { %v5435_v16 = vsel %vm5393_vm5, %v5370_v32, %v10283_v49  ;;  %v5195_v15 = vsel %vm2303_vm9, %v5126_v28, %v10829_v40  ;;  %v10832_v28 = vld [vmem:[#allocation39_spill] sm:$0xff]  ;;  %v10833_v40 = vld [vmem:[#allocation57_spill] sm:$0xff] }
 0x4b8   : > { %v4491_v0 = vpop.permute.xlu1 %4490  ;;  %v5259_v49 = vsel %vm2417_vm11, %v5195_v15, %v4187_v17 }
 0x4b9   : > { %v5340_v25 = vsel %vm5328_vm2, %v5288_v62, %v4491_v0  ;;  %v5312_v52 = vsel %vm2531_vm13, %v5259_v49, %v4373_v42  ;;  %v6971_v62 = vld [vmem:[#allocation3 + $0x94] sm:$0xf] }
 0x4ba   : > { %v10383_v39 = vpop.permute.xlu0 %4516 }
 0x4bc   : > { %v4523_v20 = vpop.permute.xlu1 %4522 }
 0x4bd   : > { %v5372_v0 = vsel %vm5328_vm2, %v5312_v52, %v4523_v20 }
 0x4be   : > { %v10409_v29 = vpop.permute.xlu0 %4676 }
 0x4c0   : > { %v4683_v44 = vpop.permute.xlu1 %4682 }
 0x4c1   : > { %v5405_v26 = vsel %vm5393_vm5, %v5340_v25, %v4683_v44  ;;  %v10831_v25 = vld [vmem:[#allocation12_spill] sm:$0xff] }
 0x4c2   : > { %v10424_v43 = vpop.permute.xlu0 %4708  ;;  %v5467_v59 = vsel %vm5458_vm6, %v5405_v26, %v10311_v38 }
 0x4c4   : > { %v4715_v34 = vpop.permute.xlu1 %4714 }
 0x4c5   : > { %v5437_v47 = vsel %vm5393_vm5, %v5372_v0, %v4715_v34 }
 0x4c6   : > { %v10436_v6 = vpop.permute.xlu0 %4882 }
 0x4c8   : > { %v4901_v8 = vpop.permute.xlu1 %4900 }
 0x4c9   : > { %v5490_v19 = vsel %vm5458_vm6, %v5435_v16, %v4901_v8  ;;  %v5491_v17 = vsel %vm5458_vm6, %v5437_v47, %v4901_v8  ;;  %v6262_v16 = vcombine.low %v3386_v3, %v6971_v62  ;;  %v10830_v8 = vld [vmem:[#allocation8_spill] sm:$0xff] }
 0x4ca   : > { %v5549_v56 = vsel %vm5507_vm8, %v5490_v19, %v10340_v63  ;;  %v5013_v5 = vpop.permute.xlu0 %5012  ;;  %v5079_v55 = vsel %vm2173_vm7, %v6246_v7, %v10830_v8 }
 0x4cb   : > { %v5722_v12 = vshrl.u32 %v5549_v56, 16  ;;  %v5725_v41 = vshll.u32 %v5549_v56, 16  ;;  %v5119_v19 = vsel %vm2173_vm7, %v6262_v16, %v10831_v25  ;;  %v5157_v26 = vsel %vm2303_vm9, %v5079_v55, %v10832_v28  ;;  %v6972_v56 = vld [vmem:[#allocation3 + $0x18] sm:$0xf] }
 0x4cc   : > { %v5019_v10 = vpop.permute.xlu1 %5018  ;;  %v5189_v15 = vsel %vm2303_vm9, %v5119_v19, %v10833_v40  ;;  %v6247_v49 = vcombine.low %v6972_v56, %v6972_v56 }
 0x4cd   : > { %v5519_v30 = vsel %vm5507_vm8, %v5467_v59, %v5019_v10  ;;  %v5724_v23 = vrot.slane %v5722_v12, 3  ;;  %v5727_v20 = vrot.slane %v5725_v41, 4  ;;  %v5221_v10 = vsel %vm2417_vm11, %v5157_v26, %v10349_v48 }
 0x4ce   : > { %v5609_v11 = vshrl.u32 %v5519_v30, 16  ;;  %v5612_v63 = vshll.u32 %v5519_v30, 16  ;;  %v5045_v9 = vpop.permute.xlu0 %5044  ;;  %v5253_v37 = vsel %vm2417_vm11, %v5189_v15, %v10362_v14  ;;  %v5284_v59 = vsel %vm2531_vm13, %v5221_v10, %v10375_v45  ;;  %v10834_v30 = vld [vmem:[#allocation24_spill] sm:$0xff] }
 0x4cf   : > { %v5728_v18 = vor.u32 %v5727_v20, %v5724_v23  ;;  %v5081_v12 = vsel %vm2173_vm7, %v6247_v49, %v10830_v8  ;;  %v5334_v41 = vsel %vm5328_vm2, %v5284_v59, %v10377_v31  ;;  %v6973_v31 = vld [vmem:[#allocation3 + $0x98] sm:$0xf] }
 0x4d0   : > { %v5051_v13 = vpop.permute.xlu1 %5050  ;;  %v5611_v42 = vrot.slane %v5609_v11, 3  ;;  %v5614_v24 = vrot.slane %v5612_v63, 4  ;;  %v5159_v58 = vsel %vm2303_vm9, %v5081_v12, %v10834_v30  ;;  %v5399_v48 = vsel %vm5393_vm5, %v5334_v41, %v10409_v29  ;;  %v3359_v30 = vld [vmem:[#allocation3] sm:$0x8] }
 0x4d1   : > { %v5551_v38 = vsel %vm5507_vm8, %v5491_v17, %v5051_v13  ;;  %v5463_v47 = vsel %vm5458_vm6, %v5399_v48, %v10436_v6  ;;  %v3383_v48 = vld [vmem:[#allocation3 + $0x80] sm:$0x8] }
 0x4d2   : > { %v5729_v4 = vshrl.u32 %v5551_v38, 16  ;;  %v5732_v21 = vshll.u32 %v5551_v38, 16  ;;  %v5615_v22 = vor.u32 %v5614_v24, %v5611_v42  ;;  %v10443_v32 = vpop.permute.xlu0 %4144  ;;  %v5513_v17 = vsel %vm5507_vm8, %v5463_v47, %v5013_v5 }
 0x4d3   : > { %v6263_v42 = vcombine.low %v6973_v31, %v6973_v31  ;;  %v5587_v23 = vshrl.u32 %v5513_v17, 16 }
 0x4d4   : > { %v5731_v44 = vrot.slane %v5729_v4, 3  ;;  %v5734_v33 = vrot.slane %v5732_v21, 4  ;;  %v4151_v53 = vpop.permute.xlu1 %4150  ;;  %v5616_v1 = vsel %vm2596_vm14, %v5608_v54, %v5615_v22  ;;  %v10835_v54 = vld [vmem:[#allocation26_spill] sm:$0xff] }
 0x4d5   : > { %v5830_v57 = vsel %vm5819_vm10, %v5616_v1, 0  ;;  %v5223_v11 = vsel %vm2417_vm11, %v5159_v58, %v4151_v53  ;;  %v5589_v53 = vrot.slane %v5587_v23, 3  ;;  %v10837_v23 = vld [vmem:[#allocation16_spill] sm:$0xff] }
 0x4d6   : > { %v5735_v51 = vor.u32 %v5734_v33, %v5731_v44  ;;  %v10457_v52 = vpop.permute.xlu0 %4176  ;;  %v5285_v24 = vsel %vm2531_vm13, %v5223_v11, %v10375_v45  ;;  %v5590_v44 = vshll.u32 %v5513_v17, 16 }
 0x4d8   : > { %v4183_v2 = vpop.permute.xlu1 %4182  ;;  %v5736_v50 = vsel %vm2596_vm14, %v5728_v18, %v5735_v51  ;;  %v5592_v27 = vrot.slane %v5590_v44, 4  ;;  %v10839_v44 = vld [vmem:[#allocation18_spill] sm:$0xff] }
 0x4d9   : > { %6557 = vmatprep.subr.msk.bf16.mxu1 %vm5819_vm10, %v5736_v50 }
 0x4da   : > { %6506 = vmatpush3.bf16.xpose.msra.mxu1 %v5830_v57  ;;  %v10476_v13 = vpop.permute.xlu0 %4352 }
 0x4dc   : > { %v4371_v46 = vpop.permute.xlu1 %4370 }
 0x4dd   : > { %v5308_v0 = vsel %vm2531_vm13, %v5253_v37, %v4371_v46 }
 0x4de   : > { %v5366_v63 = vsel %vm5328_vm2, %v5308_v0, %v10383_v39  ;;  %v5121_v39 = vsel %vm2173_vm7, %v6263_v42, %v10831_v25  ;;  %v4481_v18 = vpop.permute.xlu0 %4480  ;;  %v5593_v25 = vor.u32 %v5592_v27, %v5589_v53  ;;  %v6976_v42 = vld [vmem:[#allocation3 + $0x8] sm:$0xf] }
 0x4df   : > { %v5431_v29 = vsel %vm5393_vm5, %v5366_v63, %v10424_v43  ;;  %v5191_v22 = vsel %vm2303_vm9, %v5121_v39, %v10835_v54  ;;  %v6975_v63 = vld [vmem:[#allocation3 + $0x84] sm:$0xf] }
 0x4e0   : > { %v4487_v34 = vpop.permute.xlu1 %4486  ;;  %v5255_v33 = vsel %vm2417_vm11, %v5191_v22, %v4183_v2  ;;  %v6260_v17 = vcombine.low %v3383_v48, %v6975_v63 }
 0x4e1   : > { %v5336_v20 = vsel %vm5328_vm2, %v5285_v24, %v4487_v34  ;;  %v5309_v1 = vsel %vm2531_vm13, %v5255_v33, %v4371_v46  ;;  %v6245_v24 = vcombine.low %v6976_v42, %v6976_v42 }
 0x4e2   : > { %v4513_v19 = vpop.permute.xlu0 %4512 }
 0x4e4   : > { %v4519_v35 = vpop.permute.xlu1 %4518 }
 0x4e5   : > { %v5368_v5 = vsel %vm5328_vm2, %v5309_v1, %v4519_v35 }
 0x4e6   : > { %v4673_v59 = vpop.permute.xlu0 %4672 }
 0x4e8   : > { %v4679_v61 = vpop.permute.xlu1 %4678 }
 0x4e9   : > { %v5401_v21 = vsel %vm5393_vm5, %v5336_v20, %v4679_v61  ;;  %v5114_v20 = vsel %vm2173_vm7, %v6260_v17, %v10837_v23 }
 0x4ea   : > { %v5464_v51 = vsel %vm5458_vm6, %v5401_v21, %v10436_v6  ;;  %v4705_v41 = vpop.permute.xlu0 %4704 }
 0x4ec   : > { %v4711_v14 = vpop.permute.xlu1 %4710 }
 0x4ed   : > { %v5433_v3 = vsel %vm5393_vm5, %v5368_v5, %v4711_v14  ;;  %v6974_v14 = vld [vmem:[#allocation3 + $0x4] sm:$0xf] }
 0x4ee   : > { %v6244_v47 = vcombine.low %v3359_v30, %v6974_v14  ;;  %v4881_v31 = vpop.permute.xlu0 %4880 }
 0x4f0   : > { %v4899_v38 = vpop.permute.xlu1 %4898 }
 0x4f1   : > { %v5487_v4 = vsel %vm5458_vm6, %v5431_v29, %v4899_v38  ;;  %v5488_v2 = vsel %vm5458_vm6, %v5433_v3, %v4899_v38  ;;  %v10836_v29 = vld [vmem:[#allocation13_spill] sm:$0xff] }
 0x4f2   : > { %v5545_v45 = vsel %vm5507_vm8, %v5487_v4, %v5045_v9  ;;  %v5074_v38 = vsel %vm2173_vm7, %v6244_v47, %v10836_v29  ;;  %v10838_v4 = vld [vmem:[#allocation41_spill] sm:$0xff]  ;;  %v5076_v22 = vsel %vm2173_vm7, %v6245_v24, %v10836_v29 }
 0x4f3   : > { %v5707_v50 = vshrl.u32 %v5545_v45, 16  ;;  %v5710_v57 = vshll.u32 %v5545_v45, 16  ;;  %v5185_v39 = vsel %vm2303_vm9, %v5114_v20, %v10838_v4  ;;  %v5153_v45 = vsel %vm2303_vm9, %v5074_v38, %v10839_v44 }
 0x4f4   : > { %v5015_v43 = vpop.permute.xlu1 %5014  ;;  %v5249_v54 = vsel %vm2417_vm11, %v5185_v39, %v10457_v52  ;;  %v5217_v1 = vsel %vm2417_vm11, %v5153_v45, %v10443_v32 }
 0x4f5   : > { %v5515_v34 = vsel %vm5507_vm8, %v5464_v51, %v5015_v43  ;;  %v5709_v8 = vrot.slane %v5707_v50, 3  ;;  %v5712_v6 = vrot.slane %v5710_v57, 4  ;;  %v10840_v43 = vld [vmem:[#allocation23_spill] sm:$0xff]  ;;  %v5009_v51 = vpop.permute.xlu0 %5008  ;;  %v5281_v5 = vsel %vm2531_vm13, %v5217_v1, %v10476_v13 }
 0x4f6   : > { %v5594_v9 = vshrl.u32 %v5515_v34, 16  ;;  %v5597_v36 = vshll.u32 %v5515_v34, 16  ;;  %v5155_v53 = vsel %vm2303_vm9, %v5076_v22, %v10840_v43  ;;  %v5330_v57 = vsel %vm5328_vm2, %v5281_v5, %v4481_v18 }
 0x4f7   : > { %v5713_v56 = vor.u32 %v5712_v6, %v5709_v8  ;;  %v5395_v27 = vsel %vm5393_vm5, %v5330_v57, %v4673_v59 }
 0x4f8   : > { %v5047_v7 = vpop.permute.xlu1 %5046  ;;  %v5596_v62 = vrot.slane %v5594_v9, 3  ;;  %v5599_v46 = vrot.slane %v5597_v36, 4  ;;  %v5460_v3 = vsel %vm5458_vm6, %v5395_v27, %v4881_v31  ;;  %v6977_v36 = vld [vmem:[#allocation3 + $0x88] sm:$0xf] }
 0x4f9   : > { %v5547_v16 = vsel %vm5507_vm8, %v5488_v2, %v5047_v7  ;;  %v6261_v32 = vcombine.low %v6977_v36, %v6977_v36  ;;  %v5509_v2 = vsel %vm5507_vm8, %v5460_v3, %v5009_v51 }
 0x4fa   : > { %v5714_v55 = vshrl.u32 %v5547_v16, 16  ;;  %v5717_v35 = vshll.u32 %v5547_v16, 16  ;;  %v5600_v28 = vor.u32 %v5599_v46, %v5596_v62  ;;  %v5041_v16 = vpop.permute.xlu0 %5040 }
 0x4fb   : > { %v5116_v6 = vsel %vm2173_vm7, %v6261_v32, %v10837_v23 }
 0x4fc   : > { %v5716_v26 = vrot.slane %v5714_v55, 3  ;;  %v5719_v40 = vrot.slane %v5717_v35, 4  ;;  %v4147_v15 = vpop.permute.xlu1 %4146  ;;  %v5601_v61 = vsel %vm2596_vm14, %v5593_v25, %v5600_v28  ;;  %v5572_v25 = vshrl.u32 %v5509_v2, 16 }
 0x4fd   : > { %v5827_v0 = vsel %vm5819_vm10, %v5601_v61, 0  ;;  %v5219_v52 = vsel %vm2417_vm11, %v5155_v53, %v4147_v15 }
 0x4fe   : > { %v5720_v49 = vor.u32 %v5719_v40, %v5716_v26  ;;  %v5282_v9 = vsel %vm2531_vm13, %v5219_v52, %v10476_v13  ;;  %v10841_v13 = vld [vmem:[#allocation45_spill] sm:$0xff] }
 0x4ff   : > { %v5187_v35 = vsel %vm2303_vm9, %v5116_v6, %v10841_v13 }
 0x500   : > { %v4179_v10 = vpop.permute.xlu1 %4178  ;;  %v5721_v37 = vsel %vm2596_vm14, %v5713_v56, %v5720_v49 }
 0x501   : > { %6558 = vmatprep.subr.msk.bf16.mxu1 %vm5819_vm10, %v5721_v37  ;;  %v5251_v28 = vsel %vm2417_vm11, %v5187_v35, %v4179_v10 }
 0x502   : > { %6508 = vmatpush3.bf16.xpose.msra.mxu1 %v5827_v0 }
 0x504   : > { %v4369_v12 = vpop.permute.xlu1 %4368 }
 0x505   : > { %v5305_v33 = vsel %vm2531_vm13, %v5249_v54, %v4369_v12  ;;  %v5306_v15 = vsel %vm2531_vm13, %v5251_v28, %v4369_v12 }
 0x506   : > { %v5362_v34 = vsel %vm5328_vm2, %v5305_v33, %v4513_v19  ;;  %v5575_v19 = vshll.u32 %v5509_v2, 16 }
 0x507   : > { %v5427_v62 = vsel %vm5393_vm5, %v5362_v34, %v4705_v41  ;;  %v5574_v41 = vrot.slane %v5572_v25, 3 }
 0x508   : > { %v4483_v58 = vpop.permute.xlu1 %4482 }
 0x509   : > { %v5332_v7 = vsel %vm5328_vm2, %v5282_v9, %v4483_v58  ;;  %v5577_v58 = vrot.slane %v5575_v19, 4 }
 0x50b   : > { %v5578_v24 = vor.u32 %v5577_v58, %v5574_v41 }
 0x50c   : > { %v4515_v11 = vpop.permute.xlu1 %4514  ;;  %v5817_v54 = vpop.permute.xlu0 %5816 }
 0x50d   : > { %v5364_v49 = vsel %vm5328_vm2, %v5306_v15, %v4515_v11 }
 0x510   : > { %v4675_v21 = vpop.permute.xlu1 %4674 }
 0x511   : > { %v5397_v18 = vsel %vm5393_vm5, %v5332_v7, %v4675_v21 }
 0x512   : > { %v5461_v26 = vsel %vm5458_vm6, %v5397_v18, %v4881_v31 }
 0x514   : > { %v4707_v50 = vpop.permute.xlu1 %4706 }
 0x515   : > { %v5429_v30 = vsel %vm5393_vm5, %v5364_v49, %v4707_v50 }
 0x518   : > { %v4897_v46 = vpop.permute.xlu1 %4896 }
 0x519   : > { %v5484_v8 = vsel %vm5458_vm6, %v5427_v62, %v4897_v46  ;;  %v5485_v48 = vsel %vm5458_vm6, %v5429_v30, %v4897_v46 }
 0x51a   : > { %v5541_v55 = vsel %vm5507_vm8, %v5484_v8, %v5041_v16 }
 0x51b   : > { %v5692_v61 = vshrl.u32 %v5541_v55, 16  ;;  %v5695_v37 = vshll.u32 %v5541_v55, 16 }
 0x51c   : > { %v5011_v40 = vpop.permute.xlu1 %5010 }
 0x51d   : > { %v5511_v56 = vsel %vm5507_vm8, %v5461_v26, %v5011_v40  ;;  %v5694_v63 = vrot.slane %v5692_v61, 3  ;;  %v5697_v17 = vrot.slane %v5695_v37, 4 }
 0x51e   : > { %v5579_v59 = vshrl.u32 %v5511_v56, 16  ;;  %v5582_v0 = vshll.u32 %v5511_v56, 16 }
 0x51f   : > { %v5698_v23 = vor.u32 %v5697_v17, %v5694_v63 }
 0x520   : > { %v5581_v10 = vrot.slane %v5579_v59, 3  ;;  %v5584_v14 = vrot.slane %v5582_v0, 4  ;;  %v5043_v47 = vpop.permute.xlu1 %5042 }
 0x521   : > { %v5543_v12 = vsel %vm5507_vm8, %v5485_v48, %v5043_v47 }
 0x522   : > { %v5585_v31 = vor.u32 %v5584_v14, %v5581_v10  ;;  %v5699_v42 = vshrl.u32 %v5543_v12, 16  ;;  %v5702_v11 = vshll.u32 %v5543_v12, 16 }
 0x524   : > { %v5701_v29 = vrot.slane %v5699_v42, 3  ;;  %v5704_v38 = vrot.slane %v5702_v11, 4  ;;  %v5586_v4 = vsel %vm2596_vm14, %v5578_v24, %v5585_v31 }
 0x525   : > { %v5824_v21 = vsel %vm5819_vm10, %v5586_v4, 0 }
 0x526   : > { %v5705_v20 = vor.u32 %v5704_v38, %v5701_v29 }
 0x528   : > { %v5706_v39 = vsel %vm2596_vm14, %v5698_v23, %v5705_v20 }
 0x529   : > { %6559 = vmatprep.subr.msk.bf16.mxu1 %vm5819_vm10, %v5706_v39 }
 0x52a   : > { %6510 = vmatpush3.bf16.xpose.msra.mxu1 %v5824_v21 }
 0x531   : > { %6512 = vmatmul.mubr.msk.bf16.vlgmr.msra.gmra.mxu1 %vm5819_vm10, %v10358_v60 }
 0x5f1   : > { %v5905_v22 = vpop.f32.mrf.mxu1 }
 0x5f2   : > { %v5906_v44 = vadd.f32 %v5905_v22, %v5817_v54 }
 0x5f3   : > { %v5907_v45 = vpop.f32.mrf.mxu1 }
 0x5f4   : > { %v5908_v33 = vadd.f32 %v5907_v45, %v5817_v54  ;;  %v5912_v53 = vmax.f32 %v5906_v44, 0.0 }
 0x5f5   : > { %v5909_v43 = vpop.f32.mrf.mxu1 }
 0x5f6   : > { %v5913_v1 = vmax.f32 %v5908_v33, 0.0 }
 0x5f7   : > { %v5910_v51 = vpop.f32.mrf.mxu1 }
 0x5f8   : > { %v5916_v5 = vcombine.low %v5912_v53, %v5913_v1 }
 0x5fa   : > { %5918 = vst [vmem:[%s217_s30] sm:$0xff] %v5916_v5 }
 0x5fb   : > { %6991 = shalt.err (!%p6988_p3)
}
 0x5fc   : > { %s6992_s13 = scalar_lea.hbm %s5932_s9, 128  ;;  %s6996_s17 = scalar_lea.hbm %s10592_s5, 256 }
 0x5fd   : > { %p6993_p4 = scmp.ne.s32.totalorder %s5932_s9, %s6992_s13  ;;  %p6997_p9 = scmp.lt.s32.totalorder %s5932_s9, %s10592_s5 }
 0x5fe   : > { %p6998_p10 = scmp.lt.s32.totalorder %s6996_s17, %s6992_s13 }
 0x5ff   : > { %p6994_p7 = pnand %p6993_p4, %p7122_p5 }
 0x600   : > { %p6999_p11 = por %p6998_p10, %p6997_p9 }
 0x601   : > { %p6995_p8 = pneg %p6994_p7 }
 0x603   : > { %p7000_p12 = pnand %p6999_p11, %p6995_p8 }
 0x605   : > { %7003 = shalt.err (!%p7000_p12)
}
 0x606   : > { %6560 = dma.vmem_to_hbm [thread:$0]  (%p7122_p5), %s5935_s6, 128, %s5932_s9, %s5920_s10  }
 0x607 PF: > { %p6566_p13 = scmp.ge.s32.totalorder %s7038_s21, 2  ;;  %s5946_s26 = sand.u32 1, %s7026_s18  }
 0x608   : > { %s5947_s30 = scalar_lea.sflag [#allocation5], %s5946_s26 }
 0x609   : > { %p6563_p0 = pnand %p6566_p13, %p7126_p6 }
 0x60b   : > { %p6564_p1 = pneg %p6563_p0 }
 0x60d   : > { %7021 = dma.done.wait (%p6564_p1), %s5947_s30, 128  }
 0x60e   : > { %7023 = vsyncadd (%p6564_p1), %s5947_s30, 4294967168  ;;  %p15_p2 = scmp.ge.s32.totalorder %s7109_s24, 4   ;;  %s10842_s18 = smov %s7030_s19 }
 0x60f   : > { %s10843_s19 = smov %s7034_s20  ;;  %s10844_s20 = smov %s7120_s27 }
 0x610   : > { %s10845_s21 = smov %s7109_s24  ;;  %17 = sbr.rel (!%p15_p2) target bundleno = 3 (0x3), region = 81 }
 0x615   :  { %5952 = vsyncpa [#allocation5], 1 }
 0x616   :  { %5954 = vsyncpa [#allocation5 + $0x1], 1 }

</bundles_post_ra>
